<compile_context>
chip_gen: v7x
topology: tpu7x:2x2x1
jax: 0.10.0
libtpu: 0.0.40
codegen_flags: <defaults>
</compile_context>

<pallas_src>
import functools

import jax
import jax.numpy as jnp
from jax.experimental import pallas as pl
from jax.experimental.pallas import tpu as pltpu

PATCH = 4
D_MODEL = 64
N_HEADS = 8
HEAD_DIM = D_MODEL // N_HEADS          # 8
D_FF = 2048                            # nn.TransformerEncoderLayer default
N_LAYERS = 2
LN_EPS = 1e-5                          # nn.LayerNorm default
NEG_INF = -1e30                        # large finite negative for the attn mask


# ----------------------------------------------------------------------------
# Fused kernel (grid = (N_LAYERS,), activations live in VMEM scratch)
# ----------------------------------------------------------------------------
def _layernorm(x, g, b):
    mu = jnp.mean(x, axis=-1, keepdims=True)
    var = jnp.mean(jnp.square(x - mu), axis=-1, keepdims=True)
    return (x - mu) * jax.lax.rsqrt(var + LN_EPS) * g + b


def _vit_kernel(patches_ref, pos_ref, bias_ref, pew_ref, peb_ref,
                wqkvo_ref, small_ref, w1_ref, b1_ref, w2_ref,
                ow_ref, ob_ref, o_ref, x_ref, ctx_ref, *, n_patches, batch):
    l = pl.program_id(0)
    N, D = x_ref.shape
    scale = 1.0 / (HEAD_DIM ** 0.5)

    # ---- patch embedding + position embedding (first grid step only) --------
    @pl.when(l == 0)
    def _():
        tok = jnp.dot(patches_ref[...].astype(jnp.bfloat16), pew_ref[...],
                      preferred_element_type=jnp.float32)
        x_ref[...] = tok + peb_ref[...] + pos_ref[...]

    # ---- this layer's weights (prefetched by the grid pipeline) -------------
    qkvo = wqkvo_ref[0]                                   # (4, D, D) bf16
    wq, wk, wv, wo = qkvo[0], qkvo[1], qkvo[2], qkvo[3]
    small = small_ref[0]                                  # (9, D) f32
    bq, bk, bv, bo = small[0:1], small[1:2], small[2:3], small[3:4]
    ln1g, ln1b = small[4:5], small[5:6]
    b2 = small[6:7]
    ln2g, ln2b = small[7:8], small[8:9]
    w1 = w1_ref[0]                                        # (D, D_FF) bf16
    b1 = b1_ref[0]                                        # (1, D_FF) f32
    w2 = w2_ref[0]                                        # (D_FF, D) bf16

    x = x_ref[...]                                        # (N, D) f32
    xb = x.astype(jnp.bfloat16)

    # ---- self-attention: sequence axis = image batch (batch_first=False) ----
    # softmax scale folded into q (identical math to scaling the scores)
    q = (jnp.dot(xb, wq, preferred_element_type=jnp.float32) + bq) * scale
    k = jnp.dot(xb, wk, preferred_element_type=jnp.float32) + bk
    v = jnp.dot(xb, wv, preferred_element_type=jnp.float32) + bv
    bias = bias_ref[...]                                  # (N, N) 0 / -1e30

    for h in range(N_HEADS):
        sl = slice(h * HEAD_DIM, (h + 1) * HEAD_DIM)
        qh = q[:, sl].astype(jnp.bfloat16)                # (N, hd)
        kh = k[:, sl].astype(jnp.bfloat16)                # (N, hd)
        vh = v[:, sl].astype(jnp.bfloat16)                # (N, hd)
        # full-slab masked scores: (N, hd) x (N, hd) contracted on hd -> (N, N)
        s = jax.lax.dot_general(qh, kh, (((1,), (1,)), ((), ())),
                                preferred_element_type=jnp.float32)
        s = s + bias                                      # block-diagonal mask
        s = s - jnp.max(s, axis=-1, keepdims=True)
        e = jnp.exp(s)
        a = e * pl.reciprocal(jnp.sum(e, axis=-1, keepdims=True), approx=True)
        # stage per-head context into VMEM scratch (bounds vreg liveness)
        ctx_ref[:, sl] = jnp.dot(a.astype(jnp.bfloat16), vh,
                                 preferred_element_type=jnp.float32)

    # single full-K output projection over the concatenated heads
    attn = jnp.dot(ctx_ref[...].astype(jnp.bfloat16), wo,
                   preferred_element_type=jnp.float32) + bo

    # residual + LN1 (post-norm, PyTorch default norm_first=False)
    x = _layernorm(x + attn, ln1g, ln1b)

    # ---- feed-forward (ReLU), full-width matmuls -----------------------------
    h1 = jnp.dot(x.astype(jnp.bfloat16), w1,
                 preferred_element_type=jnp.float32) + b1
    h1 = jnp.maximum(h1, 0.0)
    ff = jnp.dot(h1.astype(jnp.bfloat16), w2,
                 preferred_element_type=jnp.float32) + b2
    x = _layernorm(x + ff, ln2g, ln2b)
    x_ref[...] = x

    # ---- mean over patches (x.mean(dim=1)) + classification head (last step) -
    @pl.when(l == N_LAYERS - 1)
    def _():
        pooled = jnp.mean(x.reshape(n_patches, batch, D), axis=0)   # (B, D)
        o_ref[...] = (jnp.dot(pooled.astype(jnp.bfloat16), ow_ref[...],
                              preferred_element_type=jnp.float32) + ob_ref[...])


def vit_fused_call(patches, pos_rows, mask_bias, p, *, n_patches, batch):
    N, D = pos_rows.shape
    num_classes = p["out_w"].shape[1]

    def const_spec(shape):
        zeros = (0,) * len(shape)
        return pl.BlockSpec(shape, lambda l, z=zeros: z)

    def layer_spec(full_shape):
        block = (1,) + tuple(full_shape[1:])
        zeros = (0,) * (len(full_shape) - 1)
        return pl.BlockSpec(block, lambda l, z=zeros: (l,) + z)

    in_specs = [
        const_spec(patches.shape),            # patches (N, in_dim) f32
        const_spec(pos_rows.shape),           # pos rows (N, D) f32
        const_spec(mask_bias.shape),          # attn mask bias (N, N) f32
        const_spec(p["patch_w"].shape),       # (in_dim, D) bf16
        const_spec(p["patch_b"].shape),       # (1, D) f32
        layer_spec(p["wqkvo"].shape),         # (L, 4, D, D) bf16
        layer_spec(p["small"].shape),         # (L, 9, D) f32
        layer_spec(p["w1"].shape),            # (L, D, D_FF) bf16
        layer_spec(p["b1"].shape),            # (L, 1, D_FF) f32
        layer_spec(p["w2"].shape),            # (L, D_FF, D) bf16
        const_spec(p["out_w"].shape),         # (D, C) bf16
        const_spec(p["out_b"].shape),         # (1, C) f32
    ]

    kernel = functools.partial(_vit_kernel, n_patches=n_patches, batch=batch)

    return pl.pallas_call(
        kernel,
        out_shape=jax.ShapeDtypeStruct((batch, num_classes), jnp.float32),
        grid_spec=pltpu.PrefetchScalarGridSpec(
            num_scalar_prefetch=0,
            grid=(N_LAYERS,),
            in_specs=in_specs,
            out_specs=const_spec((batch, num_classes)),
            scratch_shapes=[
                pltpu.VMEM((N, D), jnp.float32),   # persistent activations x
                pltpu.VMEM((N, D), jnp.float32),   # per-head context staging
            ]),
        compiler_params=pltpu.CompilerParams(
            dimension_semantics=("arbitrary",)),
    )(patches, pos_rows, mask_bias,
      p["patch_w"], p["patch_b"],
      p["wqkvo"], p["small"], p["w1"], p["b1"], p["w2"],
      p["out_w"], p["out_b"])


# ----------------------------------------------------------------------------
# Glue (XLA-side patch extraction / parameter setup)
# ----------------------------------------------------------------------------
def extract_patches_pmajor(images, ps):
    # Reproduces inputs.unfold(1,ps,ps).unfold(2,ps,ps).view(B,-1,ps*ps*C)
    # (per-patch flatten order (C, ph, pw)), emitted patch-major: row = p*B + b.
    B, H, W, C = images.shape
    x = images.reshape(B, H // ps, ps, W // ps, ps, C)
    x = jnp.transpose(x, (1, 3, 0, 5, 2, 4))          # (nH, nW, B, C, ph, pw)
    P = (H // ps) * (W // ps)
    return x.reshape(P * B, C * ps * ps)


def init_params(key, num_classes, input_shape):
    H, W, C = input_shape
    num_patches = (H // PATCH) * (W // PATCH)
    in_dim = PATCH * PATCH * C
    L = N_LAYERS
    ks = iter(jax.random.split(key, 24))

    def nrm(shape, scale=0.02, dtype=jnp.float32):
        return (scale * jax.random.normal(next(ks), shape)).astype(dtype)

    # packed small per-layer vectors:
    # rows = [bq, bk, bv, bo, ln1_g, ln1_b, b2, ln2_g, ln2_b]
    small = jnp.zeros((L, 9, D_MODEL), jnp.float32)
    small = small.at[:, 4, :].set(1.0)   # ln1 gamma
    small = small.at[:, 7, :].set(1.0)   # ln2 gamma

    return {
        "patch_w": nrm((in_dim, D_MODEL), dtype=jnp.bfloat16),
        "patch_b": jnp.zeros((1, D_MODEL), jnp.float32),
        "pos": nrm((1, num_patches, D_MODEL), scale=1.0),     # torch.randn-like
        # per-layer weights: [Wq, Wk, Wv, Wo] stacked -> one DMA per layer
        "wqkvo": nrm((L, 4, D_MODEL, D_MODEL), dtype=jnp.bfloat16),
        "small": small,
        "w1": nrm((L, D_MODEL, D_FF), dtype=jnp.bfloat16),
        "b1": jnp.zeros((L, 1, D_FF), jnp.float32),
        "w2": nrm((L, D_FF, D_MODEL), dtype=jnp.bfloat16),
        "out_w": nrm((D_MODEL, num_classes), dtype=jnp.bfloat16),
        "out_b": jnp.zeros((1, num_classes), jnp.float32),
    }
    # TODO(synk): if loading real PyTorch checkpoints, transpose nn.Linear (out,in)
    # weights and split/transpose MHA in_proj_weight into wqkvo at load time.


@jax.jit
def vit_forward(params, images):
    B = images.shape[0]
    patches = extract_patches_pmajor(images, PATCH)           # (P*B, 48) f32
    P = params["pos"].shape[1]
    N = P * B
    # position embedding pre-expanded to patch-major rows (row p*B+b <- pos[p])
    pos_rows = jnp.repeat(params["pos"].reshape(P, D_MODEL), B, axis=0)
    # block-diagonal additive mask: attend only within the same patch group
    group = jnp.arange(N, dtype=jnp.int32) // B
    mask_bias = jnp.where(group[:, None] == group[None, :], 0.0,
                          NEG_INF).astype(jnp.float32)
    return vit_fused_call(patches, pos_rows, mask_bias, params,
                          n_patches=P, batch=B)                # (B, num_classes)


if __name__ == "__main__":
    key = jax.random.PRNGKey(0)
    k_img, k_par = jax.random.split(key)

    B = 8
    num_classes = 10
    input_shape = (16, 16, 3)     # -> 16 patches, P*B = 128 token rows

    images = jax.random.normal(k_img, (B,) + input_shape, dtype=jnp.float32)
    params = init_params(k_par, num_classes, input_shape)

    logits = vit_forward(params, images)
    jax.block_until_ready(logits)
    assert logits.shape == (B, num_classes)
    assert bool(jnp.all(jnp.isfinite(logits)))
    print("KERNEL_OK")
</pallas_src>

<mosaic_0001>
module attributes {stable_mosaic.version = 11 : i64} {
  func.func @_vit_kernel(%arg0: i32, %arg1: memref<128x48xf32, #tpu.memory_space<vmem>>, %arg2: memref<128x64xf32, #tpu.memory_space<vmem>>, %arg3: memref<128x128xf32, #tpu.memory_space<vmem>>, %arg4: memref<48x64xbf16, #tpu.memory_space<vmem>>, %arg5: memref<1x64xf32, #tpu.memory_space<vmem>>, %arg6: memref<1x4x64x64xbf16, #tpu.memory_space<vmem>>, %arg7: memref<1x9x64xf32, #tpu.memory_space<vmem>>, %arg8: memref<1x64x2048xbf16, #tpu.memory_space<vmem>>, %arg9: memref<1x1x2048xf32, #tpu.memory_space<vmem>>, %arg10: memref<1x2048x64xbf16, #tpu.memory_space<vmem>>, %arg11: memref<64x10xbf16, #tpu.memory_space<vmem>>, %arg12: memref<1x10xf32, #tpu.memory_space<vmem>>, %arg13: memref<8x10xf32, #tpu.memory_space<vmem>>, %arg14: memref<128x64xf32, #tpu.memory_space<vmem>>, %arg15: memref<128x64xf32, #tpu.memory_space<vmem>>) attributes {dimension_semantics = [#tpu.dimension_semantics<arbitrary>], iteration_bounds = array<i64: 2>, scalar_prefetch = 0 : i64, scratch_operands = 2 : i64, tpu.core_type = #tpu.core_type<tc>, window_params = [{pipeline_mode = #tpu.pipeline_mode<synchronous>, transform_indices = @transform_0, window_bounds = array<i64: 128, 48>}, {pipeline_mode = #tpu.pipeline_mode<synchronous>, transform_indices = @transform_1, window_bounds = array<i64: 128, 64>}, {pipeline_mode = #tpu.pipeline_mode<synchronous>, transform_indices = @transform_2, window_bounds = array<i64: 128, 128>}, {pipeline_mode = #tpu.pipeline_mode<synchronous>, transform_indices = @transform_3, window_bounds = array<i64: 48, 64>}, {pipeline_mode = #tpu.pipeline_mode<synchronous>, transform_indices = @transform_4, window_bounds = array<i64: 1, 64>}, {transform_indices = @transform_5, window_bounds = array<i64: 1, 4, 64, 64>}, {transform_indices = @transform_6, window_bounds = array<i64: 1, 9, 64>}, {transform_indices = @transform_7, window_bounds = array<i64: 1, 64, 2048>}, {transform_indices = @transform_8, window_bounds = array<i64: 1, 1, 2048>}, {transform_indices = @transform_9, window_bounds = array<i64: 1, 2048, 64>}, {pipeline_mode = #tpu.pipeline_mode<synchronous>, transform_indices = @transform_10, window_bounds = array<i64: 64, 10>}, {pipeline_mode = #tpu.pipeline_mode<synchronous>, transform_indices = @transform_11, window_bounds = array<i64: 1, 10>}, {pipeline_mode = #tpu.pipeline_mode<synchronous>, transform_indices = @transform_12, window_bounds = array<i64: 8, 10>}]} {
    %c0_i32 = arith.constant 0 : i32
    %0 = arith.cmpi eq, %arg0, %c0_i32 : i32
    %1 = arith.extui %0 : i1 to i32
    %c0_i32_0 = arith.constant 0 : i32
    %2 = arith.cmpi ne, %1, %c0_i32_0 : i32
    scf.if %2 {
      %c0_83 = arith.constant 0 : index
      %c0_84 = arith.constant 0 : index
      %277 = vector.load %arg1[%c0_83, %c0_84] : memref<128x48xf32, #tpu.memory_space<vmem>>, vector<128x48xf32>
      %278 = arith.truncf %277 : vector<128x48xf32> to vector<128x48xbf16>
      %c0_85 = arith.constant 0 : index
      %c0_86 = arith.constant 0 : index
      %279 = vector.load %arg4[%c0_85, %c0_86] : memref<48x64xbf16, #tpu.memory_space<vmem>>, vector<48x64xbf16>
      %cst_87 = arith.constant dense<0.000000e+00> : vector<128x64xf32>
      %280 = tpu.matmul %278, %279, %cst_87 {dimension_numbers = #tpu.dot_dimension_numbers<[1], [0], [0], [1], [0, 0, 1, 1], [], []>} : vector<128x48xbf16>, vector<48x64xbf16>, vector<128x64xf32> -> vector<128x64xf32>
      %c0_88 = arith.constant 0 : index
      %c0_89 = arith.constant 0 : index
      %281 = vector.load %arg5[%c0_88, %c0_89] : memref<1x64xf32, #tpu.memory_space<vmem>>, vector<1x64xf32>
      %282 = vector.broadcast %281 : vector<1x64xf32> to vector<128x64xf32>
      %283 = arith.addf %280, %282 : vector<128x64xf32>
      %c0_90 = arith.constant 0 : index
      %c0_91 = arith.constant 0 : index
      %284 = vector.load %arg2[%c0_90, %c0_91] : memref<128x64xf32, #tpu.memory_space<vmem>>, vector<128x64xf32>
      %285 = arith.addf %283, %284 : vector<128x64xf32>
      %c0_92 = arith.constant 0 : index
      %c0_93 = arith.constant 0 : index
      %286 = vector.load %arg14[%c0_92, %c0_93] : memref<128x64xf32, #tpu.memory_space<vmem>>, vector<128x64xf32>
      tpu.vector_store %arg14[%c0_92, %c0_93], %285 {strides = array<i32>} : memref<128x64xf32, #tpu.memory_space<vmem>>, vector<128x64xf32>,
    } else {
    }
    %c0 = arith.constant 0 : index
    %c0_1 = arith.constant 0 : index
    %c0_2 = arith.constant 0 : index
    %c0_3 = arith.constant 0 : index
    %3 = vector.load %arg6[%c0, %c0_1, %c0_2, %c0_3] : memref<1x4x64x64xbf16, #tpu.memory_space<vmem>>, vector<1x4x64x64xbf16>
    %4 = vector.shape_cast %3 : vector<1x4x64x64xbf16> to vector<4x64x64xbf16>
    %5 = vector.extract_strided_slice %4 {offsets = [0, 0, 0], sizes = [1, 64, 64], strides = [1, 1, 1]} : vector<4x64x64xbf16> to vector<1x64x64xbf16>
    %6 = vector.shape_cast %5 : vector<1x64x64xbf16> to vector<64x64xbf16>
    %7 = vector.extract_strided_slice %4 {offsets = [1, 0, 0], sizes = [1, 64, 64], strides = [1, 1, 1]} : vector<4x64x64xbf16> to vector<1x64x64xbf16>
    %8 = vector.shape_cast %7 : vector<1x64x64xbf16> to vector<64x64xbf16>
    %9 = vector.extract_strided_slice %4 {offsets = [2, 0, 0], sizes = [1, 64, 64], strides = [1, 1, 1]} : vector<4x64x64xbf16> to vector<1x64x64xbf16>
    %10 = vector.shape_cast %9 : vector<1x64x64xbf16> to vector<64x64xbf16>
    %11 = vector.extract_strided_slice %4 {offsets = [3, 0, 0], sizes = [1, 64, 64], strides = [1, 1, 1]} : vector<4x64x64xbf16> to vector<1x64x64xbf16>
    %12 = vector.shape_cast %11 : vector<1x64x64xbf16> to vector<64x64xbf16>
    %c0_4 = arith.constant 0 : index
    %c0_5 = arith.constant 0 : index
    %c0_6 = arith.constant 0 : index
    %13 = vector.load %arg7[%c0_4, %c0_5, %c0_6] : memref<1x9x64xf32, #tpu.memory_space<vmem>>, vector<1x9x64xf32>
    %14 = vector.shape_cast %13 : vector<1x9x64xf32> to vector<9x64xf32>
    %15 = vector.extract_strided_slice %14 {offsets = [0, 0], sizes = [1, 64], strides = [1, 1]} : vector<9x64xf32> to vector<1x64xf32>
    %16 = vector.extract_strided_slice %14 {offsets = [1, 0], sizes = [1, 64], strides = [1, 1]} : vector<9x64xf32> to vector<1x64xf32>
    %17 = vector.extract_strided_slice %14 {offsets = [2, 0], sizes = [1, 64], strides = [1, 1]} : vector<9x64xf32> to vector<1x64xf32>
    %18 = vector.extract_strided_slice %14 {offsets = [3, 0], sizes = [1, 64], strides = [1, 1]} : vector<9x64xf32> to vector<1x64xf32>
    %19 = vector.extract_strided_slice %14 {offsets = [4, 0], sizes = [1, 64], strides = [1, 1]} : vector<9x64xf32> to vector<1x64xf32>
    %20 = vector.extract_strided_slice %14 {offsets = [5, 0], sizes = [1, 64], strides = [1, 1]} : vector<9x64xf32> to vector<1x64xf32>
    %21 = vector.extract_strided_slice %14 {offsets = [6, 0], sizes = [1, 64], strides = [1, 1]} : vector<9x64xf32> to vector<1x64xf32>
    %22 = vector.extract_strided_slice %14 {offsets = [7, 0], sizes = [1, 64], strides = [1, 1]} : vector<9x64xf32> to vector<1x64xf32>
    %23 = vector.extract_strided_slice %14 {offsets = [8, 0], sizes = [1, 64], strides = [1, 1]} : vector<9x64xf32> to vector<1x64xf32>
    %c0_7 = arith.constant 0 : index
    %c0_8 = arith.constant 0 : index
    %c0_9 = arith.constant 0 : index
    %24 = vector.load %arg8[%c0_7, %c0_8, %c0_9] : memref<1x64x2048xbf16, #tpu.memory_space<vmem>>, vector<1x64x2048xbf16>
    %25 = vector.shape_cast %24 : vector<1x64x2048xbf16> to vector<64x2048xbf16>
    %c0_10 = arith.constant 0 : index
    %c0_11 = arith.constant 0 : index
    %c0_12 = arith.constant 0 : index
    %26 = vector.load %arg9[%c0_10, %c0_11, %c0_12] : memref<1x1x2048xf32, #tpu.memory_space<vmem>>, vector<1x1x2048xf32>
    %27 = vector.shape_cast %26 : vector<1x1x2048xf32> to vector<1x2048xf32>
    %c0_13 = arith.constant 0 : index
    %c0_14 = arith.constant 0 : index
    %c0_15 = arith.constant 0 : index
    %28 = vector.load %arg10[%c0_13, %c0_14, %c0_15] : memref<1x2048x64xbf16, #tpu.memory_space<vmem>>, vector<1x2048x64xbf16>
    %29 = vector.shape_cast %28 : vector<1x2048x64xbf16> to vector<2048x64xbf16>
    %c0_16 = arith.constant 0 : index
    %c0_17 = arith.constant 0 : index
    %30 = vector.load %arg14[%c0_16, %c0_17] : memref<128x64xf32, #tpu.memory_space<vmem>>, vector<128x64xf32>
    %31 = arith.truncf %30 : vector<128x64xf32> to vector<128x64xbf16>
    %cst = arith.constant dense<0.000000e+00> : vector<128x64xf32>
    %32 = tpu.matmul %31, %6, %cst {dimension_numbers = #tpu.dot_dimension_numbers<[1], [0], [0], [1], [0, 0, 1, 1], [], []>} : vector<128x64xbf16>, vector<64x64xbf16>, vector<128x64xf32> -> vector<128x64xf32>
    %33 = vector.broadcast %15 : vector<1x64xf32> to vector<128x64xf32>
    %34 = arith.addf %32, %33 : vector<128x64xf32>
    %cst_18 = arith.constant 0.353553385 : f32
    %35 = vector.broadcast %cst_18 : f32 to vector<128x64xf32>
    %36 = arith.mulf %34, %35 : vector<128x64xf32>
    %cst_19 = arith.constant dense<0.000000e+00> : vector<128x64xf32>
    %37 = tpu.matmul %31, %8, %cst_19 {dimension_numbers = #tpu.dot_dimension_numbers<[1], [0], [0], [1], [0, 0, 1, 1], [], []>} : vector<128x64xbf16>, vector<64x64xbf16>, vector<128x64xf32> -> vector<128x64xf32>
    %38 = vector.broadcast %16 : vector<1x64xf32> to vector<128x64xf32>
    %39 = arith.addf %37, %38 : vector<128x64xf32>
    %cst_20 = arith.constant dense<0.000000e+00> : vector<128x64xf32>
    %40 = tpu.matmul %31, %10, %cst_20 {dimension_numbers = #tpu.dot_dimension_numbers<[1], [0], [0], [1], [0, 0, 1, 1], [], []>} : vector<128x64xbf16>, vector<64x64xbf16>, vector<128x64xf32> -> vector<128x64xf32>
    %41 = vector.broadcast %17 : vector<1x64xf32> to vector<128x64xf32>
    %42 = arith.addf %40, %41 : vector<128x64xf32>
    %c0_21 = arith.constant 0 : index
    %c0_22 = arith.constant 0 : index
    %43 = vector.load %arg3[%c0_21, %c0_22] : memref<128x128xf32, #tpu.memory_space<vmem>>, vector<128x128xf32>
    %44 = vector.extract_strided_slice %36 {offsets = [0, 0], sizes = [128, 8], strides = [1, 1]} : vector<128x64xf32> to vector<128x8xf32>
    %45 = arith.truncf %44 : vector<128x8xf32> to vector<128x8xbf16>
    %46 = vector.extract_strided_slice %39 {offsets = [0, 0], sizes = [128, 8], strides = [1, 1]} : vector<128x64xf32> to vector<128x8xf32>
    %47 = arith.truncf %46 : vector<128x8xf32> to vector<128x8xbf16>
    %48 = vector.extract_strided_slice %42 {offsets = [0, 0], sizes = [128, 8], strides = [1, 1]} : vector<128x64xf32> to vector<128x8xf32>
    %49 = arith.truncf %48 : vector<128x8xf32> to vector<128x8xbf16>
    %cst_23 = arith.constant dense<0.000000e+00> : vector<128x128xf32>
    %50 = tpu.matmul %45, %47, %cst_23 {dimension_numbers = #tpu.dot_dimension_numbers<[1], [1], [0], [0], [0, 0, 1, 0], [], []>} : vector<128x8xbf16>, vector<128x8xbf16>, vector<128x128xf32> -> vector<128x128xf32>
    %51 = arith.addf %50, %43 : vector<128x128xf32>
    %cst_24 = arith.constant dense<0xFF800000> : vector<128xf32>
    %52 = vector.multi_reduction <maximumf>, %51, %cst_24 [1] : vector<128x128xf32> to vector<128xf32>
    %53 = vector.shape_cast %52 : vector<128xf32> to vector<128x1xf32>
    %54 = vector.broadcast %53 : vector<128x1xf32> to vector<128x128xf32>
    %55 = arith.subf %51, %54 : vector<128x128xf32>
    %56 = math.exp %55 : vector<128x128xf32>
    %cst_25 = arith.constant dense<0.000000e+00> : vector<128xf32>
    %57 = vector.multi_reduction <add>, %56, %cst_25 [1] : vector<128x128xf32> to vector<128xf32>
    %58 = vector.shape_cast %57 : vector<128xf32> to vector<128x1xf32>
    %59 = tpu.reciprocal %58 {approx = true} : vector<128x1xf32> -> vector<128x1xf32>
    %60 = vector.broadcast %59 : vector<128x1xf32> to vector<128x128xf32>
    %61 = arith.mulf %56, %60 : vector<128x128xf32>
    %62 = arith.truncf %61 : vector<128x128xf32> to vector<128x128xbf16>
    %cst_26 = arith.constant dense<0.000000e+00> : vector<128x8xf32>
    %63 = tpu.matmul %62, %49, %cst_26 {dimension_numbers = #tpu.dot_dimension_numbers<[1], [0], [0], [1], [0, 0, 1, 1], [], []>} : vector<128x128xbf16>, vector<128x8xbf16>, vector<128x8xf32> -> vector<128x8xf32>
    %c0_27 = arith.constant 0 : index
    %c0_28 = arith.constant 0 : index
    %64 = vector.load %arg15[%c0_27, %c0_28] : memref<128x64xf32, #tpu.memory_space<vmem>>, vector<128x8xf32>
    tpu.vector_store %arg15[%c0_27, %c0_28], %63 {strides = array<i32>} : memref<128x64xf32, #tpu.memory_space<vmem>>, vector<128x8xf32>,
    %65 = vector.extract_strided_slice %36 {offsets = [0, 8], sizes = [128, 8], strides = [1, 1]} : vector<128x64xf32> to vector<128x8xf32>
    %66 = arith.truncf %65 : vector<128x8xf32> to vector<128x8xbf16>
    %67 = vector.extract_strided_slice %39 {offsets = [0, 8], sizes = [128, 8], strides = [1, 1]} : vector<128x64xf32> to vector<128x8xf32>
    %68 = arith.truncf %67 : vector<128x8xf32> to vector<128x8xbf16>
    %69 = vector.extract_strided_slice %42 {offsets = [0, 8], sizes = [128, 8], strides = [1, 1]} : vector<128x64xf32> to vector<128x8xf32>
    %70 = arith.truncf %69 : vector<128x8xf32> to vector<128x8xbf16>
    %cst_29 = arith.constant dense<0.000000e+00> : vector<128x128xf32>
    %71 = tpu.matmul %66, %68, %cst_29 {dimension_numbers = #tpu.dot_dimension_numbers<[1], [1], [0], [0], [0, 0, 1, 0], [], []>} : vector<128x8xbf16>, vector<128x8xbf16>, vector<128x128xf32> -> vector<128x128xf32>
    %72 = arith.addf %71, %43 : vector<128x128xf32>
    %cst_30 = arith.constant dense<0xFF800000> : vector<128xf32>
    %73 = vector.multi_reduction <maximumf>, %72, %cst_30 [1] : vector<128x128xf32> to vector<128xf32>
    %74 = vector.shape_cast %73 : vector<128xf32> to vector<128x1xf32>
    %75 = vector.broadcast %74 : vector<128x1xf32> to vector<128x128xf32>
    %76 = arith.subf %72, %75 : vector<128x128xf32>
    %77 = math.exp %76 : vector<128x128xf32>
    %cst_31 = arith.constant dense<0.000000e+00> : vector<128xf32>
    %78 = vector.multi_reduction <add>, %77, %cst_31 [1] : vector<128x128xf32> to vector<128xf32>
    %79 = vector.shape_cast %78 : vector<128xf32> to vector<128x1xf32>
    %80 = tpu.reciprocal %79 {approx = true} : vector<128x1xf32> -> vector<128x1xf32>
    %81 = vector.broadcast %80 : vector<128x1xf32> to vector<128x128xf32>
    %82 = arith.mulf %77, %81 : vector<128x128xf32>
    %83 = arith.truncf %82 : vector<128x128xf32> to vector<128x128xbf16>
    %cst_32 = arith.constant dense<0.000000e+00> : vector<128x8xf32>
    %84 = tpu.matmul %83, %70, %cst_32 {dimension_numbers = #tpu.dot_dimension_numbers<[1], [0], [0], [1], [0, 0, 1, 1], [], []>} : vector<128x128xbf16>, vector<128x8xbf16>, vector<128x8xf32> -> vector<128x8xf32>
    %c0_33 = arith.constant 0 : index
    %c8 = arith.constant 8 : index
    %85 = vector.load %arg15[%c0_33, %c8] : memref<128x64xf32, #tpu.memory_space<vmem>>, vector<128x8xf32>
    tpu.vector_store %arg15[%c0_33, %c8], %84 {strides = array<i32>} : memref<128x64xf32, #tpu.memory_space<vmem>>, vector<128x8xf32>,
    %86 = vector.extract_strided_slice %36 {offsets = [0, 16], sizes = [128, 8], strides = [1, 1]} : vector<128x64xf32> to vector<128x8xf32>
    %87 = arith.truncf %86 : vector<128x8xf32> to vector<128x8xbf16>
    %88 = vector.extract_strided_slice %39 {offsets = [0, 16], sizes = [128, 8], strides = [1, 1]} : vector<128x64xf32> to vector<128x8xf32>
    %89 = arith.truncf %88 : vector<128x8xf32> to vector<128x8xbf16>
    %90 = vector.extract_strided_slice %42 {offsets = [0, 16], sizes = [128, 8], strides = [1, 1]} : vector<128x64xf32> to vector<128x8xf32>
    %91 = arith.truncf %90 : vector<128x8xf32> to vector<128x8xbf16>
    %cst_34 = arith.constant dense<0.000000e+00> : vector<128x128xf32>
    %92 = tpu.matmul %87, %89, %cst_34 {dimension_numbers = #tpu.dot_dimension_numbers<[1], [1], [0], [0], [0, 0, 1, 0], [], []>} : vector<128x8xbf16>, vector<128x8xbf16>, vector<128x128xf32> -> vector<128x128xf32>
    %93 = arith.addf %92, %43 : vector<128x128xf32>
    %cst_35 = arith.constant dense<0xFF800000> : vector<128xf32>
    %94 = vector.multi_reduction <maximumf>, %93, %cst_35 [1] : vector<128x128xf32> to vector<128xf32>
    %95 = vector.shape_cast %94 : vector<128xf32> to vector<128x1xf32>
    %96 = vector.broadcast %95 : vector<128x1xf32> to vector<128x128xf32>
    %97 = arith.subf %93, %96 : vector<128x128xf32>
    %98 = math.exp %97 : vector<128x128xf32>
    %cst_36 = arith.constant dense<0.000000e+00> : vector<128xf32>
    %99 = vector.multi_reduction <add>, %98, %cst_36 [1] : vector<128x128xf32> to vector<128xf32>
    %100 = vector.shape_cast %99 : vector<128xf32> to vector<128x1xf32>
    %101 = tpu.reciprocal %100 {approx = true} : vector<128x1xf32> -> vector<128x1xf32>
    %102 = vector.broadcast %101 : vector<128x1xf32> to vector<128x128xf32>
    %103 = arith.mulf %98, %102 : vector<128x128xf32>
    %104 = arith.truncf %103 : vector<128x128xf32> to vector<128x128xbf16>
    %cst_37 = arith.constant dense<0.000000e+00> : vector<128x8xf32>
    %105 = tpu.matmul %104, %91, %cst_37 {dimension_numbers = #tpu.dot_dimension_numbers<[1], [0], [0], [1], [0, 0, 1, 1], [], []>} : vector<128x128xbf16>, vector<128x8xbf16>, vector<128x8xf32> -> vector<128x8xf32>
    %c0_38 = arith.constant 0 : index
    %c16 = arith.constant 16 : index
    %106 = vector.load %arg15[%c0_38, %c16] : memref<128x64xf32, #tpu.memory_space<vmem>>, vector<128x8xf32>
    tpu.vector_store %arg15[%c0_38, %c16], %105 {strides = array<i32>} : memref<128x64xf32, #tpu.memory_space<vmem>>, vector<128x8xf32>,
    %107 = vector.extract_strided_slice %36 {offsets = [0, 24], sizes = [128, 8], strides = [1, 1]} : vector<128x64xf32> to vector<128x8xf32>
    %108 = arith.truncf %107 : vector<128x8xf32> to vector<128x8xbf16>
    %109 = vector.extract_strided_slice %39 {offsets = [0, 24], sizes = [128, 8], strides = [1, 1]} : vector<128x64xf32> to vector<128x8xf32>
    %110 = arith.truncf %109 : vector<128x8xf32> to vector<128x8xbf16>
    %111 = vector.extract_strided_slice %42 {offsets = [0, 24], sizes = [128, 8], strides = [1, 1]} : vector<128x64xf32> to vector<128x8xf32>
    %112 = arith.truncf %111 : vector<128x8xf32> to vector<128x8xbf16>
    %cst_39 = arith.constant dense<0.000000e+00> : vector<128x128xf32>
    %113 = tpu.matmul %108, %110, %cst_39 {dimension_numbers = #tpu.dot_dimension_numbers<[1], [1], [0], [0], [0, 0, 1, 0], [], []>} : vector<128x8xbf16>, vector<128x8xbf16>, vector<128x128xf32> -> vector<128x128xf32>
    %114 = arith.addf %113, %43 : vector<128x128xf32>
    %cst_40 = arith.constant dense<0xFF800000> : vector<128xf32>
    %115 = vector.multi_reduction <maximumf>, %114, %cst_40 [1] : vector<128x128xf32> to vector<128xf32>
    %116 = vector.shape_cast %115 : vector<128xf32> to vector<128x1xf32>
    %117 = vector.broadcast %116 : vector<128x1xf32> to vector<128x128xf32>
    %118 = arith.subf %114, %117 : vector<128x128xf32>
    %119 = math.exp %118 : vector<128x128xf32>
    %cst_41 = arith.constant dense<0.000000e+00> : vector<128xf32>
    %120 = vector.multi_reduction <add>, %119, %cst_41 [1] : vector<128x128xf32> to vector<128xf32>
    %121 = vector.shape_cast %120 : vector<128xf32> to vector<128x1xf32>
    %122 = tpu.reciprocal %121 {approx = true} : vector<128x1xf32> -> vector<128x1xf32>
    %123 = vector.broadcast %122 : vector<128x1xf32> to vector<128x128xf32>
    %124 = arith.mulf %119, %123 : vector<128x128xf32>
    %125 = arith.truncf %124 : vector<128x128xf32> to vector<128x128xbf16>
    %cst_42 = arith.constant dense<0.000000e+00> : vector<128x8xf32>
    %126 = tpu.matmul %125, %112, %cst_42 {dimension_numbers = #tpu.dot_dimension_numbers<[1], [0], [0], [1], [0, 0, 1, 1], [], []>} : vector<128x128xbf16>, vector<128x8xbf16>, vector<128x8xf32> -> vector<128x8xf32>
    %c0_43 = arith.constant 0 : index
    %c24 = arith.constant 24 : index
    %127 = vector.load %arg15[%c0_43, %c24] : memref<128x64xf32, #tpu.memory_space<vmem>>, vector<128x8xf32>
    tpu.vector_store %arg15[%c0_43, %c24], %126 {strides = array<i32>} : memref<128x64xf32, #tpu.memory_space<vmem>>, vector<128x8xf32>,
    %128 = vector.extract_strided_slice %36 {offsets = [0, 32], sizes = [128, 8], strides = [1, 1]} : vector<128x64xf32> to vector<128x8xf32>
    %129 = arith.truncf %128 : vector<128x8xf32> to vector<128x8xbf16>
    %130 = vector.extract_strided_slice %39 {offsets = [0, 32], sizes = [128, 8], strides = [1, 1]} : vector<128x64xf32> to vector<128x8xf32>
    %131 = arith.truncf %130 : vector<128x8xf32> to vector<128x8xbf16>
    %132 = vector.extract_strided_slice %42 {offsets = [0, 32], sizes = [128, 8], strides = [1, 1]} : vector<128x64xf32> to vector<128x8xf32>
    %133 = arith.truncf %132 : vector<128x8xf32> to vector<128x8xbf16>
    %cst_44 = arith.constant dense<0.000000e+00> : vector<128x128xf32>
    %134 = tpu.matmul %129, %131, %cst_44 {dimension_numbers = #tpu.dot_dimension_numbers<[1], [1], [0], [0], [0, 0, 1, 0], [], []>} : vector<128x8xbf16>, vector<128x8xbf16>, vector<128x128xf32> -> vector<128x128xf32>
    %135 = arith.addf %134, %43 : vector<128x128xf32>
    %cst_45 = arith.constant dense<0xFF800000> : vector<128xf32>
    %136 = vector.multi_reduction <maximumf>, %135, %cst_45 [1] : vector<128x128xf32> to vector<128xf32>
    %137 = vector.shape_cast %136 : vector<128xf32> to vector<128x1xf32>
    %138 = vector.broadcast %137 : vector<128x1xf32> to vector<128x128xf32>
    %139 = arith.subf %135, %138 : vector<128x128xf32>
    %140 = math.exp %139 : vector<128x128xf32>
    %cst_46 = arith.constant dense<0.000000e+00> : vector<128xf32>
    %141 = vector.multi_reduction <add>, %140, %cst_46 [1] : vector<128x128xf32> to vector<128xf32>
    %142 = vector.shape_cast %141 : vector<128xf32> to vector<128x1xf32>
    %143 = tpu.reciprocal %142 {approx = true} : vector<128x1xf32> -> vector<128x1xf32>
    %144 = vector.broadcast %143 : vector<128x1xf32> to vector<128x128xf32>
    %145 = arith.mulf %140, %144 : vector<128x128xf32>
    %146 = arith.truncf %145 : vector<128x128xf32> to vector<128x128xbf16>
    %cst_47 = arith.constant dense<0.000000e+00> : vector<128x8xf32>
    %147 = tpu.matmul %146, %133, %cst_47 {dimension_numbers = #tpu.dot_dimension_numbers<[1], [0], [0], [1], [0, 0, 1, 1], [], []>} : vector<128x128xbf16>, vector<128x8xbf16>, vector<128x8xf32> -> vector<128x8xf32>
    %c0_48 = arith.constant 0 : index
    %c32 = arith.constant 32 : index
    %148 = vector.load %arg15[%c0_48, %c32] : memref<128x64xf32, #tpu.memory_space<vmem>>, vector<128x8xf32>
    tpu.vector_store %arg15[%c0_48, %c32], %147 {strides = array<i32>} : memref<128x64xf32, #tpu.memory_space<vmem>>, vector<128x8xf32>,
    %149 = vector.extract_strided_slice %36 {offsets = [0, 40], sizes = [128, 8], strides = [1, 1]} : vector<128x64xf32> to vector<128x8xf32>
    %150 = arith.truncf %149 : vector<128x8xf32> to vector<128x8xbf16>
    %151 = vector.extract_strided_slice %39 {offsets = [0, 40], sizes = [128, 8], strides = [1, 1]} : vector<128x64xf32> to vector<128x8xf32>
    %152 = arith.truncf %151 : vector<128x8xf32> to vector<128x8xbf16>
    %153 = vector.extract_strided_slice %42 {offsets = [0, 40], sizes = [128, 8], strides = [1, 1]} : vector<128x64xf32> to vector<128x8xf32>
    %154 = arith.truncf %153 : vector<128x8xf32> to vector<128x8xbf16>
    %cst_49 = arith.constant dense<0.000000e+00> : vector<128x128xf32>
    %155 = tpu.matmul %150, %152, %cst_49 {dimension_numbers = #tpu.dot_dimension_numbers<[1], [1], [0], [0], [0, 0, 1, 0], [], []>} : vector<128x8xbf16>, vector<128x8xbf16>, vector<128x128xf32> -> vector<128x128xf32>
    %156 = arith.addf %155, %43 : vector<128x128xf32>
    %cst_50 = arith.constant dense<0xFF800000> : vector<128xf32>
    %157 = vector.multi_reduction <maximumf>, %156, %cst_50 [1] : vector<128x128xf32> to vector<128xf32>
    %158 = vector.shape_cast %157 : vector<128xf32> to vector<128x1xf32>
    %159 = vector.broadcast %158 : vector<128x1xf32> to vector<128x128xf32>
    %160 = arith.subf %156, %159 : vector<128x128xf32>
    %161 = math.exp %160 : vector<128x128xf32>
    %cst_51 = arith.constant dense<0.000000e+00> : vector<128xf32>
    %162 = vector.multi_reduction <add>, %161, %cst_51 [1] : vector<128x128xf32> to vector<128xf32>
    %163 = vector.shape_cast %162 : vector<128xf32> to vector<128x1xf32>
    %164 = tpu.reciprocal %163 {approx = true} : vector<128x1xf32> -> vector<128x1xf32>
    %165 = vector.broadcast %164 : vector<128x1xf32> to vector<128x128xf32>
    %166 = arith.mulf %161, %165 : vector<128x128xf32>
    %167 = arith.truncf %166 : vector<128x128xf32> to vector<128x128xbf16>
    %cst_52 = arith.constant dense<0.000000e+00> : vector<128x8xf32>
    %168 = tpu.matmul %167, %154, %cst_52 {dimension_numbers = #tpu.dot_dimension_numbers<[1], [0], [0], [1], [0, 0, 1, 1], [], []>} : vector<128x128xbf16>, vector<128x8xbf16>, vector<128x8xf32> -> vector<128x8xf32>
    %c0_53 = arith.constant 0 : index
    %c40 = arith.constant 40 : index
    %169 = vector.load %arg15[%c0_53, %c40] : memref<128x64xf32, #tpu.memory_space<vmem>>, vector<128x8xf32>
    tpu.vector_store %arg15[%c0_53, %c40], %168 {strides = array<i32>} : memref<128x64xf32, #tpu.memory_space<vmem>>, vector<128x8xf32>,
    %170 = vector.extract_strided_slice %36 {offsets = [0, 48], sizes = [128, 8], strides = [1, 1]} : vector<128x64xf32> to vector<128x8xf32>
    %171 = arith.truncf %170 : vector<128x8xf32> to vector<128x8xbf16>
    %172 = vector.extract_strided_slice %39 {offsets = [0, 48], sizes = [128, 8], strides = [1, 1]} : vector<128x64xf32> to vector<128x8xf32>
    %173 = arith.truncf %172 : vector<128x8xf32> to vector<128x8xbf16>
    %174 = vector.extract_strided_slice %42 {offsets = [0, 48], sizes = [128, 8], strides = [1, 1]} : vector<128x64xf32> to vector<128x8xf32>
    %175 = arith.truncf %174 : vector<128x8xf32> to vector<128x8xbf16>
    %cst_54 = arith.constant dense<0.000000e+00> : vector<128x128xf32>
    %176 = tpu.matmul %171, %173, %cst_54 {dimension_numbers = #tpu.dot_dimension_numbers<[1], [1], [0], [0], [0, 0, 1, 0], [], []>} : vector<128x8xbf16>, vector<128x8xbf16>, vector<128x128xf32> -> vector<128x128xf32>
    %177 = arith.addf %176, %43 : vector<128x128xf32>
    %cst_55 = arith.constant dense<0xFF800000> : vector<128xf32>
    %178 = vector.multi_reduction <maximumf>, %177, %cst_55 [1] : vector<128x128xf32> to vector<128xf32>
    %179 = vector.shape_cast %178 : vector<128xf32> to vector<128x1xf32>
    %180 = vector.broadcast %179 : vector<128x1xf32> to vector<128x128xf32>
    %181 = arith.subf %177, %180 : vector<128x128xf32>
    %182 = math.exp %181 : vector<128x128xf32>
    %cst_56 = arith.constant dense<0.000000e+00> : vector<128xf32>
    %183 = vector.multi_reduction <add>, %182, %cst_56 [1] : vector<128x128xf32> to vector<128xf32>
    %184 = vector.shape_cast %183 : vector<128xf32> to vector<128x1xf32>
    %185 = tpu.reciprocal %184 {approx = true} : vector<128x1xf32> -> vector<128x1xf32>
    %186 = vector.broadcast %185 : vector<128x1xf32> to vector<128x128xf32>
    %187 = arith.mulf %182, %186 : vector<128x128xf32>
    %188 = arith.truncf %187 : vector<128x128xf32> to vector<128x128xbf16>
    %cst_57 = arith.constant dense<0.000000e+00> : vector<128x8xf32>
    %189 = tpu.matmul %188, %175, %cst_57 {dimension_numbers = #tpu.dot_dimension_numbers<[1], [0], [0], [1], [0, 0, 1, 1], [], []>} : vector<128x128xbf16>, vector<128x8xbf16>, vector<128x8xf32> -> vector<128x8xf32>
    %c0_58 = arith.constant 0 : index
    %c48 = arith.constant 48 : index
    %190 = vector.load %arg15[%c0_58, %c48] : memref<128x64xf32, #tpu.memory_space<vmem>>, vector<128x8xf32>
    tpu.vector_store %arg15[%c0_58, %c48], %189 {strides = array<i32>} : memref<128x64xf32, #tpu.memory_space<vmem>>, vector<128x8xf32>,
    %191 = vector.extract_strided_slice %36 {offsets = [0, 56], sizes = [128, 8], strides = [1, 1]} : vector<128x64xf32> to vector<128x8xf32>
    %192 = arith.truncf %191 : vector<128x8xf32> to vector<128x8xbf16>
    %193 = vector.extract_strided_slice %39 {offsets = [0, 56], sizes = [128, 8], strides = [1, 1]} : vector<128x64xf32> to vector<128x8xf32>
    %194 = arith.truncf %193 : vector<128x8xf32> to vector<128x8xbf16>
    %195 = vector.extract_strided_slice %42 {offsets = [0, 56], sizes = [128, 8], strides = [1, 1]} : vector<128x64xf32> to vector<128x8xf32>
    %196 = arith.truncf %195 : vector<128x8xf32> to vector<128x8xbf16>
    %cst_59 = arith.constant dense<0.000000e+00> : vector<128x128xf32>
    %197 = tpu.matmul %192, %194, %cst_59 {dimension_numbers = #tpu.dot_dimension_numbers<[1], [1], [0], [0], [0, 0, 1, 0], [], []>} : vector<128x8xbf16>, vector<128x8xbf16>, vector<128x128xf32> -> vector<128x128xf32>
    %198 = arith.addf %197, %43 : vector<128x128xf32>
    %cst_60 = arith.constant dense<0xFF800000> : vector<128xf32>
    %199 = vector.multi_reduction <maximumf>, %198, %cst_60 [1] : vector<128x128xf32> to vector<128xf32>
    %200 = vector.shape_cast %199 : vector<128xf32> to vector<128x1xf32>
    %201 = vector.broadcast %200 : vector<128x1xf32> to vector<128x128xf32>
    %202 = arith.subf %198, %201 : vector<128x128xf32>
    %203 = math.exp %202 : vector<128x128xf32>
    %cst_61 = arith.constant dense<0.000000e+00> : vector<128xf32>
    %204 = vector.multi_reduction <add>, %203, %cst_61 [1] : vector<128x128xf32> to vector<128xf32>
    %205 = vector.shape_cast %204 : vector<128xf32> to vector<128x1xf32>
    %206 = tpu.reciprocal %205 {approx = true} : vector<128x1xf32> -> vector<128x1xf32>
    %207 = vector.broadcast %206 : vector<128x1xf32> to vector<128x128xf32>
    %208 = arith.mulf %203, %207 : vector<128x128xf32>
    %209 = arith.truncf %208 : vector<128x128xf32> to vector<128x128xbf16>
    %cst_62 = arith.constant dense<0.000000e+00> : vector<128x8xf32>
    %210 = tpu.matmul %209, %196, %cst_62 {dimension_numbers = #tpu.dot_dimension_numbers<[1], [0], [0], [1], [0, 0, 1, 1], [], []>} : vector<128x128xbf16>, vector<128x8xbf16>, vector<128x8xf32> -> vector<128x8xf32>
    %c0_63 = arith.constant 0 : index
    %c56 = arith.constant 56 : index
    %211 = vector.load %arg15[%c0_63, %c56] : memref<128x64xf32, #tpu.memory_space<vmem>>, vector<128x8xf32>
    tpu.vector_store %arg15[%c0_63, %c56], %210 {strides = array<i32>} : memref<128x64xf32, #tpu.memory_space<vmem>>, vector<128x8xf32>,
    %c0_64 = arith.constant 0 : index
    %c0_65 = arith.constant 0 : index
    %212 = vector.load %arg15[%c0_64, %c0_65] : memref<128x64xf32, #tpu.memory_space<vmem>>, vector<128x64xf32>
    %213 = arith.truncf %212 : vector<128x64xf32> to vector<128x64xbf16>
    %cst_66 = arith.constant dense<0.000000e+00> : vector<128x64xf32>
    %214 = tpu.matmul %213, %12, %cst_66 {dimension_numbers = #tpu.dot_dimension_numbers<[1], [0], [0], [1], [0, 0, 1, 1], [], []>} : vector<128x64xbf16>, vector<64x64xbf16>, vector<128x64xf32> -> vector<128x64xf32>
    %215 = vector.broadcast %18 : vector<1x64xf32> to vector<128x64xf32>
    %216 = arith.addf %214, %215 : vector<128x64xf32>
    %217 = arith.addf %30, %216 : vector<128x64xf32>
    %cst_67 = arith.constant dense<0.000000e+00> : vector<128xf32>
    %218 = vector.multi_reduction <add>, %217, %cst_67 [1] : vector<128x64xf32> to vector<128xf32>
    %219 = vector.shape_cast %218 : vector<128xf32> to vector<128x1xf32>
    %cst_68 = arith.constant 6.400000e+01 : f32
    %220 = vector.broadcast %cst_68 : f32 to vector<128x1xf32>
    %221 = arith.divf %219, %220 : vector<128x1xf32>
    %222 = vector.broadcast %221 : vector<128x1xf32> to vector<128x64xf32>
    %223 = arith.subf %217, %222 : vector<128x64xf32>
    %224 = arith.mulf %223, %223 : vector<128x64xf32>
    %cst_69 = arith.constant dense<0.000000e+00> : vector<128xf32>
    %225 = vector.multi_reduction <add>, %224, %cst_69 [1] : vector<128x64xf32> to vector<128xf32>
    %226 = vector.shape_cast %225 : vector<128xf32> to vector<128x1xf32>
    %cst_70 = arith.constant 6.400000e+01 : f32
    %227 = vector.broadcast %cst_70 : f32 to vector<128x1xf32>
    %228 = arith.divf %226, %227 : vector<128x1xf32>
    %229 = vector.broadcast %221 : vector<128x1xf32> to vector<128x64xf32>
    %230 = arith.subf %217, %229 : vector<128x64xf32>
    %cst_71 = arith.constant 9.99999974E-6 : f32
    %231 = vector.broadcast %cst_71 : f32 to vector<128x1xf32>
    %232 = arith.addf %228, %231 : vector<128x1xf32>
    %233 = math.rsqrt %232 : vector<128x1xf32>
    %234 = vector.broadcast %233 : vector<128x1xf32> to vector<128x64xf32>
    %235 = arith.mulf %230, %234 : vector<128x64xf32>
    %236 = vector.broadcast %19 : vector<1x64xf32> to vector<128x64xf32>
    %237 = arith.mulf %235, %236 : vector<128x64xf32>
    %238 = vector.broadcast %20 : vector<1x64xf32> to vector<128x64xf32>
    %239 = arith.addf %237, %238 : vector<128x64xf32>
    %240 = arith.truncf %239 : vector<128x64xf32> to vector<128x64xbf16>
    %cst_72 = arith.constant dense<0.000000e+00> : vector<128x2048xf32>
    %241 = tpu.matmul %240, %25, %cst_72 {dimension_numbers = #tpu.dot_dimension_numbers<[1], [0], [0], [1], [0, 0, 1, 1], [], []>} : vector<128x64xbf16>, vector<64x2048xbf16>, vector<128x2048xf32> -> vector<128x2048xf32>
    %242 = vector.broadcast %27 : vector<1x2048xf32> to vector<128x2048xf32>
    %243 = arith.addf %241, %242 : vector<128x2048xf32>
    %cst_73 = arith.constant 0.000000e+00 : f32
    %244 = vector.broadcast %cst_73 : f32 to vector<128x2048xf32>
    %245 = arith.maximumf %243, %244 : vector<128x2048xf32>
    %246 = arith.truncf %245 : vector<128x2048xf32> to vector<128x2048xbf16>
    %cst_74 = arith.constant dense<0.000000e+00> : vector<128x64xf32>
    %247 = tpu.matmul %246, %29, %cst_74 {dimension_numbers = #tpu.dot_dimension_numbers<[1], [0], [0], [1], [0, 0, 1, 1], [], []>} : vector<128x2048xbf16>, vector<2048x64xbf16>, vector<128x64xf32> -> vector<128x64xf32>
    %248 = vector.broadcast %21 : vector<1x64xf32> to vector<128x64xf32>
    %249 = arith.addf %247, %248 : vector<128x64xf32>
    %250 = arith.addf %239, %249 : vector<128x64xf32>
    %cst_75 = arith.constant dense<0.000000e+00> : vector<128xf32>
    %251 = vector.multi_reduction <add>, %250, %cst_75 [1] : vector<128x64xf32> to vector<128xf32>
    %252 = vector.shape_cast %251 : vector<128xf32> to vector<128x1xf32>
    %cst_76 = arith.constant 6.400000e+01 : f32
    %253 = vector.broadcast %cst_76 : f32 to vector<128x1xf32>
    %254 = arith.divf %252, %253 : vector<128x1xf32>
    %255 = vector.broadcast %254 : vector<128x1xf32> to vector<128x64xf32>
    %256 = arith.subf %250, %255 : vector<128x64xf32>
    %257 = arith.mulf %256, %256 : vector<128x64xf32>
    %cst_77 = arith.constant dense<0.000000e+00> : vector<128xf32>
    %258 = vector.multi_reduction <add>, %257, %cst_77 [1] : vector<128x64xf32> to vector<128xf32>
    %259 = vector.shape_cast %258 : vector<128xf32> to vector<128x1xf32>
    %cst_78 = arith.constant 6.400000e+01 : f32
    %260 = vector.broadcast %cst_78 : f32 to vector<128x1xf32>
    %261 = arith.divf %259, %260 : vector<128x1xf32>
    %262 = vector.broadcast %254 : vector<128x1xf32> to vector<128x64xf32>
    %263 = arith.subf %250, %262 : vector<128x64xf32>
    %cst_79 = arith.constant 9.99999974E-6 : f32
    %264 = vector.broadcast %cst_79 : f32 to vector<128x1xf32>
    %265 = arith.addf %261, %264 : vector<128x1xf32>
    %266 = math.rsqrt %265 : vector<128x1xf32>
    %267 = vector.broadcast %266 : vector<128x1xf32> to vector<128x64xf32>
    %268 = arith.mulf %263, %267 : vector<128x64xf32>
    %269 = vector.broadcast %22 : vector<1x64xf32> to vector<128x64xf32>
    %270 = arith.mulf %268, %269 : vector<128x64xf32>
    %271 = vector.broadcast %23 : vector<1x64xf32> to vector<128x64xf32>
    %272 = arith.addf %270, %271 : vector<128x64xf32>
    %c0_80 = arith.constant 0 : index
    %c0_81 = arith.constant 0 : index
    %273 = vector.load %arg14[%c0_80, %c0_81] : memref<128x64xf32, #tpu.memory_space<vmem>>, vector<128x64xf32>
    tpu.vector_store %arg14[%c0_80, %c0_81], %272 {strides = array<i32>} : memref<128x64xf32, #tpu.memory_space<vmem>>, vector<128x64xf32>,
    %c1_i32 = arith.constant 1 : i32
    %274 = arith.cmpi eq, %arg0, %c1_i32 : i32
    %275 = arith.extui %274 : i1 to i32
    %c0_i32_82 = arith.constant 0 : i32
    %276 = arith.cmpi ne, %275, %c0_i32_82 : i32
    scf.if %276 {
      %277 = vector.shape_cast %272 : vector<128x64xf32> to vector<16x8x64xf32>
      %cst_83 = arith.constant dense<0.000000e+00> : vector<8x64xf32>
      %278 = vector.multi_reduction <add>, %277, %cst_83 [0] : vector<16x8x64xf32> to vector<8x64xf32>
      %cst_84 = arith.constant 1.600000e+01 : f32
      %279 = vector.broadcast %cst_84 : f32 to vector<8x64xf32>
      %280 = arith.divf %278, %279 : vector<8x64xf32>
      %281 = arith.truncf %280 : vector<8x64xf32> to vector<8x64xbf16>
      %c0_85 = arith.constant 0 : index
      %c0_86 = arith.constant 0 : index
      %282 = vector.load %arg11[%c0_85, %c0_86] : memref<64x10xbf16, #tpu.memory_space<vmem>>, vector<64x10xbf16>
      %cst_87 = arith.constant dense<0.000000e+00> : vector<8x10xf32>
      %283 = tpu.matmul %281, %282, %cst_87 {dimension_numbers = #tpu.dot_dimension_numbers<[1], [0], [0], [1], [0, 0, 1, 1], [], []>} : vector<8x64xbf16>, vector<64x10xbf16>, vector<8x10xf32> -> vector<8x10xf32>
      %c0_88 = arith.constant 0 : index
      %c0_89 = arith.constant 0 : index
      %284 = vector.load %arg12[%c0_88, %c0_89] : memref<1x10xf32, #tpu.memory_space<vmem>>, vector<1x10xf32>
      %285 = vector.broadcast %284 : vector<1x10xf32> to vector<8x10xf32>
      %286 = arith.addf %283, %285 : vector<8x10xf32>
      %c0_90 = arith.constant 0 : index
      %c0_91 = arith.constant 0 : index
      %287 = vector.load %arg13[%c0_90, %c0_91] : memref<8x10xf32, #tpu.memory_space<vmem>>, vector<8x10xf32>
      tpu.vector_store %arg13[%c0_90, %c0_91], %286 {strides = array<i32>} : memref<8x10xf32, #tpu.memory_space<vmem>>, vector<8x10xf32>,
    } else {
    }
    return
  }
  func.func @transform_0(%arg0: i32) -> (i32, i32) {
    %c0_i32 = arith.constant 0 : i32
    %c0_i32_0 = arith.constant 0 : i32
    %c0_i32_1 = arith.constant 0 : i32
    return %c0_i32, %c0_i32_0 : i32, i32
  }
  func.func @transform_1(%arg0: i32) -> (i32, i32) {
    %c0_i32 = arith.constant 0 : i32
    %c0_i32_0 = arith.constant 0 : i32
    %c0_i32_1 = arith.constant 0 : i32
    return %c0_i32, %c0_i32_0 : i32, i32
  }
  func.func @transform_2(%arg0: i32) -> (i32, i32) {
    %c0_i32 = arith.constant 0 : i32
    %c0_i32_0 = arith.constant 0 : i32
    %c0_i32_1 = arith.constant 0 : i32
    return %c0_i32, %c0_i32_0 : i32, i32
  }
  func.func @transform_3(%arg0: i32) -> (i32, i32) {
    %c0_i32 = arith.constant 0 : i32
    %c0_i32_0 = arith.constant 0 : i32
    %c0_i32_1 = arith.constant 0 : i32
    return %c0_i32, %c0_i32_0 : i32, i32
  }
  func.func @transform_4(%arg0: i32) -> (i32, i32) {
    %c0_i32 = arith.constant 0 : i32
    %c0_i32_0 = arith.constant 0 : i32
    %c0_i32_1 = arith.constant 0 : i32
    return %c0_i32, %c0_i32_0 : i32, i32
  }
  func.func @transform_5(%arg0: i32) -> (i32, i32, i32, i32) {
    %c0_i32 = arith.constant 0 : i32
    %c0_i32_0 = arith.constant 0 : i32
    %c0_i32_1 = arith.constant 0 : i32
    %c0_i32_2 = arith.constant 0 : i32
    return %arg0, %c0_i32, %c0_i32_0, %c0_i32_1 : i32, i32, i32, i32
  }
  func.func @transform_6(%arg0: i32) -> (i32, i32, i32) {
    %c0_i32 = arith.constant 0 : i32
    %c0_i32_0 = arith.constant 0 : i32
    %c0_i32_1 = arith.constant 0 : i32
    return %arg0, %c0_i32, %c0_i32_0 : i32, i32, i32
  }
  func.func @transform_7(%arg0: i32) -> (i32, i32, i32) {
    %c0_i32 = arith.constant 0 : i32
    %c0_i32_0 = arith.constant 0 : i32
    %c0_i32_1 = arith.constant 0 : i32
    return %arg0, %c0_i32, %c0_i32_0 : i32, i32, i32
  }
  func.func @transform_8(%arg0: i32) -> (i32, i32, i32) {
    %c0_i32 = arith.constant 0 : i32
    %c0_i32_0 = arith.constant 0 : i32
    %c0_i32_1 = arith.constant 0 : i32
    return %arg0, %c0_i32, %c0_i32_0 : i32, i32, i32
  }
  func.func @transform_9(%arg0: i32) -> (i32, i32, i32) {
    %c0_i32 = arith.constant 0 : i32
    %c0_i32_0 = arith.constant 0 : i32
    %c0_i32_1 = arith.constant 0 : i32
    return %arg0, %c0_i32, %c0_i32_0 : i32, i32, i32
  }
  func.func @transform_10(%arg0: i32) -> (i32, i32) {
    %c0_i32 = arith.constant 0 : i32
    %c0_i32_0 = arith.constant 0 : i32
    %c0_i32_1 = arith.constant 0 : i32
    return %c0_i32, %c0_i32_0 : i32, i32
  }
  func.func @transform_11(%arg0: i32) -> (i32, i32) {
    %c0_i32 = arith.constant 0 : i32
    %c0_i32_0 = arith.constant 0 : i32
    %c0_i32_1 = arith.constant 0 : i32
    return %c0_i32, %c0_i32_0 : i32, i32
  }
  func.func @transform_12(%arg0: i32) -> (i32, i32) {
    %c0_i32 = arith.constant 0 : i32
    %c0_i32_0 = arith.constant 0 : i32
    %c0_i32_1 = arith.constant 0 : i32
    return %c0_i32, %c0_i32_0 : i32, i32
  }
}

</mosaic_0001>

<bundles_post_ra>
// kernel: vit_forward.1
= control target key start
LH: loop header
LB: loop body
LE: loop exit
PB: predicated region body
PF: predicated region fallthrough
CT: control target
= control target key end

     0   :  { %17 = vsyncpa [#allocation5], 0  ;;  %s12801_s21 = smov 0   ;;  %s17692_s0 = inlined_call_operand.vmem [shape: f32[128,48], index: 0, kind: input, shape index: {}]   ;;  %s17693_s1 = inlined_call_operand.vmem [shape: f32[128,64], index: 1, kind: input, shape index: {}]   ;;  %s17694_s2 = inlined_call_operand.vmem [shape: f32[128,128], index: 2, kind: input, shape index: {}]   ;;  %s17695_s3 = inlined_call_operand.vmem [shape: bf16[48,64], index: 3, kind: input, shape index: {}]   ;;  %s17696_s4 = inlined_call_operand.vmem [shape: f32[1,64], index: 4, kind: input, shape index: {}]   ;;  %s17697_s5 = inlined_call_operand.vmem [shape: bf16[2,4,64,64], index: 5, kind: input, shape index: {}]   ;;  %s17698_s6 = inlined_call_operand.vmem [shape: f32[2,9,64], index: 6, kind: input, shape index: {}]   ;;  %s17699_s7 = inlined_call_operand.vmem [shape: bf16[2,64,2048], index: 7, kind: input, shape index: {}]   ;;  %s17700_s8 = inlined_call_operand.vmem [shape: f32[2,1,2048], index: 8, kind: input, shape index: {}]   ;;  %s17701_s9 = inlined_call_operand.vmem [shape: bf16[2,2048,64], index: 9, kind: input, shape index: {}]   ;;  %s17702_s10 = inlined_call_operand.vmem [shape: bf16[64,10], index: 10, kind: input, shape index: {}]   ;;  %s17703_s11 = inlined_call_operand.vmem [shape: f32[1,10], index: 11, kind: input, shape index: {}]   ;;  %s17704_s12 = inlined_call_operand.hbm [shape: f32[8,10], index: 12, kind: output, shape index: {}]  }
   0x1 LB: > { %17768 = sst [smem:[#allocation7_spill]] %s12716_s21  ;;  %s12807_s22 = sadd.s32 4294967295, %s12716_s21   ;;  %s12716_s21 = sphi %s12801_s21, %s23_s21  }
   0x2   : > { %p9903_p0 = scmp.ge.s32.totalorder %s12716_s21, 1  ;;  %p397_p1 = scmp.lt.s32.totalorder %s12716_s21, 3 }
   0x4   : > { %p398_p2 = pnand %p9903_p0, %p397_p1 }
   0x6   : > { %401 = sbr.rel (%p398_p2) target bundleno = 7681 (0x1e01), region = 68 }
   0xd   : > { %p453_p3 = scmp.lt.s32.totalorder %s12807_s22, 1  ;;  %p9913_p4 = scmp.ne.s32.totalorder %s12807_s22, 0 }
   0xe   : > { %v11886_v0 = vld [vmem:[%s17695_s3] sm:$0xff] (!%p9913_p4)   ;;  %v11887_v1 = vld [vmem:[%s17695_s3 + $0x8] sm:$0xff] (!%p9913_p4)   ;;  %vm537_vm0 = vcmask (!%p9913_p4), 392192   ;;  %v11888_v5 = vld [vmem:[%s17695_s3 + $0x10] sm:$0xff] (!%p9913_p4)   ;;  %vm691_vm1 = vcmask (!%p9913_p4), 523264  }
   0xf   : > { %s454_s23 = scalar_select %p453_p3, %s12807_s22, 1 }
  0x10   : > { %481 = sbr.rel (%p9913_p4) target bundleno = 256 (0x100), region = 72  ;;  %11142 = vmatprep.subr.bf16.mxu0 (!%p9913_p4), %v11886_v0  ;;  %11784 = vmatprep.subr.bf16.mxu1 (!%p9913_p4), %v11886_v0  ;;  %v482_v2 = vld [vmem:[%s17692_s0] sm:$0xff] (!%p9913_p4)  ;;  %v483_v3 = vld [vmem:[%s17692_s0 + $0x8] sm:$0xff] (!%p9913_p4)  ;;  %v484_v9 = vld [vmem:[%s17692_s0 + $0x10] sm:$0xff] (!%p9913_p4) }
  0x11   : > { %s10306_s24 = sshll.u32 %s454_s23, 7  ;;  %s10307_s25 = sshll.u32 %s454_s23, 4  ;;  %11143 = vmatpush3.bf16.msra.mxu0 (!%p9913_p4), %v11886_v0  ;;  %11787 = vmatpush3.bf16.msra.mxu1 (!%p9913_p4), %v11886_v0  ;;  %v490_v4 = vld [vmem:[%s17692_s0 + $0x40] sm:$0xff] (!%p9913_p4)  ;;  %v498_v6 = vpack.c.bf16 (!%p9913_p4), %v483_v3, %v482_v2  ;;  %v491_v7 = vld [vmem:[%s17692_s0 + $0x48] sm:$0xff] (!%p9913_p4)  ;;  %v485_v10 = vld [vmem:[%s17692_s0 + $0x18] sm:$0xff] (!%p9913_p4) }
  0x12   : > { %s12816_s28 = scalar_lea.vmem %s17697_s5, %s10306_s24  ;;  %s12821_s13 = scalar_lea.vmem %s17698_s6, %s10307_s25  ;;  %11144 = vmatprep.subr.bf16.mxu0 (!%p9913_p4), %v11887_v1  ;;  %11785 = vmatprep.subr.bf16.mxu1 (!%p9913_p4), %v11887_v1  ;;  %v502_v8 = vpack.c.bf16 (!%p9913_p4), %v491_v7, %v490_v4  ;;  %v492_v11 = vld [vmem:[%s17692_s0 + $0x50] sm:$0xff] (!%p9913_p4)  ;;  %v493_v12 = vld [vmem:[%s17692_s0 + $0x58] sm:$0xff] (!%p9913_p4)  ;;  %v486_v13 = vld [vmem:[%s17692_s0 + $0x20] sm:$0xff] (!%p9913_p4)  ;;  %v499_v17 = vpack.c.bf16 (!%p9913_p4), %v485_v10, %v484_v9 }
  0x13   : > { %s10308_s14 = sshll.u32 %s454_s23, 9  ;;  %s12826_s17 = scalar_lea.vmem %s17700_s8, %s10307_s25  ;;  %11148 = vmatprep.mubr.msk.bf16.mxu0 (!%p9913_p4), %vm537_vm0, %v498_v6  ;;  %v487_v14 = vld [vmem:[%s17692_s0 + $0x28] sm:$0xff] (!%p9913_p4)  ;;  %v494_v15 = vld [vmem:[%s17692_s0 + $0x60] sm:$0xff] (!%p9913_p4)  ;;  %v503_v18 = vpack.c.bf16 (!%p9913_p4), %v493_v12, %v492_v11  ;;  %v488_v21 = vld [vmem:[%s17692_s0 + $0x30] sm:$0xff] (!%p9913_p4) }
  0x14   : > { %s12831_s20 = scalar_lea.vmem %s17699_s7, %s10308_s14  ;;  %s10309_s21 = sshll.u32 %s454_s23, 10  ;;  %v495_v16 = vld [vmem:[%s17692_s0 + $0x68] sm:$0xff] (!%p9913_p4)  ;;  %11156 = vmatprep.mubr.msk.bf16.mxu1 (!%p9913_p4), %vm537_vm0, %v502_v8  ;;  %v500_v19 = vpack.c.bf16 (!%p9913_p4), %v487_v14, %v486_v13  ;;  %v489_v22 = vld [vmem:[%s17692_s0 + $0x38] sm:$0xff] (!%p9913_p4)  ;;  %v496_v23 = vld [vmem:[%s17692_s0 + $0x70] sm:$0xff] (!%p9913_p4) }
  0x15   : > { %s12836_s27 = scalar_lea.vmem %s17701_s9, %s10309_s21  ;;  %11145 = vmatpush3.bf16.msra.mxu0 (!%p9913_p4), %v11887_v1  ;;  %11788 = vmatpush3.bf16.msra.mxu1 (!%p9913_p4), %v11887_v1  ;;  %v504_v20 = vpack.c.bf16 (!%p9913_p4), %v495_v16, %v494_v15  ;;  %v497_v24 = vld [vmem:[%s17692_s0 + $0x78] sm:$0xff] (!%p9913_p4)  ;;  %v501_v25 = vpack.c.bf16 (!%p9913_p4), %v489_v22, %v488_v21  ;;  %v12907_v27 = vld [vmem:[%s17696_s4] ss:$0 sm:$0xff] (!%p9913_p4)  ;;  %v661_v29 = vld [vmem:[%s17693_s1 + $0x10] sm:$0xff] (!%p9913_p4) }
  0x16   : > { %11146 = vmatprep.subr.bf16.mxu0 (!%p9913_p4), %v11888_v5  ;;  %11786 = vmatprep.subr.bf16.mxu1 (!%p9913_p4), %v11888_v5  ;;  %v505_v26 = vpack.c.bf16 (!%p9913_p4), %v497_v24, %v496_v23  ;;  %v669_v31 = vld [vmem:[%s17693_s1 + $0x50] sm:$0xff] (!%p9913_p4)  ;;  %v659_v35 = vld [vmem:[%s17693_s1] sm:$0xff] (!%p9913_p4)  ;;  %v662_v41 = vld [vmem:[%s17693_s1 + $0x18] sm:$0xff] (!%p9913_p4) }
  0x17   : > { %v667_v37 = vld [vmem:[%s17693_s1 + $0x40] sm:$0xff]  ;;  %v670_v43 = vld [vmem:[%s17693_s1 + $0x58] sm:$0xff]  ;;  %v660_v49 = vld [vmem:[%s17693_s1 + $0x8] sm:$0xff] }
  0x18   : > { %v668_v51 = vld [vmem:[%s17693_s1 + $0x48] sm:$0xff]  ;;  %v665_v61 = vld [vmem:[%s17693_s1 + $0x30] sm:$0xff]  ;;  %v663_v3 = vld [vmem:[%s17693_s1 + $0x20] sm:$0xff] }
  0x19   : > { %11147 = vmatpush3.bf16.msra.mxu0 %v11888_v5  ;;  %11789 = vmatpush3.bf16.msra.mxu1 %v11888_v5  ;;  %v673_v63 = vld [vmem:[%s17693_s1 + $0x70] sm:$0xff]  ;;  %v671_v5 = vld [vmem:[%s17693_s1 + $0x60] sm:$0xff]  ;;  %v666_v9 = vld [vmem:[%s17693_s1 + $0x38] sm:$0xff] }
  0x1a   : > { %v674_v11 = vld [vmem:[%s17693_s1 + $0x78] sm:$0xff] }
  0x1c   : > { %11149 = vmatmul.mubr.msk.bf16.vlgmr.msra.gmra.mrb[0].mxu0 %vm537_vm0, %v499_v17  ;;  %11157 = vmatmul.mubr.msk.bf16.vlgmr.msra.gmra.mrb[0].mxu1 %vm537_vm0, %v503_v18  ;;  %v664_v17 = vld [vmem:[%s17693_s1 + $0x28] sm:$0xff] }
  0x1d   : > { %11152 = vmatprep.mubr.msk.bf16.mxu0 %vm537_vm0, %v500_v19  ;;  %11160 = vmatprep.mubr.msk.bf16.mxu1 %vm537_vm0, %v504_v20  ;;  %v672_v19 = vld [vmem:[%s17693_s1 + $0x68] sm:$0xff] }
  0x24   : > { %11153 = vmatmul.mubr.msk.bf16.gmra.mrb[4].mxu0 %vm537_vm0, %v501_v25  ;;  %11161 = vmatmul.mubr.msk.bf16.gmra.mrb[4].mxu1 %vm537_vm0, %v505_v26 }
  0xef   : > { %v11150_v28 = vpop.f32.mrb[0].mxu0  ;;  %v11158_v30 = vpop.f32.mrb[0].mxu1 }
  0xf0   : > { %v605_v32 = vadd.f32 %v11150_v28, %v12907_v27  ;;  %v637_v33 = vadd.f32 %v11158_v30, %v12907_v27  ;;  %v596_v34 = vpop.f32.mrb[1].mxu0  ;;  %v628_v36 = vpop.f32.mrb[1].mxu1 }
  0xf1   : > { %v597_v38 = vadd.f32 %v12907_v27, %v596_v34  ;;  %v629_v39 = vadd.f32 %v12907_v27, %v628_v36  ;;  %v11151_v40 = vpop.f32.mrb[2].mxu0  ;;  %v11159_v42 = vpop.f32.mrb[2].mxu1 }
  0xf2   : > { %v677_v44 = vadd.f32 %v661_v29, %v605_v32  ;;  %v685_v45 = vadd.f32 %v669_v31, %v637_v33  ;;  %v608_v46 = vadd.f32 %v11151_v40, %v12907_v27  ;;  %v640_v47 = vadd.f32 %v11159_v42, %v12907_v27  ;;  %v599_v48 = vpop.f32.mrb[3].mxu0  ;;  %v631_v50 = vpop.f32.mrb[3].mxu1 }
  0xf3   : > { %v675_v52 = vadd.f32 %v659_v35, %v597_v38  ;;  %v683_v53 = vadd.f32 %v667_v37, %v629_v39  ;;  %v600_v54 = vadd.f32 %v12907_v27, %v599_v48  ;;  %v632_v55 = vadd.f32 %v12907_v27, %v631_v50 }
  0xf4   : > { %694 = vst.msk [vmem:[#allocation2 + $0x10] sm:$0xff] %vm691_vm1, %v677_v44  ;;  %702 = vst.msk [vmem:[#allocation2 + $0x50] sm:$0xff] %vm691_vm1, %v685_v45  ;;  %v678_v56 = vadd.f32 %v662_v41, %v608_v46  ;;  %v686_v57 = vadd.f32 %v670_v43, %v640_v47 }
  0xf5   : > { %692 = vst.msk [vmem:[#allocation2] sm:$0xff] %vm691_vm1, %v675_v52  ;;  %700 = vst.msk [vmem:[#allocation2 + $0x40] sm:$0xff] %vm691_vm1, %v683_v53  ;;  %v676_v58 = vadd.f32 %v660_v49, %v600_v54  ;;  %v684_v59 = vadd.f32 %v668_v51, %v632_v55 }
  0xf6   : > { %695 = vst.msk [vmem:[#allocation2 + $0x18] sm:$0xff] %vm691_vm1, %v678_v56  ;;  %703 = vst.msk [vmem:[#allocation2 + $0x58] sm:$0xff] %vm691_vm1, %v686_v57 }
  0xf7   : > { %693 = vst.msk [vmem:[#allocation2 + $0x8] sm:$0xff] %vm691_vm1, %v676_v58  ;;  %701 = vst.msk [vmem:[#allocation2 + $0x48] sm:$0xff] %vm691_vm1, %v684_v59  ;;  %v11154_v60 = vpop.f32.mrb[4].mxu0  ;;  %v11162_v62 = vpop.f32.mrb[4].mxu1 }
  0xf8   : > { %v621_v0 = vadd.f32 %v11154_v60, %v12907_v27  ;;  %v653_v1 = vadd.f32 %v11162_v62, %v12907_v27  ;;  %v612_v2 = vpop.f32.mrb[5].mxu0  ;;  %v644_v4 = vpop.f32.mrb[5].mxu1 }
  0xf9   : > { %v613_v6 = vadd.f32 %v12907_v27, %v612_v2  ;;  %v645_v7 = vadd.f32 %v12907_v27, %v644_v4  ;;  %v11155_v8 = vpop.f32.mrb[6].mxu0  ;;  %v11163_v10 = vpop.f32.mrb[6].mxu1 }
  0xfa   : > { %v681_v12 = vadd.f32 %v665_v61, %v621_v0  ;;  %v689_v13 = vadd.f32 %v673_v63, %v653_v1  ;;  %v624_v14 = vadd.f32 %v11155_v8, %v12907_v27  ;;  %v656_v15 = vadd.f32 %v11163_v10, %v12907_v27  ;;  %v615_v16 = vpop.f32.mrb[7].mxu0  ;;  %v647_v18 = vpop.f32.mrb[7].mxu1 }
  0xfb   : > { %v679_v20 = vadd.f32 %v663_v3, %v613_v6  ;;  %v687_v21 = vadd.f32 %v671_v5, %v645_v7  ;;  %v616_v22 = vadd.f32 %v12907_v27, %v615_v16  ;;  %v648_v23 = vadd.f32 %v12907_v27, %v647_v18 }
  0xfc   : > { %698 = vst.msk [vmem:[#allocation2 + $0x30] sm:$0xff] %vm691_vm1, %v681_v12  ;;  %706 = vst.msk [vmem:[#allocation2 + $0x70] sm:$0xff] %vm691_vm1, %v689_v13  ;;  %v682_v24 = vadd.f32 %v666_v9, %v624_v14  ;;  %v690_v25 = vadd.f32 %v674_v11, %v656_v15 }
  0xfd   : > { %696 = vst.msk [vmem:[#allocation2 + $0x20] sm:$0xff] %vm691_vm1, %v679_v20  ;;  %704 = vst.msk [vmem:[#allocation2 + $0x60] sm:$0xff] %vm691_vm1, %v687_v21  ;;  %v680_v26 = vadd.f32 %v664_v17, %v616_v22  ;;  %v688_v28 = vadd.f32 %v672_v19, %v648_v23 }
  0xfe   : > { %699 = vst.msk [vmem:[#allocation2 + $0x38] sm:$0xff] %vm691_vm1, %v682_v24  ;;  %707 = vst.msk [vmem:[#allocation2 + $0x78] sm:$0xff] %vm691_vm1, %v690_v25 }
  0xff   : > { %697 = vst.msk [vmem:[#allocation2 + $0x28] sm:$0xff] %vm691_vm1, %v680_v26  ;;  %705 = vst.msk [vmem:[#allocation2 + $0x68] sm:$0xff] %vm691_vm1, %v688_v28 }
 0x100 PF: > { %v11889_v27 = vld [vmem:[%s12816_s28 + $0x20] sm:$0xff]   ;;  %v11890_v29 = vld [vmem:[%s12816_s28 + $0x28] sm:$0xff]   ;;  %v11891_v30 = vld [vmem:[%s12816_s28 + $0x30] sm:$0xff]   ;;  %vm1116_vm2 = vcmask 523264   ;;  %v1088_v0 = vlaneseq  ;;  %vm1544_vm3 = vcmask 64512   ;;  %s12718_s29 = smov 120  }
 0x101   : > { %11188 = vmatprep.subr.bf16.mxu1 %v11889_v27  ;;  %v1064_v31 = vld [vmem:[#allocation2] sm:$0xff]  ;;  %v1065_v32 = vld [vmem:[#allocation2 + $0x8] sm:$0xff]  ;;  %v11892_v34 = vld [vmem:[%s12816_s28 + $0x38] sm:$0xff]   ;;  %s12719_s24 = smov 112   ;;  %s12727_s30 = smov 24   ;;  %vm2493_vm4 = vcmask 130112  }
 0x102   : > { %11189 = vmatpush3.bf16.msra.mxu1 %v11889_v27  ;;  %v12992_v33 = vpack.c.bf16 %v1065_v32, %v1064_v31  ;;  %v11893_v35 = vld [vmem:[%s12816_s28] sm:$0xff]   ;;  %v11894_v36 = vld [vmem:[%s12816_s28 + $0x8] sm:$0xff]   ;;  %v1066_v37 = vld [vmem:[#allocation2 + $0x10] sm:$0xff]  ;;  %v13030_v1 = vshrl.u32 %v1088_v0, 7  ;;  %s12728_s25 = smov 32   ;;  %s12729_s15 = smov 40  }
 0x103   : > { %11190 = vmatprep.subr.bf16.mxu1 %v11890_v29  ;;  %v1067_v38 = vld [vmem:[#allocation2 + $0x18] sm:$0xff]  ;;  %11164 = vmatprep.subr.bf16.mxu0 %v11893_v35  ;;  %v11895_v41 = vld [vmem:[%s12816_s28 + $0x10] sm:$0xff]   ;;  %v1072_v47 = vld [vmem:[#allocation2 + $0x40] sm:$0xff]  ;;  %s12730_s23 = smov 48   ;;  %vm3024_vm5 = vcmask 195712   ;;  %vm3555_vm6 = vcmask 261312  }
 0x104   : > { %11196 = vmatprep.mubr.msk.bf16.mxu1 %vm1116_vm2, %v12992_v33  ;;  %11172 = vmatprep.mubr.msk.bf16.mxu0 %vm1116_vm2, %v12992_v33  ;;  %v1068_v39 = vld [vmem:[#allocation2 + $0x20] sm:$0xff]  ;;  %v1081_v42 = vpack.c.bf16 %v1067_v38, %v1066_v37  ;;  %v11896_v44 = vld [vmem:[%s12816_s28 + $0x18] sm:$0xff]   ;;  %v1070_v45 = vld [vmem:[#allocation2 + $0x30] sm:$0xff]  ;;  %17769 = vst [vmem:[#allocation8_spill] sm:$0xff] %v13030_v1  ;;  %v13033_v2 = vsub.s32 1, %v13030_v1  ;;  %v13043_v7 = vsub.s32 0, %v13030_v1 }
 0x105   : > { %11165 = vmatpush3.bf16.msra.mxu0 %v11893_v35  ;;  %v1071_v46 = vld [vmem:[#allocation2 + $0x38] sm:$0xff]  ;;  %v1073_v48 = vld [vmem:[#allocation2 + $0x48] sm:$0xff]  ;;  %v11897_v49 = vld [vmem:[%s12816_s28 + $0x40] sm:$0xff]   ;;  %vm4086_vm7 = vcmask 326912   ;;  %vm4617_vm8 = vcmask 392512   ;;  %vm5148_vm9 = vcmask 458112  }
 0x106   : > { %11191 = vmatpush3.bf16.msra.mxu1 %v11890_v29  ;;  %v1069_v40 = vld [vmem:[#allocation2 + $0x28] sm:$0xff]  ;;  %11166 = vmatprep.subr.bf16.mxu0 %v11894_v36  ;;  %v1083_v50 = vpack.c.bf16 %v1071_v46, %v1070_v45  ;;  %v1084_v51 = vpack.c.bf16 %v1073_v48, %v1072_v47  ;;  %v1074_v53 = vld [vmem:[#allocation2 + $0x50] sm:$0xff]  ;;  %v1075_v54 = vld [vmem:[#allocation2 + $0x58] sm:$0xff]  ;;  %17770 = vst [vmem:[#allocation9_spill] sm:$0xff] %v13033_v2  ;;  %s12731_s14 = smov 56   ;;  %vm5679_vm10 = vcmask 523712  }
 0x107   : > { %11192 = vmatprep.subr.bf16.mxu1 %v11891_v30  ;;  %v1082_v43 = vpack.c.bf16 %v1069_v40, %v1068_v39  ;;  %v11898_v52 = vld [vmem:[%s12816_s28 + $0x48] sm:$0xff]   ;;  %v1076_v55 = vld [vmem:[#allocation2 + $0x60] sm:$0xff]  ;;  %v11899_v57 = vld [vmem:[%s12816_s28 + $0x50] sm:$0xff]   ;;  %v1085_v58 = vpack.c.bf16 %v1075_v54, %v1074_v53  ;;  %17771 = vst [vmem:[#allocation10_spill] sm:$0xff] %v13043_v7  ;;  %p10295_p5 = scmp.ne.s32.totalorder %s12807_s22, 1 }
 0x108   : > { %v1077_v56 = vld [vmem:[#allocation2 + $0x68] sm:$0xff]  ;;  %v11900_v60 = vld [vmem:[%s12816_s28 + $0x58] sm:$0xff]   ;;  %v1078_v61 = vld [vmem:[#allocation2 + $0x70] sm:$0xff]  ;;  %vm12734_vm11 = vmmov (!%p10295_p5), 0   ;;  %vm9804_vm12 = vcmask (!%p10295_p5), 80896  }
 0x109   : > { %11167 = vmatpush3.bf16.msra.mxu0 %v11894_v36  ;;  %v1086_v59 = vpack.c.bf16 %v1077_v56, %v1076_v55  ;;  %v1079_v62 = vld [vmem:[#allocation2 + $0x78] sm:$0xff]  ;;  %v13036_v3 = vld [vmem:[%s12821_s13] sm:$0xff] }
 0x10a   : > { %11193 = vmatpush3.bf16.msra.mxu1 %v11891_v30  ;;  %11168 = vmatprep.subr.bf16.mxu0 %v11895_v41  ;;  %v1087_v63 = vpack.c.bf16 %v1079_v62, %v1078_v61  ;;  %v13040_v4 = vrot.slane %v13036_v3, %v13033_v2  ;;  %v13053_v15 = vrot.slane %v13036_v3, %v13043_v7 }
 0x10b   : > { %11194 = vmatprep.subr.bf16.mxu1 %v11892_v34 }
 0x10d   : > { %11169 = vmatpush3.bf16.msra.mxu0 %v11895_v41 }
 0x10e   : > { %11195 = vmatpush3.bf16.msra.mxu1 %v11892_v34  ;;  %11170 = vmatprep.subr.bf16.mxu0 %v11896_v44 }
 0x111   : > { %11197 = vmatmul.mubr.msk.bf16.vlgmr.msra.gmra.mrb[0].mxu1 %vm1116_vm2, %v1081_v42  ;;  %11171 = vmatpush3.bf16.msra.mxu0 %v11896_v44 }
 0x112   : > { %11200 = vmatprep.mubr.msk.bf16.mxu1 %vm1116_vm2, %v1082_v43  ;;  %11212 = vmatprep.subr.bf16.mxu0 %v11897_v49 }
 0x114   : > { %11173 = vmatmul.mubr.msk.bf16.vlgmr.msra.gmra.mrb[0].mxu0 %vm1116_vm2, %v1081_v42 }
 0x115   : > { %11176 = vmatprep.mubr.msk.bf16.mxu0 %vm1116_vm2, %v1082_v43  ;;  %11213 = vmatpush3.bf16.msra.mxu0 %v11897_v49 }
 0x116   : > { %11214 = vmatprep.subr.bf16.mxu0 %v11898_v52 }
 0x119   : > { %11201 = vmatmul.mubr.msk.bf16.gmra.mrb[4].mxu1 %vm1116_vm2, %v1083_v50  ;;  %11215 = vmatpush3.bf16.msra.mxu0 %v11898_v52 }
 0x11a   : > { %11204 = vmatprep.mubr.msk.bf16.mxu1 %vm1116_vm2, %v1084_v51  ;;  %11216 = vmatprep.subr.bf16.mxu0 %v11899_v57 }
 0x11c   : > { %11177 = vmatmul.mubr.msk.bf16.gmra.mrb[4].mxu0 %vm1116_vm2, %v1083_v50 }
 0x11d   : > { %11180 = vmatprep.mubr.msk.bf16.mxu0 %vm1116_vm2, %v1084_v51  ;;  %11217 = vmatpush3.bf16.msra.mxu0 %v11899_v57 }
 0x11e   : > { %11218 = vmatprep.subr.bf16.mxu0 %v11900_v60 }
 0x121   : > { %11205 = vmatmul.mubr.msk.bf16.gmra.mrb[8].mxu1 %vm1116_vm2, %v1085_v58  ;;  %11219 = vmatpush3.bf16.msra.mxu0 %v11900_v60 }
 0x122   : > { %11208 = vmatprep.mubr.msk.bf16.mxu1 %vm1116_vm2, %v1086_v59 }
 0x124   : > { %11181 = vmatmul.mubr.msk.bf16.gmra.mrb[8].mxu0 %vm1116_vm2, %v1085_v58 }
 0x125   : > { %11184 = vmatprep.mubr.msk.bf16.mxu0 %vm1116_vm2, %v1086_v59 }
 0x129   : > { %11209 = vmatmul.mubr.msk.bf16.gmra.mrb[12].mxu1 %vm1116_vm2, %v1087_v63 }
 0x12c   : > { %11185 = vmatmul.mubr.msk.bf16.gmra.mrb[12].mxu0 %vm1116_vm2, %v1087_v63 }
 0x12d   : > { %11220 = vmatprep.mubr.msk.bf16.mxu0 %vm1116_vm2, %v12992_v33 }
 0x134   : > { %11221 = vmatmul.mubr.msk.bf16.vlgmr.msra.gmra.mrb[16].mxu0 %vm1116_vm2, %v1081_v42 }
 0x135   : > { %11224 = vmatprep.mubr.msk.bf16.mxu0 %vm1116_vm2, %v1082_v43 }
 0x13c   : > { %11225 = vmatmul.mubr.msk.bf16.gmra.mrb[20].mxu0 %vm1116_vm2, %v1083_v50 }
 0x13d   : > { %11228 = vmatprep.mubr.msk.bf16.mxu0 %vm1116_vm2, %v1084_v51 }
 0x144   : > { %11229 = vmatmul.mubr.msk.bf16.gmra.mrb[24].mxu0 %vm1116_vm2, %v1085_v58 }
 0x145   : > { %11232 = vmatprep.mubr.msk.bf16.mxu0 %vm1116_vm2, %v1086_v59 }
 0x14c   : > { %11233 = vmatmul.mubr.msk.bf16.gmra.mrb[28].mxu0 %vm1116_vm2, %v1087_v63 }
 0x1e4   : > { %v11198_v5 = vpop.f32.mrb[0].mxu1 }
 0x1e5   : > { %v1316_v6 = vpop.f32.mrb[1].mxu1  ;;  %v1325_v9 = vadd.f32 %v11198_v5, %v13040_v4 }
 0x1e6   : > { %v11199_v8 = vpop.f32.mrb[2].mxu1  ;;  %v1317_v12 = vadd.f32 %v1316_v6, %v13040_v4 }
 0x1e7   : > { %v1328_v10 = vadd.f32 %v11199_v8, %v13040_v4  ;;  %v1319_v11 = vpop.f32.mrb[3].mxu1  ;;  %v11174_v19 = vpop.f32.mrb[0].mxu0 }
 0x1e8   : > { %v1320_v13 = vadd.f32 %v1319_v11, %v13040_v4  ;;  %v1184_v22 = vadd.f32 %v11174_v19, %v13053_v15  ;;  %v1175_v23 = vpop.f32.mrb[1].mxu0 }
 0x1e9   : > { %v13049_v14 = vpack.c.bf16 %v1328_v10, %v1325_v9  ;;  %v1176_v26 = vadd.f32 %v1175_v23, %v13053_v15  ;;  %v11175_v28 = vpop.f32.mrb[2].mxu0 }
 0x1ea   : > { %v13055_v16 = vpack.c.bf16 %v1320_v13, %v1317_v12  ;;  %v1240_v30 = vmul.f32 0.35355338, %v1184_v22  ;;  %v1187_v31 = vadd.f32 %v11175_v28, %v13053_v15  ;;  %v1178_v32 = vpop.f32.mrb[3].mxu0 }
 0x1eb   : > { %1989 = vrot.lane.b32.xlu1 %v13049_v14, %s12718_s29  ;;  %v1238_v34 = vmul.f32 0.35355338, %v1176_v26  ;;  %v1179_v35 = vadd.f32 %v1178_v32, %v13053_v15  ;;  %v1573_v41 = vsel %vm1544_vm3, %v13049_v14, 0 }
 0x1ec   : > { %1987 = vrot.lane.b32.xlu0 %v13055_v16, %s12718_s29  ;;  %11790 = vmatprep.subr.msk.bf16.mxu1 %vm1544_vm3, %v13055_v16  ;;  %v1570_v17 = vsel %vm1544_vm3, %v13055_v16, 0  ;;  %v11202_v18 = vpop.f32.mrb[4].mxu1  ;;  %v1241_v37 = vmul.f32 0.35355338, %v1187_v31 }
 0x1ed   : > { %11237 = vmatpush3.bf16.xpose.msra.mxu1 %v1570_v17  ;;  %v1341_v20 = vadd.f32 %v11202_v18, %v13040_v4  ;;  %v1332_v21 = vpop.f32.mrb[5].mxu1  ;;  %v1239_v39 = vmul.f32 0.35355338, %v1179_v35 }
 0x1ee   : > { %11791 = vmatprep.subr.msk.bf16.mxu1 %vm1544_vm3, %v13049_v14  ;;  %v1333_v24 = vadd.f32 %v1332_v21, %v13040_v4  ;;  %v11203_v25 = vpop.f32.mrb[6].mxu1  ;;  %v13079_v40 = vpack.c.bf16 %v1241_v37, %v1240_v30 }
 0x1ef   : > { %v1344_v27 = vadd.f32 %v11203_v25, %v13040_v4  ;;  %v1335_v29 = vpop.f32.mrb[7].mxu1  ;;  %v13083_v43 = vpack.c.bf16 %v1239_v39, %v1238_v34  ;;  %v11178_v44 = vpop.f32.mrb[4].mxu0 }
 0x1f0   : > { %v1336_v33 = vadd.f32 %v1335_v29, %v13040_v4  ;;  %v1200_v47 = vadd.f32 %v11178_v44, %v13053_v15  ;;  %v1191_v48 = vpop.f32.mrb[5].mxu0 }
 0x1f1   : > { %v13075_v36 = vpack.c.bf16 %v1344_v27, %v1341_v20  ;;  %11252 = vmatprep.mubr.msk.bf16.mxu1 %vm1544_vm3, %v13083_v43  ;;  %v1192_v51 = vadd.f32 %v1191_v48, %v13053_v15  ;;  %v11179_v52 = vpop.f32.mrb[6].mxu0 }
 0x1f2   : > { %v13077_v38 = vpack.c.bf16 %v1336_v33, %v1333_v24  ;;  %v1244_v55 = vmul.f32 0.35355338, %v1200_v47  ;;  %v1203_v56 = vadd.f32 %v11179_v52, %v13053_v15  ;;  %v1194_v57 = vpop.f32.mrb[7].mxu0 }
 0x1f3   : > { %17772 = vst [vmem:[#allocation11_spill] sm:$0xff] %v13075_v36  ;;  %v1242_v59 = vmul.f32 0.35355338, %v1192_v51  ;;  %v1195_v60 = vadd.f32 %v1194_v57, %v13053_v15  ;;  %v1579_v35 = vsel %vm1544_vm3, %v13075_v36, 0 }
 0x1f4   : > { %17773 = vst [vmem:[#allocation12_spill] sm:$0xff] %v13077_v38  ;;  %v11206_v42 = vpop.f32.mrb[8].mxu1  ;;  %v1245_v62 = vmul.f32 0.35355338, %v1203_v56  ;;  %v1576_v6 = vsel %vm1544_vm3, %v13077_v38, 0 }
 0x1f5   : > { %11239 = vmatpush3.bf16.xpose.msra.mxu1 %v1573_v41  ;;  %v1357_v45 = vadd.f32 %v11206_v42, %v13040_v4  ;;  %v1348_v46 = vpop.f32.mrb[9].mxu1  ;;  %v1243_v0 = vmul.f32 0.35355338, %v1195_v60 }
 0x1f6   : > { %11792 = vmatprep.subr.msk.bf16.mxu1 %vm1544_vm3, %v13077_v38  ;;  %v1349_v49 = vadd.f32 %v1348_v46, %v13040_v4  ;;  %v11207_v50 = vpop.f32.mrb[10].mxu1  ;;  %v13101_v5 = vpack.c.bf16 %v1245_v62, %v1244_v55 }
 0x1f7   : > { %v1360_v53 = vadd.f32 %v11207_v50, %v13040_v4  ;;  %v1351_v54 = vpop.f32.mrb[11].mxu1  ;;  %v13105_v9 = vpack.c.bf16 %v1243_v0, %v1242_v59  ;;  %v11182_v10 = vpop.f32.mrb[8].mxu0 }
 0x1f8   : > { %v1352_v58 = vadd.f32 %v1351_v54, %v13040_v4  ;;  %v1216_v13 = vadd.f32 %v11182_v10, %v13053_v15  ;;  %v1207_v17 = vpop.f32.mrb[9].mxu0 }
 0x1f9   : > { %v13097_v61 = vpack.c.bf16 %v1360_v53, %v1357_v45  ;;  %v1208_v20 = vadd.f32 %v1207_v17, %v13053_v15  ;;  %v11183_v21 = vpop.f32.mrb[10].mxu0  ;;  %v13132_v45 = vsub.s32 2, %v13030_v1 }
 0x1fa   : > { %v13099_v63 = vpack.c.bf16 %v1352_v58, %v1349_v49  ;;  %v1248_v24 = vmul.f32 0.35355338, %v1216_v13  ;;  %v1219_v25 = vadd.f32 %v11183_v21, %v13053_v15  ;;  %v1210_v26 = vpop.f32.mrb[11].mxu0 }
 0x1fb   : > { %17774 = vst [vmem:[#allocation13_spill] sm:$0xff] %v13097_v61  ;;  %v1246_v27 = vmul.f32 0.35355338, %v1208_v20  ;;  %v1211_v29 = vadd.f32 %v1210_v26, %v13053_v15  ;;  %17776 = vst [vmem:[#allocation15_spill] sm:$0xff] %v13132_v45  ;;  %v1382_v53 = vrot.slane %v13036_v3, %v13132_v45  ;;  %v1585_v10 = vsel %vm1544_vm3, %v13097_v61, 0 }
 0x1fc   : > { %17775 = vst [vmem:[#allocation14_spill] sm:$0xff] %v13099_v63  ;;  %v11210_v8 = vpop.f32.mrb[12].mxu1  ;;  %v1249_v31 = vmul.f32 0.35355338, %v1219_v25  ;;  %v1582_v55 = vsel %vm1544_vm3, %v13099_v63, 0 }
 0x1fd   : > { %11241 = vmatpush3.bf16.xpose.msra.mxu1 %v1576_v6  ;;  %v1373_v11 = vadd.f32 %v11210_v8, %v13040_v4  ;;  %v1364_v12 = vpop.f32.mrb[13].mxu1  ;;  %v1247_v33 = vmul.f32 0.35355338, %v1211_v29 }
 0x1fe   : > { %11793 = vmatprep.subr.msk.bf16.mxu1 %vm1544_vm3, %v13075_v36  ;;  %v1365_v18 = vadd.f32 %v1364_v12, %v13040_v4  ;;  %v11211_v19 = vpop.f32.mrb[14].mxu1  ;;  %v13121_v34 = vpack.c.bf16 %v1249_v31, %v1248_v24 }
 0x1ff   : > { %v1376_v22 = vadd.f32 %v11211_v19, %v13040_v4  ;;  %v1367_v23 = vpop.f32.mrb[15].mxu1  ;;  %v13125_v37 = vpack.c.bf16 %v1247_v33, %v1246_v27  ;;  %v11186_v39 = vpop.f32.mrb[12].mxu0 }
 0x200   : > { %v1368_v28 = vadd.f32 %v1367_v23, %v13040_v4  ;;  %v1232_v4 = vadd.f32 %v11186_v39, %v13053_v15  ;;  %v1223_v41 = vpop.f32.mrb[13].mxu0 }
 0x201   : > { %v13117_v30 = vpack.c.bf16 %v1376_v22, %v1373_v11  ;;  %v1224_v42 = vadd.f32 %v1223_v41, %v13053_v15  ;;  %v11187_v44 = vpop.f32.mrb[14].mxu0 }
 0x202   : > { %v13119_v32 = vpack.c.bf16 %v1368_v28, %v1365_v18  ;;  %v1252_v46 = vmul.f32 0.35355338, %v1232_v4  ;;  %v1235_v47 = vadd.f32 %v11187_v44, %v13053_v15  ;;  %v1226_v48 = vpop.f32.mrb[15].mxu0 }
 0x203   : > { %v1250_v49 = vmul.f32 0.35355338, %v1224_v42  ;;  %v1227_v50 = vadd.f32 %v1226_v48, %v13053_v15  ;;  %v1591_v41 = vsel %vm1544_vm3, %v13117_v30, 0 }
 0x204   : > { %v1253_v51 = vmul.f32 0.35355338, %v1235_v47  ;;  %v1588_v24 = vsel %vm1544_vm3, %v13119_v32, 0 }
 0x205   : > { %11243 = vmatpush3.bf16.xpose.msra.mxu1 %v1579_v35  ;;  %v1251_v52 = vmul.f32 0.35355338, %v1227_v50 }
 0x206   : > { %11794 = vmatprep.subr.msk.bf16.mxu1 %vm1544_vm3, %v13099_v63  ;;  %v13138_v54 = vpack.c.bf16 %v1253_v51, %v1252_v46 }
 0x207   : > { %v13142_v56 = vpack.c.bf16 %v1251_v52, %v1250_v49  ;;  %v11222_v57 = vpop.f32.mrb[16].mxu0 }
 0x208   : > { %v1450_v58 = vadd.f32 %v11222_v57, %v1382_v53  ;;  %v1441_v59 = vpop.f32.mrb[17].mxu0  ;;  %v13209_v57 = vld [vmem:[%s17694_s2 + $0x10] sm:$0xff] }
 0x209   : > { %v1442_v15 = vadd.f32 %v1441_v59, %v1382_v53  ;;  %v11223_v60 = vpop.f32.mrb[18].mxu0 }
 0x20a   : > { %v1453_v62 = vadd.f32 %v11223_v60, %v1382_v53  ;;  %v1444_v0 = vpop.f32.mrb[19].mxu0 }
 0x20b   : > { %v1445_v6 = vadd.f32 %v1444_v0, %v1382_v53 }
 0x20c   : > { %v13146_v3 = vpack.c.bf16 %v1453_v62, %v1450_v58  ;;  %v13214_v58 = vld [vmem:[%s17694_s2] sm:$0xff] }
 0x20d   : > { %11245 = vmatpush3.bf16.xpose.msra.mxu1 %v1582_v55  ;;  %v13148_v8 = vpack.c.bf16 %v1445_v6, %v1442_v15  ;;  %v13225_v6 = vld [vmem:[%s17694_s2 + $0x18] sm:$0xff] }
 0x20e   : > { %11795 = vmatprep.subr.msk.bf16.mxu1 %vm1544_vm3, %v13097_v61 }
 0x20f   : > { %v11226_v11 = vpop.f32.mrb[20].mxu0  ;;  %11268 = vmatprep.subr.bf16.mxu0 %v13148_v8 }
 0x210   : > { %v1466_v12 = vadd.f32 %v11226_v11, %v1382_v53  ;;  %v1457_v13 = vpop.f32.mrb[21].mxu0  ;;  %11269 = vmatpush3.bf16.msra.mxu0 %v13148_v8  ;;  %v13231_v11 = vld [vmem:[%s17694_s2 + $0x8] sm:$0xff] }
 0x211   : > { %v1458_v17 = vadd.f32 %v1457_v13, %v1382_v53  ;;  %v11227_v18 = vpop.f32.mrb[22].mxu0  ;;  %11270 = vmatprep.subr.bf16.mxu0 %v13146_v3 }
 0x212   : > { %v1469_v19 = vadd.f32 %v11227_v18, %v1382_v53  ;;  %v1460_v20 = vpop.f32.mrb[23].mxu0 }
 0x213   : > { %v1461_v21 = vadd.f32 %v1460_v20, %v1382_v53 }
 0x214   : > { %v13157_v22 = vpack.c.bf16 %v1469_v19, %v1466_v12  ;;  %11271 = vmatpush3.bf16.msra.mxu0 %v13146_v3  ;;  %v13250_v19 = vld [vmem:[%s17694_s2 + $0x38] sm:$0xff] }
 0x215   : > { %11247 = vmatpush3.bf16.xpose.msra.mxu1 %v1585_v10  ;;  %v13160_v23 = vpack.c.bf16 %v1461_v21, %v1458_v17  ;;  %v13243_v17 = vld [vmem:[%s17694_s2 + $0x30] sm:$0xff] }
 0x216   : > { %11796 = vmatprep.subr.msk.bf16.mxu1 %vm1544_vm3, %v13119_v32 }
 0x217   : > { %v11230_v25 = vpop.f32.mrb[24].mxu0  ;;  %11272 = vmatprep.subr.bf16.mxu0 %v13160_v23 }
 0x218   : > { %v1482_v26 = vadd.f32 %v11230_v25, %v1382_v53  ;;  %v1473_v28 = vpop.f32.mrb[25].mxu0  ;;  %11273 = vmatpush3.bf16.msra.mxu0 %v13160_v23 }
 0x219   : > { %v1474_v27 = vadd.f32 %v1473_v28, %v1382_v53  ;;  %v11231_v29 = vpop.f32.mrb[26].mxu0  ;;  %11274 = vmatprep.subr.bf16.mxu0 %v13157_v22 }
 0x21a   : > { %v1485_v31 = vadd.f32 %v11231_v29, %v1382_v53  ;;  %v1476_v33 = vpop.f32.mrb[27].mxu0 }
 0x21b   : > { %v1477_v35 = vadd.f32 %v1476_v33, %v1382_v53  ;;  %v13279_v33 = vld [vmem:[%s17694_s2 + $0x50] sm:$0xff] }
 0x21c   : > { %v13169_v39 = vpack.c.bf16 %v1485_v31, %v1482_v26  ;;  %11275 = vmatpush3.bf16.msra.mxu0 %v13157_v22  ;;  %v13263_v26 = vld [vmem:[%s17694_s2 + $0x28] sm:$0xff]  ;;  %17782 = vst [vmem:[#allocation21_spill] sm:$0xff] %v13279_v33 }
 0x21d   : > { %11249 = vmatpush3.bf16.xpose.msra.mxu1 %v1588_v24  ;;  %v13172_v4 = vpack.c.bf16 %v1477_v35, %v1474_v27  ;;  %v13258_v24 = vld [vmem:[%s17694_s2 + $0x20] sm:$0xff] }
 0x21e   : > { %11797 = vmatprep.subr.msk.bf16.mxu1 %vm1544_vm3, %v13117_v30  ;;  %17777 = vst [vmem:[#allocation16_spill] sm:$0xff] %v13169_v39  ;;  %17781 = vst [vmem:[#allocation20_spill] sm:$0xff] %v13258_v24 }
 0x21f   : > { %17778 = vst [vmem:[#allocation17_spill] sm:$0xff] %v13172_v4  ;;  %v11234_v42 = vpop.f32.mrb[28].mxu0  ;;  %11276 = vmatprep.subr.bf16.mxu0 %v13172_v4 }
 0x220   : > { %v1498_v44 = vadd.f32 %v11234_v42, %v1382_v53  ;;  %v1489_v46 = vpop.f32.mrb[29].mxu0  ;;  %11277 = vmatpush3.bf16.msra.mxu0 %v13172_v4 }
 0x221   : > { %v1490_v47 = vadd.f32 %v1489_v46, %v1382_v53  ;;  %v11235_v48 = vpop.f32.mrb[30].mxu0  ;;  %11278 = vmatprep.subr.bf16.mxu0 %v13169_v39  ;;  %v13294_v46 = vld [vmem:[%s17694_s2 + $0x40] sm:$0xff] }
 0x222   : > { %v1501_v49 = vadd.f32 %v11235_v48, %v1382_v53  ;;  %v1492_v50 = vpop.f32.mrb[31].mxu0  ;;  %17784 = vst [vmem:[#allocation23_spill] sm:$0xff] %v13294_v46  ;;  %v13299_v48 = vld [vmem:[%s17694_s2 + $0x48] sm:$0xff] }
 0x223   : > { %v1493_v51 = vadd.f32 %v1492_v50, %v1382_v53  ;;  %17785 = vst [vmem:[#allocation24_spill] sm:$0xff] %v13299_v48 }
 0x224   : > { %v13179_v52 = vpack.c.bf16 %v1501_v49, %v1498_v44  ;;  %11279 = vmatpush3.bf16.msra.mxu0 %v13169_v39 }
 0x225   : > { %11251 = vmatpush3.bf16.xpose.msra.mxu1 %v1591_v41  ;;  %v13182_v55 = vpack.c.bf16 %v1493_v51, %v1490_v47  ;;  %v13285_v41 = vld [vmem:[%s17694_s2 + $0x58] sm:$0xff] }
 0x226   : > { %17779 = vst [vmem:[#allocation18_spill] sm:$0xff] %v13179_v52  ;;  %17783 = vst [vmem:[#allocation22_spill] sm:$0xff] %v13285_v41 }
 0x227   : > { %17780 = vst [vmem:[#allocation19_spill] sm:$0xff] %v13182_v55  ;;  %11280 = vmatprep.subr.bf16.mxu0 %v13182_v55 }
 0x228   : > { %11281 = vmatpush3.bf16.msra.mxu0 %v13182_v55 }
 0x229   : > { %11282 = vmatprep.subr.bf16.mxu0 %v13179_v52 }
 0x22c   : > { %11253 = vmatmul.mubr.msk.bf16.vlgmr.msra.gmra.mrb[16].mxu1 %vm1544_vm3, %v13079_v40  ;;  %11283 = vmatpush3.bf16.msra.mxu0 %v13179_v52 }
 0x22d   : > { %11256 = vmatprep.mubr.msk.bf16.mxu1 %vm1544_vm3, %v13105_v9 }
 0x234   : > { %11257 = vmatmul.mubr.msk.bf16.gmra.mrb[20].mxu1 %vm1544_vm3, %v13101_v5 }
 0x235   : > { %11260 = vmatprep.mubr.msk.bf16.mxu1 %vm1544_vm3, %v13125_v37 }
 0x23c   : > { %11261 = vmatmul.mubr.msk.bf16.gmra.mrb[24].mxu1 %vm1544_vm3, %v13121_v34 }
 0x23d   : > { %11264 = vmatprep.mubr.msk.bf16.mxu1 %vm1544_vm3, %v13142_v56 }
 0x244   : > { %11265 = vmatmul.mubr.msk.bf16.gmra.mrb[28].mxu1 %vm1544_vm3, %v13138_v54 }
 0x25e   : > { %v13202_v53 = vpop.permute.xlu0 %1987 }
 0x25f   : > { %11798 = vmatprep.subr.msk.bf16.mxu0 %vm1544_vm3, %v13202_v53 }
 0x2ff   : > { %v11254_v59 = vpop.f32.mrb[16].mxu1 }
 0x300   : > { %v1627_v15 = vpop.f32.mrb[17].mxu1  ;;  %v13217_v60 = vadd.f32 %v11254_v59, %v13209_v57 }
 0x301   : > { %v11255_v62 = vpop.f32.mrb[18].mxu1  ;;  %v13220_v0 = vadd.f32 %v1627_v15, %v13214_v58  ;;  %v13315_v15 = vld [vmem:[%s17694_s2 + $0x70] sm:$0xff] }
 0x302   : > { %1694 = vmax.xlane.f32.xlu1 %v13217_v60  ;;  %v1630_v10 = vpop.f32.mrb[19].mxu1  ;;  %v13235_v12 = vadd.f32 %v11255_v62, %v13225_v6  ;;  %17786 = vst [vmem:[#allocation25_spill] sm:$0xff] %v13315_v15 }
 0x303   : > { %1690 = vmax.xlane.f32.xlu0 %v13220_v0  ;;  %v13238_v13 = vadd.f32 %v1630_v10, %v13231_v11 }
 0x306   : > { %1696 = vmax.xlane.f32.xlu1 %v13235_v12 }
 0x307   : > { %v11258_v18 = vpop.f32.mrb[20].mxu1  ;;  %1692 = vmax.xlane.f32.xlu0 %v13238_v13 }
 0x308   : > { %v1643_v20 = vpop.f32.mrb[21].mxu1  ;;  %v13253_v21 = vadd.f32 %v11258_v18, %v13243_v17 }
 0x309   : > { %v11259_v25 = vpop.f32.mrb[22].mxu1  ;;  %v13270_v29 = vadd.f32 %v1643_v20, %v13258_v24  ;;  %v13325_v20 = vld [vmem:[%s17694_s2 + $0x60] sm:$0xff] }
 0x30a   : > { %v13266_v28 = vadd.f32 %v11259_v25, %v13250_v19  ;;  %v1646_v27 = vpop.f32.mrb[23].mxu1  ;;  %17787 = vst [vmem:[#allocation26_spill] sm:$0xff] %v13325_v20 }
 0x30b   : > { %1702 = vmax.xlane.f32.xlu0 %v13253_v21  ;;  %v13274_v31 = vadd.f32 %v1646_v27, %v13263_v26 }
 0x30c   : > { %1704 = vmax.xlane.f32.xlu1 %v13266_v28 }
 0x30f   : > { %v11262_v35 = vpop.f32.mrb[24].mxu1  ;;  %1698 = vmax.xlane.f32.xlu0 %v13270_v29 }
 0x310   : > { %v1659_v42 = vpop.f32.mrb[25].mxu1  ;;  %1700 = vmax.xlane.f32.xlu1 %v13274_v31  ;;  %v13289_v44 = vadd.f32 %v11262_v35, %v13279_v33 }
 0x311   : > { %v11263_v47 = vpop.f32.mrb[26].mxu1  ;;  %v13306_v51 = vadd.f32 %v1659_v42, %v13294_v46  ;;  %v13339_v42 = vld [vmem:[%s17694_s2 + $0x78] sm:$0xff] }
 0x312   : > { %v13302_v49 = vadd.f32 %v11263_v47, %v13285_v41  ;;  %v1662_v50 = vpop.f32.mrb[27].mxu1  ;;  %17788 = vst [vmem:[#allocation27_spill] sm:$0xff] %v13339_v42 }
 0x313   : > { %1710 = vmax.xlane.f32.xlu0 %v13289_v44  ;;  %v13310_v59 = vadd.f32 %v1662_v50, %v13299_v48  ;;  %v13347_v50 = vld [vmem:[%s17694_s2 + $0x68] sm:$0xff] }
 0x314   : > { %1712 = vmax.xlane.f32.xlu1 %v13302_v49  ;;  %17789 = vst [vmem:[#allocation28_spill] sm:$0xff] %v13347_v50 }
 0x317   : > { %1706 = vmax.xlane.f32.xlu0 %v13306_v51  ;;  %v11266_v62 = vpop.f32.mrb[28].mxu1 }
 0x318   : > { %1708 = vmax.xlane.f32.xlu1 %v13310_v59  ;;  %v13320_v10 = vadd.f32 %v11266_v62, %v13315_v15  ;;  %v1675_v18 = vpop.f32.mrb[29].mxu1 }
 0x319   : > { %v11267_v25 = vpop.f32.mrb[30].mxu1  ;;  %v13329_v35 = vadd.f32 %v1675_v18, %v13325_v20  ;;  %v13354_v18 = vpop.permute.xlu1 %1989 }
 0x31a   : > { %v1678_v27 = vpop.f32.mrb[31].mxu1  ;;  %v13342_v47 = vadd.f32 %v11267_v25, %v13339_v42 }
 0x31b   : > { %1718 = vmax.xlane.f32.xlu0 %v13320_v10  ;;  %v13351_v62 = vadd.f32 %v1678_v27, %v13347_v50 }
 0x31f   : > { %1714 = vmax.xlane.f32.xlu0 %v13329_v35 }
 0x329   : > { %1993 = vrot.lane.b32.xlu1 %v13075_v36, %s12718_s29 }
 0x335   : > { %1991 = vrot.lane.b32.xlu0 %v13077_v38, %s12718_s29 }
 0x34d   : > { %1720 = vmax.xlane.f32.xlu1 %v13342_v47 }
 0x351   : > { %1716 = vmax.xlane.f32.xlu1 %v13351_v62 }
 0x38f   : > { %v1695_v2 = vpop.xlane.xlu1 %1694 }
 0x390   : > { %v1724_v45 = vsub.f32 %v13217_v60, %v1695_v2  ;;  %v1691_v7 = vpop.xlane.xlu0 %1690 }
 0x391   : > { %v1722_v25 = vsub.f32 %v13220_v0, %v1691_v7 }
 0x392   : > { %v1742_v1 = vmul.f32 1.442695, %v1724_v45 }
 0x393   : > { %v1738_v42 = vmul.f32 1.442695, %v1722_v25  ;;  %v1697_v38 = vpop.xlane.xlu1 %1696 }
 0x394   : > { %12033 = vpow2.f32 %v1742_v1  ;;  %v1725_v36 = vsub.f32 %v13235_v12, %v1697_v38  ;;  %v1693_v20 = vpop.xlane.xlu0 %1692 }
 0x395   : > { %v1723_v27 = vsub.f32 %v13238_v13, %v1693_v20  ;;  %12035 = vpow2.f32 %v1738_v42 }
 0x396   : > { %v1744_v50 = vmul.f32 1.442695, %v1725_v36 }
 0x397   : > { %v1740_v15 = vmul.f32 1.442695, %v1723_v27 }
 0x398   : > { %12037 = vpow2.f32 %v1744_v50  ;;  %v1703_v36 = vpop.xlane.xlu0 %1702 }
 0x399   : > { %12039 = vpow2.f32 %v1740_v15  ;;  %v1705_v60 = vpop.xlane.xlu1 %1704  ;;  %v1728_v13 = vsub.f32 %v13253_v21, %v1703_v36 }
 0x39a   : > { %v1729_v27 = vsub.f32 %v13266_v28, %v1705_v60 }
 0x39b   : > { %v1750_v42 = vmul.f32 1.442695, %v1728_v13 }
 0x39c   : > { %v1699_v38 = vpop.xlane.xlu0 %1698  ;;  %v1752_v41 = vmul.f32 1.442695, %v1729_v27 }
 0x39d   : > { %v1701_v12 = vpop.xlane.xlu1 %1700  ;;  %v1726_v15 = vsub.f32 %v13270_v29, %v1699_v38  ;;  %12041 = vpow2.f32 %v1750_v42 }
 0x39e   : > { %v13360_v46 = vpop.eup %12033  ;;  %v1727_v50 = vsub.f32 %v13274_v31, %v1701_v12 }
 0x39f   : > { %1774 = vadd.xlane.f32.xlu0 %v13360_v46  ;;  %v13363_v2 = vpop.eup %12035  ;;  %v1746_v48 = vmul.f32 1.442695, %v1726_v15 }
 0x3a0   : > { %v1711_v45 = vpop.xlane.xlu0 %1710 }
 0x3a1   : > { %v1713_v25 = vpop.xlane.xlu1 %1712  ;;  %12043 = vpow2.f32 %v1746_v48  ;;  %v1732_v24 = vsub.f32 %v13289_v44, %v1711_v45 }
 0x3a2   : > { %v13365_v7 = vpop.eup %12037  ;;  %v1733_v44 = vsub.f32 %v13302_v49, %v1713_v25 }
 0x3a3   : > { %1776 = vadd.xlane.f32.xlu1 %v13365_v7  ;;  %1770 = vadd.xlane.f32.xlu0 %v13363_v2  ;;  %v13369_v1 = vpop.eup %12039  ;;  %v1758_v31 = vmul.f32 1.442695, %v1732_v24 }
 0x3a4   : > { %v1707_v0 = vpop.xlane.xlu0 %1706 }
 0x3a5   : > { %v1709_v21 = vpop.xlane.xlu1 %1708  ;;  %v1730_v38 = vsub.f32 %v13306_v51, %v1707_v0 }
 0x3a6   : > { %v1731_v51 = vsub.f32 %v13310_v59, %v1709_v21 }
 0x3a7   : > { %1772 = vadd.xlane.f32.xlu1 %v13369_v1  ;;  %v13386_v12 = vpop.eup %12041  ;;  %v1754_v48 = vmul.f32 1.442695, %v1730_v38 }
 0x3a8   : > { %v1719_v20 = vpop.xlane.xlu0 %1718 }
 0x3a9   : > { %v13384_v60 = vpop.permute.xlu1 %1993 }
 0x3ac   : > { %v1715_v33 = vpop.xlane.xlu0 %1714 }
 0x3ad   : > { %v1734_v36 = vsub.f32 %v13329_v35, %v1715_v33 }
 0x3af   : > { %v1762_v28 = vmul.f32 1.442695, %v1734_v36 }
 0x3b0   : > { %v1992_v27 = vpop.permute.xlu0 %1991 }
 0x3b8   : > { %1997 = vrot.lane.b32.xlu1 %v13097_v61, %s12718_s29  ;;  %v1748_v61 = vmul.f32 1.442695, %v1727_v50 }
 0x3b9   : > { %1995 = vrot.lane.b32.xlu0 %v13099_v63, %s12718_s29  ;;  %v1736_v63 = vsub.f32 %v13320_v10, %v1719_v20 }
 0x3ba   : > { %12045 = vpow2.f32 %v1748_v61  ;;  %v13390_v61 = vpop.eup %12043 }
 0x3bb   : > { %v1766_v29 = vmul.f32 1.442695, %v1736_v63  ;;  %12047 = vpow2.f32 %v1752_v41  ;;  %v1760_v41 = vmul.f32 1.442695, %v1733_v44 }
 0x3bd   : > { %12049 = vpow2.f32 %v1766_v29 }
 0x3be   : > { %12051 = vpow2.f32 %v1758_v31 }
 0x3bf   : > { %12053 = vpow2.f32 %v1762_v28 }
 0x3c0   : > { %12055 = vpow2.f32 %v1754_v48 }
 0x3c4   : > { %v13392_v33 = vpop.eup %12045 }
 0x3c5   : > { %v13398_v35 = vpop.eup %12047 }
 0x3c7   : > { %v13400_v45 = vpop.eup %12049 }
 0x3c8   : > { %v13405_v13 = vpop.eup %12051 }
 0x3c9   : > { %v13407_v15 = vpop.eup %12053 }
 0x3ca   : > { %v13411_v20 = vpop.eup %12055 }
 0x3d8   : > { %1782 = vadd.xlane.f32.xlu0 %v13386_v12 }
 0x3da   : > { %v1721_v63 = vpop.xlane.xlu1 %1720 }
 0x3db   : > { %v1737_v24 = vsub.f32 %v13342_v47, %v1721_v63  ;;  %v1756_v47 = vmul.f32 1.442695, %v1731_v51 }
 0x3dc   : > { %1780 = vadd.xlane.f32.xlu0 %v13392_v33  ;;  %1778 = vadd.xlane.f32.xlu1 %v13390_v61 }
 0x3dd   : > { %v1768_v10 = vmul.f32 1.442695, %v1737_v24 }
 0x3de   : > { %v1717_v49 = vpop.xlane.xlu1 %1716 }
 0x3df   : > { %12057 = vpow2.f32 %v1768_v10  ;;  %v1735_v0 = vsub.f32 %v13351_v62, %v1717_v49 }
 0x3e0   : > { %1784 = vadd.xlane.f32.xlu1 %v13398_v35  ;;  %1798 = vadd.xlane.f32.xlu0 %v13400_v45  ;;  %12059 = vpow2.f32 %v1760_v41 }
 0x3e1   : > { %12061 = vpow2.f32 %v1756_v47  ;;  %v1764_v59 = vmul.f32 1.442695, %v1735_v0  ;;  %v2028_v47 = vsel %vm1544_vm3, %v13202_v53, 0 }
 0x3e3   : > { %12063 = vpow2.f32 %v1764_v59 }
 0x3e4   : > { %1790 = vadd.xlane.f32.xlu1 %v13405_v13  ;;  %1794 = vadd.xlane.f32.xlu0 %v13407_v15 }
 0x3e8   : > { %1786 = vadd.xlane.f32.xlu1 %v13411_v20 }
 0x3e9   : > { %v13414_v42 = vpop.eup %12057 }
 0x3ea   : > { %1800 = vadd.xlane.f32.xlu0 %v13414_v42  ;;  %v13417_v62 = vpop.eup %12059 }
 0x3eb   : > { %v13420_v50 = vpop.eup %12061 }
 0x3ec   : > { %1792 = vadd.xlane.f32.xlu1 %v13417_v62 }
 0x3ed   : > { %v13423_v25 = vpop.eup %12063 }
 0x3f0   : > { %1788 = vadd.xlane.f32.xlu1 %v13420_v50 }
 0x3f4   : > { %1796 = vadd.xlane.f32.xlu1 %v13423_v25 }
 0x400   : > { %1999 = vrot.lane.b32.xlu0 %v13119_v32, %s12718_s29 }
 0x404   : > { %1963 = vrot.lane.b32.xlu0 %v13083_v43, %s12718_s29 }
 0x405   : > { %2001 = vrot.lane.b32.xlu1 %v13117_v30, %s12718_s29 }
 0x408   : > { %1967 = vrot.lane.b32.xlu0 %v13105_v9, %s12718_s29 }
 0x409   : > { %1965 = vrot.lane.b32.xlu1 %v13079_v40, %s12718_s29 }
 0x40c   : > { %1971 = vrot.lane.b32.xlu0 %v13125_v37, %s12718_s29 }
 0x40d   : > { %1969 = vrot.lane.b32.xlu1 %v13101_v5, %s12718_s29 }
 0x410   : > { %1975 = vrot.lane.b32.xlu0 %v13142_v56, %s12718_s29 }
 0x411   : > { %1973 = vrot.lane.b32.xlu1 %v13121_v34, %s12718_s29 }
 0x414   : > { %2308 = vrot.lane.b32.xlu0 %v13148_v8, %s12718_s29 }
 0x415   : > { %1977 = vrot.lane.b32.xlu1 %v13138_v54, %s12718_s29 }
 0x418   : > { %2312 = vrot.lane.b32.xlu0 %v13160_v23, %s12718_s29 }
 0x419   : > { %2310 = vrot.lane.b32.xlu1 %v13146_v3, %s12718_s29 }
 0x41c   : > { %2316 = vrot.lane.b32.xlu0 %v13172_v4, %s12718_s29 }
 0x41d   : > { %2314 = vrot.lane.b32.xlu1 %v13157_v22, %s12718_s29 }
 0x420   : > { %2320 = vrot.lane.b32.xlu0 %v13182_v55, %s12718_s29 }
 0x421   : > { %2318 = vrot.lane.b32.xlu1 %v13169_v39, %s12718_s29 }
 0x424   : > { %2526 = vrot.lane.b32.xlu0 %v13055_v16, %s12719_s24 }
 0x425   : > { %2322 = vrot.lane.b32.xlu1 %v13179_v52, %s12718_s29  ;;  %s12720_s29 = smov 104  }
 0x429   : > { %2528 = vrot.lane.b32.xlu1 %v13049_v14, %s12719_s24 }
 0x42c   : > { %v1775_v21 = vpop.xlane.xlu0 %1774 }
 0x430   : > { %v1777_v29 = vpop.xlane.xlu1 %1776  ;;  %v1771_v36 = vpop.xlane.xlu0 %1770 }
 0x431   : > { %12065 = vrcp.f32 %v1777_v29 }
 0x432   : > { %12067 = vrcp.f32 %v1771_v36 }
 0x433   : > { %12069 = vrcp.f32 %v1775_v21 }
 0x434   : > { %v1773_v31 = vpop.xlane.xlu1 %1772  ;;  %v1996_v53 = vpop.permute.xlu0 %1995 }
 0x435   : > { %12071 = vrcp.f32 %v1773_v31  ;;  %v2040_v0 = vsel %vm1544_vm3, %v1996_v53, 0 }
 0x43b   : > { %v12066_v38 = vpop.eup %12065 }
 0x43c   : > { %v12068_v28 = vpop.eup %12067  ;;  %v1821_v63 = vmul.f32 %v12066_v38, %v13365_v7  ;;  %v2031_v7 = vsel %vm1544_vm3, %v13354_v18, 0 }
 0x43d   : > { %v12070_v44 = vpop.eup %12069  ;;  %v1818_v24 = vmul.f32 %v12068_v28, %v13363_v2  ;;  %v2034_v2 = vsel %vm1544_vm3, %v1992_v27, 0 }
 0x43e   : > { %v1820_v51 = vmul.f32 %v12070_v44, %v13360_v46  ;;  %v2037_v46 = vsel %vm1544_vm3, %v13384_v60, 0 }
 0x43f   : > { %v12072_v48 = vpop.eup %12071 }
 0x440   : > { %v1819_v41 = vmul.f32 %v12072_v48, %v13369_v1  ;;  %v1835_v49 = vpack.c.bf16 %v1821_v63, %v1820_v51  ;;  %v1998_v1 = vpop.permute.xlu1 %1997 }
 0x441   : > { %v2043_v29 = vsel %vm1544_vm3, %v1998_v1, 0 }
 0x442   : > { %v1834_v10 = vpack.c.bf16 %v1819_v41, %v1818_v24 }
 0x444   : > { %11284 = vmatprep.mubr.bf16.mxu0 %v1834_v10 }
 0x445   : > { %11285 = vmatmul.mubr.bf16.vlgmr.msra.gmra.mrb[32].mxu0 %v1835_v49 }
 0x446   : > { %11301 = vmatpush3.bf16.xpose.msra.mxu0 %v2028_v47 }
 0x447   : > { %11799 = vmatprep.subr.msk.bf16.mxu0 %vm1544_vm3, %v13354_v18 }
 0x44e   : > { %11303 = vmatpush3.bf16.xpose.msra.mxu0 %v2031_v7 }
 0x44f   : > { %11800 = vmatprep.subr.msk.bf16.mxu0 %vm1544_vm3, %v1992_v27 }
 0x456   : > { %11305 = vmatpush3.bf16.xpose.msra.mxu0 %v2034_v2 }
 0x457   : > { %11801 = vmatprep.subr.msk.bf16.mxu0 %vm1544_vm3, %v13384_v60 }
 0x45e   : > { %11307 = vmatpush3.bf16.xpose.msra.mxu0 %v2037_v46 }
 0x45f   : > { %11802 = vmatprep.subr.msk.bf16.mxu0 %vm1544_vm3, %v1996_v53 }
 0x465   : > { %v1783_v18 = vpop.xlane.xlu0 %1782 }
 0x466   : > { %11309 = vmatpush3.bf16.xpose.msra.mxu0 %v2040_v0 }
 0x467   : > { %11803 = vmatprep.subr.msk.bf16.mxu0 %vm1544_vm3, %v1998_v1 }
 0x469   : > { %v1779_v59 = vpop.xlane.xlu1 %1778  ;;  %v1781_v27 = vpop.xlane.xlu0 %1780 }
 0x46a   : > { %12073 = vrcp.f32 %v1779_v59 }
 0x46b   : > { %12075 = vrcp.f32 %v1781_v27 }
 0x46c   : > { %12077 = vrcp.f32 %v1783_v18 }
 0x46d   : > { %v1785_v21 = vpop.xlane.xlu1 %1784  ;;  %v1799_v60 = vpop.xlane.xlu0 %1798 }
 0x46e   : > { %12079 = vrcp.f32 %v1785_v21  ;;  %11311 = vmatpush3.bf16.xpose.msra.mxu0 %v2043_v29 }
 0x471   : > { %v1791_v36 = vpop.xlane.xlu1 %1790  ;;  %v1795_v31 = vpop.xlane.xlu0 %1794 }
 0x474   : > { %v12074_v38 = vpop.eup %12073 }
 0x475   : > { %v12076_v28 = vpop.eup %12075  ;;  %v1787_v44 = vpop.xlane.xlu1 %1786  ;;  %v1822_v48 = vmul.f32 %v12074_v38, %v13390_v61 }
 0x476   : > { %v12078_v63 = vpop.eup %12077  ;;  %v1823_v24 = vmul.f32 %v12076_v28, %v13392_v33 }
 0x477   : > { %v1801_v41 = vpop.xlane.xlu0 %1800  ;;  %v1824_v47 = vmul.f32 %v12078_v63, %v13386_v12 }
 0x478   : > { %v12080_v51 = vpop.eup %12079  ;;  %v1836_v10 = vpack.c.bf16 %v1823_v24, %v1822_v48 }
 0x479   : > { %v1793_v49 = vpop.xlane.xlu1 %1792  ;;  %v1825_v7 = vmul.f32 %v12080_v51, %v13398_v35 }
 0x47a   : > { %11288 = vmatprep.mubr.bf16.mxu0 %v1836_v10  ;;  %12081 = vrcp.f32 %v1793_v49 }
 0x47b   : > { %v2000_v2 = vpop.permute.xlu0 %1999  ;;  %v1837_v46 = vpack.c.bf16 %v1825_v7, %v1824_v47  ;;  %12083 = vrcp.f32 %v1787_v44 }
 0x47c   : > { %11804 = vmatprep.subr.msk.bf16.mxu0 %vm1544_vm3, %v2000_v2  ;;  %v2046_v61 = vsel %vm1544_vm3, %v2000_v2, 0  ;;  %12085 = vrcp.f32 %v1791_v36 }
 0x47d   : > { %v1789_v53 = vpop.xlane.xlu1 %1788  ;;  %11289 = vmatmul.mubr.bf16.gmra.mrb[36].mxu0 %v1837_v46 }
 0x47e   : > { %12087 = vrcp.f32 %v1789_v53  ;;  %11313 = vmatpush3.bf16.xpose.msra.mxu0 %v2046_v61 }
 0x47f   : > { %v1964_v33 = vpop.permute.xlu0 %1963  ;;  %12089 = vrcp.f32 %v1795_v31 }
 0x481   : > { %v1797_v1 = vpop.xlane.xlu1 %1796 }
 0x482   : > { %12091 = vrcp.f32 %v1797_v1 }
 0x483   : > { %12093 = vrcp.f32 %v1801_v41  ;;  %v1968_v12 = vpop.permute.xlu0 %1967 }
 0x484   : > { %v12082_v35 = vpop.eup %12081  ;;  %12095 = vrcp.f32 %v1799_v60 }
 0x485   : > { %v2002_v0 = vpop.permute.xlu1 %2001  ;;  %v12084_v18 = vpop.eup %12083  ;;  %v1829_v36 = vmul.f32 %v12082_v35, %v13417_v62 }
 0x486   : > { %11805 = vmatprep.subr.msk.bf16.mxu0 %vm1544_vm3, %v2002_v0  ;;  %v2049_v59 = vsel %vm1544_vm3, %v2002_v0, 0  ;;  %v12086_v27 = vpop.eup %12085  ;;  %v1826_v31 = vmul.f32 %v12084_v18, %v13411_v20 }
 0x487   : > { %11315 = vmatpush3.bf16.xpose.msra.mxu0 %v2049_v59  ;;  %v1972_v21 = vpop.permute.xlu0 %1971  ;;  %v1828_v60 = vmul.f32 %v12086_v27, %v13405_v13 }
 0x488   : > { %v12088_v29 = vpop.eup %12087 }
 0x489   : > { %v1966_v38 = vpop.permute.xlu1 %1965  ;;  %v1827_v28 = vmul.f32 %v12088_v29, %v13420_v50  ;;  %v12090_v44 = vpop.eup %12089  ;;  %v1839_v41 = vpack.c.bf16 %v1829_v36, %v1828_v60 }
 0x48a   : > { %v1830_v49 = vmul.f32 %v12090_v44, %v13407_v15 }
 0x48b   : > { %v1976_v48 = vpop.permute.xlu0 %1975  ;;  %v1838_v63 = vpack.c.bf16 %v1827_v28, %v1826_v31 }
 0x48c   : > { %v12092_v24 = vpop.eup %12091 }
 0x48d   : > { %v12094_v51 = vpop.eup %12093  ;;  %v1970_v10 = vpop.permute.xlu1 %1969  ;;  %11292 = vmatprep.mubr.bf16.mxu0 %v1838_v63  ;;  %v1831_v47 = vmul.f32 %v12092_v24, %v13423_v25 }
 0x48e   : > { %11293 = vmatmul.mubr.bf16.gmra.mrb[40].mxu0 %v1839_v41  ;;  %v12096_v62 = vpop.eup %12095  ;;  %v1833_v50 = vmul.f32 %v12094_v51, %v13414_v42 }
 0x48f   : > { %v2309_v7 = vpop.permute.xlu0 %2308  ;;  %v1840_v20 = vpack.c.bf16 %v1831_v47, %v1830_v49  ;;  %v1832_v13 = vmul.f32 %v12096_v62, %v13400_v45 }
 0x490   : > { %11332 = vmatprep.subr.bf16.mxu1 %v2309_v7 }
 0x491   : > { %v1974_v2 = vpop.permute.xlu1 %1973  ;;  %11296 = vmatprep.mubr.bf16.mxu0 %v1840_v20  ;;  %11333 = vmatpush3.bf16.msra.mxu1 %v2309_v7  ;;  %v1841_v46 = vpack.c.bf16 %v1833_v50, %v1832_v13 }
 0x493   : > { %v2313_v25 = vpop.permute.xlu0 %2312 }
 0x495   : > { %v1978_v61 = vpop.permute.xlu1 %1977 }
 0x496   : > { %11297 = vmatmul.mubr.bf16.gmra.mrb[44].mxu0 %v1841_v46 }
 0x497   : > { %11316 = vmatprep.mubr.msk.bf16.mxu0 %vm1544_vm3, %v1964_v33  ;;  %v2317_v42 = vpop.permute.xlu0 %2316 }
 0x499   : > { %v2311_v15 = vpop.permute.xlu1 %2310 }
 0x49a   : > { %11334 = vmatprep.subr.bf16.mxu1 %v2311_v15 }
 0x49b   : > { %11335 = vmatpush3.bf16.msra.mxu1 %v2311_v15  ;;  %v2321_v33 = vpop.permute.xlu0 %2320  ;;  %v17790_v15 = vld [vmem:[#allocation20_spill] sm:$0xff] }
 0x49c   : > { %11336 = vmatprep.subr.bf16.mxu1 %v2313_v25 }
 0x49d   : > { %v2315_v53 = vpop.permute.xlu1 %2314 }
 0x49e   : > { %11317 = vmatmul.mubr.msk.bf16.vlgmr.msra.gmra.mrb[48].mxu0 %vm1544_vm3, %v1966_v38 }
 0x49f   : > { %11320 = vmatprep.mubr.msk.bf16.mxu0 %vm1544_vm3, %v1968_v12  ;;  %11337 = vmatpush3.bf16.msra.mxu1 %v2313_v25  ;;  %v13509_v12 = vpop.permute.xlu0 %2526 }
 0x4a0   : > { %11338 = vmatprep.subr.bf16.mxu1 %v2315_v53 }
 0x4a1   : > { %v2319_v45 = vpop.permute.xlu1 %2318 }
 0x4a3   : > { %11339 = vmatpush3.bf16.msra.mxu1 %v2315_v53 }
 0x4a4   : > { %11340 = vmatprep.subr.bf16.mxu1 %v2317_v42 }
 0x4a5   : > { %v2323_v1 = vpop.permute.xlu1 %2322 }
 0x4a6   : > { %11321 = vmatmul.mubr.msk.bf16.gmra.mrb[52].mxu0 %vm1544_vm3, %v1970_v10 }
 0x4a7   : > { %11324 = vmatprep.mubr.msk.bf16.mxu0 %vm1544_vm3, %v1972_v21  ;;  %11341 = vmatpush3.bf16.msra.mxu1 %v2317_v42  ;;  %v17791_v42 = vld [vmem:[#allocation22_spill] sm:$0xff] }
 0x4a8   : > { %11342 = vmatprep.subr.bf16.mxu1 %v2319_v45 }
 0x4ab   : > { %11343 = vmatpush3.bf16.msra.mxu1 %v2319_v45 }
 0x4ac   : > { %11344 = vmatprep.subr.bf16.mxu1 %v2321_v33 }
 0x4ae   : > { %11325 = vmatmul.mubr.msk.bf16.gmra.mrb[56].mxu0 %vm1544_vm3, %v1974_v2 }
 0x4af   : > { %11328 = vmatprep.mubr.msk.bf16.mxu0 %vm1544_vm3, %v1976_v48  ;;  %11345 = vmatpush3.bf16.msra.mxu1 %v2321_v33 }
 0x4b0   : > { %11346 = vmatprep.subr.bf16.mxu1 %v2323_v1 }
 0x4b3   : > { %11347 = vmatpush3.bf16.msra.mxu1 %v2323_v1 }
 0x4b4   : > { %11806 = vmatprep.subr.msk.bf16.mxu1 %vm1544_vm3, %v13509_v12 }
 0x4b6   : > { %11329 = vmatmul.mubr.msk.bf16.gmra.mrb[60].mxu0 %vm1544_vm3, %v1978_v61 }
 0x518   : > { %v11286_v35 = vpop.f32.mrb[32].mxu0 }
 0x519   : > { %1941 = vst.msk [vmem:[#allocation3 + $0x10] sm:$0xff] %vm1544_vm3, %v11286_v35  ;;  %v1876_v0 = vpop.f32.mrb[33].mxu0 }
 0x51a   : > { %1939 = vst.msk [vmem:[#allocation3] sm:$0xff] %vm1544_vm3, %v1876_v0  ;;  %v11287_v18 = vpop.f32.mrb[34].mxu0 }
 0x51b   : > { %1942 = vst.msk [vmem:[#allocation3 + $0x18] sm:$0xff] %vm1544_vm3, %v11287_v18  ;;  %v1879_v59 = vpop.f32.mrb[35].mxu0  ;;  %v17794_v18 = vld [vmem:[#allocation23_spill] sm:$0xff] }
 0x51c   : > { %1940 = vst.msk [vmem:[#allocation3 + $0x8] sm:$0xff] %vm1544_vm3, %v1879_v59 }
 0x550   : > { %v11290_v27 = vpop.f32.mrb[36].mxu0 }
 0x551   : > { %1945 = vst.msk [vmem:[#allocation3 + $0x30] sm:$0xff] %vm1544_vm3, %v11290_v27  ;;  %v1892_v21 = vpop.f32.mrb[37].mxu0 }
 0x552   : > { %1943 = vst.msk [vmem:[#allocation3 + $0x20] sm:$0xff] %vm1544_vm3, %v1892_v21  ;;  %v11291_v29 = vpop.f32.mrb[38].mxu0 }
 0x553   : > { %1946 = vst.msk [vmem:[#allocation3 + $0x38] sm:$0xff] %vm1544_vm3, %v11291_v29  ;;  %v1895_v36 = vpop.f32.mrb[39].mxu0  ;;  %v17795_v29 = vld [vmem:[#allocation25_spill] sm:$0xff] }
 0x554   : > { %1944 = vst.msk [vmem:[#allocation3 + $0x28] sm:$0xff] %vm1544_vm3, %v1895_v36 }
 0x561   : > { %v11294_v38 = vpop.f32.mrb[40].mxu0 }
 0x562   : > { %1949 = vst.msk [vmem:[#allocation3 + $0x50] sm:$0xff] %vm1544_vm3, %v11294_v38  ;;  %v1908_v31 = vpop.f32.mrb[41].mxu0  ;;  %v17796_v38 = vld [vmem:[#allocation26_spill] sm:$0xff] }
 0x563   : > { %1947 = vst.msk [vmem:[#allocation3 + $0x40] sm:$0xff] %vm1544_vm3, %v1908_v31  ;;  %v11295_v28 = vpop.f32.mrb[42].mxu0 }
 0x564   : > { %1950 = vst.msk [vmem:[#allocation3 + $0x58] sm:$0xff] %vm1544_vm3, %v11295_v28  ;;  %v1911_v44 = vpop.f32.mrb[43].mxu0  ;;  %v17797_v28 = vld [vmem:[#allocation11_spill] sm:$0xff] }
 0x565   : > { %1948 = vst.msk [vmem:[#allocation3 + $0x48] sm:$0xff] %vm1544_vm3, %v1911_v44  ;;  %v17798_v44 = vld [vmem:[#allocation12_spill] sm:$0xff] }
 0x569   : > { %v11298_v60 = vpop.f32.mrb[44].mxu0 }
 0x56a   : > { %1953 = vst.msk [vmem:[#allocation3 + $0x70] sm:$0xff] %vm1544_vm3, %v11298_v60  ;;  %v1924_v48 = vpop.f32.mrb[45].mxu0  ;;  %v17799_v60 = vld [vmem:[#allocation27_spill] sm:$0xff] }
 0x56b   : > { %1951 = vst.msk [vmem:[#allocation3 + $0x60] sm:$0xff] %vm1544_vm3, %v1924_v48  ;;  %v11299_v63 = vpop.f32.mrb[46].mxu0 }
 0x56c   : > { %1954 = vst.msk [vmem:[#allocation3 + $0x78] sm:$0xff] %vm1544_vm3, %v11299_v63  ;;  %v1927_v24 = vpop.f32.mrb[47].mxu0  ;;  %v17800_v63 = vld [vmem:[#allocation28_spill] sm:$0xff] }
 0x56d   : > { %1952 = vst.msk [vmem:[#allocation3 + $0x68] sm:$0xff] %vm1544_vm3, %v1927_v24 }
 0x571   : > { %v11318_v41 = vpop.f32.mrb[48].mxu0 }
 0x572   : > { %v2085_v51 = vpop.f32.mrb[49].mxu0  ;;  %v2094_v10 = vadd.f32 %v11318_v41, %v13209_v57  ;;  %v13586_v41 = vpop.permute.xlu1 %2528 }
 0x573   : > { %v11319_v49 = vpop.f32.mrb[50].mxu0  ;;  %v2086_v7 = vadd.f32 %v2085_v51, %v13214_v58 }
 0x574   : > { %2152 = vmax.xlane.f32.xlu0 %v2094_v10  ;;  %v2088_v47 = vpop.f32.mrb[51].mxu0  ;;  %v2097_v2 = vadd.f32 %v11319_v49, %v13225_v6 }
 0x575   : > { %v2089_v62 = vadd.f32 %v2088_v47, %v13231_v11 }
 0x577   : > { %2150 = vmax.xlane.f32.xlu1 %v2089_v62 }
 0x578   : > { %2148 = vmax.xlane.f32.xlu0 %v2086_v7 }
 0x579   : > { %v11322_v20 = vpop.f32.mrb[52].mxu0 }
 0x57a   : > { %v2101_v50 = vpop.f32.mrb[53].mxu0  ;;  %v13539_v57 = vadd.f32 %v11322_v20, %v13243_v17  ;;  %v17792_v17 = vld [vmem:[#allocation21_spill] sm:$0xff] }
 0x57b   : > { %v11323_v13 = vpop.f32.mrb[54].mxu0  ;;  %v13547_v25 = vadd.f32 %v2101_v50, %v17790_v15 }
 0x57c   : > { %2154 = vmax.xlane.f32.xlu0 %v2097_v2  ;;  %v2104_v46 = vpop.f32.mrb[55].mxu0  ;;  %v13535_v61 = vadd.f32 %v11323_v13, %v13250_v19 }
 0x57d   : > { %v13543_v58 = vadd.f32 %v2104_v46, %v13263_v26  ;;  %v17793_v26 = vld [vmem:[#allocation24_spill] sm:$0xff] }
 0x57e   : > { %2162 = vmax.xlane.f32.xlu1 %v13535_v61 }
 0x580   : > { %2160 = vmax.xlane.f32.xlu0 %v13539_v57 }
 0x581   : > { %v11326_v11 = vpop.f32.mrb[56].mxu0 }
 0x582   : > { %2158 = vmax.xlane.f32.xlu1 %v13543_v58  ;;  %v2117_v6 = vpop.f32.mrb[57].mxu0  ;;  %v13555_v33 = vadd.f32 %v11326_v11, %v17792_v17 }
 0x583   : > { %v11327_v53 = vpop.f32.mrb[58].mxu0  ;;  %v13563_v59 = vadd.f32 %v2117_v6, %v17794_v18 }
 0x584   : > { %2156 = vmax.xlane.f32.xlu0 %v13547_v25  ;;  %v2120_v19 = vpop.f32.mrb[59].mxu0  ;;  %v13551_v45 = vadd.f32 %v11327_v53, %v17791_v42 }
 0x585   : > { %v13559_v1 = vadd.f32 %v2120_v19, %v17793_v26  ;;  %v17802_v26 = vld [vmem:[#allocation13_spill] sm:$0xff] }
 0x586   : > { %2170 = vmax.xlane.f32.xlu1 %v13551_v45 }
 0x588   : > { %2168 = vmax.xlane.f32.xlu0 %v13555_v33 }
 0x589   : > { %v11330_v35 = vpop.f32.mrb[60].mxu0 }
 0x58a   : > { %2166 = vmax.xlane.f32.xlu1 %v13559_v1  ;;  %v2133_v0 = vpop.f32.mrb[61].mxu0  ;;  %v13567_v36 = vadd.f32 %v11330_v35, %v17795_v29 }
 0x58b   : > { %v11331_v27 = vpop.f32.mrb[62].mxu0  ;;  %v13571_v31 = vadd.f32 %v2133_v0, %v17796_v38 }
 0x58c   : > { %2164 = vmax.xlane.f32.xlu0 %v13563_v59  ;;  %v2136_v21 = vpop.f32.mrb[63].mxu0  ;;  %v13579_v48 = vadd.f32 %v11331_v27, %v17799_v60 }
 0x58d   : > { %v13583_v24 = vadd.f32 %v2136_v21, %v17800_v63 }
 0x590   : > { %2176 = vmax.xlane.f32.xlu0 %v13567_v36 }
 0x594   : > { %2172 = vmax.xlane.f32.xlu0 %v13571_v31 }
 0x59b   : > { %2532 = vrot.lane.b32.xlu1 %v17797_v28, %s12719_s24 }
 0x5aa   : > { %2530 = vrot.lane.b32.xlu0 %v17798_v44, %s12719_s24 }
 0x5bf   : > { %2178 = vmax.xlane.f32.xlu1 %v13579_v48 }
 0x5c3   : > { %2174 = vmax.xlane.f32.xlu1 %v13583_v24 }
 0x601   : > { %v2153_v51 = vpop.xlane.xlu0 %2152 }
 0x602   : > { %v2182_v49 = vsub.f32 %v2094_v10, %v2153_v51 }
 0x604   : > { %v2200_v47 = vmul.f32 1.442695, %v2182_v49  ;;  %v2151_v20 = vpop.xlane.xlu1 %2150 }
 0x605   : > { %v2181_v50 = vsub.f32 %v2089_v62, %v2151_v20  ;;  %v2149_v13 = vpop.xlane.xlu0 %2148 }
 0x606   : > { %12097 = vpow2.f32 %v2200_v47  ;;  %v2180_v46 = vsub.f32 %v2086_v7, %v2149_v13 }
 0x607   : > { %v2198_v11 = vmul.f32 1.442695, %v2181_v50 }
 0x608   : > { %v2196_v6 = vmul.f32 1.442695, %v2180_v46 }
 0x609   : > { %12099 = vpow2.f32 %v2198_v11  ;;  %v2155_v15 = vpop.xlane.xlu0 %2154 }
 0x60a   : > { %12101 = vpow2.f32 %v2196_v6  ;;  %v2183_v53 = vsub.f32 %v2097_v2, %v2155_v15  ;;  %v17801_v2 = vld [vmem:[#allocation14_spill] sm:$0xff] }
 0x60b   : > { %v2163_v0 = vpop.xlane.xlu1 %2162 }
 0x60c   : > { %v2202_v19 = vmul.f32 1.442695, %v2183_v53  ;;  %v2187_v47 = vsub.f32 %v13535_v61, %v2163_v0 }
 0x60d   : > { %v2161_v7 = vpop.xlane.xlu0 %2160 }
 0x60e   : > { %12103 = vpow2.f32 %v2202_v19  ;;  %v2186_v27 = vsub.f32 %v13539_v57, %v2161_v7  ;;  %v2210_v46 = vmul.f32 1.442695, %v2187_v47 }
 0x60f   : > { %v2159_v21 = vpop.xlane.xlu1 %2158 }
 0x610   : > { %v13588_v42 = vpop.eup %12097  ;;  %v2208_v38 = vmul.f32 1.442695, %v2186_v27  ;;  %v2185_v63 = vsub.f32 %v13543_v58, %v2159_v21 }
 0x611   : > { %2232 = vadd.xlane.f32.xlu1 %v13588_v42  ;;  %v2157_v35 = vpop.xlane.xlu0 %2156 }
 0x612   : > { %v2184_v60 = vsub.f32 %v13547_v25, %v2157_v35  ;;  %12105 = vpow2.f32 %v2208_v38  ;;  %v2206_v50 = vmul.f32 1.442695, %v2185_v63 }
 0x613   : > { %v13591_v17 = vpop.eup %12099  ;;  %v2171_v51 = vpop.xlane.xlu1 %2170 }
 0x614   : > { %v13593_v10 = vpop.eup %12101  ;;  %2230 = vadd.xlane.f32.xlu0 %v13591_v17  ;;  %v2204_v20 = vmul.f32 1.442695, %v2184_v60  ;;  %v2191_v61 = vsub.f32 %v13551_v45, %v2171_v51 }
 0x615   : > { %2228 = vadd.xlane.f32.xlu1 %v13593_v10  ;;  %v2169_v18 = vpop.xlane.xlu0 %2168 }
 0x616   : > { %v2190_v13 = vsub.f32 %v13555_v33, %v2169_v18  ;;  %12107 = vpow2.f32 %v2204_v20  ;;  %v2218_v35 = vmul.f32 1.442695, %v2191_v61 }
 0x617   : > { %v2167_v11 = vpop.xlane.xlu1 %2166  ;;  %12109 = vpow2.f32 %v2206_v50 }
 0x618   : > { %v13597_v62 = vpop.eup %12103  ;;  %v2216_v6 = vmul.f32 1.442695, %v2190_v13  ;;  %12111 = vpow2.f32 %v2210_v46 }
 0x619   : > { %2234 = vadd.xlane.f32.xlu1 %v13597_v62  ;;  %v2165_v29 = vpop.xlane.xlu0 %2164 }
 0x61a   : > { %v2188_v25 = vsub.f32 %v13563_v59, %v2165_v29  ;;  %12113 = vpow2.f32 %v2216_v6  ;;  %v2189_v59 = vsub.f32 %v13559_v1, %v2167_v11 }
 0x61b   : > { %v13615_v33 = vpop.permute.xlu1 %2532 }
 0x61c   : > { %v2212_v19 = vmul.f32 1.442695, %v2188_v25  ;;  %v13613_v7 = vpop.eup %12105  ;;  %v2214_v27 = vmul.f32 1.442695, %v2189_v59 }
 0x61d   : > { %v2177_v49 = vpop.xlane.xlu0 %2176 }
 0x61e   : > { %v2194_v57 = vsub.f32 %v13567_v36, %v2177_v49 }
 0x620   : > { %v2224_v58 = vmul.f32 1.442695, %v2194_v57  ;;  %v13619_v0 = vpop.eup %12107 }
 0x621   : > { %v2173_v15 = vpop.xlane.xlu0 %2172 }
 0x622   : > { %v2192_v53 = vsub.f32 %v13571_v31, %v2173_v15  ;;  %12115 = vpow2.f32 %v2224_v58  ;;  %v13621_v31 = vpop.eup %12109 }
 0x623   : > { %12117 = vpow2.f32 %v2212_v19  ;;  %v13626_v29 = vpop.eup %12111 }
 0x624   : > { %v2220_v36 = vmul.f32 1.442695, %v2192_v53  ;;  %v13628_v1 = vpop.eup %12113 }
 0x625   : > { %v2531_v13 = vpop.permute.xlu0 %2530 }
 0x626   : > { %12119 = vpow2.f32 %v2220_v36 }
 0x627   : > { %12121 = vpow2.f32 %v2218_v35 }
 0x62a   : > { %2534 = vrot.lane.b32.xlu0 %v17801_v2, %s12719_s24  ;;  %2536 = vrot.lane.b32.xlu1 %v17802_v26, %s12719_s24 }
 0x62c   : > { %v13633_v63 = vpop.eup %12115 }
 0x62d   : > { %v13635_v51 = vpop.eup %12117 }
 0x630   : > { %v13639_v49 = vpop.eup %12119 }
 0x631   : > { %v13641_v47 = vpop.eup %12121 }
 0x649   : > { %2240 = vadd.xlane.f32.xlu0 %v13613_v7 }
 0x64c   : > { %v2179_v18 = vpop.xlane.xlu1 %2178 }
 0x64d   : > { %v2195_v45 = vsub.f32 %v13579_v48, %v2179_v18  ;;  %2236 = vadd.xlane.f32.xlu0 %v13619_v0 }
 0x64e   : > { %2238 = vadd.xlane.f32.xlu1 %v13621_v31 }
 0x64f   : > { %v2226_v21 = vmul.f32 1.442695, %v2195_v45  ;;  %v2567_v45 = vsel %vm1544_vm3, %v13509_v12, 0 }
 0x650   : > { %v2175_v38 = vpop.xlane.xlu1 %2174 }
 0x651   : > { %12123 = vpow2.f32 %v2226_v21  ;;  %v2193_v60 = vsub.f32 %v13583_v24, %v2175_v38  ;;  %2242 = vadd.xlane.f32.xlu0 %v13626_v29 }
 0x652   : > { %2248 = vadd.xlane.f32.xlu1 %v13628_v1  ;;  %12125 = vpow2.f32 %v2214_v27 }
 0x653   : > { %v2222_v48 = vmul.f32 1.442695, %v2193_v60 }
 0x655   : > { %2256 = vadd.xlane.f32.xlu0 %v13633_v63  ;;  %12127 = vpow2.f32 %v2222_v48 }
 0x656   : > { %2244 = vadd.xlane.f32.xlu1 %v13635_v51 }
 0x659   : > { %2252 = vadd.xlane.f32.xlu0 %v13639_v49 }
 0x65a   : > { %2250 = vadd.xlane.f32.xlu1 %v13641_v47 }
 0x65b   : > { %v13645_v24 = vpop.eup %12123 }
 0x65c   : > { %v13647_v20 = vpop.eup %12125 }
 0x65d   : > { %2258 = vadd.xlane.f32.xlu0 %v13645_v24 }
 0x65e   : > { %2246 = vadd.xlane.f32.xlu1 %v13647_v20 }
 0x65f   : > { %v13651_v50 = vpop.eup %12127 }
 0x662   : > { %2254 = vadd.xlane.f32.xlu1 %v13651_v50 }
 0x673   : > { %2540 = vrot.lane.b32.xlu1 %v13117_v30, %s12719_s24  ;;  %2538 = vrot.lane.b32.xlu0 %v13119_v32, %s12719_s24 }
 0x677   : > { %2512 = vrot.lane.b32.xlu1 %v13079_v40, %s12719_s24  ;;  %2510 = vrot.lane.b32.xlu0 %v13083_v43, %s12719_s24 }
 0x67b   : > { %2516 = vrot.lane.b32.xlu1 %v13101_v5, %s12719_s24  ;;  %2514 = vrot.lane.b32.xlu0 %v13105_v9, %s12719_s24 }
 0x67f   : > { %2520 = vrot.lane.b32.xlu1 %v13121_v34, %s12719_s24  ;;  %2518 = vrot.lane.b32.xlu0 %v13125_v37, %s12719_s24 }
 0x683   : > { %2524 = vrot.lane.b32.xlu1 %v13138_v54, %s12719_s24  ;;  %2522 = vrot.lane.b32.xlu0 %v13142_v56, %s12719_s24 }
 0x687   : > { %2841 = vrot.lane.b32.xlu1 %v13146_v3, %s12719_s24  ;;  %2839 = vrot.lane.b32.xlu0 %v13148_v8, %s12719_s24 }
 0x68b   : > { %2845 = vrot.lane.b32.xlu1 %v13157_v22, %s12719_s24  ;;  %2843 = vrot.lane.b32.xlu0 %v13160_v23, %s12719_s24 }
 0x68f   : > { %2849 = vrot.lane.b32.xlu1 %v13169_v39, %s12719_s24  ;;  %2847 = vrot.lane.b32.xlu0 %v13172_v4, %s12719_s24 }
 0x693   : > { %2853 = vrot.lane.b32.xlu1 %v13179_v52, %s12719_s24  ;;  %2851 = vrot.lane.b32.xlu0 %v13182_v55, %s12719_s24  ;;  %s12721_s24 = smov 96  }
 0x697   : > { %3059 = vrot.lane.b32.xlu1 %v13049_v14, %s12720_s29  ;;  %3057 = vrot.lane.b32.xlu0 %v13055_v16, %s12720_s29 }
 0x69e   : > { %v2233_v46 = vpop.xlane.xlu1 %2232 }
 0x6a1   : > { %v2231_v11 = vpop.xlane.xlu0 %2230 }
 0x6a2   : > { %12129 = vrcp.f32 %v2231_v11  ;;  %v2229_v57 = vpop.xlane.xlu1 %2228 }
 0x6a3   : > { %12131 = vrcp.f32 %v2229_v57 }
 0x6a4   : > { %12133 = vrcp.f32 %v2233_v46 }
 0x6a5   : > { %v2535_v12 = vpop.permute.xlu0 %2534 }
 0x6a6   : > { %v2235_v6 = vpop.xlane.xlu1 %2234 }
 0x6a7   : > { %12135 = vrcp.f32 %v2235_v6 }
 0x6ac   : > { %v12130_v25 = vpop.eup %12129 }
 0x6ad   : > { %v12132_v15 = vpop.eup %12131  ;;  %v2277_v58 = vmul.f32 %v12130_v25, %v13591_v17  ;;  %v2570_v17 = vsel %vm1544_vm3, %v13586_v41, 0 }
 0x6ae   : > { %v2276_v53 = vmul.f32 %v12132_v15, %v13593_v10  ;;  %v12134_v61 = vpop.eup %12133  ;;  %v2576_v10 = vsel %vm1544_vm3, %v13615_v33, 0 }
 0x6af   : > { %v2278_v35 = vmul.f32 %v12134_v61, %v13588_v42  ;;  %v2573_v42 = vsel %vm1544_vm3, %v2531_v13, 0 }
 0x6b0   : > { %v2292_v19 = vpack.c.bf16 %v2277_v58, %v2276_v53 }
 0x6b1   : > { %v12136_v36 = vpop.eup %12135 }
 0x6b2   : > { %v2279_v59 = vmul.f32 %v12136_v36, %v13597_v62  ;;  %11348 = vmatprep.mubr.bf16.mxu1 %v2292_v19  ;;  %v2579_v62 = vsel %vm1544_vm3, %v2535_v12, 0 }
 0x6b4   : > { %v2293_v18 = vpack.c.bf16 %v2279_v59, %v2278_v35 }
 0x6b6   : > { %11349 = vmatmul.mubr.bf16.vlgmr.msra.gmra.mrb[32].mxu1 %v2293_v18 }
 0x6b7   : > { %11365 = vmatpush3.bf16.xpose.msra.mxu1 %v2567_v45 }
 0x6b8   : > { %11807 = vmatprep.subr.msk.bf16.mxu1 %vm1544_vm3, %v13586_v41  ;;  %v2537_v41 = vpop.permute.xlu1 %2536 }
 0x6b9   : > { %v2582_v60 = vsel %vm1544_vm3, %v2537_v41, 0 }
 0x6bf   : > { %11367 = vmatpush3.bf16.xpose.msra.mxu1 %v2570_v17 }
 0x6c0   : > { %11808 = vmatprep.subr.msk.bf16.mxu1 %vm1544_vm3, %v2531_v13 }
 0x6c7   : > { %11369 = vmatpush3.bf16.xpose.msra.mxu1 %v2573_v42 }
 0x6c8   : > { %11809 = vmatprep.subr.msk.bf16.mxu1 %vm1544_vm3, %v13615_v33 }
 0x6cf   : > { %11371 = vmatpush3.bf16.xpose.msra.mxu1 %v2576_v10 }
 0x6d0   : > { %11810 = vmatprep.subr.msk.bf16.mxu1 %vm1544_vm3, %v2535_v12 }
 0x6d6   : > { %v2241_v27 = vpop.xlane.xlu0 %2240 }
 0x6d7   : > { %11373 = vmatpush3.bf16.xpose.msra.mxu1 %v2579_v62 }
 0x6d8   : > { %11811 = vmatprep.subr.msk.bf16.mxu1 %vm1544_vm3, %v2537_v41 }
 0x6da   : > { %v2237_v21 = vpop.xlane.xlu0 %2236 }
 0x6db   : > { %12137 = vrcp.f32 %v2237_v21  ;;  %v2239_v38 = vpop.xlane.xlu1 %2238 }
 0x6dc   : > { %12139 = vrcp.f32 %v2239_v38 }
 0x6dd   : > { %12141 = vrcp.f32 %v2241_v27 }
 0x6de   : > { %v2243_v48 = vpop.xlane.xlu0 %2242 }
 0x6df   : > { %11375 = vmatpush3.bf16.xpose.msra.mxu1 %v2582_v60  ;;  %12143 = vrcp.f32 %v2243_v48  ;;  %v2249_v33 = vpop.xlane.xlu1 %2248 }
 0x6e2   : > { %v2257_v13 = vpop.xlane.xlu0 %2256 }
 0x6e3   : > { %v2245_v46 = vpop.xlane.xlu1 %2244 }
 0x6e5   : > { %v12138_v11 = vpop.eup %12137 }
 0x6e6   : > { %v12140_v57 = vpop.eup %12139  ;;  %v2253_v6 = vpop.xlane.xlu0 %2252  ;;  %v2280_v25 = vmul.f32 %v12138_v11, %v13619_v0 }
 0x6e7   : > { %v12142_v15 = vpop.eup %12141  ;;  %v2251_v58 = vpop.xlane.xlu1 %2250  ;;  %v2281_v53 = vmul.f32 %v12140_v57, %v13621_v31 }
 0x6e8   : > { %12145 = vrcp.f32 %v2251_v58  ;;  %v2282_v35 = vmul.f32 %v12142_v15, %v13613_v7 }
 0x6e9   : > { %v12144_v61 = vpop.eup %12143  ;;  %v2294_v19 = vpack.c.bf16 %v2281_v53, %v2280_v25  ;;  %12147 = vrcp.f32 %v2245_v46 }
 0x6ea   : > { %v2259_v36 = vpop.xlane.xlu0 %2258  ;;  %v2283_v59 = vmul.f32 %v12144_v61, %v13626_v29  ;;  %12149 = vrcp.f32 %v2249_v33 }
 0x6eb   : > { %v2247_v18 = vpop.xlane.xlu1 %2246  ;;  %11352 = vmatprep.mubr.bf16.mxu1 %v2294_v19 }
 0x6ec   : > { %12151 = vrcp.f32 %v2247_v18  ;;  %v2295_v45 = vpack.c.bf16 %v2283_v59, %v2282_v35 }
 0x6ed   : > { %12153 = vrcp.f32 %v2253_v6 }
 0x6ee   : > { %11353 = vmatmul.mubr.bf16.gmra.mrb[36].mxu1 %v2295_v45  ;;  %v2539_v0 = vpop.permute.xlu0 %2538 }
 0x6ef   : > { %v2255_v17 = vpop.xlane.xlu1 %2254  ;;  %11812 = vmatprep.subr.msk.bf16.mxu1 %vm1544_vm3, %v2539_v0  ;;  %v2585_v31 = vsel %vm1544_vm3, %v2539_v0, 0 }
 0x6f0   : > { %12155 = vrcp.f32 %v2255_v17  ;;  %11377 = vmatpush3.bf16.xpose.msra.mxu1 %v2585_v31 }
 0x6f1   : > { %12157 = vrcp.f32 %v2259_v36 }
 0x6f2   : > { %v2511_v42 = vpop.permute.xlu0 %2510  ;;  %v12146_v7 = vpop.eup %12145  ;;  %12159 = vrcp.f32 %v2257_v13 }
 0x6f3   : > { %v2541_v29 = vpop.permute.xlu1 %2540  ;;  %v12148_v10 = vpop.eup %12147  ;;  %v2287_v41 = vmul.f32 %v12146_v7, %v13641_v47 }
 0x6f4   : > { %11813 = vmatprep.subr.msk.bf16.mxu1 %vm1544_vm3, %v2541_v29  ;;  %v12150_v12 = vpop.eup %12149  ;;  %v2588_v38 = vsel %vm1544_vm3, %v2541_v29, 0  ;;  %v2284_v60 = vmul.f32 %v12148_v10, %v13635_v51 }
 0x6f5   : > { %v2286_v13 = vmul.f32 %v12150_v12, %v13628_v1 }
 0x6f6   : > { %v12152_v62 = vpop.eup %12151  ;;  %v2515_v27 = vpop.permute.xlu0 %2514 }
 0x6f7   : > { %v2513_v21 = vpop.permute.xlu1 %2512  ;;  %v2285_v48 = vmul.f32 %v12152_v62, %v13647_v20  ;;  %v12154_v33 = vpop.eup %12153  ;;  %v2297_v6 = vpack.c.bf16 %v2287_v41, %v2286_v13 }
 0x6f8   : > { %11379 = vmatpush3.bf16.xpose.msra.mxu1 %v2588_v38  ;;  %v2288_v47 = vmul.f32 %v12154_v33, %v13639_v49 }
 0x6f9   : > { %v2296_v46 = vpack.c.bf16 %v2285_v48, %v2284_v60 }
 0x6fa   : > { %v12156_v11 = vpop.eup %12155  ;;  %v2519_v57 = vpop.permute.xlu0 %2518 }
 0x6fb   : > { %v12158_v25 = vpop.eup %12157  ;;  %v2517_v15 = vpop.permute.xlu1 %2516  ;;  %11356 = vmatprep.mubr.bf16.mxu1 %v2296_v46  ;;  %v2289_v58 = vmul.f32 %v12156_v11, %v13651_v50 }
 0x6fc   : > { %11357 = vmatmul.mubr.bf16.gmra.mrb[40].mxu1 %v2297_v6  ;;  %v12160_v53 = vpop.eup %12159  ;;  %v2291_v20 = vmul.f32 %v12158_v25, %v13645_v24 }
 0x6fd   : > { %v2298_v51 = vpack.c.bf16 %v2289_v58, %v2288_v47  ;;  %v2290_v1 = vmul.f32 %v12160_v53, %v13633_v63  ;;  %v13786_v58 = vld [vmem:[%s17694_s2 + $0x8] sm:$0xff] }
 0x6fe   : > { %v2523_v61 = vpop.permute.xlu0 %2522 }
 0x6ff   : > { %v2521_v19 = vpop.permute.xlu1 %2520  ;;  %11360 = vmatprep.mubr.bf16.mxu1 %v2298_v51  ;;  %v2299_v35 = vpack.c.bf16 %v2291_v20, %v2290_v1  ;;  %v13794_v51 = vld [vmem:[%s17694_s2] sm:$0xff] }
 0x702   : > { %v2840_v36 = vpop.permute.xlu0 %2839 }
 0x703   : > { %v2525_v59 = vpop.permute.xlu1 %2524  ;;  %11396 = vmatprep.subr.bf16.mxu0 %v2840_v36 }
 0x704   : > { %11361 = vmatmul.mubr.bf16.gmra.mrb[44].mxu1 %v2299_v35  ;;  %11397 = vmatpush3.bf16.msra.mxu0 %v2840_v36 }
 0x705   : > { %11380 = vmatprep.mubr.msk.bf16.mxu1 %vm1544_vm3, %v2511_v42 }
 0x706   : > { %v2844_v50 = vpop.permute.xlu0 %2843 }
 0x707   : > { %v2842_v49 = vpop.permute.xlu1 %2841 }
 0x708   : > { %11398 = vmatprep.subr.bf16.mxu0 %v2842_v49 }
 0x709   : > { %11399 = vmatpush3.bf16.msra.mxu0 %v2842_v49 }
 0x70a   : > { %11400 = vmatprep.subr.bf16.mxu0 %v2844_v50  ;;  %v2848_v63 = vpop.permute.xlu0 %2847 }
 0x70b   : > { %v2846_v24 = vpop.permute.xlu1 %2845 }
 0x70c   : > { %11381 = vmatmul.mubr.msk.bf16.vlgmr.msra.gmra.mrb[48].mxu1 %vm1544_vm3, %v2513_v21 }
 0x70d   : > { %11384 = vmatprep.mubr.msk.bf16.mxu1 %vm1544_vm3, %v2515_v27  ;;  %11401 = vmatpush3.bf16.msra.mxu0 %v2844_v50 }
 0x70e   : > { %11402 = vmatprep.subr.bf16.mxu0 %v2846_v24  ;;  %v2852_v45 = vpop.permute.xlu0 %2851 }
 0x70f   : > { %v2850_v18 = vpop.permute.xlu1 %2849 }
 0x711   : > { %11403 = vmatpush3.bf16.msra.mxu0 %v2846_v24  ;;  %v13821_v24 = vld [vmem:[%s17694_s2 + $0x30] sm:$0xff] }
 0x712   : > { %11404 = vmatprep.subr.bf16.mxu0 %v2848_v63  ;;  %v13737_v17 = vpop.permute.xlu0 %3057 }
 0x713   : > { %v2854_v0 = vpop.permute.xlu1 %2853 }
 0x714   : > { %11385 = vmatmul.mubr.msk.bf16.gmra.mrb[52].mxu1 %vm1544_vm3, %v2517_v15 }
 0x715   : > { %11388 = vmatprep.mubr.msk.bf16.mxu1 %vm1544_vm3, %v2519_v57  ;;  %11405 = vmatpush3.bf16.msra.mxu0 %v2848_v63  ;;  %v13777_v57 = vld [vmem:[%s17694_s2 + $0x10] sm:$0xff] }
 0x716   : > { %11406 = vmatprep.subr.bf16.mxu0 %v2850_v18 }
 0x719   : > { %11407 = vmatpush3.bf16.msra.mxu0 %v2850_v18  ;;  %v13830_v18 = vld [vmem:[%s17694_s2 + $0x28] sm:$0xff] }
 0x71a   : > { %11408 = vmatprep.subr.bf16.mxu0 %v2852_v45 }
 0x71c   : > { %11389 = vmatmul.mubr.msk.bf16.gmra.mrb[56].mxu1 %vm1544_vm3, %v2521_v19  ;;  %v13804_v19 = vld [vmem:[%s17694_s2 + $0x18] sm:$0xff] }
 0x71d   : > { %11392 = vmatprep.mubr.msk.bf16.mxu1 %vm1544_vm3, %v2523_v61  ;;  %11409 = vmatpush3.bf16.msra.mxu0 %v2852_v45 }
 0x71e   : > { %11410 = vmatprep.subr.bf16.mxu0 %v2854_v0 }
 0x721   : > { %11411 = vmatpush3.bf16.msra.mxu0 %v2854_v0 }
 0x722   : > { %11814 = vmatprep.subr.msk.bf16.mxu0 %vm1544_vm3, %v13737_v17 }
 0x724   : > { %11393 = vmatmul.mubr.msk.bf16.gmra.mrb[60].mxu1 %vm1544_vm3, %v2525_v59  ;;  %v13812_v59 = vld [vmem:[%s17694_s2 + $0x38] sm:$0xff] }
 0x789   : > { %v13742_v31 = vpop.f32.mrb[32].mxu1 }
 0x78a   : > { %17803 = vst [vmem:[#allocation20_spill] sm:$0xff] %v13742_v31  ;;  %v13744_v42 = vpop.f32.mrb[33].mxu1 }
 0x78b   : > { %17804 = vst [vmem:[#allocation22_spill] sm:$0xff] %v13744_v42  ;;  %v13746_v7 = vpop.f32.mrb[34].mxu1 }
 0x78c   : > { %17805 = vst [vmem:[#allocation21_spill] sm:$0xff] %v13746_v7  ;;  %v13748_v29 = vpop.f32.mrb[35].mxu1 }
 0x78d   : > { %17806 = vst [vmem:[#allocation24_spill] sm:$0xff] %v13748_v29 }
 0x7c1   : > { %v13750_v10 = vpop.f32.mrb[36].mxu1 }
 0x7c2   : > { %17807 = vst [vmem:[#allocation23_spill] sm:$0xff] %v13750_v10  ;;  %v13752_v12 = vpop.f32.mrb[37].mxu1 }
 0x7c3   : > { %17808 = vst [vmem:[#allocation25_spill] sm:$0xff] %v13752_v12  ;;  %v13754_v62 = vpop.f32.mrb[38].mxu1  ;;  %v13922_v12 = vpop.permute.xlu1 %3059 }
 0x7c4   : > { %17809 = vst [vmem:[#allocation26_spill] sm:$0xff] %v13754_v62  ;;  %v13756_v27 = vpop.f32.mrb[39].mxu1 }
 0x7c5   : > { %17810 = vst [vmem:[#allocation27_spill] sm:$0xff] %v13756_v27 }
 0x7cf   : > { %v13758_v41 = vpop.f32.mrb[40].mxu1 }
 0x7d0   : > { %17811 = vst [vmem:[#allocation28_spill] sm:$0xff] %v13758_v41  ;;  %v13760_v21 = vpop.f32.mrb[41].mxu1 }
 0x7d1   : > { %17812 = vst [vmem:[#allocation29_spill] sm:$0xff] %v13760_v21  ;;  %v13762_v38 = vpop.f32.mrb[42].mxu1 }
 0x7d2   : > { %17813 = vst [vmem:[#allocation30_spill] sm:$0xff] %v13762_v38  ;;  %v13764_v60 = vpop.f32.mrb[43].mxu1 }
 0x7d3   : > { %17814 = vst [vmem:[#allocation31_spill] sm:$0xff] %v13764_v60 }
 0x7d7   : > { %v13766_v48 = vpop.f32.mrb[44].mxu1 }
 0x7d8   : > { %17815 = vst [vmem:[#allocation32_spill] sm:$0xff] %v13766_v48  ;;  %v13768_v33 = vpop.f32.mrb[45].mxu1  ;;  %v13866_v48 = vld [vmem:[%s17694_s2 + $0x48] sm:$0xff] }
 0x7d9   : > { %17816 = vst [vmem:[#allocation33_spill] sm:$0xff] %v13768_v33  ;;  %v13770_v13 = vpop.f32.mrb[46].mxu1  ;;  %17821 = vst [vmem:[#allocation38_spill] sm:$0xff] %v13866_v48  ;;  %v13875_v33 = vld [vmem:[%s17694_s2 + $0x40] sm:$0xff] }
 0x7da   : > { %17817 = vst [vmem:[#allocation34_spill] sm:$0xff] %v13770_v13  ;;  %v13772_v46 = vpop.f32.mrb[47].mxu1  ;;  %17822 = vst [vmem:[#allocation39_spill] sm:$0xff] %v13875_v33 }
 0x7db   : > { %17818 = vst [vmem:[#allocation35_spill] sm:$0xff] %v13772_v46 }
 0x7df   : > { %v11382_v11 = vpop.f32.mrb[48].mxu1 }
 0x7e0   : > { %v13780_v6 = vadd.f32 %v13777_v57, %v11382_v11  ;;  %v2624_v25 = vpop.f32.mrb[49].mxu1  ;;  %v13839_v11 = vld [vmem:[%s17694_s2 + $0x20] sm:$0xff] }
 0x7e1   : > { %v11383_v15 = vpop.f32.mrb[50].mxu1  ;;  %v13797_v61 = vadd.f32 %v13794_v51, %v2624_v25 }
 0x7e2   : > { %2691 = vmax.xlane.f32.xlu0 %v13780_v6  ;;  %v2627_v47 = vpop.f32.mrb[51].mxu1  ;;  %v13807_v1 = vadd.f32 %v13804_v19, %v11383_v15 }
 0x7e3   : > { %v13789_v53 = vadd.f32 %v13786_v58, %v2627_v47 }
 0x7e5   : > { %2689 = vmax.xlane.f32.xlu1 %v13789_v53 }
 0x7e6   : > { %2687 = vmax.xlane.f32.xlu0 %v13797_v61 }
 0x7e7   : > { %v11386_v20 = vpop.f32.mrb[52].mxu1 }
 0x7e8   : > { %v2640_v36 = vpop.f32.mrb[53].mxu1  ;;  %v13824_v63 = vadd.f32 %v13821_v24, %v11386_v20  ;;  %v13848_v20 = vld [vmem:[%s17694_s2 + $0x58] sm:$0xff] }
 0x7e9   : > { %v11387_v35 = vpop.f32.mrb[54].mxu1  ;;  %v13842_v25 = vadd.f32 %v13839_v11, %v2640_v36  ;;  %17819 = vst [vmem:[#allocation36_spill] sm:$0xff] %v13848_v20  ;;  %v13857_v36 = vld [vmem:[%s17694_s2 + $0x50] sm:$0xff] }
 0x7ea   : > { %v13815_v49 = vadd.f32 %v13812_v59, %v11387_v35  ;;  %2693 = vmax.xlane.f32.xlu0 %v13807_v1  ;;  %v2643_v50 = vpop.f32.mrb[55].mxu1  ;;  %17820 = vst [vmem:[#allocation37_spill] sm:$0xff] %v13857_v36 }
 0x7eb   : > { %v13833_v45 = vadd.f32 %v13830_v18, %v2643_v50 }
 0x7ec   : > { %2701 = vmax.xlane.f32.xlu1 %v13815_v49 }
 0x7ee   : > { %2699 = vmax.xlane.f32.xlu0 %v13824_v63 }
 0x7ef   : > { %v11390_v0 = vpop.f32.mrb[56].mxu1 }
 0x7f0   : > { %2697 = vmax.xlane.f32.xlu1 %v13833_v45  ;;  %v2656_v15 = vpop.f32.mrb[57].mxu1  ;;  %v13860_v13 = vadd.f32 %v13857_v36, %v11390_v0 }
 0x7f1   : > { %v11391_v47 = vpop.f32.mrb[58].mxu1  ;;  %v13878_v0 = vadd.f32 %v13875_v33, %v2656_v15  ;;  %v13894_v15 = vld [vmem:[%s17694_s2 + $0x60] sm:$0xff] }
 0x7f2   : > { %v13851_v35 = vadd.f32 %v13848_v20, %v11391_v47  ;;  %2695 = vmax.xlane.f32.xlu0 %v13842_v25  ;;  %v2659_v50 = vpop.f32.mrb[59].mxu1  ;;  %17824 = vst [vmem:[#allocation41_spill] sm:$0xff] %v13894_v15 }
 0x7f3   : > { %v13869_v47 = vadd.f32 %v13866_v48, %v2659_v50  ;;  %v13885_v50 = vld [vmem:[%s17694_s2 + $0x70] sm:$0xff] }
 0x7f4   : > { %2709 = vmax.xlane.f32.xlu1 %v13851_v35  ;;  %17823 = vst [vmem:[#allocation40_spill] sm:$0xff] %v13885_v50 }
 0x7f6   : > { %2707 = vmax.xlane.f32.xlu0 %v13860_v13 }
 0x7f7   : > { %v11394_v46 = vpop.f32.mrb[60].mxu1 }
 0x7f8   : > { %2705 = vmax.xlane.f32.xlu1 %v13869_v47  ;;  %v2672_v38 = vpop.f32.mrb[61].mxu1  ;;  %v13888_v21 = vadd.f32 %v13885_v50, %v11394_v46  ;;  %v13907_v46 = vld [vmem:[%s17694_s2 + $0x78] sm:$0xff] }
 0x7f9   : > { %v11395_v41 = vpop.f32.mrb[62].mxu1  ;;  %v13897_v62 = vadd.f32 %v13894_v15, %v2672_v38  ;;  %17825 = vst [vmem:[#allocation42_spill] sm:$0xff] %v13907_v46  ;;  %v13916_v38 = vld [vmem:[%s17694_s2 + $0x68] sm:$0xff] }
 0x7fa   : > { %2703 = vmax.xlane.f32.xlu0 %v13878_v0  ;;  %v2675_v60 = vpop.f32.mrb[63].mxu1  ;;  %v13910_v10 = vadd.f32 %v13907_v46, %v11395_v41  ;;  %17826 = vst [vmem:[#allocation43_spill] sm:$0xff] %v13916_v38 }
 0x7fb   : > { %v13919_v27 = vadd.f32 %v13916_v38, %v2675_v60 }
 0x7fe   : > { %2715 = vmax.xlane.f32.xlu0 %v13888_v21 }
 0x802   : > { %2711 = vmax.xlane.f32.xlu0 %v13897_v62 }
 0x809   : > { %3063 = vrot.lane.b32.xlu1 %v17797_v28, %s12720_s29 }
 0x818   : > { %3061 = vrot.lane.b32.xlu0 %v17798_v44, %s12720_s29 }
 0x82d   : > { %2717 = vmax.xlane.f32.xlu1 %v13910_v10 }
 0x831   : > { %2713 = vmax.xlane.f32.xlu1 %v13919_v27 }
 0x86f   : > { %v2692_v7 = vpop.xlane.xlu0 %2691 }
 0x870   : > { %v2721_v42 = vsub.f32 %v13780_v6, %v2692_v7 }
 0x872   : > { %v2739_v31 = vmul.f32 1.442695, %v2721_v42  ;;  %v2690_v41 = vpop.xlane.xlu1 %2689 }
 0x873   : > { %v2720_v29 = vsub.f32 %v13789_v53, %v2690_v41  ;;  %v2688_v46 = vpop.xlane.xlu0 %2687 }
 0x874   : > { %12161 = vpow2.f32 %v2739_v31  ;;  %v2719_v44 = vsub.f32 %v13797_v61, %v2688_v46 }
 0x875   : > { %v2737_v28 = vmul.f32 1.442695, %v2720_v29 }
 0x876   : > { %v2735_v15 = vmul.f32 1.442695, %v2719_v44 }
 0x877   : > { %12163 = vpow2.f32 %v2737_v28  ;;  %v2694_v60 = vpop.xlane.xlu0 %2693 }
 0x878   : > { %12165 = vpow2.f32 %v2735_v15  ;;  %v2722_v38 = vsub.f32 %v13807_v1, %v2694_v60 }
 0x879   : > { %v2702_v29 = vpop.xlane.xlu1 %2701 }
 0x87a   : > { %v2741_v50 = vmul.f32 1.442695, %v2722_v38  ;;  %v2726_v60 = vsub.f32 %v13815_v49, %v2702_v29 }
 0x87b   : > { %v2700_v28 = vpop.xlane.xlu0 %2699 }
 0x87c   : > { %12167 = vpow2.f32 %v2741_v50  ;;  %v2725_v53 = vsub.f32 %v13824_v63, %v2700_v28  ;;  %v2749_v36 = vmul.f32 1.442695, %v2726_v60 }
 0x87d   : > { %v2698_v61 = vpop.xlane.xlu1 %2697 }
 0x87e   : > { %v13928_v33 = vpop.eup %12161  ;;  %v2747_v50 = vmul.f32 1.442695, %v2725_v53  ;;  %v2724_v46 = vsub.f32 %v13833_v45, %v2698_v61 }
 0x87f   : > { %2771 = vadd.xlane.f32.xlu1 %v13928_v33  ;;  %v2696_v31 = vpop.xlane.xlu0 %2695 }
 0x880   : > { %v2723_v15 = vsub.f32 %v13842_v25, %v2696_v31  ;;  %12169 = vpow2.f32 %v2747_v50  ;;  %v2745_v48 = vmul.f32 1.442695, %v2724_v46 }
 0x881   : > { %v13931_v42 = vpop.eup %12163  ;;  %v2710_v38 = vpop.xlane.xlu1 %2709 }
 0x882   : > { %v13933_v7 = vpop.eup %12165  ;;  %2769 = vadd.xlane.f32.xlu0 %v13931_v42  ;;  %v2730_v49 = vsub.f32 %v13851_v35, %v2710_v38 }
 0x883   : > { %2767 = vadd.xlane.f32.xlu1 %v13933_v7  ;;  %v2708_v6 = vpop.xlane.xlu0 %2707 }
 0x885   : > { %v2706_v20 = vpop.xlane.xlu1 %2705 }
 0x886   : > { %v13937_v44 = vpop.eup %12167 }
 0x887   : > { %2773 = vadd.xlane.f32.xlu1 %v13937_v44  ;;  %v2704_v1 = vpop.xlane.xlu0 %2703 }
 0x888   : > { %v2727_v25 = vsub.f32 %v13878_v0, %v2704_v1 }
 0x88a   : > { %v2751_v29 = vmul.f32 1.442695, %v2727_v25  ;;  %v13953_v61 = vpop.eup %12169 }
 0x88b   : > { %v2716_v41 = vpop.xlane.xlu0 %2715 }
 0x88c   : > { %v2733_v63 = vsub.f32 %v13888_v21, %v2716_v41  ;;  %v2728_v21 = vsub.f32 %v13869_v47, %v2706_v20 }
 0x88e   : > { %v2763_v45 = vmul.f32 1.442695, %v2733_v63  ;;  %v2753_v0 = vmul.f32 1.442695, %v2728_v21 }
 0x88f   : > { %v2712_v31 = vpop.xlane.xlu0 %2711 }
 0x890   : > { %v2731_v53 = vsub.f32 %v13897_v62, %v2712_v31 }
 0x898   : > { %3065 = vrot.lane.b32.xlu0 %v17801_v2, %s12720_s29  ;;  %3067 = vrot.lane.b32.xlu1 %v17802_v26, %s12720_s29  ;;  %v2743_v2 = vmul.f32 1.442695, %v2723_v15  ;;  %v2729_v26 = vsub.f32 %v13860_v13, %v2708_v6  ;;  %v13955_v13 = vpop.permute.xlu1 %3063 }
 0x89a   : > { %12171 = vpow2.f32 %v2743_v2  ;;  %v2755_v28 = vmul.f32 1.442695, %v2729_v26  ;;  %v2759_v2 = vmul.f32 1.442695, %v2731_v53  ;;  %v2757_v26 = vmul.f32 1.442695, %v2730_v49 }
 0x89b   : > { %12173 = vpow2.f32 %v2745_v48 }
 0x89c   : > { %12175 = vpow2.f32 %v2749_v36 }
 0x89d   : > { %12177 = vpow2.f32 %v2755_v28  ;;  %v3062_v28 = vpop.permute.xlu0 %3061 }
 0x89e   : > { %12179 = vpow2.f32 %v2763_v45 }
 0x89f   : > { %12181 = vpow2.f32 %v2751_v29 }
 0x8a0   : > { %12183 = vpow2.f32 %v2759_v2 }
 0x8a1   : > { %12185 = vpow2.f32 %v2757_v26 }
 0x8a4   : > { %v13959_v48 = vpop.eup %12171 }
 0x8a5   : > { %v13961_v62 = vpop.eup %12173 }
 0x8a6   : > { %v13966_v1 = vpop.eup %12175 }
 0x8a7   : > { %v13968_v20 = vpop.eup %12177 }
 0x8a8   : > { %v13973_v15 = vpop.eup %12179 }
 0x8a9   : > { %v13975_v46 = vpop.eup %12181 }
 0x8aa   : > { %v13979_v38 = vpop.eup %12183 }
 0x8ab   : > { %v13981_v41 = vpop.eup %12185 }
 0x8b7   : > { %2779 = vadd.xlane.f32.xlu0 %v13953_v61 }
 0x8ba   : > { %v2718_v36 = vpop.xlane.xlu1 %2717 }
 0x8bb   : > { %v2734_v35 = vsub.f32 %v13910_v10, %v2718_v36  ;;  %2775 = vadd.xlane.f32.xlu0 %v13959_v48 }
 0x8bc   : > { %2777 = vadd.xlane.f32.xlu1 %v13961_v62 }
 0x8bd   : > { %v2765_v6 = vmul.f32 1.442695, %v2734_v35 }
 0x8be   : > { %v2714_v50 = vpop.xlane.xlu1 %2713 }
 0x8bf   : > { %12187 = vpow2.f32 %v2765_v6  ;;  %v2732_v47 = vsub.f32 %v13919_v27, %v2714_v50  ;;  %2781 = vadd.xlane.f32.xlu0 %v13966_v1 }
 0x8c0   : > { %2787 = vadd.xlane.f32.xlu1 %v13968_v20  ;;  %12189 = vpow2.f32 %v2753_v0 }
 0x8c1   : > { %v2761_v10 = vmul.f32 1.442695, %v2732_v47  ;;  %v3098_v47 = vsel %vm1544_vm3, %v13737_v17, 0 }
 0x8c3   : > { %2795 = vadd.xlane.f32.xlu0 %v13973_v15  ;;  %12191 = vpow2.f32 %v2761_v10 }
 0x8c4   : > { %2783 = vadd.xlane.f32.xlu1 %v13975_v46 }
 0x8c7   : > { %2791 = vadd.xlane.f32.xlu0 %v13979_v38 }
 0x8c8   : > { %2789 = vadd.xlane.f32.xlu1 %v13981_v41 }
 0x8c9   : > { %v13985_v27 = vpop.eup %12187 }
 0x8ca   : > { %v13987_v60 = vpop.eup %12189 }
 0x8cb   : > { %2797 = vadd.xlane.f32.xlu0 %v13985_v27 }
 0x8cc   : > { %2785 = vadd.xlane.f32.xlu1 %v13987_v60 }
 0x8cd   : > { %v13991_v63 = vpop.eup %12191 }
 0x8d0   : > { %2793 = vadd.xlane.f32.xlu1 %v13991_v63 }
 0x8e1   : > { %3071 = vrot.lane.b32.xlu1 %v13117_v30, %s12720_s29  ;;  %3069 = vrot.lane.b32.xlu0 %v13119_v32, %s12720_s29 }
 0x8e5   : > { %3043 = vrot.lane.b32.xlu1 %v13079_v40, %s12720_s29  ;;  %3041 = vrot.lane.b32.xlu0 %v13083_v43, %s12720_s29 }
 0x8e9   : > { %3047 = vrot.lane.b32.xlu1 %v13101_v5, %s12720_s29  ;;  %3045 = vrot.lane.b32.xlu0 %v13105_v9, %s12720_s29 }
 0x8ed   : > { %3051 = vrot.lane.b32.xlu1 %v13121_v34, %s12720_s29  ;;  %3049 = vrot.lane.b32.xlu0 %v13125_v37, %s12720_s29 }
 0x8f1   : > { %3055 = vrot.lane.b32.xlu1 %v13138_v54, %s12720_s29  ;;  %3053 = vrot.lane.b32.xlu0 %v13142_v56, %s12720_s29 }
 0x8f5   : > { %3372 = vrot.lane.b32.xlu1 %v13146_v3, %s12720_s29  ;;  %3370 = vrot.lane.b32.xlu0 %v13148_v8, %s12720_s29 }
 0x8f9   : > { %3376 = vrot.lane.b32.xlu1 %v13157_v22, %s12720_s29  ;;  %3374 = vrot.lane.b32.xlu0 %v13160_v23, %s12720_s29 }
 0x8fd   : > { %3380 = vrot.lane.b32.xlu1 %v13169_v39, %s12720_s29  ;;  %3378 = vrot.lane.b32.xlu0 %v13172_v4, %s12720_s29 }
 0x901   : > { %3384 = vrot.lane.b32.xlu1 %v13179_v52, %s12720_s29  ;;  %3382 = vrot.lane.b32.xlu0 %v13182_v55, %s12720_s29  ;;  %s12722_s29 = smov 88  }
 0x905   : > { %3590 = vrot.lane.b32.xlu1 %v13049_v14, %s12721_s24  ;;  %3588 = vrot.lane.b32.xlu0 %v13055_v16, %s12721_s24 }
 0x90c   : > { %v2772_v25 = vpop.xlane.xlu1 %2771 }
 0x90f   : > { %v2770_v31 = vpop.xlane.xlu0 %2769 }
 0x910   : > { %12193 = vrcp.f32 %v2770_v31  ;;  %v2768_v45 = vpop.xlane.xlu1 %2767 }
 0x911   : > { %12195 = vrcp.f32 %v2768_v45 }
 0x912   : > { %12197 = vrcp.f32 %v2772_v25 }
 0x913   : > { %v3066_v17 = vpop.permute.xlu0 %3065 }
 0x914   : > { %v2774_v53 = vpop.xlane.xlu1 %2773 }
 0x915   : > { %12199 = vrcp.f32 %v2774_v53 }
 0x91a   : > { %v12194_v49 = vpop.eup %12193 }
 0x91b   : > { %v12196_v29 = vpop.eup %12195  ;;  %v2816_v2 = vmul.f32 %v12194_v49, %v13931_v42  ;;  %v3101_v42 = vsel %vm1544_vm3, %v13922_v12, 0 }
 0x91c   : > { %v2815_v26 = vmul.f32 %v12196_v29, %v13933_v7  ;;  %v12198_v21 = vpop.eup %12197  ;;  %v3107_v7 = vsel %vm1544_vm3, %v13955_v13, 0 }
 0x91d   : > { %v2817_v0 = vmul.f32 %v12198_v21, %v13928_v33  ;;  %v3104_v33 = vsel %vm1544_vm3, %v3062_v28, 0 }
 0x91e   : > { %v2831_v36 = vpack.c.bf16 %v2816_v2, %v2815_v26 }
 0x91f   : > { %v12200_v35 = vpop.eup %12199 }
 0x920   : > { %v2818_v6 = vmul.f32 %v12200_v35, %v13937_v44  ;;  %11412 = vmatprep.mubr.bf16.mxu0 %v2831_v36  ;;  %v3110_v44 = vsel %vm1544_vm3, %v3066_v17, 0 }
 0x922   : > { %v2832_v50 = vpack.c.bf16 %v2818_v6, %v2817_v0 }
 0x924   : > { %11413 = vmatmul.mubr.bf16.vlgmr.msra.gmra.mrb[64].mxu0 %v2832_v50 }
 0x925   : > { %11429 = vmatpush3.bf16.xpose.msra.mxu0 %v3098_v47 }
 0x926   : > { %11815 = vmatprep.subr.msk.bf16.mxu0 %vm1544_vm3, %v13922_v12  ;;  %v3068_v12 = vpop.permute.xlu1 %3067 }
 0x927   : > { %v3113_v31 = vsel %vm1544_vm3, %v3068_v12, 0 }
 0x92d   : > { %11431 = vmatpush3.bf16.xpose.msra.mxu0 %v3101_v42 }
 0x92e   : > { %11816 = vmatprep.subr.msk.bf16.mxu0 %vm1544_vm3, %v3062_v28 }
 0x935   : > { %11433 = vmatpush3.bf16.xpose.msra.mxu0 %v3104_v33 }
 0x936   : > { %11817 = vmatprep.subr.msk.bf16.mxu0 %vm1544_vm3, %v13955_v13 }
 0x93d   : > { %11435 = vmatpush3.bf16.xpose.msra.mxu0 %v3107_v7 }
 0x93e   : > { %11818 = vmatprep.subr.msk.bf16.mxu0 %vm1544_vm3, %v3066_v17 }
 0x944   : > { %v2780_v10 = vpop.xlane.xlu0 %2779 }
 0x945   : > { %11437 = vmatpush3.bf16.xpose.msra.mxu0 %v3110_v44 }
 0x946   : > { %11819 = vmatprep.subr.msk.bf16.mxu0 %vm1544_vm3, %v3068_v12 }
 0x948   : > { %v2776_v25 = vpop.xlane.xlu0 %2775 }
 0x949   : > { %12201 = vrcp.f32 %v2776_v25  ;;  %v2778_v28 = vpop.xlane.xlu1 %2777 }
 0x94a   : > { %12203 = vrcp.f32 %v2778_v28 }
 0x94b   : > { %12205 = vrcp.f32 %v2780_v10 }
 0x94c   : > { %v2782_v45 = vpop.xlane.xlu0 %2781 }
 0x94d   : > { %11439 = vmatpush3.bf16.xpose.msra.mxu0 %v3113_v31  ;;  %12207 = vrcp.f32 %v2782_v45  ;;  %v2788_v13 = vpop.xlane.xlu1 %2787 }
 0x950   : > { %v2796_v53 = vpop.xlane.xlu0 %2795 }
 0x951   : > { %v2784_v49 = vpop.xlane.xlu1 %2783 }
 0x953   : > { %v12202_v29 = vpop.eup %12201 }
 0x954   : > { %v12204_v2 = vpop.eup %12203  ;;  %v2792_v26 = vpop.xlane.xlu0 %2791  ;;  %v2819_v21 = vmul.f32 %v12202_v29, %v13959_v48 }
 0x955   : > { %v12206_v36 = vpop.eup %12205  ;;  %v2790_v35 = vpop.xlane.xlu1 %2789  ;;  %v2820_v0 = vmul.f32 %v12204_v2, %v13961_v62 }
 0x956   : > { %12209 = vrcp.f32 %v2790_v35  ;;  %v2821_v42 = vmul.f32 %v12206_v36, %v13953_v61 }
 0x957   : > { %v12208_v6 = vpop.eup %12207  ;;  %v2833_v50 = vpack.c.bf16 %v2820_v0, %v2819_v21  ;;  %12211 = vrcp.f32 %v2784_v49 }
 0x958   : > { %v2798_v47 = vpop.xlane.xlu0 %2797  ;;  %v2822_v33 = vmul.f32 %v12208_v6, %v13966_v1  ;;  %12213 = vrcp.f32 %v2788_v13 }
 0x959   : > { %v2786_v7 = vpop.xlane.xlu1 %2785  ;;  %11416 = vmatprep.mubr.bf16.mxu0 %v2833_v50 }
 0x95a   : > { %12215 = vrcp.f32 %v2786_v7  ;;  %v2834_v17 = vpack.c.bf16 %v2822_v33, %v2821_v42 }
 0x95b   : > { %12217 = vrcp.f32 %v2792_v26 }
 0x95c   : > { %11417 = vmatmul.mubr.bf16.gmra.mrb[68].mxu0 %v2834_v17  ;;  %v3070_v48 = vpop.permute.xlu0 %3069 }
 0x95d   : > { %v2794_v44 = vpop.xlane.xlu1 %2793  ;;  %11820 = vmatprep.subr.msk.bf16.mxu0 %vm1544_vm3, %v3070_v48  ;;  %v3116_v62 = vsel %vm1544_vm3, %v3070_v48, 0 }
 0x95e   : > { %12219 = vrcp.f32 %v2794_v44  ;;  %11441 = vmatpush3.bf16.xpose.msra.mxu0 %v3116_v62 }
 0x95f   : > { %12221 = vrcp.f32 %v2798_v47 }
 0x960   : > { %v3042_v10 = vpop.permute.xlu0 %3041  ;;  %v12210_v61 = vpop.eup %12209  ;;  %12223 = vrcp.f32 %v2796_v53 }
 0x961   : > { %v3072_v1 = vpop.permute.xlu1 %3071  ;;  %v12212_v12 = vpop.eup %12211  ;;  %v2826_v45 = vmul.f32 %v12210_v61, %v13981_v41 }
 0x962   : > { %11821 = vmatprep.subr.msk.bf16.mxu0 %vm1544_vm3, %v3072_v1  ;;  %v12214_v25 = vpop.eup %12213  ;;  %v3119_v49 = vsel %vm1544_vm3, %v3072_v1, 0  ;;  %v2823_v29 = vmul.f32 %v12212_v12, %v13975_v46 }
 0x963   : > { %v2825_v53 = vmul.f32 %v12214_v25, %v13968_v20 }
 0x964   : > { %v12216_v28 = vpop.eup %12215  ;;  %v3046_v31 = vpop.permute.xlu0 %3045 }
 0x965   : > { %v3044_v13 = vpop.permute.xlu1 %3043  ;;  %v2824_v2 = vmul.f32 %v12216_v28, %v13987_v60  ;;  %v12218_v26 = vpop.eup %12217  ;;  %v2836_v0 = vpack.c.bf16 %v2826_v45, %v2825_v53 }
 0x966   : > { %11443 = vmatpush3.bf16.xpose.msra.mxu0 %v3119_v49  ;;  %v2827_v41 = vmul.f32 %v12218_v26, %v13979_v38 }
 0x967   : > { %v2835_v21 = vpack.c.bf16 %v2824_v2, %v2823_v29 }
 0x968   : > { %v12220_v36 = vpop.eup %12219  ;;  %v3050_v35 = vpop.permute.xlu0 %3049 }
 0x969   : > { %v12222_v6 = vpop.eup %12221  ;;  %v3048_v50 = vpop.permute.xlu1 %3047  ;;  %11420 = vmatprep.mubr.bf16.mxu0 %v2835_v21  ;;  %v2828_v47 = vmul.f32 %v12220_v36, %v13991_v63 }
 0x96a   : > { %11421 = vmatmul.mubr.bf16.gmra.mrb[72].mxu0 %v2836_v0  ;;  %v12224_v42 = vpop.eup %12223  ;;  %v2830_v60 = vmul.f32 %v12222_v6, %v13985_v27 }
 0x96b   : > { %v2837_v46 = vpack.c.bf16 %v2828_v47, %v2827_v41  ;;  %v2829_v20 = vmul.f32 %v12224_v42, %v13973_v15 }
 0x96c   : > { %v3054_v33 = vpop.permute.xlu0 %3053 }
 0x96d   : > { %v3052_v7 = vpop.permute.xlu1 %3051  ;;  %11424 = vmatprep.mubr.bf16.mxu0 %v2837_v46  ;;  %v2838_v48 = vpack.c.bf16 %v2830_v60, %v2829_v20 }
 0x970   : > { %v3371_v17 = vpop.permute.xlu0 %3370 }
 0x971   : > { %v3056_v44 = vpop.permute.xlu1 %3055  ;;  %11460 = vmatprep.subr.bf16.mxu1 %v3371_v17 }
 0x972   : > { %11425 = vmatmul.mubr.bf16.gmra.mrb[76].mxu0 %v2838_v48  ;;  %11461 = vmatpush3.bf16.msra.mxu1 %v3371_v17 }
 0x973   : > { %11444 = vmatprep.mubr.msk.bf16.mxu0 %vm1544_vm3, %v3042_v10 }
 0x974   : > { %v3375_v63 = vpop.permute.xlu0 %3374 }
 0x975   : > { %v3373_v38 = vpop.permute.xlu1 %3372 }
 0x976   : > { %11462 = vmatprep.subr.bf16.mxu1 %v3373_v38 }
 0x977   : > { %11463 = vmatpush3.bf16.msra.mxu1 %v3373_v38 }
 0x978   : > { %11464 = vmatprep.subr.bf16.mxu1 %v3375_v63  ;;  %v3379_v15 = vpop.permute.xlu0 %3378 }
 0x979   : > { %v3377_v27 = vpop.permute.xlu1 %3376 }
 0x97a   : > { %11445 = vmatmul.mubr.msk.bf16.vlgmr.msra.gmra.mrb[80].mxu0 %vm1544_vm3, %v3044_v13 }
 0x97b   : > { %11448 = vmatprep.mubr.msk.bf16.mxu0 %vm1544_vm3, %v3046_v31  ;;  %11465 = vmatpush3.bf16.msra.mxu1 %v3375_v63 }
 0x97c   : > { %11466 = vmatprep.subr.bf16.mxu1 %v3377_v27  ;;  %v3383_v10 = vpop.permute.xlu0 %3382 }
 0x97d   : > { %v3381_v62 = vpop.permute.xlu1 %3380 }
 0x97f   : > { %11467 = vmatpush3.bf16.msra.mxu1 %v3377_v27  ;;  %v17843_v27 = vld [vmem:[#allocation36_spill] sm:$0xff] }
 0x980   : > { %11468 = vmatprep.subr.bf16.mxu1 %v3379_v15  ;;  %v14077_v1 = vpop.permute.xlu0 %3588 }
 0x981   : > { %v3385_v61 = vpop.permute.xlu1 %3384 }
 0x982   : > { %11449 = vmatmul.mubr.msk.bf16.gmra.mrb[84].mxu0 %vm1544_vm3, %v3048_v50 }
 0x983   : > { %11452 = vmatprep.mubr.msk.bf16.mxu0 %vm1544_vm3, %v3050_v35  ;;  %11469 = vmatpush3.bf16.msra.mxu1 %v3379_v15 }
 0x984   : > { %11470 = vmatprep.subr.bf16.mxu1 %v3381_v62 }
 0x987   : > { %11471 = vmatpush3.bf16.msra.mxu1 %v3381_v62  ;;  %v17844_v62 = vld [vmem:[#allocation37_spill] sm:$0xff] }
 0x988   : > { %11472 = vmatprep.subr.bf16.mxu1 %v3383_v10 }
 0x98a   : > { %11453 = vmatmul.mubr.msk.bf16.gmra.mrb[88].mxu0 %vm1544_vm3, %v3052_v7 }
 0x98b   : > { %11456 = vmatprep.mubr.msk.bf16.mxu0 %vm1544_vm3, %v3054_v33  ;;  %11473 = vmatpush3.bf16.msra.mxu1 %v3383_v10 }
 0x98c   : > { %11474 = vmatprep.subr.bf16.mxu1 %v3385_v61 }
 0x98f   : > { %11475 = vmatpush3.bf16.msra.mxu1 %v3385_v61 }
 0x990   : > { %11822 = vmatprep.subr.msk.bf16.mxu1 %vm1544_vm3, %v14077_v1 }
 0x992   : > { %11457 = vmatmul.mubr.msk.bf16.gmra.mrb[92].mxu0 %vm1544_vm3, %v3056_v44 }
 0x9f7   : > { %v14082_v12 = vpop.f32.mrb[64].mxu0 }
 0x9f8   : > { %17827 = vst [vmem:[#allocation44_spill] sm:$0xff] %v14082_v12  ;;  %v14084_v25 = vpop.f32.mrb[65].mxu0 }
 0x9f9   : > { %17828 = vst [vmem:[#allocation45_spill] sm:$0xff] %v14084_v25  ;;  %v14086_v28 = vpop.f32.mrb[66].mxu0 }
 0x9fa   : > { %17829 = vst [vmem:[#allocation46_spill] sm:$0xff] %v14086_v28  ;;  %v14088_v31 = vpop.f32.mrb[67].mxu0 }
 0x9fb   : > { %17830 = vst [vmem:[#allocation47_spill] sm:$0xff] %v14088_v31 }
 0xa2f   : > { %v14090_v45 = vpop.f32.mrb[68].mxu0 }
 0xa30   : > { %17831 = vst [vmem:[#allocation48_spill] sm:$0xff] %v14090_v45  ;;  %v14092_v13 = vpop.f32.mrb[69].mxu0 }
 0xa31   : > { %17832 = vst [vmem:[#allocation49_spill] sm:$0xff] %v14092_v13  ;;  %v14094_v49 = vpop.f32.mrb[70].mxu0 }
 0xa32   : > { %17833 = vst [vmem:[#allocation50_spill] sm:$0xff] %v14094_v49  ;;  %v14096_v29 = vpop.f32.mrb[71].mxu0 }
 0xa33   : > { %17834 = vst [vmem:[#allocation51_spill] sm:$0xff] %v14096_v29 }
 0xa3d   : > { %v14098_v2 = vpop.f32.mrb[72].mxu0 }
 0xa3e   : > { %17835 = vst [vmem:[#allocation52_spill] sm:$0xff] %v14098_v2  ;;  %v14100_v26 = vpop.f32.mrb[73].mxu0 }
 0xa3f   : > { %17836 = vst [vmem:[#allocation53_spill] sm:$0xff] %v14100_v26  ;;  %v14102_v53 = vpop.f32.mrb[74].mxu0 }
 0xa40   : > { %17837 = vst [vmem:[#allocation54_spill] sm:$0xff] %v14102_v53  ;;  %v14104_v21 = vpop.f32.mrb[75].mxu0 }
 0xa41   : > { %17838 = vst [vmem:[#allocation55_spill] sm:$0xff] %v14104_v21 }
 0xa45   : > { %v14106_v36 = vpop.f32.mrb[76].mxu0 }
 0xa46   : > { %17839 = vst [vmem:[#allocation56_spill] sm:$0xff] %v14106_v36  ;;  %v14108_v35 = vpop.f32.mrb[77].mxu0 }
 0xa47   : > { %17840 = vst [vmem:[#allocation57_spill] sm:$0xff] %v14108_v35  ;;  %v14110_v0 = vpop.f32.mrb[78].mxu0 }
 0xa48   : > { %17841 = vst [vmem:[#allocation58_spill] sm:$0xff] %v14110_v0  ;;  %v14112_v6 = vpop.f32.mrb[79].mxu0 }
 0xa49   : > { %17842 = vst [vmem:[#allocation59_spill] sm:$0xff] %v14112_v6 }
 0xa4d   : > { %v11446_v50 = vpop.f32.mrb[80].mxu0 }
 0xa4e   : > { %v3164_v41 = vadd.f32 %v13777_v57, %v11446_v50  ;;  %v3155_v47 = vpop.f32.mrb[81].mxu0  ;;  %v17846_v50 = vld [vmem:[#allocation39_spill] sm:$0xff] }
 0xa4f   : > { %v11447_v42 = vpop.f32.mrb[82].mxu0  ;;  %v3156_v60 = vadd.f32 %v13794_v51, %v3155_v47 }
 0xa50   : > { %3222 = vmax.xlane.f32.xlu0 %v3164_v41  ;;  %v3158_v46 = vpop.f32.mrb[83].mxu0  ;;  %v3167_v20 = vadd.f32 %v13804_v19, %v11447_v42 }
 0xa51   : > { %v3159_v33 = vadd.f32 %v13786_v58, %v3158_v46 }
 0xa53   : > { %3220 = vmax.xlane.f32.xlu1 %v3159_v33 }
 0xa54   : > { %3218 = vmax.xlane.f32.xlu0 %v3156_v60 }
 0xa55   : > { %v11450_v7 = vpop.f32.mrb[84].mxu0 }
 0xa56   : > { %v3171_v17 = vpop.f32.mrb[85].mxu0  ;;  %v14122_v38 = vadd.f32 %v13821_v24, %v11450_v7 }
 0xa57   : > { %v11451_v48 = vpop.f32.mrb[86].mxu0  ;;  %v14130_v19 = vadd.f32 %v13839_v11, %v3171_v17  ;;  %v17847_v17 = vld [vmem:[#allocation40_spill] sm:$0xff] }
 0xa58   : > { %v14119_v44 = vadd.f32 %v13812_v59, %v11451_v48  ;;  %3224 = vmax.xlane.f32.xlu0 %v3167_v20  ;;  %v3174_v57 = vpop.f32.mrb[87].mxu0 }
 0xa59   : > { %v14126_v58 = vadd.f32 %v13830_v18, %v3174_v57  ;;  %v17845_v18 = vld [vmem:[#allocation38_spill] sm:$0xff]  ;;  %v17848_v57 = vld [vmem:[#allocation41_spill] sm:$0xff] }
 0xa5a   : > { %3232 = vmax.xlane.f32.xlu1 %v14119_v44 }
 0xa5c   : > { %3230 = vmax.xlane.f32.xlu0 %v14122_v38 }
 0xa5d   : > { %v11454_v51 = vpop.f32.mrb[88].mxu0 }
 0xa5e   : > { %3228 = vmax.xlane.f32.xlu1 %v14126_v58  ;;  %v3187_v59 = vpop.f32.mrb[89].mxu0  ;;  %v14138_v10 = vadd.f32 %v17844_v62, %v11454_v51  ;;  %v17852_v62 = vld [vmem:[#allocation43_spill] sm:$0xff] }
 0xa5f   : > { %v11455_v63 = vpop.f32.mrb[90].mxu0  ;;  %v14146_v47 = vadd.f32 %v17846_v50, %v3187_v59  ;;  %v17849_v59 = vld [vmem:[#allocation11_spill] sm:$0xff] }
 0xa60   : > { %v14134_v15 = vadd.f32 %v17843_v27, %v11455_v63  ;;  %3226 = vmax.xlane.f32.xlu0 %v14130_v19  ;;  %v3190_v24 = vpop.f32.mrb[91].mxu0  ;;  %v17850_v63 = vld [vmem:[#allocation12_spill] sm:$0xff]  ;;  %v17851_v27 = vld [vmem:[#allocation42_spill] sm:$0xff] }
 0xa61   : > { %v14142_v61 = vadd.f32 %v17845_v18, %v3190_v24 }
 0xa62   : > { %3240 = vmax.xlane.f32.xlu1 %v14134_v15 }
 0xa64   : > { %3238 = vmax.xlane.f32.xlu0 %v14138_v10 }
 0xa65   : > { %v11458_v11 = vpop.f32.mrb[92].mxu0 }
 0xa66   : > { %3236 = vmax.xlane.f32.xlu1 %v14142_v61  ;;  %v3203_v42 = vpop.f32.mrb[93].mxu0  ;;  %v14151_v48 = vadd.f32 %v17847_v17, %v11458_v11  ;;  %v14170_v11 = vpop.permute.xlu1 %3590 }
 0xa67   : > { %v11459_v46 = vpop.f32.mrb[94].mxu0  ;;  %v14155_v51 = vadd.f32 %v17848_v57, %v3203_v42 }
 0xa68   : > { %3234 = vmax.xlane.f32.xlu0 %v14146_v47  ;;  %v3206_v7 = vpop.f32.mrb[95].mxu0  ;;  %v14163_v24 = vadd.f32 %v17851_v27, %v11459_v46 }
 0xa69   : > { %v14167_v18 = vadd.f32 %v17852_v62, %v3206_v7 }
 0xa6c   : > { %3246 = vmax.xlane.f32.xlu0 %v14151_v48 }
 0xa70   : > { %3242 = vmax.xlane.f32.xlu0 %v14155_v51 }
 0xa77   : > { %3594 = vrot.lane.b32.xlu1 %v17849_v59, %s12721_s24 }
 0xa86   : > { %3592 = vrot.lane.b32.xlu0 %v17850_v63, %s12721_s24 }
 0xa9b   : > { %3248 = vmax.xlane.f32.xlu1 %v14163_v24 }
 0xa9f   : > { %3244 = vmax.xlane.f32.xlu1 %v14167_v18 }
 0xadd   : > { %v3223_v50 = vpop.xlane.xlu0 %3222 }
 0xade   : > { %v3252_v42 = vsub.f32 %v3164_v41, %v3223_v50 }
 0xae0   : > { %v3270_v17 = vmul.f32 1.442695, %v3252_v42  ;;  %v3221_v57 = vpop.xlane.xlu1 %3220 }
 0xae1   : > { %v3251_v0 = vsub.f32 %v3159_v33, %v3221_v57  ;;  %v3219_v36 = vpop.xlane.xlu0 %3218 }
 0xae2   : > { %12225 = vpow2.f32 %v3270_v17  ;;  %v3250_v6 = vsub.f32 %v3156_v60, %v3219_v36 }
 0xae3   : > { %v3268_v35 = vmul.f32 1.442695, %v3251_v0  ;;  %v17854_v0 = vld [vmem:[#allocation13_spill] sm:$0xff] }
 0xae4   : > { %v3266_v46 = vmul.f32 1.442695, %v3250_v6 }
 0xae5   : > { %12227 = vpow2.f32 %v3268_v35  ;;  %v3225_v27 = vpop.xlane.xlu0 %3224 }
 0xae6   : > { %12229 = vpow2.f32 %v3266_v46  ;;  %v3253_v53 = vsub.f32 %v3167_v20, %v3225_v27 }
 0xae7   : > { %v3233_v33 = vpop.xlane.xlu1 %3232 }
 0xae8   : > { %v3272_v7 = vmul.f32 1.442695, %v3253_v53  ;;  %v17853_v53 = vld [vmem:[#allocation14_spill] sm:$0xff]  ;;  %v3257_v21 = vsub.f32 %v14119_v44, %v3233_v33 }
 0xae9   : > { %v3231_v35 = vpop.xlane.xlu0 %3230 }
 0xaea   : > { %12231 = vpow2.f32 %v3272_v7  ;;  %v3256_v20 = vsub.f32 %v14122_v38, %v3231_v35  ;;  %v3280_v29 = vmul.f32 1.442695, %v3257_v21 }
 0xaeb   : > { %v3229_v50 = vpop.xlane.xlu1 %3228 }
 0xaec   : > { %v14172_v62 = vpop.eup %12225  ;;  %v3278_v17 = vmul.f32 1.442695, %v3256_v20  ;;  %v3255_v46 = vsub.f32 %v14126_v58, %v3229_v50 }
 0xaed   : > { %3302 = vadd.xlane.f32.xlu1 %v14172_v62  ;;  %v3227_v6 = vpop.xlane.xlu0 %3226 }
 0xaee   : > { %v3254_v57 = vsub.f32 %v14130_v19, %v3227_v6  ;;  %12233 = vpow2.f32 %v3278_v17  ;;  %v3276_v49 = vmul.f32 1.442695, %v3255_v46 }
 0xaef   : > { %v14175_v2 = vpop.eup %12227  ;;  %v3241_v27 = vpop.xlane.xlu1 %3240 }
 0xaf0   : > { %v14177_v41 = vpop.eup %12229  ;;  %3300 = vadd.xlane.f32.xlu0 %v14175_v2  ;;  %v3274_v26 = vmul.f32 1.442695, %v3254_v57  ;;  %v3261_v44 = vsub.f32 %v14134_v15, %v3241_v27 }
 0xaf1   : > { %3298 = vadd.xlane.f32.xlu1 %v14177_v41  ;;  %v3239_v60 = vpop.xlane.xlu0 %3238 }
 0xaf2   : > { %v3260_v45 = vsub.f32 %v14138_v10, %v3239_v60  ;;  %12235 = vpow2.f32 %v3274_v26 }
 0xaf3   : > { %v3237_v13 = vpop.xlane.xlu1 %3236  ;;  %12237 = vpow2.f32 %v3276_v49 }
 0xaf4   : > { %v14181_v36 = vpop.eup %12231  ;;  %v3286_v35 = vmul.f32 1.442695, %v3260_v45  ;;  %12239 = vpow2.f32 %v3280_v29  ;;  %v3288_v45 = vmul.f32 1.442695, %v3261_v44  ;;  %v3259_v26 = vsub.f32 %v14142_v61, %v3237_v13 }
 0xaf5   : > { %3304 = vadd.xlane.f32.xlu1 %v14181_v36  ;;  %v3235_v42 = vpop.xlane.xlu0 %3234 }
 0xaf6   : > { %v3258_v19 = vsub.f32 %v14146_v47, %v3235_v42  ;;  %12241 = vpow2.f32 %v3286_v35 }
 0xaf7   : > { %v14199_v21 = vpop.permute.xlu1 %3594 }
 0xaf8   : > { %v3282_v33 = vmul.f32 1.442695, %v3258_v19  ;;  %v14197_v50 = vpop.eup %12233 }
 0xaf9   : > { %v3247_v7 = vpop.xlane.xlu0 %3246 }
 0xafa   : > { %v3264_v38 = vsub.f32 %v14151_v48, %v3247_v7  ;;  %v3284_v48 = vmul.f32 1.442695, %v3259_v26 }
 0xafc   : > { %v3294_v58 = vmul.f32 1.442695, %v3264_v38  ;;  %v14203_v29 = vpop.eup %12235 }
 0xafd   : > { %v3243_v6 = vpop.xlane.xlu0 %3242  ;;  %v14205_v47 = vpop.eup %12237 }
 0xafe   : > { %v3262_v20 = vsub.f32 %v14155_v51, %v3243_v6  ;;  %12243 = vpow2.f32 %v3294_v58  ;;  %v14210_v60 = vpop.eup %12239 }
 0xaff   : > { %12245 = vpow2.f32 %v3282_v33 }
 0xb00   : > { %v3290_v49 = vmul.f32 1.442695, %v3262_v20  ;;  %v14212_v13 = vpop.eup %12241 }
 0xb01   : > { %v3593_v35 = vpop.permute.xlu0 %3592 }
 0xb02   : > { %12247 = vpow2.f32 %v3290_v49 }
 0xb03   : > { %12249 = vpow2.f32 %v3288_v45 }
 0xb06   : > { %3596 = vrot.lane.b32.xlu0 %v17853_v53, %s12721_s24  ;;  %3598 = vrot.lane.b32.xlu1 %v17854_v0, %s12721_s24 }
 0xb08   : > { %v14217_v17 = vpop.eup %12243 }
 0xb09   : > { %v14219_v57 = vpop.eup %12245 }
 0xb0c   : > { %v14223_v46 = vpop.eup %12247 }
 0xb0d   : > { %v14225_v27 = vpop.eup %12249 }
 0xb25   : > { %3310 = vadd.xlane.f32.xlu0 %v14197_v50 }
 0xb28   : > { %v3249_v10 = vpop.xlane.xlu1 %3248 }
 0xb29   : > { %v3265_v15 = vsub.f32 %v14163_v24, %v3249_v10  ;;  %3306 = vadd.xlane.f32.xlu0 %v14203_v29 }
 0xb2a   : > { %3308 = vadd.xlane.f32.xlu1 %v14205_v47 }
 0xb2b   : > { %v3296_v51 = vmul.f32 1.442695, %v3265_v15 }
 0xb2c   : > { %v3245_v42 = vpop.xlane.xlu1 %3244 }
 0xb2d   : > { %12251 = vpow2.f32 %v3296_v51  ;;  %v3263_v61 = vsub.f32 %v14167_v18, %v3245_v42  ;;  %3312 = vadd.xlane.f32.xlu0 %v14210_v60 }
 0xb2e   : > { %3318 = vadd.xlane.f32.xlu1 %v14212_v13  ;;  %12253 = vpow2.f32 %v3284_v48 }
 0xb2f   : > { %v3292_v24 = vmul.f32 1.442695, %v3263_v61  ;;  %v3629_v61 = vsel %vm1544_vm3, %v14077_v1, 0 }
 0xb31   : > { %3326 = vadd.xlane.f32.xlu0 %v14217_v17  ;;  %12255 = vpow2.f32 %v3292_v24 }
 0xb32   : > { %3314 = vadd.xlane.f32.xlu1 %v14219_v57 }
 0xb35   : > { %3322 = vadd.xlane.f32.xlu0 %v14223_v46 }
 0xb36   : > { %3320 = vadd.xlane.f32.xlu1 %v14225_v27 }
 0xb37   : > { %v14229_v18 = vpop.eup %12251 }
 0xb38   : > { %v14231_v7 = vpop.eup %12253 }
 0xb39   : > { %3328 = vadd.xlane.f32.xlu0 %v14229_v18 }
 0xb3a   : > { %3316 = vadd.xlane.f32.xlu1 %v14231_v7 }
 0xb3b   : > { %v14235_v38 = vpop.eup %12255 }
 0xb3e   : > { %3324 = vadd.xlane.f32.xlu1 %v14235_v38 }
 0xb4f   : > { %3602 = vrot.lane.b32.xlu1 %v13117_v30, %s12721_s24  ;;  %3600 = vrot.lane.b32.xlu0 %v13119_v32, %s12721_s24 }
 0xb53   : > { %3574 = vrot.lane.b32.xlu1 %v13079_v40, %s12721_s24  ;;  %3572 = vrot.lane.b32.xlu0 %v13083_v43, %s12721_s24 }
 0xb57   : > { %3578 = vrot.lane.b32.xlu1 %v13101_v5, %s12721_s24  ;;  %3576 = vrot.lane.b32.xlu0 %v13105_v9, %s12721_s24 }
 0xb5b   : > { %3582 = vrot.lane.b32.xlu1 %v13121_v34, %s12721_s24  ;;  %3580 = vrot.lane.b32.xlu0 %v13125_v37, %s12721_s24 }
 0xb5f   : > { %3586 = vrot.lane.b32.xlu1 %v13138_v54, %s12721_s24  ;;  %3584 = vrot.lane.b32.xlu0 %v13142_v56, %s12721_s24 }
 0xb63   : > { %3903 = vrot.lane.b32.xlu1 %v13146_v3, %s12721_s24  ;;  %3901 = vrot.lane.b32.xlu0 %v13148_v8, %s12721_s24 }
 0xb67   : > { %3907 = vrot.lane.b32.xlu1 %v13157_v22, %s12721_s24  ;;  %3905 = vrot.lane.b32.xlu0 %v13160_v23, %s12721_s24 }
 0xb6b   : > { %3911 = vrot.lane.b32.xlu1 %v13169_v39, %s12721_s24  ;;  %3909 = vrot.lane.b32.xlu0 %v13172_v4, %s12721_s24 }
 0xb6f   : > { %3915 = vrot.lane.b32.xlu1 %v13179_v52, %s12721_s24  ;;  %3913 = vrot.lane.b32.xlu0 %v13182_v55, %s12721_s24  ;;  %s12723_s24 = smov 80  }
 0xb73   : > { %4121 = vrot.lane.b32.xlu1 %v13049_v14, %s12722_s29  ;;  %4119 = vrot.lane.b32.xlu0 %v13055_v16, %s12722_s29 }
 0xb7a   : > { %v3303_v19 = vpop.xlane.xlu1 %3302 }
 0xb7d   : > { %v3301_v6 = vpop.xlane.xlu0 %3300 }
 0xb7e   : > { %12257 = vrcp.f32 %v3301_v6  ;;  %v3299_v58 = vpop.xlane.xlu1 %3298 }
 0xb7f   : > { %12259 = vrcp.f32 %v3299_v58 }
 0xb80   : > { %12261 = vrcp.f32 %v3303_v19 }
 0xb81   : > { %v3597_v1 = vpop.permute.xlu0 %3596 }
 0xb82   : > { %v3305_v20 = vpop.xlane.xlu1 %3304 }
 0xb83   : > { %12263 = vrcp.f32 %v3305_v20 }
 0xb88   : > { %v12258_v44 = vpop.eup %12257 }
 0xb89   : > { %v12260_v33 = vpop.eup %12259  ;;  %v3347_v49 = vmul.f32 %v12258_v44, %v14175_v2  ;;  %v3632_v2 = vsel %vm1544_vm3, %v14170_v11, 0 }
 0xb8a   : > { %v3346_v45 = vmul.f32 %v12260_v33, %v14177_v41  ;;  %v12262_v26 = vpop.eup %12261  ;;  %v3638_v41 = vsel %vm1544_vm3, %v14199_v21, 0 }
 0xb8b   : > { %v3348_v48 = vmul.f32 %v12262_v26, %v14172_v62  ;;  %v3635_v62 = vsel %vm1544_vm3, %v3593_v35, 0 }
 0xb8c   : > { %v3362_v10 = vpack.c.bf16 %v3347_v49, %v3346_v45 }
 0xb8d   : > { %v12264_v15 = vpop.eup %12263 }
 0xb8e   : > { %v3349_v51 = vmul.f32 %v12264_v15, %v14181_v36  ;;  %11476 = vmatprep.mubr.bf16.mxu1 %v3362_v10  ;;  %v3641_v36 = vsel %vm1544_vm3, %v3597_v1, 0 }
 0xb90   : > { %v3363_v42 = vpack.c.bf16 %v3349_v51, %v3348_v48 }
 0xb92   : > { %11477 = vmatmul.mubr.bf16.vlgmr.msra.gmra.mrb[64].mxu1 %v3363_v42 }
 0xb93   : > { %11493 = vmatpush3.bf16.xpose.msra.mxu1 %v3629_v61 }
 0xb94   : > { %11823 = vmatprep.subr.msk.bf16.mxu1 %vm1544_vm3, %v14170_v11  ;;  %v3599_v11 = vpop.permute.xlu1 %3598 }
 0xb95   : > { %v3644_v6 = vsel %vm1544_vm3, %v3599_v11, 0 }
 0xb9b   : > { %11495 = vmatpush3.bf16.xpose.msra.mxu1 %v3632_v2 }
 0xb9c   : > { %11824 = vmatprep.subr.msk.bf16.mxu1 %vm1544_vm3, %v3593_v35 }
 0xba3   : > { %11497 = vmatpush3.bf16.xpose.msra.mxu1 %v3635_v62 }
 0xba4   : > { %11825 = vmatprep.subr.msk.bf16.mxu1 %vm1544_vm3, %v14199_v21 }
 0xbab   : > { %11499 = vmatpush3.bf16.xpose.msra.mxu1 %v3638_v41 }
 0xbac   : > { %11826 = vmatprep.subr.msk.bf16.mxu1 %vm1544_vm3, %v3597_v1 }
 0xbb2   : > { %v3311_v24 = vpop.xlane.xlu0 %3310 }
 0xbb3   : > { %11501 = vmatpush3.bf16.xpose.msra.mxu1 %v3641_v36 }
 0xbb4   : > { %11827 = vmatprep.subr.msk.bf16.mxu1 %vm1544_vm3, %v3599_v11 }
 0xbb6   : > { %v3307_v19 = vpop.xlane.xlu0 %3306 }
 0xbb7   : > { %12265 = vrcp.f32 %v3307_v19  ;;  %v3309_v35 = vpop.xlane.xlu1 %3308 }
 0xbb8   : > { %12267 = vrcp.f32 %v3309_v35 }
 0xbb9   : > { %12269 = vrcp.f32 %v3311_v24 }
 0xbba   : > { %v3313_v58 = vpop.xlane.xlu0 %3312 }
 0xbbb   : > { %11503 = vmatpush3.bf16.xpose.msra.mxu1 %v3644_v6  ;;  %12271 = vrcp.f32 %v3313_v58  ;;  %v3319_v21 = vpop.xlane.xlu1 %3318 }
 0xbbe   : > { %v3327_v20 = vpop.xlane.xlu0 %3326 }
 0xbbf   : > { %v3315_v44 = vpop.xlane.xlu1 %3314 }
 0xbc1   : > { %v12266_v33 = vpop.eup %12265 }
 0xbc2   : > { %v12268_v49 = vpop.eup %12267  ;;  %v3323_v45 = vpop.xlane.xlu0 %3322  ;;  %v3350_v26 = vmul.f32 %v12266_v33, %v14203_v29 }
 0xbc3   : > { %v12270_v10 = vpop.eup %12269  ;;  %v3321_v15 = vpop.xlane.xlu1 %3320  ;;  %v3351_v48 = vmul.f32 %v12268_v49, %v14205_v47 }
 0xbc4   : > { %12273 = vrcp.f32 %v3321_v15  ;;  %v3352_v2 = vmul.f32 %v12270_v10, %v14197_v50 }
 0xbc5   : > { %v12272_v51 = vpop.eup %12271  ;;  %v3364_v42 = vpack.c.bf16 %v3351_v48, %v3350_v26  ;;  %12275 = vrcp.f32 %v3315_v44 }
 0xbc6   : > { %v3329_v61 = vpop.xlane.xlu0 %3328  ;;  %v3353_v62 = vmul.f32 %v12272_v51, %v14210_v60  ;;  %12277 = vrcp.f32 %v3319_v21 }
 0xbc7   : > { %v3317_v41 = vpop.xlane.xlu1 %3316  ;;  %11480 = vmatprep.mubr.bf16.mxu1 %v3364_v42 }
 0xbc8   : > { %12279 = vrcp.f32 %v3317_v41  ;;  %v3365_v1 = vpack.c.bf16 %v3353_v62, %v3352_v2 }
 0xbc9   : > { %12281 = vrcp.f32 %v3323_v45 }
 0xbca   : > { %11481 = vmatmul.mubr.bf16.gmra.mrb[68].mxu1 %v3365_v1  ;;  %v3601_v29 = vpop.permute.xlu0 %3600 }
 0xbcb   : > { %v3325_v36 = vpop.xlane.xlu1 %3324  ;;  %11828 = vmatprep.subr.msk.bf16.mxu1 %vm1544_vm3, %v3601_v29  ;;  %v3647_v47 = vsel %vm1544_vm3, %v3601_v29, 0 }
 0xbcc   : > { %12283 = vrcp.f32 %v3325_v36  ;;  %11505 = vmatpush3.bf16.xpose.msra.mxu1 %v3647_v47 }
 0xbcd   : > { %12285 = vrcp.f32 %v3329_v61 }
 0xbce   : > { %v3573_v24 = vpop.permute.xlu0 %3572  ;;  %v12274_v50 = vpop.eup %12273  ;;  %12287 = vrcp.f32 %v3327_v20 }
 0xbcf   : > { %v3603_v60 = vpop.permute.xlu1 %3602  ;;  %v12276_v11 = vpop.eup %12275  ;;  %v3357_v58 = vmul.f32 %v12274_v50, %v14225_v27 }
 0xbd0   : > { %11829 = vmatprep.subr.msk.bf16.mxu1 %vm1544_vm3, %v3603_v60  ;;  %v12278_v19 = vpop.eup %12277  ;;  %v3650_v44 = vsel %vm1544_vm3, %v3603_v60, 0  ;;  %v3354_v33 = vmul.f32 %v12276_v11, %v14219_v57 }
 0xbd1   : > { %v3356_v20 = vmul.f32 %v12278_v19, %v14212_v13 }
 0xbd2   : > { %v12280_v35 = vpop.eup %12279  ;;  %v3577_v6 = vpop.permute.xlu0 %3576 }
 0xbd3   : > { %v3575_v21 = vpop.permute.xlu1 %3574  ;;  %v3355_v49 = vmul.f32 %v12280_v35, %v14231_v7  ;;  %v12282_v45 = vpop.eup %12281  ;;  %v3367_v48 = vpack.c.bf16 %v3357_v58, %v3356_v20 }
 0xbd4   : > { %11507 = vmatpush3.bf16.xpose.msra.mxu1 %v3650_v44  ;;  %v3358_v27 = vmul.f32 %v12282_v45, %v14223_v46 }
 0xbd5   : > { %v3366_v26 = vpack.c.bf16 %v3355_v49, %v3354_v33 }
 0xbd6   : > { %v12284_v10 = vpop.eup %12283  ;;  %v3581_v15 = vpop.permute.xlu0 %3580 }
 0xbd7   : > { %v12286_v51 = vpop.eup %12285  ;;  %v3579_v42 = vpop.permute.xlu1 %3578  ;;  %11484 = vmatprep.mubr.bf16.mxu1 %v3366_v26  ;;  %v3359_v61 = vmul.f32 %v12284_v10, %v14235_v38 }
 0xbd8   : > { %11485 = vmatmul.mubr.bf16.gmra.mrb[72].mxu1 %v3367_v48  ;;  %v12288_v2 = vpop.eup %12287  ;;  %v3361_v7 = vmul.f32 %v12286_v51, %v14229_v18 }
 0xbd9   : > { %v3368_v57 = vpack.c.bf16 %v3359_v61, %v3358_v27  ;;  %v3360_v13 = vmul.f32 %v12288_v2, %v14217_v17  ;;  %v14361_v27 = vld [vmem:[%s17694_s2 + $0x10] sm:$0xff] }
 0xbda   : > { %v3585_v62 = vpop.permute.xlu0 %3584 }
 0xbdb   : > { %v3583_v41 = vpop.permute.xlu1 %3582  ;;  %11488 = vmatprep.mubr.bf16.mxu1 %v3368_v57  ;;  %v3369_v29 = vpack.c.bf16 %v3361_v7, %v3360_v13  ;;  %v14370_v7 = vld [vmem:[%s17694_s2 + $0x8] sm:$0xff]  ;;  %v14378_v13 = vld [vmem:[%s17694_s2] sm:$0xff] }
 0xbde   : > { %v3902_v1 = vpop.permute.xlu0 %3901 }
 0xbdf   : > { %v3587_v36 = vpop.permute.xlu1 %3586  ;;  %11524 = vmatprep.subr.bf16.mxu0 %v3902_v1 }
 0xbe0   : > { %11489 = vmatmul.mubr.bf16.gmra.mrb[76].mxu1 %v3369_v29  ;;  %11525 = vmatpush3.bf16.msra.mxu0 %v3902_v1 }
 0xbe1   : > { %11508 = vmatprep.mubr.msk.bf16.mxu1 %vm1544_vm3, %v3573_v24 }
 0xbe2   : > { %v3906_v38 = vpop.permute.xlu0 %3905 }
 0xbe3   : > { %v3904_v46 = vpop.permute.xlu1 %3903 }
 0xbe4   : > { %11526 = vmatprep.subr.bf16.mxu0 %v3904_v46 }
 0xbe5   : > { %11527 = vmatpush3.bf16.msra.mxu0 %v3904_v46 }
 0xbe6   : > { %11528 = vmatprep.subr.bf16.mxu0 %v3906_v38  ;;  %v3910_v17 = vpop.permute.xlu0 %3909 }
 0xbe7   : > { %v3908_v18 = vpop.permute.xlu1 %3907 }
 0xbe8   : > { %11509 = vmatmul.mubr.msk.bf16.vlgmr.msra.gmra.mrb[80].mxu1 %vm1544_vm3, %v3575_v21 }
 0xbe9   : > { %11512 = vmatprep.mubr.msk.bf16.mxu1 %vm1544_vm3, %v3577_v6  ;;  %11529 = vmatpush3.bf16.msra.mxu0 %v3906_v38 }
 0xbea   : > { %11530 = vmatprep.subr.bf16.mxu0 %v3908_v18  ;;  %v3914_v24 = vpop.permute.xlu0 %3913 }
 0xbeb   : > { %v3912_v47 = vpop.permute.xlu1 %3911 }
 0xbed   : > { %11531 = vmatpush3.bf16.msra.mxu0 %v3908_v18 }
 0xbee   : > { %11532 = vmatprep.subr.bf16.mxu0 %v3910_v17  ;;  %v14321_v60 = vpop.permute.xlu0 %4119 }
 0xbef   : > { %v3916_v50 = vpop.permute.xlu1 %3915 }
 0xbf0   : > { %11513 = vmatmul.mubr.msk.bf16.gmra.mrb[84].mxu1 %vm1544_vm3, %v3579_v42 }
 0xbf1   : > { %11516 = vmatprep.mubr.msk.bf16.mxu1 %vm1544_vm3, %v3581_v15  ;;  %11533 = vmatpush3.bf16.msra.mxu0 %v3910_v17  ;;  %v14396_v17 = vld [vmem:[%s17694_s2 + $0x38] sm:$0xff] }
 0xbf2   : > { %11534 = vmatprep.subr.bf16.mxu0 %v3912_v47 }
 0xbf5   : > { %11535 = vmatpush3.bf16.msra.mxu0 %v3912_v47 }
 0xbf6   : > { %11536 = vmatprep.subr.bf16.mxu0 %v3914_v24 }
 0xbf8   : > { %11517 = vmatmul.mubr.msk.bf16.gmra.mrb[88].mxu1 %vm1544_vm3, %v3583_v41 }
 0xbf9   : > { %11520 = vmatprep.mubr.msk.bf16.mxu1 %vm1544_vm3, %v3585_v62  ;;  %11537 = vmatpush3.bf16.msra.mxu0 %v3914_v24 }
 0xbfa   : > { %11538 = vmatprep.subr.bf16.mxu0 %v3916_v50 }
 0xbfd   : > { %11539 = vmatpush3.bf16.msra.mxu0 %v3916_v50  ;;  %v14405_v50 = vld [vmem:[%s17694_s2 + $0x30] sm:$0xff] }
 0xbfe   : > { %11830 = vmatprep.subr.msk.bf16.mxu0 %vm1544_vm3, %v14321_v60 }
 0xc00   : > { %11521 = vmatmul.mubr.msk.bf16.gmra.mrb[92].mxu1 %vm1544_vm3, %v3587_v36  ;;  %v14388_v36 = vld [vmem:[%s17694_s2 + $0x18] sm:$0xff] }
 0xc65   : > { %v14326_v11 = vpop.f32.mrb[64].mxu1 }
 0xc66   : > { %17855 = vst [vmem:[#allocation36_spill] sm:$0xff] %v14326_v11  ;;  %v14328_v19 = vpop.f32.mrb[65].mxu1 }
 0xc67   : > { %17856 = vst [vmem:[#allocation37_spill] sm:$0xff] %v14328_v19  ;;  %v14330_v35 = vpop.f32.mrb[66].mxu1  ;;  %v14506_v19 = vpop.permute.xlu1 %4121 }
 0xc68   : > { %17857 = vst [vmem:[#allocation38_spill] sm:$0xff] %v14330_v35  ;;  %v14332_v6 = vpop.f32.mrb[67].mxu1 }
 0xc69   : > { %17858 = vst [vmem:[#allocation39_spill] sm:$0xff] %v14332_v6 }
 0xc9d   : > { %v14334_v58 = vpop.f32.mrb[68].mxu1 }
 0xc9e   : > { %17859 = vst [vmem:[#allocation40_spill] sm:$0xff] %v14334_v58  ;;  %v14336_v21 = vpop.f32.mrb[69].mxu1 }
 0xc9f   : > { %17860 = vst [vmem:[#allocation41_spill] sm:$0xff] %v14336_v21  ;;  %v14338_v44 = vpop.f32.mrb[70].mxu1 }
 0xca0   : > { %17861 = vst [vmem:[#allocation42_spill] sm:$0xff] %v14338_v44  ;;  %v14340_v33 = vpop.f32.mrb[71].mxu1 }
 0xca1   : > { %17862 = vst [vmem:[#allocation43_spill] sm:$0xff] %v14340_v33 }
 0xcab   : > { %v14342_v49 = vpop.f32.mrb[72].mxu1 }
 0xcac   : > { %17863 = vst [vmem:[#allocation60_spill] sm:$0xff] %v14342_v49  ;;  %v14344_v45 = vpop.f32.mrb[73].mxu1  ;;  %v14450_v49 = vld [vmem:[%s17694_s2 + $0x48] sm:$0xff] }
 0xcad   : > { %17864 = vst [vmem:[#allocation61_spill] sm:$0xff] %v14344_v45  ;;  %v14346_v20 = vpop.f32.mrb[74].mxu1  ;;  %17873 = vst [vmem:[#allocation70_spill] sm:$0xff] %v14450_v49  ;;  %v14459_v45 = vld [vmem:[%s17694_s2 + $0x40] sm:$0xff] }
 0xcae   : > { %17865 = vst [vmem:[#allocation62_spill] sm:$0xff] %v14346_v20  ;;  %v14348_v26 = vpop.f32.mrb[75].mxu1  ;;  %17874 = vst [vmem:[#allocation71_spill] sm:$0xff] %v14459_v45 }
 0xcaf   : > { %17866 = vst [vmem:[#allocation63_spill] sm:$0xff] %v14348_v26 }
 0xcb3   : > { %v14350_v10 = vpop.f32.mrb[76].mxu1 }
 0xcb4   : > { %17867 = vst [vmem:[#allocation64_spill] sm:$0xff] %v14350_v10  ;;  %v14352_v15 = vpop.f32.mrb[77].mxu1 }
 0xcb5   : > { %17868 = vst [vmem:[#allocation65_spill] sm:$0xff] %v14352_v15  ;;  %v14354_v48 = vpop.f32.mrb[78].mxu1 }
 0xcb6   : > { %17869 = vst [vmem:[#allocation66_spill] sm:$0xff] %v14354_v48  ;;  %v14356_v51 = vpop.f32.mrb[79].mxu1 }
 0xcb7   : > { %17870 = vst [vmem:[#allocation67_spill] sm:$0xff] %v14356_v51 }
 0xcbb   : > { %v11510_v42 = vpop.f32.mrb[80].mxu1 }
 0xcbc   : > { %v14364_v61 = vadd.f32 %v14361_v27, %v11510_v42  ;;  %v3686_v2 = vpop.f32.mrb[81].mxu1 }
 0xcbd   : > { %v11511_v57 = vpop.f32.mrb[82].mxu1  ;;  %v14381_v1 = vadd.f32 %v14378_v13, %v3686_v2  ;;  %v14414_v2 = vld [vmem:[%s17694_s2 + $0x28] sm:$0xff] }
 0xcbe   : > { %3753 = vmax.xlane.f32.xlu0 %v14364_v61  ;;  %v3689_v62 = vpop.f32.mrb[83].mxu1  ;;  %v14391_v46 = vadd.f32 %v14388_v36, %v11511_v57 }
 0xcbf   : > { %v14373_v41 = vadd.f32 %v14370_v7, %v3689_v62 }
 0xcc1   : > { %3751 = vmax.xlane.f32.xlu1 %v14373_v41 }
 0xcc2   : > { %3749 = vmax.xlane.f32.xlu0 %v14381_v1 }
 0xcc3   : > { %v11514_v29 = vpop.f32.mrb[84].mxu1 }
 0xcc4   : > { %v3702_v38 = vpop.f32.mrb[85].mxu1  ;;  %v14408_v42 = vadd.f32 %v14405_v50, %v11514_v29 }
 0xcc5   : > { %v11515_v18 = vpop.f32.mrb[86].mxu1 }
 0xcc6   : > { %v14399_v47 = vadd.f32 %v14396_v17, %v11515_v18  ;;  %3755 = vmax.xlane.f32.xlu0 %v14391_v46  ;;  %v3705_v24 = vpop.f32.mrb[87].mxu1  ;;  %v14423_v18 = vld [vmem:[%s17694_s2 + $0x20] sm:$0xff] }
 0xcc7   : > { %v14417_v57 = vadd.f32 %v14414_v2, %v3705_v24  ;;  %v14426_v29 = vadd.f32 %v14423_v18, %v3702_v38  ;;  %v14432_v24 = vld [vmem:[%s17694_s2 + $0x58] sm:$0xff]  ;;  %v14441_v38 = vld [vmem:[%s17694_s2 + $0x50] sm:$0xff] }
 0xcc8   : > { %3763 = vmax.xlane.f32.xlu1 %v14399_v47  ;;  %17871 = vst [vmem:[#allocation68_spill] sm:$0xff] %v14432_v24  ;;  %17872 = vst [vmem:[#allocation69_spill] sm:$0xff] %v14441_v38 }
 0xcca   : > { %3761 = vmax.xlane.f32.xlu0 %v14408_v42 }
 0xccb   : > { %v11518_v62 = vpop.f32.mrb[88].mxu1 }
 0xccc   : > { %3759 = vmax.xlane.f32.xlu1 %v14417_v57  ;;  %v3718_v48 = vpop.f32.mrb[89].mxu1  ;;  %v14444_v20 = vadd.f32 %v14441_v38, %v11518_v62 }
 0xccd   : > { %v11519_v10 = vpop.f32.mrb[90].mxu1  ;;  %v14462_v62 = vadd.f32 %v14459_v45, %v3718_v48  ;;  %v14478_v48 = vld [vmem:[%s17694_s2 + $0x60] sm:$0xff] }
 0xcce   : > { %v14435_v51 = vadd.f32 %v14432_v24, %v11519_v10  ;;  %3757 = vmax.xlane.f32.xlu0 %v14426_v29  ;;  %v3721_v15 = vpop.f32.mrb[91].mxu1  ;;  %17876 = vst [vmem:[#allocation73_spill] sm:$0xff] %v14478_v48 }
 0xccf   : > { %v14453_v10 = vadd.f32 %v14450_v49, %v3721_v15  ;;  %v14469_v15 = vld [vmem:[%s17694_s2 + $0x70] sm:$0xff] }
 0xcd0   : > { %3771 = vmax.xlane.f32.xlu1 %v14435_v51  ;;  %17875 = vst [vmem:[#allocation72_spill] sm:$0xff] %v14469_v15 }
 0xcd2   : > { %3769 = vmax.xlane.f32.xlu0 %v14444_v20 }
 0xcd3   : > { %v11522_v26 = vpop.f32.mrb[92].mxu1 }
 0xcd4   : > { %3767 = vmax.xlane.f32.xlu1 %v14453_v10  ;;  %v3734_v44 = vpop.f32.mrb[93].mxu1  ;;  %v14472_v21 = vadd.f32 %v14469_v15, %v11522_v26  ;;  %v14491_v26 = vld [vmem:[%s17694_s2 + $0x78] sm:$0xff] }
 0xcd5   : > { %v11523_v58 = vpop.f32.mrb[94].mxu1  ;;  %v14481_v35 = vadd.f32 %v14478_v48, %v3734_v44  ;;  %17877 = vst [vmem:[#allocation74_spill] sm:$0xff] %v14491_v26  ;;  %v14500_v44 = vld [vmem:[%s17694_s2 + $0x68] sm:$0xff] }
 0xcd6   : > { %3765 = vmax.xlane.f32.xlu0 %v14462_v62  ;;  %v3737_v33 = vpop.f32.mrb[95].mxu1  ;;  %v14494_v11 = vadd.f32 %v14491_v26, %v11523_v58  ;;  %17878 = vst [vmem:[#allocation75_spill] sm:$0xff] %v14500_v44 }
 0xcd7   : > { %v14503_v6 = vadd.f32 %v14500_v44, %v3737_v33 }
 0xcda   : > { %3777 = vmax.xlane.f32.xlu0 %v14472_v21 }
 0xcde   : > { %3773 = vmax.xlane.f32.xlu0 %v14481_v35 }
 0xce5   : > { %4125 = vrot.lane.b32.xlu1 %v17849_v59, %s12722_s29 }
 0xcf4   : > { %4123 = vrot.lane.b32.xlu0 %v17850_v63, %s12722_s29 }
 0xd09   : > { %3779 = vmax.xlane.f32.xlu1 %v14494_v11 }
 0xd0d   : > { %3775 = vmax.xlane.f32.xlu1 %v14503_v6 }
 0xd4b   : > { %v3754_v28 = vpop.xlane.xlu0 %3753 }
 0xd4c   : > { %v3783_v12 = vsub.f32 %v14364_v61, %v3754_v28 }
 0xd4e   : > { %v3801_v31 = vmul.f32 1.442695, %v3783_v12  ;;  %v3752_v58 = vpop.xlane.xlu1 %3751 }
 0xd4f   : > { %v3782_v25 = vsub.f32 %v14373_v41, %v3752_v58  ;;  %v3750_v26 = vpop.xlane.xlu0 %3749 }
 0xd50   : > { %12289 = vpow2.f32 %v3801_v31  ;;  %v3781_v63 = vsub.f32 %v14381_v1, %v3750_v26 }
 0xd51   : > { %v3799_v59 = vmul.f32 1.442695, %v3782_v25 }
 0xd52   : > { %v3797_v48 = vmul.f32 1.442695, %v3781_v63 }
 0xd53   : > { %12291 = vpow2.f32 %v3799_v59  ;;  %v3756_v33 = vpop.xlane.xlu0 %3755 }
 0xd54   : > { %12293 = vpow2.f32 %v3797_v48  ;;  %v3784_v44 = vsub.f32 %v14391_v46, %v3756_v33 }
 0xd55   : > { %v3764_v63 = vpop.xlane.xlu1 %3763 }
 0xd56   : > { %v3803_v15 = vmul.f32 1.442695, %v3784_v44  ;;  %v3788_v33 = vsub.f32 %v14399_v47, %v3764_v63 }
 0xd57   : > { %v3762_v31 = vpop.xlane.xlu0 %3761 }
 0xd58   : > { %12295 = vpow2.f32 %v3803_v15  ;;  %v3787_v41 = vsub.f32 %v14408_v42, %v3762_v31  ;;  %v3811_v38 = vmul.f32 1.442695, %v3788_v33 }
 0xd59   : > { %v3760_v1 = vpop.xlane.xlu1 %3759 }
 0xd5a   : > { %v14512_v45 = vpop.eup %12289  ;;  %v3809_v15 = vmul.f32 1.442695, %v3787_v41  ;;  %v3786_v26 = vsub.f32 %v14417_v57, %v3760_v1 }
 0xd5b   : > { %3833 = vadd.xlane.f32.xlu1 %v14512_v45  ;;  %v3758_v59 = vpop.xlane.xlu0 %3757 }
 0xd5c   : > { %v3785_v48 = vsub.f32 %v14426_v29, %v3758_v59  ;;  %12297 = vpow2.f32 %v3809_v15  ;;  %v3807_v49 = vmul.f32 1.442695, %v3786_v26 }
 0xd5d   : > { %v14515_v12 = vpop.eup %12291  ;;  %v3772_v44 = vpop.xlane.xlu1 %3771 }
 0xd5e   : > { %v14517_v28 = vpop.eup %12293  ;;  %3831 = vadd.xlane.f32.xlu0 %v14515_v12  ;;  %v3792_v47 = vsub.f32 %v14435_v51, %v3772_v44 }
 0xd5f   : > { %3829 = vadd.xlane.f32.xlu1 %v14517_v28  ;;  %v3770_v61 = vpop.xlane.xlu0 %3769 }
 0xd61   : > { %v3768_v24 = vpop.xlane.xlu1 %3767 }
 0xd62   : > { %v14521_v25 = vpop.eup %12295 }
 0xd63   : > { %3835 = vadd.xlane.f32.xlu1 %v14521_v25  ;;  %v3766_v46 = vpop.xlane.xlu0 %3765 }
 0xd64   : > { %v3789_v29 = vsub.f32 %v14462_v62, %v3766_v46 }
 0xd66   : > { %v3813_v63 = vmul.f32 1.442695, %v3789_v29  ;;  %v14537_v1 = vpop.eup %12297 }
 0xd67   : > { %v3778_v58 = vpop.xlane.xlu0 %3777 }
 0xd68   : > { %v3795_v42 = vsub.f32 %v14472_v21, %v3778_v58  ;;  %v3790_v21 = vsub.f32 %v14453_v10, %v3768_v24 }
 0xd6a   : > { %v3825_v57 = vmul.f32 1.442695, %v3795_v42  ;;  %v3815_v62 = vmul.f32 1.442695, %v3790_v21 }
 0xd6b   : > { %v3774_v59 = vpop.xlane.xlu0 %3773 }
 0xd6c   : > { %v3793_v41 = vsub.f32 %v14481_v35, %v3774_v59 }
 0xd74   : > { %4127 = vrot.lane.b32.xlu0 %v17853_v53, %s12722_s29  ;;  %4129 = vrot.lane.b32.xlu1 %v17854_v0, %s12722_s29  ;;  %v3805_v53 = vmul.f32 1.442695, %v3785_v48  ;;  %v3791_v0 = vsub.f32 %v14444_v20, %v3770_v61  ;;  %v14539_v20 = vpop.permute.xlu1 %4125 }
 0xd76   : > { %12299 = vpow2.f32 %v3805_v53  ;;  %v3817_v31 = vmul.f32 1.442695, %v3791_v0  ;;  %v3821_v53 = vmul.f32 1.442695, %v3793_v41  ;;  %v3819_v0 = vmul.f32 1.442695, %v3792_v47 }
 0xd77   : > { %12301 = vpow2.f32 %v3807_v49 }
 0xd78   : > { %12303 = vpow2.f32 %v3811_v38 }
 0xd79   : > { %12305 = vpow2.f32 %v3817_v31  ;;  %v4124_v31 = vpop.permute.xlu0 %4123 }
 0xd7a   : > { %12307 = vpow2.f32 %v3825_v57 }
 0xd7b   : > { %12309 = vpow2.f32 %v3813_v63 }
 0xd7c   : > { %12311 = vpow2.f32 %v3821_v53 }
 0xd7d   : > { %12313 = vpow2.f32 %v3819_v0 }
 0xd80   : > { %v14543_v49 = vpop.eup %12299 }
 0xd81   : > { %v14545_v35 = vpop.eup %12301 }
 0xd82   : > { %v14550_v46 = vpop.eup %12303 }
 0xd83   : > { %v14552_v24 = vpop.eup %12305 }
 0xd84   : > { %v14557_v48 = vpop.eup %12307 }
 0xd85   : > { %v14559_v26 = vpop.eup %12309 }
 0xd86   : > { %v14563_v44 = vpop.eup %12311 }
 0xd87   : > { %v14565_v58 = vpop.eup %12313 }
 0xd93   : > { %3841 = vadd.xlane.f32.xlu0 %v14537_v1 }
 0xd96   : > { %v3780_v38 = vpop.xlane.xlu1 %3779 }
 0xd97   : > { %v3796_v51 = vsub.f32 %v14494_v11, %v3780_v38  ;;  %3837 = vadd.xlane.f32.xlu0 %v14543_v49 }
 0xd98   : > { %3839 = vadd.xlane.f32.xlu1 %v14545_v35 }
 0xd99   : > { %v3827_v61 = vmul.f32 1.442695, %v3796_v51 }
 0xd9a   : > { %v3776_v15 = vpop.xlane.xlu1 %3775 }
 0xd9b   : > { %12315 = vpow2.f32 %v3827_v61  ;;  %v3794_v10 = vsub.f32 %v14503_v6, %v3776_v15  ;;  %3843 = vadd.xlane.f32.xlu0 %v14550_v46 }
 0xd9c   : > { %3849 = vadd.xlane.f32.xlu1 %v14552_v24  ;;  %12317 = vpow2.f32 %v3815_v62 }
 0xd9d   : > { %v3823_v11 = vmul.f32 1.442695, %v3794_v10  ;;  %v4160_v10 = vsel %vm1544_vm3, %v14321_v60, 0 }
 0xd9f   : > { %3857 = vadd.xlane.f32.xlu0 %v14557_v48  ;;  %12319 = vpow2.f32 %v3823_v11 }
 0xda0   : > { %3845 = vadd.xlane.f32.xlu1 %v14559_v26 }
 0xda3   : > { %3853 = vadd.xlane.f32.xlu0 %v14563_v44 }
 0xda4   : > { %3851 = vadd.xlane.f32.xlu1 %v14565_v58 }
 0xda5   : > { %v14569_v6 = vpop.eup %12315 }
 0xda6   : > { %v14571_v33 = vpop.eup %12317 }
 0xda7   : > { %3859 = vadd.xlane.f32.xlu0 %v14569_v6 }
 0xda8   : > { %3847 = vadd.xlane.f32.xlu1 %v14571_v33 }
 0xda9   : > { %v14575_v42 = vpop.eup %12319 }
 0xdac   : > { %3855 = vadd.xlane.f32.xlu1 %v14575_v42 }
 0xdbd   : > { %4133 = vrot.lane.b32.xlu1 %v13117_v30, %s12722_s29  ;;  %4131 = vrot.lane.b32.xlu0 %v13119_v32, %s12722_s29 }
 0xdc1   : > { %4105 = vrot.lane.b32.xlu1 %v13079_v40, %s12722_s29  ;;  %4103 = vrot.lane.b32.xlu0 %v13083_v43, %s12722_s29 }
 0xdc5   : > { %4109 = vrot.lane.b32.xlu1 %v13101_v5, %s12722_s29  ;;  %4107 = vrot.lane.b32.xlu0 %v13105_v9, %s12722_s29 }
 0xdc9   : > { %4113 = vrot.lane.b32.xlu1 %v13121_v34, %s12722_s29  ;;  %4111 = vrot.lane.b32.xlu0 %v13125_v37, %s12722_s29 }
 0xdcd   : > { %4117 = vrot.lane.b32.xlu1 %v13138_v54, %s12722_s29  ;;  %4115 = vrot.lane.b32.xlu0 %v13142_v56, %s12722_s29 }
 0xdd1   : > { %4434 = vrot.lane.b32.xlu1 %v13146_v3, %s12722_s29  ;;  %4432 = vrot.lane.b32.xlu0 %v13148_v8, %s12722_s29 }
 0xdd5   : > { %4438 = vrot.lane.b32.xlu1 %v13157_v22, %s12722_s29  ;;  %4436 = vrot.lane.b32.xlu0 %v13160_v23, %s12722_s29 }
 0xdd9   : > { %4442 = vrot.lane.b32.xlu1 %v13169_v39, %s12722_s29  ;;  %4440 = vrot.lane.b32.xlu0 %v13172_v4, %s12722_s29 }
 0xddd   : > { %4446 = vrot.lane.b32.xlu1 %v13179_v52, %s12722_s29  ;;  %4444 = vrot.lane.b32.xlu0 %v13182_v55, %s12722_s29  ;;  %s12724_s29 = smov 72  }
 0xde1   : > { %4652 = vrot.lane.b32.xlu1 %v13049_v14, %s12723_s24  ;;  %4650 = vrot.lane.b32.xlu0 %v13055_v16, %s12723_s24 }
 0xde8   : > { %v3834_v29 = vpop.xlane.xlu1 %3833 }
 0xdeb   : > { %v3832_v59 = vpop.xlane.xlu0 %3831 }
 0xdec   : > { %12321 = vrcp.f32 %v3832_v59  ;;  %v3830_v57 = vpop.xlane.xlu1 %3829 }
 0xded   : > { %12323 = vrcp.f32 %v3830_v57 }
 0xdee   : > { %12325 = vrcp.f32 %v3834_v29 }
 0xdef   : > { %v4128_v60 = vpop.permute.xlu0 %4127 }
 0xdf0   : > { %v3836_v41 = vpop.xlane.xlu1 %3835 }
 0xdf1   : > { %12327 = vrcp.f32 %v3836_v41 }
 0xdf6   : > { %v12322_v47 = vpop.eup %12321 }
 0xdf7   : > { %v12324_v63 = vpop.eup %12323  ;;  %v3878_v53 = vmul.f32 %v12322_v47, %v14515_v12  ;;  %v4163_v12 = vsel %vm1544_vm3, %v14506_v19, 0 }
 0xdf8   : > { %v3877_v0 = vmul.f32 %v12324_v63, %v14517_v28  ;;  %v12326_v21 = vpop.eup %12325  ;;  %v4169_v28 = vsel %vm1544_vm3, %v14539_v20, 0 }
 0xdf9   : > { %v3879_v62 = vmul.f32 %v12326_v21, %v14512_v45  ;;  %v4166_v45 = vsel %vm1544_vm3, %v4124_v31, 0 }
 0xdfa   : > { %v3893_v38 = vpack.c.bf16 %v3878_v53, %v3877_v0 }
 0xdfb   : > { %v12328_v51 = vpop.eup %12327 }
 0xdfc   : > { %v3880_v61 = vmul.f32 %v12328_v51, %v14521_v25  ;;  %11540 = vmatprep.mubr.bf16.mxu0 %v3893_v38  ;;  %v4172_v25 = vsel %vm1544_vm3, %v4128_v60, 0 }
 0xdfe   : > { %v3894_v15 = vpack.c.bf16 %v3880_v61, %v3879_v62 }
 0xe00   : > { %11541 = vmatmul.mubr.bf16.vlgmr.msra.gmra.mrb[96].mxu0 %v3894_v15 }
 0xe01   : > { %11557 = vmatpush3.bf16.xpose.msra.mxu0 %v4160_v10 }
 0xe02   : > { %11831 = vmatprep.subr.msk.bf16.mxu0 %vm1544_vm3, %v14506_v19  ;;  %v4130_v19 = vpop.permute.xlu1 %4129 }
 0xe03   : > { %v4175_v59 = vsel %vm1544_vm3, %v4130_v19, 0 }
 0xe09   : > { %11559 = vmatpush3.bf16.xpose.msra.mxu0 %v4163_v12 }
 0xe0a   : > { %11832 = vmatprep.subr.msk.bf16.mxu0 %vm1544_vm3, %v4124_v31 }
 0xe11   : > { %11561 = vmatpush3.bf16.xpose.msra.mxu0 %v4166_v45 }
 0xe12   : > { %11833 = vmatprep.subr.msk.bf16.mxu0 %vm1544_vm3, %v14539_v20 }
 0xe19   : > { %11563 = vmatpush3.bf16.xpose.msra.mxu0 %v4169_v28 }
 0xe1a   : > { %11834 = vmatprep.subr.msk.bf16.mxu0 %vm1544_vm3, %v4128_v60 }
 0xe20   : > { %v3842_v11 = vpop.xlane.xlu0 %3841 }
 0xe21   : > { %11565 = vmatpush3.bf16.xpose.msra.mxu0 %v4172_v25 }
 0xe22   : > { %11835 = vmatprep.subr.msk.bf16.mxu0 %vm1544_vm3, %v4130_v19 }
 0xe24   : > { %v3838_v29 = vpop.xlane.xlu0 %3837 }
 0xe25   : > { %12329 = vrcp.f32 %v3838_v29  ;;  %v3840_v31 = vpop.xlane.xlu1 %3839 }
 0xe26   : > { %12331 = vrcp.f32 %v3840_v31 }
 0xe27   : > { %12333 = vrcp.f32 %v3842_v11 }
 0xe28   : > { %v3844_v57 = vpop.xlane.xlu0 %3843 }
 0xe29   : > { %11567 = vmatpush3.bf16.xpose.msra.mxu0 %v4175_v59  ;;  %12335 = vrcp.f32 %v3844_v57  ;;  %v3850_v20 = vpop.xlane.xlu1 %3849 }
 0xe2c   : > { %v3858_v41 = vpop.xlane.xlu0 %3857 }
 0xe2d   : > { %v3846_v47 = vpop.xlane.xlu1 %3845 }
 0xe2f   : > { %v12330_v63 = vpop.eup %12329 }
 0xe30   : > { %v12332_v53 = vpop.eup %12331  ;;  %v3854_v0 = vpop.xlane.xlu0 %3853  ;;  %v3881_v21 = vmul.f32 %v12330_v63, %v14543_v49 }
 0xe31   : > { %v12334_v38 = vpop.eup %12333  ;;  %v3852_v51 = vpop.xlane.xlu1 %3851  ;;  %v3882_v62 = vmul.f32 %v12332_v53, %v14545_v35 }
 0xe32   : > { %12337 = vrcp.f32 %v3852_v51  ;;  %v3883_v12 = vmul.f32 %v12334_v38, %v14537_v1 }
 0xe33   : > { %v12336_v61 = vpop.eup %12335  ;;  %v3895_v15 = vpack.c.bf16 %v3882_v62, %v3881_v21  ;;  %12339 = vrcp.f32 %v3846_v47 }
 0xe34   : > { %v3860_v10 = vpop.xlane.xlu0 %3859  ;;  %v3884_v45 = vmul.f32 %v12336_v61, %v14550_v46  ;;  %12341 = vrcp.f32 %v3850_v20 }
 0xe35   : > { %v3848_v28 = vpop.xlane.xlu1 %3847  ;;  %11544 = vmatprep.mubr.bf16.mxu0 %v3895_v15 }
 0xe36   : > { %12343 = vrcp.f32 %v3848_v28  ;;  %v3896_v60 = vpack.c.bf16 %v3884_v45, %v3883_v12 }
 0xe37   : > { %12345 = vrcp.f32 %v3854_v0 }
 0xe38   : > { %11545 = vmatmul.mubr.bf16.gmra.mrb[100].mxu0 %v3896_v60  ;;  %v4132_v49 = vpop.permute.xlu0 %4131 }
 0xe39   : > { %v3856_v25 = vpop.xlane.xlu1 %3855  ;;  %11836 = vmatprep.subr.msk.bf16.mxu0 %vm1544_vm3, %v4132_v49  ;;  %v4178_v35 = vsel %vm1544_vm3, %v4132_v49, 0 }
 0xe3a   : > { %12347 = vrcp.f32 %v3856_v25  ;;  %11569 = vmatpush3.bf16.xpose.msra.mxu0 %v4178_v35 }
 0xe3b   : > { %12349 = vrcp.f32 %v3860_v10 }
 0xe3c   : > { %v4104_v11 = vpop.permute.xlu0 %4103  ;;  %v12338_v1 = vpop.eup %12337  ;;  %12351 = vrcp.f32 %v3858_v41 }
 0xe3d   : > { %v4134_v46 = vpop.permute.xlu1 %4133  ;;  %v12340_v19 = vpop.eup %12339  ;;  %v3888_v57 = vmul.f32 %v12338_v1, %v14565_v58 }
 0xe3e   : > { %11837 = vmatprep.subr.msk.bf16.mxu0 %vm1544_vm3, %v4134_v46  ;;  %v12342_v29 = vpop.eup %12341  ;;  %v4181_v47 = vsel %vm1544_vm3, %v4134_v46, 0  ;;  %v3885_v63 = vmul.f32 %v12340_v19, %v14559_v26 }
 0xe3f   : > { %v3887_v41 = vmul.f32 %v12342_v29, %v14552_v24 }
 0xe40   : > { %v12344_v31 = vpop.eup %12343  ;;  %v4108_v59 = vpop.permute.xlu0 %4107 }
 0xe41   : > { %v4106_v20 = vpop.permute.xlu1 %4105  ;;  %v3886_v53 = vmul.f32 %v12344_v31, %v14571_v33  ;;  %v12346_v0 = vpop.eup %12345  ;;  %v3898_v62 = vpack.c.bf16 %v3888_v57, %v3887_v41 }
 0xe42   : > { %11571 = vmatpush3.bf16.xpose.msra.mxu0 %v4181_v47  ;;  %v3889_v58 = vmul.f32 %v12346_v0, %v14563_v44 }
 0xe43   : > { %v3897_v21 = vpack.c.bf16 %v3886_v53, %v3885_v63 }
 0xe44   : > { %v12348_v38 = vpop.eup %12347  ;;  %v4112_v51 = vpop.permute.xlu0 %4111 }
 0xe45   : > { %v12350_v61 = vpop.eup %12349  ;;  %v4110_v15 = vpop.permute.xlu1 %4109  ;;  %11548 = vmatprep.mubr.bf16.mxu0 %v3897_v21  ;;  %v3890_v10 = vmul.f32 %v12348_v38, %v14575_v42 }
 0xe46   : > { %11549 = vmatmul.mubr.bf16.gmra.mrb[104].mxu0 %v3898_v62  ;;  %v12352_v12 = vpop.eup %12351  ;;  %v3892_v33 = vmul.f32 %v12350_v61, %v14569_v6 }
 0xe47   : > { %v3899_v26 = vpack.c.bf16 %v3890_v10, %v3889_v58  ;;  %v3891_v24 = vmul.f32 %v12352_v12, %v14557_v48 }
 0xe48   : > { %v4116_v45 = vpop.permute.xlu0 %4115 }
 0xe49   : > { %v4114_v28 = vpop.permute.xlu1 %4113  ;;  %11552 = vmatprep.mubr.bf16.mxu0 %v3899_v26  ;;  %v3900_v49 = vpack.c.bf16 %v3892_v33, %v3891_v24 }
 0xe4c   : > { %v4433_v60 = vpop.permute.xlu0 %4432 }
 0xe4d   : > { %v4118_v25 = vpop.permute.xlu1 %4117  ;;  %11588 = vmatprep.subr.bf16.mxu1 %v4433_v60 }
 0xe4e   : > { %11553 = vmatmul.mubr.bf16.gmra.mrb[108].mxu0 %v3900_v49  ;;  %11589 = vmatpush3.bf16.msra.mxu1 %v4433_v60 }
 0xe4f   : > { %11572 = vmatprep.mubr.msk.bf16.mxu0 %vm1544_vm3, %v4104_v11 }
 0xe50   : > { %v4437_v42 = vpop.permute.xlu0 %4436 }
 0xe51   : > { %v4435_v44 = vpop.permute.xlu1 %4434 }
 0xe52   : > { %11590 = vmatprep.subr.bf16.mxu1 %v4435_v44 }
 0xe53   : > { %11591 = vmatpush3.bf16.msra.mxu1 %v4435_v44 }
 0xe54   : > { %11592 = vmatprep.subr.bf16.mxu1 %v4437_v42  ;;  %v4441_v48 = vpop.permute.xlu0 %4440 }
 0xe55   : > { %v4439_v6 = vpop.permute.xlu1 %4438 }
 0xe56   : > { %11573 = vmatmul.mubr.msk.bf16.vlgmr.msra.gmra.mrb[112].mxu0 %vm1544_vm3, %v4106_v20 }
 0xe57   : > { %11576 = vmatprep.mubr.msk.bf16.mxu0 %vm1544_vm3, %v4108_v59  ;;  %11593 = vmatpush3.bf16.msra.mxu1 %v4437_v42 }
 0xe58   : > { %11594 = vmatprep.subr.bf16.mxu1 %v4439_v6  ;;  %v4445_v11 = vpop.permute.xlu0 %4444 }
 0xe59   : > { %v4443_v35 = vpop.permute.xlu1 %4442 }
 0xe5b   : > { %11595 = vmatpush3.bf16.msra.mxu1 %v4439_v6  ;;  %v17895_v6 = vld [vmem:[#allocation68_spill] sm:$0xff] }
 0xe5c   : > { %11596 = vmatprep.subr.bf16.mxu1 %v4441_v48  ;;  %v14661_v46 = vpop.permute.xlu0 %4650 }
 0xe5d   : > { %v4447_v1 = vpop.permute.xlu1 %4446 }
 0xe5e   : > { %11577 = vmatmul.mubr.msk.bf16.gmra.mrb[116].mxu0 %vm1544_vm3, %v4110_v15 }
 0xe5f   : > { %11580 = vmatprep.mubr.msk.bf16.mxu0 %vm1544_vm3, %v4112_v51  ;;  %11597 = vmatpush3.bf16.msra.mxu1 %v4441_v48 }
 0xe60   : > { %11598 = vmatprep.subr.bf16.mxu1 %v4443_v35 }
 0xe63   : > { %11599 = vmatpush3.bf16.msra.mxu1 %v4443_v35  ;;  %v17896_v35 = vld [vmem:[#allocation69_spill] sm:$0xff] }
 0xe64   : > { %11600 = vmatprep.subr.bf16.mxu1 %v4445_v11 }
 0xe66   : > { %11581 = vmatmul.mubr.msk.bf16.gmra.mrb[120].mxu0 %vm1544_vm3, %v4114_v28 }
 0xe67   : > { %11584 = vmatprep.mubr.msk.bf16.mxu0 %vm1544_vm3, %v4116_v45  ;;  %11601 = vmatpush3.bf16.msra.mxu1 %v4445_v11 }
 0xe68   : > { %11602 = vmatprep.subr.bf16.mxu1 %v4447_v1 }
 0xe6b   : > { %11603 = vmatpush3.bf16.msra.mxu1 %v4447_v1 }
 0xe6c   : > { %11838 = vmatprep.subr.msk.bf16.mxu1 %vm1544_vm3, %v14661_v46 }
 0xe6e   : > { %11585 = vmatmul.mubr.msk.bf16.gmra.mrb[124].mxu0 %vm1544_vm3, %v4118_v25 }
 0xed3   : > { %v14666_v19 = vpop.f32.mrb[96].mxu0 }
 0xed4   : > { %17879 = vst [vmem:[#allocation76_spill] sm:$0xff] %v14666_v19  ;;  %v14668_v29 = vpop.f32.mrb[97].mxu0 }
 0xed5   : > { %17880 = vst [vmem:[#allocation77_spill] sm:$0xff] %v14668_v29  ;;  %v14670_v31 = vpop.f32.mrb[98].mxu0 }
 0xed6   : > { %17881 = vst [vmem:[#allocation78_spill] sm:$0xff] %v14670_v31  ;;  %v14672_v59 = vpop.f32.mrb[99].mxu0 }
 0xed7   : > { %17882 = vst [vmem:[#allocation79_spill] sm:$0xff] %v14672_v59 }
 0xf0b   : > { %v14674_v57 = vpop.f32.mrb[100].mxu0 }
 0xf0c   : > { %17883 = vst [vmem:[#allocation80_spill] sm:$0xff] %v14674_v57  ;;  %v14676_v20 = vpop.f32.mrb[101].mxu0 }
 0xf0d   : > { %17884 = vst [vmem:[#allocation81_spill] sm:$0xff] %v14676_v20  ;;  %v14678_v47 = vpop.f32.mrb[102].mxu0 }
 0xf0e   : > { %17885 = vst [vmem:[#allocation82_spill] sm:$0xff] %v14678_v47  ;;  %v14680_v63 = vpop.f32.mrb[103].mxu0 }
 0xf0f   : > { %17886 = vst [vmem:[#allocation83_spill] sm:$0xff] %v14680_v63 }
 0xf19   : > { %v14682_v53 = vpop.f32.mrb[104].mxu0 }
 0xf1a   : > { %17887 = vst [vmem:[#allocation84_spill] sm:$0xff] %v14682_v53  ;;  %v14684_v0 = vpop.f32.mrb[105].mxu0 }
 0xf1b   : > { %17888 = vst [vmem:[#allocation85_spill] sm:$0xff] %v14684_v0  ;;  %v14686_v41 = vpop.f32.mrb[106].mxu0 }
 0xf1c   : > { %17889 = vst [vmem:[#allocation86_spill] sm:$0xff] %v14686_v41  ;;  %v14688_v21 = vpop.f32.mrb[107].mxu0 }
 0xf1d   : > { %17890 = vst [vmem:[#allocation87_spill] sm:$0xff] %v14688_v21 }
 0xf21   : > { %v14690_v38 = vpop.f32.mrb[108].mxu0 }
 0xf22   : > { %17891 = vst [vmem:[#allocation88_spill] sm:$0xff] %v14690_v38  ;;  %v14692_v51 = vpop.f32.mrb[109].mxu0 }
 0xf23   : > { %17892 = vst [vmem:[#allocation89_spill] sm:$0xff] %v14692_v51  ;;  %v14694_v62 = vpop.f32.mrb[110].mxu0 }
 0xf24   : > { %17893 = vst [vmem:[#allocation90_spill] sm:$0xff] %v14694_v62  ;;  %v14696_v61 = vpop.f32.mrb[111].mxu0 }
 0xf25   : > { %17894 = vst [vmem:[#allocation91_spill] sm:$0xff] %v14696_v61 }
 0xf29   : > { %v11574_v15 = vpop.f32.mrb[112].mxu0 }
 0xf2a   : > { %v4226_v58 = vadd.f32 %v14361_v27, %v11574_v15  ;;  %v4217_v10 = vpop.f32.mrb[113].mxu0  ;;  %v17898_v15 = vld [vmem:[#allocation71_spill] sm:$0xff] }
 0xf2b   : > { %v11575_v12 = vpop.f32.mrb[114].mxu0  ;;  %v4218_v33 = vadd.f32 %v14378_v13, %v4217_v10 }
 0xf2c   : > { %4284 = vmax.xlane.f32.xlu0 %v4226_v58  ;;  %v4220_v26 = vpop.f32.mrb[115].mxu0  ;;  %v4229_v24 = vadd.f32 %v14388_v36, %v11575_v12 }
 0xf2d   : > { %v4221_v45 = vadd.f32 %v14370_v7, %v4220_v26 }
 0xf2f   : > { %4282 = vmax.xlane.f32.xlu1 %v4221_v45 }
 0xf30   : > { %4280 = vmax.xlane.f32.xlu0 %v4218_v33 }
 0xf31   : > { %v11578_v28 = vpop.f32.mrb[116].mxu0 }
 0xf32   : > { %v4233_v60 = vpop.f32.mrb[117].mxu0  ;;  %v14706_v44 = vadd.f32 %v14405_v50, %v11578_v28 }
 0xf33   : > { %v11579_v49 = vpop.f32.mrb[118].mxu0  ;;  %v14714_v36 = vadd.f32 %v14423_v18, %v4233_v60  ;;  %v17899_v60 = vld [vmem:[#allocation72_spill] sm:$0xff] }
 0xf34   : > { %v14703_v25 = vadd.f32 %v14396_v17, %v11579_v49  ;;  %4286 = vmax.xlane.f32.xlu0 %v4229_v24  ;;  %v4236_v27 = vpop.f32.mrb[119].mxu0 }
 0xf35   : > { %v14710_v7 = vadd.f32 %v14414_v2, %v4236_v27  ;;  %v17897_v2 = vld [vmem:[#allocation70_spill] sm:$0xff]  ;;  %v17900_v27 = vld [vmem:[#allocation73_spill] sm:$0xff] }
 0xf36   : > { %4294 = vmax.xlane.f32.xlu1 %v14703_v25 }
 0xf38   : > { %4292 = vmax.xlane.f32.xlu0 %v14706_v44 }
 0xf39   : > { %v11582_v13 = vpop.f32.mrb[120].mxu0 }
 0xf3a   : > { %4290 = vmax.xlane.f32.xlu1 %v14710_v7  ;;  %v4249_v17 = vpop.f32.mrb[121].mxu0  ;;  %v14722_v11 = vadd.f32 %v17896_v35, %v11582_v13  ;;  %v17904_v35 = vld [vmem:[#allocation75_spill] sm:$0xff] }
 0xf3b   : > { %v11583_v42 = vpop.f32.mrb[122].mxu0  ;;  %v14730_v10 = vadd.f32 %v17898_v15, %v4249_v17  ;;  %v17901_v17 = vld [vmem:[#allocation11_spill] sm:$0xff] }
 0xf3c   : > { %v14718_v48 = vadd.f32 %v17895_v6, %v11583_v42  ;;  %4288 = vmax.xlane.f32.xlu0 %v14714_v36  ;;  %v4252_v50 = vpop.f32.mrb[123].mxu0  ;;  %v17902_v42 = vld [vmem:[#allocation12_spill] sm:$0xff]  ;;  %v17903_v6 = vld [vmem:[#allocation74_spill] sm:$0xff] }
 0xf3d   : > { %v14726_v1 = vadd.f32 %v17897_v2, %v4252_v50 }
 0xf3e   : > { %4302 = vmax.xlane.f32.xlu1 %v14718_v48 }
 0xf40   : > { %4300 = vmax.xlane.f32.xlu0 %v14722_v11 }
 0xf41   : > { %v11586_v18 = vpop.f32.mrb[124].mxu0 }
 0xf42   : > { %4298 = vmax.xlane.f32.xlu1 %v14726_v1  ;;  %v4265_v12 = vpop.f32.mrb[125].mxu0  ;;  %v14735_v49 = vadd.f32 %v17899_v60, %v11586_v18  ;;  %v14754_v18 = vpop.permute.xlu1 %4652 }
 0xf43   : > { %v11587_v26 = vpop.f32.mrb[126].mxu0  ;;  %v14739_v13 = vadd.f32 %v17900_v27, %v4265_v12 }
 0xf44   : > { %4296 = vmax.xlane.f32.xlu0 %v14730_v10  ;;  %v4268_v28 = vpop.f32.mrb[127].mxu0  ;;  %v14747_v50 = vadd.f32 %v17903_v6, %v11587_v26 }
 0xf45   : > { %v14751_v2 = vadd.f32 %v17904_v35, %v4268_v28 }
 0xf48   : > { %4308 = vmax.xlane.f32.xlu0 %v14735_v49 }
 0xf4c   : > { %4304 = vmax.xlane.f32.xlu0 %v14739_v13 }
 0xf53   : > { %4656 = vrot.lane.b32.xlu1 %v17901_v17, %s12723_s24 }
 0xf62   : > { %4654 = vrot.lane.b32.xlu0 %v17902_v42, %s12723_s24 }
 0xf77   : > { %4310 = vmax.xlane.f32.xlu1 %v14747_v50 }
 0xf7b   : > { %4306 = vmax.xlane.f32.xlu1 %v14751_v2 }
 0xfb9   : > { %v4285_v15 = vpop.xlane.xlu0 %4284 }
 0xfba   : > { %v4314_v12 = vsub.f32 %v4226_v58, %v4285_v15 }
 0xfbc   : > { %v4332_v60 = vmul.f32 1.442695, %v4314_v12  ;;  %v4283_v27 = vpop.xlane.xlu1 %4282 }
 0xfbd   : > { %v4313_v62 = vsub.f32 %v4221_v45, %v4283_v27  ;;  %v4281_v38 = vpop.xlane.xlu0 %4280 }
 0xfbe   : > { %12353 = vpow2.f32 %v4332_v60  ;;  %v4312_v61 = vsub.f32 %v4218_v33, %v4281_v38 }
 0xfbf   : > { %v4330_v51 = vmul.f32 1.442695, %v4313_v62  ;;  %v17906_v62 = vld [vmem:[#allocation13_spill] sm:$0xff] }
 0xfc0   : > { %v4328_v26 = vmul.f32 1.442695, %v4312_v61 }
 0xfc1   : > { %12355 = vpow2.f32 %v4330_v51  ;;  %v4287_v6 = vpop.xlane.xlu0 %4286 }
 0xfc2   : > { %12357 = vpow2.f32 %v4328_v26  ;;  %v4315_v41 = vsub.f32 %v4229_v24, %v4287_v6 }
 0xfc3   : > { %v4295_v45 = vpop.xlane.xlu1 %4294 }
 0xfc4   : > { %v4334_v28 = vmul.f32 1.442695, %v4315_v41  ;;  %v17905_v41 = vld [vmem:[#allocation14_spill] sm:$0xff]  ;;  %v4319_v21 = vsub.f32 %v14703_v25, %v4295_v45 }
 0xfc5   : > { %v4293_v51 = vpop.xlane.xlu0 %4292 }
 0xfc6   : > { %12359 = vpow2.f32 %v4334_v28  ;;  %v4318_v24 = vsub.f32 %v14706_v44, %v4293_v51  ;;  %v4342_v63 = vmul.f32 1.442695, %v4319_v21 }
 0xfc7   : > { %v4291_v15 = vpop.xlane.xlu1 %4290 }
 0xfc8   : > { %v14756_v35 = vpop.eup %12353  ;;  %v4340_v60 = vmul.f32 1.442695, %v4318_v24  ;;  %v4317_v26 = vsub.f32 %v14710_v7, %v4291_v15 }
 0xfc9   : > { %4364 = vadd.xlane.f32.xlu1 %v14756_v35  ;;  %v4289_v61 = vpop.xlane.xlu0 %4288 }
 0xfca   : > { %v4316_v27 = vsub.f32 %v14714_v36, %v4289_v61  ;;  %12361 = vpow2.f32 %v4340_v60  ;;  %v4338_v47 = vmul.f32 1.442695, %v4317_v26 }
 0xfcb   : > { %v14759_v53 = vpop.eup %12355  ;;  %v4303_v6 = vpop.xlane.xlu1 %4302 }
 0xfcc   : > { %v14761_v58 = vpop.eup %12357  ;;  %4362 = vadd.xlane.f32.xlu0 %v14759_v53  ;;  %v4336_v0 = vmul.f32 1.442695, %v4316_v27  ;;  %v4323_v25 = vsub.f32 %v14718_v48, %v4303_v6 }
 0xfcd   : > { %4360 = vadd.xlane.f32.xlu1 %v14761_v58  ;;  %v4301_v33 = vpop.xlane.xlu0 %4300 }
 0xfce   : > { %v4322_v57 = vsub.f32 %v14722_v11, %v4301_v33  ;;  %12363 = vpow2.f32 %v4336_v0 }
 0xfcf   : > { %v4299_v20 = vpop.xlane.xlu1 %4298  ;;  %12365 = vpow2.f32 %v4338_v47 }
 0xfd0   : > { %v14765_v38 = vpop.eup %12359  ;;  %v4348_v51 = vmul.f32 1.442695, %v4322_v57  ;;  %12367 = vpow2.f32 %v4342_v63  ;;  %v4350_v57 = vmul.f32 1.442695, %v4323_v25  ;;  %v4321_v0 = vsub.f32 %v14726_v1, %v4299_v20 }
 0xfd1   : > { %4366 = vadd.xlane.f32.xlu1 %v14765_v38  ;;  %v4297_v12 = vpop.xlane.xlu0 %4296 }
 0xfd2   : > { %v4320_v36 = vsub.f32 %v14730_v10, %v4297_v12  ;;  %12369 = vpow2.f32 %v4348_v51 }
 0xfd3   : > { %v14783_v21 = vpop.permute.xlu1 %4656 }
 0xfd4   : > { %v4344_v45 = vmul.f32 1.442695, %v4320_v36  ;;  %v14781_v15 = vpop.eup %12361 }
 0xfd5   : > { %v4309_v28 = vpop.xlane.xlu0 %4308 }
 0xfd6   : > { %v4326_v44 = vsub.f32 %v14735_v49, %v4309_v28  ;;  %v4346_v49 = vmul.f32 1.442695, %v4321_v0 }
 0xfd8   : > { %v4356_v7 = vmul.f32 1.442695, %v4326_v44  ;;  %v14787_v63 = vpop.eup %12363 }
 0xfd9   : > { %v4305_v61 = vpop.xlane.xlu0 %4304  ;;  %v14789_v10 = vpop.eup %12365 }
 0xfda   : > { %v4324_v24 = vsub.f32 %v14739_v13, %v4305_v61  ;;  %12371 = vpow2.f32 %v4356_v7  ;;  %v14794_v33 = vpop.eup %12367 }
 0xfdb   : > { %12373 = vpow2.f32 %v4344_v45 }
 0xfdc   : > { %v4352_v47 = vmul.f32 1.442695, %v4324_v24  ;;  %v14796_v20 = vpop.eup %12369 }
 0xfdd   : > { %v4655_v51 = vpop.permute.xlu0 %4654 }
 0xfde   : > { %12375 = vpow2.f32 %v4352_v47 }
 0xfdf   : > { %12377 = vpow2.f32 %v4350_v57 }
 0xfe2   : > { %4658 = vrot.lane.b32.xlu0 %v17905_v41, %s12723_s24  ;;  %4660 = vrot.lane.b32.xlu1 %v17906_v62, %s12723_s24 }
 0xfe4   : > { %v14801_v60 = vpop.eup %12371 }
 0xfe5   : > { %v14803_v27 = vpop.eup %12373 }
 0xfe8   : > { %v14807_v26 = vpop.eup %12375 }
 0xfe9   : > { %v14809_v6 = vpop.eup %12377 }
0x1001   : > { %4372 = vadd.xlane.f32.xlu0 %v14781_v15 }
0x1004   : > { %v4311_v11 = vpop.xlane.xlu1 %4310 }
0x1005   : > { %v4327_v48 = vsub.f32 %v14747_v50, %v4311_v11  ;;  %4368 = vadd.xlane.f32.xlu0 %v14787_v63 }
0x1006   : > { %4370 = vadd.xlane.f32.xlu1 %v14789_v10 }
0x1007   : > { %v4358_v13 = vmul.f32 1.442695, %v4327_v48 }
0x1008   : > { %v4307_v12 = vpop.xlane.xlu1 %4306 }
0x1009   : > { %12379 = vpow2.f32 %v4358_v13  ;;  %v4325_v1 = vsub.f32 %v14751_v2, %v4307_v12  ;;  %4374 = vadd.xlane.f32.xlu0 %v14794_v33  ;;  %v4691_v13 = vsel %vm1544_vm3, %v14661_v46, 0 }
0x100a   : > { %4380 = vadd.xlane.f32.xlu1 %v14796_v20  ;;  %12381 = vpow2.f32 %v4346_v49 }
0x100b   : > { %v4354_v50 = vmul.f32 1.442695, %v4325_v1 }
0x100d   : > { %4388 = vadd.xlane.f32.xlu0 %v14801_v60  ;;  %12383 = vpow2.f32 %v4354_v50 }
0x100e   : > { %4376 = vadd.xlane.f32.xlu1 %v14803_v27 }
0x1011   : > { %4384 = vadd.xlane.f32.xlu0 %v14807_v26 }
0x1012   : > { %4382 = vadd.xlane.f32.xlu1 %v14809_v6 }
0x1013   : > { %v14813_v2 = vpop.eup %12379 }
0x1014   : > { %v14815_v28 = vpop.eup %12381 }
0x1015   : > { %4390 = vadd.xlane.f32.xlu0 %v14813_v2 }
0x1016   : > { %4378 = vadd.xlane.f32.xlu1 %v14815_v28 }
0x1017   : > { %v14819_v44 = vpop.eup %12383 }
0x101a   : > { %4386 = vadd.xlane.f32.xlu1 %v14819_v44 }
0x102b   : > { %4664 = vrot.lane.b32.xlu1 %v13117_v30, %s12723_s24  ;;  %4662 = vrot.lane.b32.xlu0 %v13119_v32, %s12723_s24 }
0x102f   : > { %4636 = vrot.lane.b32.xlu1 %v13079_v40, %s12723_s24  ;;  %4634 = vrot.lane.b32.xlu0 %v13083_v43, %s12723_s24 }
0x1033   : > { %4640 = vrot.lane.b32.xlu1 %v13101_v5, %s12723_s24  ;;  %4638 = vrot.lane.b32.xlu0 %v13105_v9, %s12723_s24 }
0x1037   : > { %4644 = vrot.lane.b32.xlu1 %v13121_v34, %s12723_s24  ;;  %4642 = vrot.lane.b32.xlu0 %v13125_v37, %s12723_s24 }
0x103b   : > { %4648 = vrot.lane.b32.xlu1 %v13138_v54, %s12723_s24  ;;  %4646 = vrot.lane.b32.xlu0 %v13142_v56, %s12723_s24 }
0x103f   : > { %4965 = vrot.lane.b32.xlu1 %v13146_v3, %s12723_s24  ;;  %4963 = vrot.lane.b32.xlu0 %v13148_v8, %s12723_s24 }
0x1043   : > { %4969 = vrot.lane.b32.xlu1 %v13157_v22, %s12723_s24  ;;  %4967 = vrot.lane.b32.xlu0 %v13160_v23, %s12723_s24 }
0x1047   : > { %4973 = vrot.lane.b32.xlu1 %v13169_v39, %s12723_s24  ;;  %4971 = vrot.lane.b32.xlu0 %v13172_v4, %s12723_s24 }
0x104b   : > { %4977 = vrot.lane.b32.xlu1 %v13179_v52, %s12723_s24  ;;  %4975 = vrot.lane.b32.xlu0 %v13182_v55, %s12723_s24  ;;  %s12726_s24 = smov 16  }
0x104f   : > { %5183 = vrot.lane.b32.xlu1 %v13049_v14, %s12724_s29  ;;  %5181 = vrot.lane.b32.xlu0 %v13055_v16, %s12724_s29 }
0x1056   : > { %v4365_v36 = vpop.xlane.xlu1 %4364 }
0x1059   : > { %v4363_v61 = vpop.xlane.xlu0 %4362 }
0x105a   : > { %12385 = vrcp.f32 %v4363_v61  ;;  %v4361_v7 = vpop.xlane.xlu1 %4360 }
0x105b   : > { %12387 = vrcp.f32 %v4361_v7 }
0x105c   : > { %12389 = vrcp.f32 %v4365_v36 }
0x105d   : > { %v4659_v46 = vpop.permute.xlu0 %4658 }
0x105e   : > { %v4367_v24 = vpop.xlane.xlu1 %4366 }
0x105f   : > { %12391 = vrcp.f32 %v4367_v24 }
0x1064   : > { %v12386_v25 = vpop.eup %12385 }
0x1065   : > { %v12388_v45 = vpop.eup %12387  ;;  %v4409_v47 = vmul.f32 %v12386_v25, %v14759_v53  ;;  %v4694_v53 = vsel %vm1544_vm3, %v14754_v18, 0 }
0x1066   : > { %v4408_v57 = vmul.f32 %v12388_v45, %v14761_v58  ;;  %v12390_v0 = vpop.eup %12389  ;;  %v4700_v58 = vsel %vm1544_vm3, %v14783_v21, 0 }
0x1067   : > { %v4410_v16 = vmul.f32 %v12390_v0, %v14756_v35  ;;  %v4697_v35 = vsel %vm1544_vm3, %v4655_v51, 0 }
0x1068   : > { %v4424_v14 = vpack.c.bf16 %v4409_v47, %v4408_v57 }
0x1069   : > { %v12392_v11 = vpop.eup %12391 }
0x106a   : > { %v4411_v48 = vmul.f32 %v12392_v11, %v14765_v38  ;;  %11604 = vmatprep.mubr.bf16.mxu1 %v4424_v14  ;;  %v4703_v38 = vsel %vm1544_vm3, %v4659_v46, 0 }
0x106c   : > { %v4425_v49 = vpack.c.bf16 %v4411_v48, %v4410_v16 }
0x106e   : > { %11605 = vmatmul.mubr.bf16.vlgmr.msra.gmra.mrb[96].mxu1 %v4425_v49 }
0x106f   : > { %11621 = vmatpush3.bf16.xpose.msra.mxu1 %v4691_v13 }
0x1070   : > { %11839 = vmatprep.subr.msk.bf16.mxu1 %vm1544_vm3, %v14754_v18  ;;  %v4661_v18 = vpop.permute.xlu1 %4660 }
0x1077   : > { %11623 = vmatpush3.bf16.xpose.msra.mxu1 %v4694_v53 }
0x1078   : > { %11840 = vmatprep.subr.msk.bf16.mxu1 %vm1544_vm3, %v4655_v51  ;;  %v4706_v51 = vsel %vm1544_vm3, %v4661_v18, 0 }
0x107f   : > { %11625 = vmatpush3.bf16.xpose.msra.mxu1 %v4697_v35 }
0x1080   : > { %11841 = vmatprep.subr.msk.bf16.mxu1 %vm1544_vm3, %v14783_v21 }
0x1087   : > { %11627 = vmatpush3.bf16.xpose.msra.mxu1 %v4700_v58 }
0x1088   : > { %11842 = vmatprep.subr.msk.bf16.mxu1 %vm1544_vm3, %v4659_v46 }
0x108e   : > { %v4373_v12 = vpop.xlane.xlu0 %4372 }
0x108f   : > { %11629 = vmatpush3.bf16.xpose.msra.mxu1 %v4703_v38 }
0x1090   : > { %11843 = vmatprep.subr.msk.bf16.mxu1 %vm1544_vm3, %v4661_v18 }
0x1092   : > { %v4369_v1 = vpop.xlane.xlu0 %4368 }
0x1093   : > { %12393 = vrcp.f32 %v4369_v1  ;;  %v4371_v50 = vpop.xlane.xlu1 %4370 }
0x1094   : > { %12395 = vrcp.f32 %v4371_v50 }
0x1095   : > { %12397 = vrcp.f32 %v4373_v12 }
0x1096   : > { %v4375_v36 = vpop.xlane.xlu0 %4374 }
0x1097   : > { %11631 = vmatpush3.bf16.xpose.msra.mxu1 %v4706_v51  ;;  %12399 = vrcp.f32 %v4375_v36  ;;  %v4381_v21 = vpop.xlane.xlu1 %4380 }
0x109a   : > { %v4389_v61 = vpop.xlane.xlu0 %4388 }
0x109b   : > { %v4377_v7 = vpop.xlane.xlu1 %4376 }
0x109d   : > { %v12394_v24 = vpop.eup %12393 }
0x109e   : > { %v12396_v25 = vpop.eup %12395  ;;  %v4385_v45 = vpop.xlane.xlu0 %4384  ;;  %v4412_v47 = vmul.f32 %v12394_v24, %v14787_v63 }
0x109f   : > { %v12398_v57 = vpop.eup %12397  ;;  %v4383_v0 = vpop.xlane.xlu1 %4382  ;;  %v4413_v14 = vmul.f32 %v12396_v25, %v14789_v10 }
0x10a0   : > { %12401 = vrcp.f32 %v4383_v0  ;;  %v4414_v49 = vmul.f32 %v12398_v57, %v14781_v15 }
0x10a1   : > { %v12400_v11 = vpop.eup %12399  ;;  %v4426_v16 = vpack.c.bf16 %v4413_v14, %v4412_v47  ;;  %12403 = vrcp.f32 %v4377_v7 }
0x10a2   : > { %v4391_v48 = vpop.xlane.xlu0 %4390  ;;  %v4415_v13 = vmul.f32 %v12400_v11, %v14794_v33  ;;  %12405 = vrcp.f32 %v4381_v21 }
0x10a3   : > { %v4379_v53 = vpop.xlane.xlu1 %4378  ;;  %11608 = vmatprep.mubr.bf16.mxu1 %v4426_v16 }
0x10a4   : > { %12407 = vrcp.f32 %v4379_v53  ;;  %v4427_v35 = vpack.c.bf16 %v4415_v13, %v4414_v49 }
0x10a5   : > { %12409 = vrcp.f32 %v4385_v45 }
0x10a6   : > { %11609 = vmatmul.mubr.bf16.gmra.mrb[100].mxu1 %v4427_v35  ;;  %v4663_v63 = vpop.permute.xlu0 %4662 }
0x10a7   : > { %v4387_v58 = vpop.xlane.xlu1 %4386  ;;  %11844 = vmatprep.subr.msk.bf16.mxu1 %vm1544_vm3, %v4663_v63  ;;  %v4709_v10 = vsel %vm1544_vm3, %v4663_v63, 0 }
0x10a8   : > { %12411 = vrcp.f32 %v4387_v58  ;;  %11633 = vmatpush3.bf16.xpose.msra.mxu1 %v4709_v10 }
0x10a9   : > { %12413 = vrcp.f32 %v4391_v48 }
0x10aa   : > { %v4635_v46 = vpop.permute.xlu0 %4634  ;;  %v12402_v15 = vpop.eup %12401  ;;  %12415 = vrcp.f32 %v4389_v61 }
0x10ab   : > { %v4665_v33 = vpop.permute.xlu1 %4664  ;;  %v12404_v38 = vpop.eup %12403  ;;  %v4419_v50 = vmul.f32 %v12402_v15, %v14809_v6 }
0x10ac   : > { %11845 = vmatprep.subr.msk.bf16.mxu1 %vm1544_vm3, %v4665_v33  ;;  %v12406_v12 = vpop.eup %12405  ;;  %v4712_v36 = vsel %vm1544_vm3, %v4665_v33, 0  ;;  %v4416_v21 = vmul.f32 %v12404_v38, %v14803_v27 }
0x10ad   : > { %v4418_v61 = vmul.f32 %v12406_v12, %v14796_v20 }
0x10ae   : > { %v12408_v18 = vpop.eup %12407  ;;  %v4639_v1 = vpop.permute.xlu0 %4638 }
0x10af   : > { %v4637_v51 = vpop.permute.xlu1 %4636  ;;  %v4417_v7 = vmul.f32 %v12408_v18, %v14815_v28  ;;  %v12410_v24 = vpop.eup %12409  ;;  %v4429_v57 = vpack.c.bf16 %v4419_v50, %v4418_v61 }
0x10b0   : > { %11635 = vmatpush3.bf16.xpose.msra.mxu1 %v4712_v36  ;;  %v4420_v6 = vmul.f32 %v12410_v24, %v14807_v26 }
0x10b1   : > { %v4428_v25 = vpack.c.bf16 %v4417_v7, %v4416_v21 }
0x10b2   : > { %v12412_v45 = vpop.eup %12411  ;;  %v4643_v47 = vpop.permute.xlu0 %4642 }
0x10b3   : > { %v12414_v0 = vpop.eup %12413  ;;  %v4641_v14 = vpop.permute.xlu1 %4640  ;;  %11612 = vmatprep.mubr.bf16.mxu1 %v4428_v25  ;;  %v4421_v11 = vmul.f32 %v12412_v45, %v14819_v44 }
0x10b4   : > { %11613 = vmatmul.mubr.bf16.gmra.mrb[104].mxu1 %v4429_v57  ;;  %v12416_v16 = vpop.eup %12415  ;;  %v4423_v28 = vmul.f32 %v12414_v0, %v14813_v2  ;;  %v14945_v0 = vld [vmem:[%s17694_s2 + $0x10] sm:$0xff] }
0x10b5   : > { %v4430_v27 = vpack.c.bf16 %v4421_v11, %v4420_v6  ;;  %v4422_v20 = vmul.f32 %v12416_v16, %v14801_v60 }
0x10b6   : > { %v4647_v48 = vpop.permute.xlu0 %4646 }
0x10b7   : > { %v4645_v49 = vpop.permute.xlu1 %4644  ;;  %11616 = vmatprep.mubr.bf16.mxu1 %v4430_v27  ;;  %v4431_v53 = vpack.c.bf16 %v4423_v28, %v4422_v20  ;;  %v14954_v27 = vld [vmem:[%s17694_s2 + $0x8] sm:$0xff]  ;;  %v14962_v28 = vld [vmem:[%s17694_s2] sm:$0xff] }
0x10ba   : > { %v4964_v13 = vpop.permute.xlu0 %4963 }
0x10bb   : > { %v4649_v35 = vpop.permute.xlu1 %4648  ;;  %11652 = vmatprep.subr.bf16.mxu0 %v4964_v13 }
0x10bc   : > { %11617 = vmatmul.mubr.bf16.gmra.mrb[108].mxu1 %v4431_v53  ;;  %11653 = vmatpush3.bf16.msra.mxu0 %v4964_v13  ;;  %v14972_v13 = vld [vmem:[%s17694_s2 + $0x18] sm:$0xff] }
0x10bd   : > { %11636 = vmatprep.mubr.msk.bf16.mxu1 %vm1544_vm3, %v4635_v46 }
0x10be   : > { %v4968_v44 = vpop.permute.xlu0 %4967 }
0x10bf   : > { %v4966_v26 = vpop.permute.xlu1 %4965 }
0x10c0   : > { %11654 = vmatprep.subr.bf16.mxu0 %v4966_v26 }
0x10c1   : > { %11655 = vmatpush3.bf16.msra.mxu0 %v4966_v26 }
0x10c2   : > { %11656 = vmatprep.subr.bf16.mxu0 %v4968_v44  ;;  %v4972_v60 = vpop.permute.xlu0 %4971 }
0x10c3   : > { %v4970_v2 = vpop.permute.xlu1 %4969 }
0x10c4   : > { %11637 = vmatmul.mubr.msk.bf16.vlgmr.msra.gmra.mrb[112].mxu1 %vm1544_vm3, %v4637_v51 }
0x10c5   : > { %11640 = vmatprep.mubr.msk.bf16.mxu1 %vm1544_vm3, %v4639_v1  ;;  %11657 = vmatpush3.bf16.msra.mxu0 %v4968_v44  ;;  %v14980_v44 = vld [vmem:[%s17694_s2 + $0x38] sm:$0xff] }
0x10c6   : > { %11658 = vmatprep.subr.bf16.mxu0 %v4970_v2  ;;  %v4976_v58 = vpop.permute.xlu0 %4975 }
0x10c7   : > { %v4974_v63 = vpop.permute.xlu1 %4973 }
0x10c9   : > { %11659 = vmatpush3.bf16.msra.mxu0 %v4970_v2 }
0x10ca   : > { %11660 = vmatprep.subr.bf16.mxu0 %v4972_v60  ;;  %v14905_v46 = vpop.permute.xlu0 %5181 }
0x10cb   : > { %v4978_v10 = vpop.permute.xlu1 %4977 }
0x10cc   : > { %11641 = vmatmul.mubr.msk.bf16.gmra.mrb[116].mxu1 %vm1544_vm3, %v4641_v14 }
0x10cd   : > { %11644 = vmatprep.mubr.msk.bf16.mxu1 %vm1544_vm3, %v4643_v47  ;;  %11661 = vmatpush3.bf16.msra.mxu0 %v4972_v60 }
0x10ce   : > { %11662 = vmatprep.subr.bf16.mxu0 %v4974_v63 }
0x10d1   : > { %11663 = vmatpush3.bf16.msra.mxu0 %v4974_v63  ;;  %v14989_v63 = vld [vmem:[%s17694_s2 + $0x30] sm:$0xff] }
0x10d2   : > { %11664 = vmatprep.subr.bf16.mxu0 %v4976_v58 }
0x10d4   : > { %11645 = vmatmul.mubr.msk.bf16.gmra.mrb[120].mxu1 %vm1544_vm3, %v4645_v49 }
0x10d5   : > { %11648 = vmatprep.mubr.msk.bf16.mxu1 %vm1544_vm3, %v4647_v48  ;;  %11665 = vmatpush3.bf16.msra.mxu0 %v4976_v58 }
0x10d6   : > { %11666 = vmatprep.subr.bf16.mxu0 %v4978_v10 }
0x10d9   : > { %11667 = vmatpush3.bf16.msra.mxu0 %v4978_v10  ;;  %v14998_v10 = vld [vmem:[%s17694_s2 + $0x28] sm:$0xff] }
0x10da   : > { %11846 = vmatprep.subr.msk.bf16.mxu0 %vm1544_vm3, %v14905_v46 }
0x10dc   : > { %11649 = vmatmul.mubr.msk.bf16.gmra.mrb[124].mxu1 %vm1544_vm3, %v4649_v35 }
0x1141   : > { %v14910_v15 = vpop.f32.mrb[96].mxu1 }
0x1142   : > { %17907 = vst [vmem:[#allocation68_spill] sm:$0xff] %v14910_v15  ;;  %v14912_v33 = vpop.f32.mrb[97].mxu1 }
0x1143   : > { %17908 = vst [vmem:[#allocation69_spill] sm:$0xff] %v14912_v33  ;;  %v14914_v38 = vpop.f32.mrb[98].mxu1 }
0x1144   : > { %17909 = vst [vmem:[#allocation70_spill] sm:$0xff] %v14914_v38  ;;  %v14916_v12 = vpop.f32.mrb[99].mxu1 }
0x1145   : > { %17910 = vst [vmem:[#allocation71_spill] sm:$0xff] %v14916_v12 }
0x1179   : > { %v14918_v18 = vpop.f32.mrb[100].mxu1 }
0x117a   : > { %17911 = vst [vmem:[#allocation72_spill] sm:$0xff] %v14918_v18  ;;  %v14920_v1 = vpop.f32.mrb[101].mxu1 }
0x117b   : > { %17912 = vst [vmem:[#allocation73_spill] sm:$0xff] %v14920_v1  ;;  %v14922_v50 = vpop.f32.mrb[102].mxu1 }
0x117c   : > { %17913 = vst [vmem:[#allocation11_spill] sm:$0xff] %v14922_v50  ;;  %v14924_v51 = vpop.f32.mrb[103].mxu1 }
0x117d   : > { %17914 = vst [vmem:[#allocation12_spill] sm:$0xff] %v14924_v51 }
0x1187   : > { %v14926_v36 = vpop.f32.mrb[104].mxu1 }
0x1188   : > { %17915 = vst [vmem:[#allocation74_spill] sm:$0xff] %v14926_v36  ;;  %v14928_v21 = vpop.f32.mrb[105].mxu1  ;;  %v15043_v36 = vld [vmem:[%s17694_s2 + $0x40] sm:$0xff] }
0x1189   : > { %17916 = vst [vmem:[#allocation75_spill] sm:$0xff] %v14928_v21  ;;  %v14930_v7 = vpop.f32.mrb[106].mxu1 }
0x118a   : > { %17917 = vst [vmem:[#allocation14_spill] sm:$0xff] %v14930_v7  ;;  %v14932_v24 = vpop.f32.mrb[107].mxu1 }
0x118b   : > { %17918 = vst [vmem:[#allocation13_spill] sm:$0xff] %v14932_v24 }
0x118f   : > { %v14934_v61 = vpop.f32.mrb[108].mxu1 }
0x1190   : > { %17919 = vst [vmem:[#allocation92_spill] sm:$0xff] %v14934_v61  ;;  %v14936_v25 = vpop.f32.mrb[109].mxu1 }
0x1191   : > { %17920 = vst [vmem:[#allocation93_spill] sm:$0xff] %v14936_v25  ;;  %v14938_v45 = vpop.f32.mrb[110].mxu1  ;;  %v15034_v25 = vld [vmem:[%s17694_s2 + $0x48] sm:$0xff] }
0x1192   : > { %17921 = vst [vmem:[#allocation94_spill] sm:$0xff] %v14938_v45  ;;  %v14940_v47 = vpop.f32.mrb[111].mxu1 }
0x1193   : > { %17922 = vst [vmem:[#allocation95_spill] sm:$0xff] %v14940_v47 }
0x1197   : > { %v11638_v57 = vpop.f32.mrb[112].mxu1 }
0x1198   : > { %v14948_v14 = vadd.f32 %v14945_v0, %v11638_v57  ;;  %v4748_v6 = vpop.f32.mrb[113].mxu1 }
0x1199   : > { %v11639_v11 = vpop.f32.mrb[114].mxu1  ;;  %v14965_v49 = vadd.f32 %v14962_v28, %v4748_v6 }
0x119a   : > { %4815 = vmax.xlane.f32.xlu0 %v14948_v14  ;;  %v4751_v16 = vpop.f32.mrb[115].mxu1  ;;  %v14975_v53 = vadd.f32 %v14972_v13, %v11639_v11  ;;  %v15007_v11 = vld [vmem:[%s17694_s2 + $0x20] sm:$0xff] }
0x119b   : > { %v14957_v48 = vadd.f32 %v14954_v27, %v4751_v16 }
0x119d   : > { %4813 = vmax.xlane.f32.xlu1 %v14957_v48 }
0x119e   : > { %4811 = vmax.xlane.f32.xlu0 %v14965_v49 }
0x119f   : > { %v11642_v20 = vpop.f32.mrb[116].mxu1 }
0x11a0   : > { %v4764_v35 = vpop.f32.mrb[117].mxu1  ;;  %v14992_v58 = vadd.f32 %v14989_v63, %v11642_v20 }
0x11a1   : > { %v11643_v26 = vpop.f32.mrb[118].mxu1  ;;  %v15010_v16 = vadd.f32 %v15007_v11, %v4764_v35  ;;  %v15025_v35 = vld [vmem:[%s17694_s2 + $0x50] sm:$0xff] }
0x11a2   : > { %v14983_v2 = vadd.f32 %v14980_v44, %v11643_v26  ;;  %4817 = vmax.xlane.f32.xlu0 %v14975_v53  ;;  %v4767_v60 = vpop.f32.mrb[119].mxu1 }
0x11a3   : > { %v15001_v57 = vadd.f32 %v14998_v10, %v4767_v60  ;;  %v15016_v60 = vld [vmem:[%s17694_s2 + $0x58] sm:$0xff] }
0x11a4   : > { %4825 = vmax.xlane.f32.xlu1 %v14983_v2 }
0x11a6   : > { %4823 = vmax.xlane.f32.xlu0 %v14992_v58 }
0x11a7   : > { %v11646_v6 = vpop.f32.mrb[120].mxu1 }
0x11a8   : > { %4821 = vmax.xlane.f32.xlu1 %v15001_v57  ;;  %v4780_v20 = vpop.f32.mrb[121].mxu1  ;;  %v15028_v47 = vadd.f32 %v15025_v35, %v11646_v6 }
0x11a9   : > { %v11647_v26 = vpop.f32.mrb[122].mxu1  ;;  %v15046_v6 = vadd.f32 %v15043_v36, %v4780_v20  ;;  %v15062_v20 = vld [vmem:[%s17694_s2 + $0x60] sm:$0xff] }
0x11aa   : > { %v15019_v45 = vadd.f32 %v15016_v60, %v11647_v26  ;;  %4819 = vmax.xlane.f32.xlu0 %v15010_v16  ;;  %v4783_v61 = vpop.f32.mrb[123].mxu1 }
0x11ab   : > { %v15037_v26 = vadd.f32 %v15034_v25, %v4783_v61  ;;  %v15053_v61 = vld [vmem:[%s17694_s2 + $0x70] sm:$0xff] }
0x11ac   : > { %4833 = vmax.xlane.f32.xlu1 %v15019_v45 }
0x11ae   : > { %4831 = vmax.xlane.f32.xlu0 %v15028_v47 }
0x11af   : > { %v11650_v7 = vpop.f32.mrb[124].mxu1 }
0x11b0   : > { %4829 = vmax.xlane.f32.xlu1 %v15037_v26  ;;  %v4796_v24 = vpop.f32.mrb[125].mxu1  ;;  %v15056_v18 = vadd.f32 %v15053_v61, %v11650_v7  ;;  %v15075_v7 = vld [vmem:[%s17694_s2 + $0x78] sm:$0xff] }
0x11b1   : > { %v11651_v21 = vpop.f32.mrb[126].mxu1  ;;  %v15065_v51 = vadd.f32 %v15062_v20, %v4796_v24  ;;  %17923 = vst [vmem:[#allocation96_spill] sm:$0xff] %v15075_v7  ;;  %v15084_v24 = vld [vmem:[%s17694_s2 + $0x68] sm:$0xff] }
0x11b2   : > { %4827 = vmax.xlane.f32.xlu0 %v15046_v6  ;;  %v4799_v50 = vpop.f32.mrb[127].mxu1  ;;  %v15078_v1 = vadd.f32 %v15075_v7, %v11651_v21  ;;  %17924 = vst [vmem:[#allocation97_spill] sm:$0xff] %v15084_v24 }
0x11b6   : > { %4839 = vmax.xlane.f32.xlu0 %v15056_v18 }
0x11ba   : > { %4835 = vmax.xlane.f32.xlu0 %v15065_v51 }
0x11c1   : > { %5187 = vrot.lane.b32.xlu1 %v17901_v17, %s12724_s29  ;;  %v15087_v17 = vadd.f32 %v15084_v24, %v4799_v50 }
0x11d0   : > { %5185 = vrot.lane.b32.xlu0 %v17902_v42, %s12724_s29  ;;  %v15090_v42 = vpop.permute.xlu1 %5183 }
0x11e5   : > { %4841 = vmax.xlane.f32.xlu1 %v15078_v1 }
0x11e9   : > { %4837 = vmax.xlane.f32.xlu1 %v15087_v17 }
0x1227   : > { %v4816_v38 = vpop.xlane.xlu0 %4815 }
0x1228   : > { %v4845_v15 = vsub.f32 %v14948_v14, %v4816_v38 }
0x122a   : > { %v4863_v12 = vmul.f32 1.442695, %v4845_v15  ;;  %v4814_v21 = vpop.xlane.xlu1 %4813 }
0x122b   : > { %v4844_v33 = vsub.f32 %v14957_v48, %v4814_v21  ;;  %v4812_v31 = vpop.xlane.xlu0 %4811 }
0x122c   : > { %12417 = vpow2.f32 %v4863_v12  ;;  %v4843_v19 = vsub.f32 %v14965_v49, %v4812_v31 }
0x122d   : > { %v4861_v59 = vmul.f32 1.442695, %v4844_v33 }
0x122e   : > { %v4859_v29 = vmul.f32 1.442695, %v4843_v19 }
0x122f   : > { %12419 = vpow2.f32 %v4861_v59  ;;  %v4818_v50 = vpop.xlane.xlu0 %4817 }
0x1230   : > { %12421 = vpow2.f32 %v4859_v29  ;;  %v4846_v55 = vsub.f32 %v14975_v53, %v4818_v50 }
0x1232   : > { %v4865_v52 = vmul.f32 1.442695, %v4846_v55  ;;  %v4826_v55 = vpop.xlane.xlu1 %4825 }
0x1233   : > { %v4824_v29 = vpop.xlane.xlu0 %4823  ;;  %v4850_v50 = vsub.f32 %v14983_v2, %v4826_v55 }
0x1234   : > { %12423 = vpow2.f32 %v4865_v52  ;;  %v4849_v59 = vsub.f32 %v14992_v58, %v4824_v29 }
0x1235   : > { %v4873_v4 = vmul.f32 1.442695, %v4850_v50 }
0x1236   : > { %v15096_v24 = vpop.eup %12417  ;;  %v4822_v33 = vpop.xlane.xlu1 %4821  ;;  %v4871_v14 = vmul.f32 1.442695, %v4849_v59 }
0x1237   : > { %4895 = vadd.xlane.f32.xlu1 %v15096_v24  ;;  %v4820_v52 = vpop.xlane.xlu0 %4819  ;;  %v4848_v49 = vsub.f32 %v15001_v57, %v4822_v33 }
0x1238   : > { %v4847_v48 = vsub.f32 %v15010_v16, %v4820_v52  ;;  %12425 = vpow2.f32 %v4871_v14 }
0x1239   : > { %v15099_v15 = vpop.eup %12419  ;;  %v4869_v7 = vmul.f32 1.442695, %v4848_v49 }
0x123a   : > { %v15101_v38 = vpop.eup %12421  ;;  %4893 = vadd.xlane.f32.xlu0 %v15099_v15  ;;  %v4834_v53 = vpop.xlane.xlu1 %4833 }
0x123b   : > { %4891 = vadd.xlane.f32.xlu1 %v15101_v38  ;;  %v4832_v31 = vpop.xlane.xlu0 %4831  ;;  %v4854_v2 = vsub.f32 %v15019_v45, %v4834_v53 }
0x123e   : > { %v15105_v19 = vpop.eup %12423  ;;  %v4830_v39 = vpop.xlane.xlu1 %4829 }
0x123f   : > { %4897 = vadd.xlane.f32.xlu1 %v15105_v19  ;;  %v4828_v12 = vpop.xlane.xlu0 %4827 }
0x1240   : > { %v4851_v16 = vsub.f32 %v15046_v6, %v4828_v12  ;;  %v4852_v6 = vsub.f32 %v15037_v26, %v4830_v39 }
0x1242   : > { %v4875_v55 = vmul.f32 1.442695, %v4851_v16  ;;  %v15121_v33 = vpop.eup %12425  ;;  %v4877_v12 = vmul.f32 1.442695, %v4852_v6  ;;  %v5222_v16 = vsel %vm1544_vm3, %v14905_v46, 0 }
0x1243   : > { %v4840_v21 = vpop.xlane.xlu0 %4839 }
0x1244   : > { %v4857_v58 = vsub.f32 %v15056_v18, %v4840_v21 }
0x1246   : > { %v4887_v57 = vmul.f32 1.442695, %v4857_v58 }
0x1247   : > { %v4836_v52 = vpop.xlane.xlu0 %4835 }
0x1248   : > { %v4855_v59 = vsub.f32 %v15065_v51, %v4836_v52 }
0x124a   : > { %v4883_v18 = vmul.f32 1.442695, %v4855_v59 }
0x1250   : > { %5189 = vrot.lane.b32.xlu0 %v17905_v41, %s12724_s29  ;;  %5191 = vrot.lane.b32.xlu1 %v17906_v62, %s12724_s29  ;;  %v4867_v41 = vmul.f32 1.442695, %v4847_v48  ;;  %v4853_v62 = vsub.f32 %v15028_v47, %v4832_v31  ;;  %v15123_v47 = vpop.permute.xlu1 %5187 }
0x1252   : > { %12427 = vpow2.f32 %v4867_v41  ;;  %v4879_v29 = vmul.f32 1.442695, %v4853_v62 }
0x1253   : > { %12429 = vpow2.f32 %v4869_v7  ;;  %v4881_v7 = vmul.f32 1.442695, %v4854_v2 }
0x1254   : > { %12431 = vpow2.f32 %v4873_v4 }
0x1255   : > { %12433 = vpow2.f32 %v4879_v29 }
0x1256   : > { %12435 = vpow2.f32 %v4887_v57 }
0x1257   : > { %12437 = vpow2.f32 %v4875_v55 }
0x1258   : > { %12439 = vpow2.f32 %v4883_v18 }
0x1259   : > { %12441 = vpow2.f32 %v4881_v7 }
0x125c   : > { %v15127_v4 = vpop.eup %12427 }
0x125d   : > { %v15129_v51 = vpop.eup %12429 }
0x125e   : > { %v15134_v48 = vpop.eup %12431 }
0x125f   : > { %v15136_v39 = vpop.eup %12433 }
0x1260   : > { %v15141_v53 = vpop.eup %12435 }
0x1261   : > { %v15143_v21 = vpop.eup %12437 }
0x1262   : > { %v15147_v50 = vpop.eup %12439 }
0x1263   : > { %v15149_v41 = vpop.eup %12441 }
0x126f   : > { %4903 = vadd.xlane.f32.xlu0 %v15121_v33 }
0x1272   : > { %v4842_v31 = vpop.xlane.xlu1 %4841 }
0x1273   : > { %v4858_v45 = vsub.f32 %v15078_v1, %v4842_v31  ;;  %4899 = vadd.xlane.f32.xlu0 %v15127_v4 }
0x1274   : > { %4901 = vadd.xlane.f32.xlu1 %v15129_v51 }
0x1275   : > { %v4889_v14 = vmul.f32 1.442695, %v4858_v45 }
0x1276   : > { %v4838_v49 = vpop.xlane.xlu1 %4837 }
0x1277   : > { %12443 = vpow2.f32 %v4889_v14  ;;  %v4856_v26 = vsub.f32 %v15087_v17, %v4838_v49  ;;  %4905 = vadd.xlane.f32.xlu0 %v15134_v48 }
0x1278   : > { %4911 = vadd.xlane.f32.xlu1 %v15136_v39  ;;  %12445 = vpow2.f32 %v4877_v12 }
0x1279   : > { %v4885_v1 = vmul.f32 1.442695, %v4856_v26 }
0x127b   : > { %4919 = vadd.xlane.f32.xlu0 %v15141_v53  ;;  %12447 = vpow2.f32 %v4885_v1 }
0x127c   : > { %4907 = vadd.xlane.f32.xlu1 %v15143_v21 }
0x127f   : > { %4915 = vadd.xlane.f32.xlu0 %v15147_v50 }
0x1280   : > { %4913 = vadd.xlane.f32.xlu1 %v15149_v41 }
0x1281   : > { %v15153_v17 = vpop.eup %12443 }
0x1282   : > { %v15155_v62 = vpop.eup %12445 }
0x1283   : > { %4921 = vadd.xlane.f32.xlu0 %v15153_v17 }
0x1284   : > { %4909 = vadd.xlane.f32.xlu1 %v15155_v62 }
0x1285   : > { %v15159_v58 = vpop.eup %12447 }
0x1288   : > { %4917 = vadd.xlane.f32.xlu1 %v15159_v58 }
0x1299   : > { %5195 = vrot.lane.b32.xlu1 %v13117_v30, %s12724_s29  ;;  %5193 = vrot.lane.b32.xlu0 %v13119_v32, %s12724_s29 }
0x129d   : > { %5167 = vrot.lane.b32.xlu1 %v13079_v40, %s12724_s29  ;;  %5165 = vrot.lane.b32.xlu0 %v13083_v43, %s12724_s29  ;;  %v5186_v40 = vpop.permute.xlu0 %5185 }
0x12a1   : > { %5171 = vrot.lane.b32.xlu1 %v13101_v5, %s12724_s29  ;;  %5169 = vrot.lane.b32.xlu0 %v13105_v9, %s12724_s29 }
0x12a5   : > { %5175 = vrot.lane.b32.xlu1 %v13121_v34, %s12724_s29  ;;  %5173 = vrot.lane.b32.xlu0 %v13125_v37, %s12724_s29 }
0x12a9   : > { %5179 = vrot.lane.b32.xlu1 %v13138_v54, %s12724_s29  ;;  %5177 = vrot.lane.b32.xlu0 %v13142_v56, %s12724_s29 }
0x12ad   : > { %5496 = vrot.lane.b32.xlu1 %v13146_v3, %s12724_s29  ;;  %5494 = vrot.lane.b32.xlu0 %v13148_v8, %s12724_s29 }
0x12b1   : > { %5498 = vrot.lane.b32.xlu0 %v13160_v23, %s12724_s29 }
0x12b5   : > { %5500 = vrot.lane.b32.xlu0 %v13157_v22, %s12724_s29 }
0x12c4   : > { %v4896_v43 = vpop.xlane.xlu1 %4895 }
0x12c7   : > { %v4894_v5 = vpop.xlane.xlu0 %4893 }
0x12c8   : > { %12449 = vrcp.f32 %v4894_v5  ;;  %v4892_v9 = vpop.xlane.xlu1 %4891 }
0x12c9   : > { %12451 = vrcp.f32 %v4892_v9 }
0x12ca   : > { %12453 = vrcp.f32 %v4896_v43 }
0x12cb   : > { %v5190_v46 = vpop.permute.xlu0 %5189 }
0x12cc   : > { %v4898_v30 = vpop.xlane.xlu1 %4897 }
0x12cd   : > { %12455 = vrcp.f32 %v4898_v30 }
0x12d2   : > { %v12450_v32 = vpop.eup %12449 }
0x12d3   : > { %v12452_v34 = vpop.eup %12451  ;;  %v4940_v37 = vmul.f32 %v12450_v32, %v15099_v15  ;;  %v5225_v15 = vsel %vm1544_vm3, %v15090_v42, 0 }
0x12d4   : > { %v4939_v54 = vmul.f32 %v12452_v34, %v15101_v38  ;;  %v12454_v56 = vpop.eup %12453  ;;  %v5231_v38 = vsel %vm1544_vm3, %v15123_v47, 0 }
0x12d5   : > { %v4941_v22 = vmul.f32 %v12454_v56, %v15096_v24  ;;  %v5228_v24 = vsel %vm1544_vm3, %v5186_v40, 0 }
0x12d6   : > { %v4955_v3 = vpack.c.bf16 %v4940_v37, %v4939_v54 }
0x12d7   : > { %v12456_v8 = vpop.eup %12455 }
0x12d8   : > { %v4942_v23 = vmul.f32 %v12456_v8, %v15105_v19  ;;  %11668 = vmatprep.mubr.bf16.mxu0 %v4955_v3  ;;  %v5234_v19 = vsel %vm1544_vm3, %v5190_v46, 0 }
0x12da   : > { %v4956_v29 = vpack.c.bf16 %v4942_v23, %v4941_v22 }
0x12dc   : > { %11669 = vmatmul.mubr.bf16.vlgmr.msra.gmra.mrb[128].mxu0 %v4956_v29 }
0x12dd   : > { %11685 = vmatpush3.bf16.xpose.msra.mxu0 %v5222_v16 }
0x12de   : > { %11847 = vmatprep.subr.msk.bf16.mxu0 %vm1544_vm3, %v15090_v42  ;;  %v5192_v42 = vpop.permute.xlu1 %5191 }
0x12df   : > { %v5237_v2 = vsel %vm1544_vm3, %v5192_v42, 0 }
0x12e5   : > { %11687 = vmatpush3.bf16.xpose.msra.mxu0 %v5225_v15 }
0x12e6   : > { %11848 = vmatprep.subr.msk.bf16.mxu0 %vm1544_vm3, %v5186_v40 }
0x12ed   : > { %11689 = vmatpush3.bf16.xpose.msra.mxu0 %v5228_v24 }
0x12ee   : > { %11849 = vmatprep.subr.msk.bf16.mxu0 %vm1544_vm3, %v15123_v47 }
0x12f5   : > { %11691 = vmatpush3.bf16.xpose.msra.mxu0 %v5231_v38 }
0x12f6   : > { %11850 = vmatprep.subr.msk.bf16.mxu0 %vm1544_vm3, %v5190_v46 }
0x12fc   : > { %v4904_v52 = vpop.xlane.xlu0 %4903 }
0x12fd   : > { %11693 = vmatpush3.bf16.xpose.msra.mxu0 %v5234_v19 }
0x12fe   : > { %11851 = vmatprep.subr.msk.bf16.mxu0 %vm1544_vm3, %v5192_v42 }
0x1300   : > { %v4900_v57 = vpop.xlane.xlu0 %4899 }
0x1301   : > { %12457 = vrcp.f32 %v4900_v57  ;;  %v4902_v59 = vpop.xlane.xlu1 %4901 }
0x1302   : > { %12459 = vrcp.f32 %v4902_v59 }
0x1303   : > { %12461 = vrcp.f32 %v4904_v52 }
0x1304   : > { %v4906_v55 = vpop.xlane.xlu0 %4905 }
0x1305   : > { %11695 = vmatpush3.bf16.xpose.msra.mxu0 %v5237_v2  ;;  %12463 = vrcp.f32 %v4906_v55  ;;  %v4912_v47 = vpop.xlane.xlu1 %4911 }
0x1308   : > { %v4920_v18 = vpop.xlane.xlu0 %4919 }
0x1309   : > { %v4908_v7 = vpop.xlane.xlu1 %4907 }
0x130b   : > { %v12458_v6 = vpop.eup %12457 }
0x130c   : > { %v12460_v31 = vpop.eup %12459  ;;  %v4916_v45 = vpop.xlane.xlu0 %4915  ;;  %v4943_v12 = vmul.f32 %v12458_v6, %v15127_v4 }
0x130d   : > { %v12462_v14 = vpop.eup %12461  ;;  %v4914_v49 = vpop.xlane.xlu1 %4913  ;;  %v4944_v26 = vmul.f32 %v12460_v31, %v15129_v51 }
0x130e   : > { %12465 = vrcp.f32 %v4914_v49  ;;  %v4945_v5 = vmul.f32 %v12462_v14, %v15121_v33 }
0x130f   : > { %v12464_v1 = vpop.eup %12463  ;;  %v4957_v40 = vpack.c.bf16 %v4944_v26, %v4943_v12  ;;  %12467 = vrcp.f32 %v4908_v7 }
0x1310   : > { %v4922_v43 = vpop.xlane.xlu0 %4921  ;;  %v4946_v9 = vmul.f32 %v12464_v1, %v15134_v48  ;;  %12469 = vrcp.f32 %v4912_v47 }
0x1311   : > { %v4910_v30 = vpop.xlane.xlu1 %4909  ;;  %11672 = vmatprep.mubr.bf16.mxu0 %v4957_v40 }
0x1312   : > { %12471 = vrcp.f32 %v4910_v30  ;;  %v4958_v32 = vpack.c.bf16 %v4946_v9, %v4945_v5 }
0x1313   : > { %12473 = vrcp.f32 %v4916_v45 }
0x1314   : > { %11673 = vmatmul.mubr.bf16.gmra.mrb[132].mxu0 %v4958_v32  ;;  %v5194_v4 = vpop.permute.xlu0 %5193 }
0x1315   : > { %v4918_v34 = vpop.xlane.xlu1 %4917  ;;  %11852 = vmatprep.subr.msk.bf16.mxu0 %vm1544_vm3, %v5194_v4  ;;  %v5240_v51 = vsel %vm1544_vm3, %v5194_v4, 0 }
0x1316   : > { %12475 = vrcp.f32 %v4918_v34  ;;  %11697 = vmatpush3.bf16.xpose.msra.mxu0 %v5240_v51 }
0x1317   : > { %12477 = vrcp.f32 %v4922_v43 }
0x1318   : > { %v5166_v37 = vpop.permute.xlu0 %5165  ;;  %v12466_v33 = vpop.eup %12465  ;;  %12479 = vrcp.f32 %v4920_v18 }
0x1319   : > { %v5196_v48 = vpop.permute.xlu1 %5195  ;;  %v12468_v54 = vpop.eup %12467  ;;  %v4950_v22 = vmul.f32 %v12466_v33, %v15149_v41 }
0x131a   : > { %11853 = vmatprep.subr.msk.bf16.mxu0 %vm1544_vm3, %v5196_v48  ;;  %v12470_v56 = vpop.eup %12469  ;;  %v5243_v29 = vsel %vm1544_vm3, %v5196_v48, 0  ;;  %v4947_v16 = vmul.f32 %v12468_v54, %v15143_v21 }
0x131b   : > { %v4949_v38 = vmul.f32 %v12470_v56, %v15136_v39 }
0x131c   : > { %v12472_v3 = vpop.eup %12471  ;;  %v5170_v8 = vpop.permute.xlu0 %5169 }
0x131d   : > { %v5168_v23 = vpop.permute.xlu1 %5167  ;;  %v4948_v15 = vmul.f32 %v12472_v3, %v15155_v62  ;;  %v12474_v24 = vpop.eup %12473  ;;  %v4960_v42 = vpack.c.bf16 %v4950_v22, %v4949_v38 }
0x131e   : > { %11699 = vmatpush3.bf16.xpose.msra.mxu0 %v5243_v29  ;;  %v4951_v41 = vmul.f32 %v12474_v24, %v15147_v50 }
0x131f   : > { %v4959_v46 = vpack.c.bf16 %v4948_v15, %v4947_v16 }
0x1320   : > { %v12476_v19 = vpop.eup %12475  ;;  %v5174_v52 = vpop.permute.xlu0 %5173 }
0x1321   : > { %v12478_v57 = vpop.eup %12477  ;;  %v5172_v59 = vpop.permute.xlu1 %5171  ;;  %11676 = vmatprep.mubr.bf16.mxu0 %v4959_v46  ;;  %v4952_v2 = vmul.f32 %v12476_v19, %v15159_v58 }
0x1322   : > { %11677 = vmatmul.mubr.bf16.gmra.mrb[136].mxu0 %v4960_v42  ;;  %v12480_v55 = vpop.eup %12479  ;;  %v4954_v62 = vmul.f32 %v12478_v57, %v15153_v17 }
0x1323   : > { %v4961_v21 = vpack.c.bf16 %v4952_v2, %v4951_v41  ;;  %v4953_v39 = vmul.f32 %v12480_v55, %v15141_v53  ;;  %v17927_v41 = vld [vmem:[#allocation96_spill] sm:$0xff] }
0x1324   : > { %v5178_v47 = vpop.permute.xlu0 %5177 }
0x1325   : > { %v5176_v18 = vpop.permute.xlu1 %5175  ;;  %11680 = vmatprep.mubr.bf16.mxu0 %v4961_v21  ;;  %v4962_v6 = vpack.c.bf16 %v4954_v62, %v4953_v39 }
0x1328   : > { %v5495_v7 = vpop.permute.xlu0 %5494 }
0x1329   : > { %v5180_v31 = vpop.permute.xlu1 %5179  ;;  %11716 = vmatprep.subr.bf16.mxu1 %v5495_v7 }
0x132a   : > { %11681 = vmatmul.mubr.bf16.gmra.mrb[140].mxu0 %v4962_v6  ;;  %11717 = vmatpush3.bf16.msra.mxu1 %v5495_v7 }
0x132b   : > { %11700 = vmatprep.mubr.msk.bf16.mxu0 %vm1544_vm3, %v5166_v37 }
0x132c   : > { %v5499_v50 = vpop.permute.xlu0 %5498 }
0x132d   : > { %v5497_v58 = vpop.permute.xlu1 %5496 }
0x132e   : > { %11718 = vmatprep.subr.bf16.mxu1 %v5497_v58 }
0x132f   : > { %11719 = vmatpush3.bf16.msra.mxu1 %v5497_v58 }
0x1330   : > { %11720 = vmatprep.subr.bf16.mxu1 %v5499_v50  ;;  %v5501_v17 = vpop.permute.xlu0 %5500 }
0x1332   : > { %11701 = vmatmul.mubr.msk.bf16.vlgmr.msra.gmra.mrb[144].mxu0 %vm1544_vm3, %v5168_v23 }
0x1333   : > { %11704 = vmatprep.mubr.msk.bf16.mxu0 %vm1544_vm3, %v5170_v8  ;;  %11721 = vmatpush3.bf16.msra.mxu1 %v5499_v50 }
0x1334   : > { %11722 = vmatprep.subr.bf16.mxu1 %v5501_v17 }
0x1337   : > { %11723 = vmatpush3.bf16.msra.mxu1 %v5501_v17 }
0x133a   : > { %11705 = vmatmul.mubr.msk.bf16.gmra.mrb[148].mxu0 %vm1544_vm3, %v5172_v59  ;;  %v17926_v59 = vld [vmem:[#allocation17_spill] sm:$0xff] }
0x133b   : > { %11708 = vmatprep.mubr.msk.bf16.mxu0 %vm1544_vm3, %v5174_v52 }
0x1342   : > { %11709 = vmatmul.mubr.msk.bf16.gmra.mrb[152].mxu0 %vm1544_vm3, %v5176_v18 }
0x1343   : > { %11712 = vmatprep.mubr.msk.bf16.mxu0 %vm1544_vm3, %v5178_v47 }
0x134a   : > { %11713 = vmatmul.mubr.msk.bf16.gmra.mrb[156].mxu0 %vm1544_vm3, %v5180_v31 }
0x13af   : > { %v15234_v53 = vpop.f32.mrb[128].mxu0 }
0x13b0   : > { %v15236_v45 = vpop.f32.mrb[129].mxu0 }
0x13b1   : > { %v15238_v12 = vpop.f32.mrb[130].mxu0 }
0x13b2   : > { %v15240_v14 = vpop.f32.mrb[131].mxu0 }
0x13e7   : > { %v15242_v49 = vpop.f32.mrb[132].mxu0 }
0x13e8   : > { %v15244_v26 = vpop.f32.mrb[133].mxu0 }
0x13e9   : > { %v15246_v1 = vpop.f32.mrb[134].mxu0 }
0x13ea   : > { %v15248_v40 = vpop.f32.mrb[135].mxu0 }
0x13f5   : > { %v15250_v43 = vpop.f32.mrb[136].mxu0 }
0x13f6   : > { %v15252_v5 = vpop.f32.mrb[137].mxu0 }
0x13f7   : > { %v15254_v9 = vpop.f32.mrb[138].mxu0 }
0x13f8   : > { %v15256_v30 = vpop.f32.mrb[139].mxu0 }
0x13fd   : > { %v15258_v32 = vpop.f32.mrb[140].mxu0 }
0x13fe   : > { %v15260_v4 = vpop.f32.mrb[141].mxu0 }
0x13ff   : > { %v15262_v34 = vpop.f32.mrb[142].mxu0 }
0x1400   : > { %v15264_v51 = vpop.f32.mrb[143].mxu0 }
0x1405   : > { %v11702_v37 = vpop.f32.mrb[144].mxu0 }
0x1406   : > { %v5288_v33 = vadd.f32 %v14945_v0, %v11702_v37  ;;  %v5279_v48 = vpop.f32.mrb[145].mxu0 }
0x1407   : > { %v11703_v54 = vpop.f32.mrb[146].mxu0  ;;  %v5280_v8 = vadd.f32 %v14962_v28, %v5279_v48 }
0x1408   : > { %5346 = vmax.xlane.f32.xlu0 %v5288_v33  ;;  %v5282_v56 = vpop.f32.mrb[147].mxu0  ;;  %v5291_v23 = vadd.f32 %v14972_v13, %v11703_v54 }
0x1409   : > { %v5283_v3 = vadd.f32 %v14954_v27, %v5282_v56 }
0x140b   : > { %5344 = vmax.xlane.f32.xlu1 %v5283_v3 }
0x140c   : > { %5342 = vmax.xlane.f32.xlu0 %v5280_v8 }
0x140d   : > { %v11706_v22 = vpop.f32.mrb[148].mxu0 }
0x140e   : > { %v5295_v29 = vpop.f32.mrb[149].mxu0  ;;  %v5304_v0 = vadd.f32 %v14989_v63, %v11706_v22 }
0x140f   : > { %v11707_v16 = vpop.f32.mrb[150].mxu0  ;;  %v5296_v28 = vadd.f32 %v15007_v11, %v5295_v29 }
0x1410   : > { %v5307_v15 = vadd.f32 %v14980_v44, %v11707_v16  ;;  %5348 = vmax.xlane.f32.xlu0 %v5291_v23  ;;  %v5298_v24 = vpop.f32.mrb[151].mxu0 }
0x1411   : > { %v15273_v38 = vadd.f32 %v14998_v10, %v5298_v24 }
0x1412   : > { %5356 = vmax.xlane.f32.xlu1 %v5307_v15 }
0x1414   : > { %5354 = vmax.xlane.f32.xlu0 %v5304_v0 }
0x1415   : > { %v11710_v27 = vpop.f32.mrb[152].mxu0 }
0x1416   : > { %5352 = vmax.xlane.f32.xlu1 %v15273_v38  ;;  %v5311_v46 = vpop.f32.mrb[153].mxu0  ;;  %v15281_v52 = vadd.f32 %v15025_v35, %v11710_v27 }
0x1417   : > { %v11711_v13 = vpop.f32.mrb[154].mxu0  ;;  %v15289_v11 = vadd.f32 %v15043_v36, %v5311_v46  ;;  %v17925_v36 = vld [vmem:[#allocation16_spill] sm:$0xff] }
0x1418   : > { %v15278_v19 = vadd.f32 %v15016_v60, %v11711_v13  ;;  %5350 = vmax.xlane.f32.xlu0 %v5296_v28  ;;  %v5314_v44 = vpop.f32.mrb[155].mxu0 }
0x1419   : > { %v15285_v63 = vadd.f32 %v15034_v25, %v5314_v44 }
0x141a   : > { %5364 = vmax.xlane.f32.xlu1 %v15278_v19 }
0x141c   : > { %5362 = vmax.xlane.f32.xlu0 %v15281_v52 }
0x141d   : > { %v11714_v10 = vpop.f32.mrb[156].mxu0 }
0x141e   : > { %5360 = vmax.xlane.f32.xlu1 %v15285_v63  ;;  %v5327_v60 = vpop.f32.mrb[157].mxu0  ;;  %v15294_v35 = vadd.f32 %v15053_v61, %v11714_v10  ;;  %v17928_v61 = vld [vmem:[#allocation97_spill] sm:$0xff] }
0x141f   : > { %v11715_v42 = vpop.f32.mrb[158].mxu0  ;;  %v15298_v25 = vadd.f32 %v15062_v20, %v5327_v60 }
0x1420   : > { %5358 = vmax.xlane.f32.xlu0 %v15289_v11  ;;  %v5330_v57 = vpop.f32.mrb[159].mxu0  ;;  %v15306_v2 = vadd.f32 %v17927_v41, %v11715_v42 }
0x1421   : > { %v15310_v55 = vadd.f32 %v17928_v61, %v5330_v57 }
0x1424   : > { %5370 = vmax.xlane.f32.xlu0 %v15294_v35 }
0x1428   : > { %5366 = vmax.xlane.f32.xlu0 %v15298_v25 }
0x142f   : > { %5504 = vrot.lane.b32.xlu1 %v17925_v36, %s12724_s29 }
0x143e   : > { %5502 = vrot.lane.b32.xlu0 %v17926_v59, %s12724_s29 }
0x1453   : > { %5372 = vmax.xlane.f32.xlu1 %v15306_v2 }
0x1457   : > { %5368 = vmax.xlane.f32.xlu1 %v15310_v55 }
0x1495   : > { %v5347_v20 = vpop.xlane.xlu0 %5346 }
0x1496   : > { %v5376_v21 = vsub.f32 %v5288_v33, %v5347_v20  ;;  %v17929_v20 = vld [vmem:[#allocation18_spill] sm:$0xff] }
0x1498   : > { %v5394_v47 = vmul.f32 1.442695, %v5376_v21  ;;  %v5345_v18 = vpop.xlane.xlu1 %5344  ;;  %v17930_v21 = vld [vmem:[#allocation19_spill] sm:$0xff] }
0x1499   : > { %v5343_v62 = vpop.xlane.xlu0 %5342  ;;  %v5375_v6 = vsub.f32 %v5283_v3, %v5345_v18 }
0x149a   : > { %12481 = vpow2.f32 %v5394_v47  ;;  %v5374_v39 = vsub.f32 %v5280_v8, %v5343_v62 }
0x149b   : > { %v5392_v37 = vmul.f32 1.442695, %v5375_v6 }
0x149c   : > { %v5390_v7 = vmul.f32 1.442695, %v5374_v39 }
0x149d   : > { %v5349_v31 = vpop.xlane.xlu0 %5348 }
0x149e   : > { %12483 = vpow2.f32 %v5390_v7  ;;  %v5377_v50 = vsub.f32 %v5291_v23, %v5349_v31 }
0x149f   : > { %v5357_v58 = vpop.xlane.xlu1 %5356 }
0x14a0   : > { %v5396_v17 = vmul.f32 1.442695, %v5377_v50  ;;  %v5381_v48 = vsub.f32 %v5307_v15, %v5357_v58 }
0x14a1   : > { %v5355_v54 = vpop.xlane.xlu0 %5354 }
0x14a2   : > { %12485 = vpow2.f32 %v5396_v17  ;;  %v5380_v56 = vsub.f32 %v5304_v0, %v5355_v54  ;;  %v5404_v16 = vmul.f32 1.442695, %v5381_v48 }
0x14a3   : > { %v5353_v22 = vpop.xlane.xlu1 %5352  ;;  %12487 = vpow2.f32 %v5392_v37 }
0x14a4   : > { %v15313_v29 = vpop.eup %12481  ;;  %v5402_v33 = vmul.f32 1.442695, %v5380_v56  ;;  %v5379_v3 = vsub.f32 %v15273_v38, %v5353_v22 }
0x14a5   : > { %5426 = vadd.xlane.f32.xlu1 %v15313_v29  ;;  %v5351_v8 = vpop.xlane.xlu0 %5350 }
0x14a6   : > { %12489 = vpow2.f32 %v5402_v33  ;;  %v5378_v23 = vsub.f32 %v5296_v28, %v5351_v8  ;;  %v5400_v0 = vmul.f32 1.442695, %v5379_v3  ;;  %v17931_v3 = vld [vmem:[#allocation24_spill] sm:$0xff] }
0x14a7   : > { %12491 = vpow2.f32 %v5404_v16  ;;  %v5365_v10 = vpop.xlane.xlu1 %5364 }
0x14a8   : > { %v15317_v24 = vpop.eup %12483  ;;  %v5398_v27 = vmul.f32 1.442695, %v5378_v23  ;;  %v5385_v62 = vsub.f32 %v15278_v19, %v5365_v10  ;;  %v17932_v23 = vld [vmem:[#allocation20_spill] sm:$0xff] }
0x14a9   : > { %5422 = vadd.xlane.f32.xlu1 %v15317_v24  ;;  %v5363_v15 = vpop.xlane.xlu0 %5362  ;;  %v17937_v10 = vld [vmem:[#allocation44_spill] sm:$0xff] }
0x14aa   : > { %12493 = vpow2.f32 %v5398_v27  ;;  %v5412_v7 = vmul.f32 1.442695, %v5385_v62  ;;  %v5384_v6 = vsub.f32 %v15281_v52, %v5363_v15  ;;  %v17933_v27 = vld [vmem:[#allocation22_spill] sm:$0xff]  ;;  %v17934_v15 = vld [vmem:[#allocation21_spill] sm:$0xff] }
0x14ab   : > { %12495 = vpow2.f32 %v5400_v0  ;;  %v5361_v57 = vpop.xlane.xlu1 %5360  ;;  %v17935_v0 = vld [vmem:[#allocation45_spill] sm:$0xff]  ;;  %v17946_v62 = vld [vmem:[#allocation78_spill] sm:$0xff] }
0x14ac   : > { %v15320_v46 = vpop.eup %12485  ;;  %v5383_v18 = vsub.f32 %v15285_v63, %v5361_v57  ;;  %v5410_v58 = vmul.f32 1.442695, %v5384_v6  ;;  %v17939_v57 = vld [vmem:[#allocation37_spill] sm:$0xff]  ;;  %v17950_v6 = vld [vmem:[#allocation70_spill] sm:$0xff] }
0x14ad   : > { %5428 = vadd.xlane.f32.xlu1 %v15320_v46  ;;  %v5359_v13 = vpop.xlane.xlu0 %5358  ;;  %v15323_v44 = vpop.eup %12487 }
0x14ae   : > { %v5382_v47 = vsub.f32 %v15289_v11, %v5359_v13  ;;  %v5408_v31 = vmul.f32 1.442695, %v5383_v18  ;;  %v17936_v13 = vld [vmem:[#allocation47_spill] sm:$0xff]  ;;  %v17947_v18 = vld [vmem:[#allocation69_spill] sm:$0xff] }
0x14af   : > { %v5505_v61 = vpop.permute.xlu1 %5504 }
0x14b0   : > { %v15325_v38 = vpop.eup %12489  ;;  %v5406_v39 = vmul.f32 1.442695, %v5382_v47  ;;  %v17945_v47 = vld [vmem:[#allocation76_spill] sm:$0xff] }
0x14b1   : > { %5424 = vadd.xlane.f32.xlu1 %v15323_v44  ;;  %5434 = vadd.xlane.f32.xlu0 %v15325_v38  ;;  %v5371_v28 = vpop.xlane.xlu0 %5370  ;;  %v15329_v60 = vpop.eup %12491 }
0x14b2   : > { %12497 = vpow2.f32 %v5406_v39  ;;  %v5388_v19 = vsub.f32 %v15294_v35, %v5371_v28  ;;  %v17938_v28 = vld [vmem:[#allocation46_spill] sm:$0xff]  ;;  %v17948_v39 = vld [vmem:[#allocation71_spill] sm:$0xff] }
0x14b3   : > { %12499 = vpow2.f32 %v5412_v7  ;;  %v17949_v7 = vld [vmem:[#allocation68_spill] sm:$0xff] }
0x14b4   : > { %v15331_v42 = vpop.eup %12493  ;;  %12501 = vpow2.f32 %v5408_v31  ;;  %v5418_v22 = vmul.f32 1.442695, %v5388_v19  ;;  %v17955_v19 = vld [vmem:[#allocation49_spill] sm:$0xff] }
0x14b5   : > { %5436 = vadd.xlane.f32.xlu0 %v15329_v60  ;;  %5430 = vadd.xlane.f32.xlu1 %v15331_v42  ;;  %v5367_v36 = vpop.xlane.xlu0 %5366  ;;  %v15335_v59 = vpop.eup %12495  ;;  %12503 = vpow2.f32 %v5410_v58 }
0x14b6   : > { %v5386_v17 = vsub.f32 %v15298_v25, %v5367_v36  ;;  %v17940_v36 = vld [vmem:[#allocation39_spill] sm:$0xff] }
0x14b8   : > { %v5414_v63 = vmul.f32 1.442695, %v5386_v17  ;;  %v17951_v17 = vld [vmem:[#allocation25_spill] sm:$0xff] }
0x14b9   : > { %5432 = vadd.xlane.f32.xlu0 %v15335_v59  ;;  %v5503_v41 = vpop.permute.xlu0 %5502 }
0x14ba   : > { %11724 = vmatprep.subr.bf16.mxu1 %v5503_v41 }
0x14bb   : > { %11725 = vmatpush3.bf16.msra.mxu1 %v5503_v41  ;;  %v17941_v41 = vld [vmem:[#allocation36_spill] sm:$0xff] }
0x14bc   : > { %11726 = vmatprep.subr.bf16.mxu1 %v5505_v61  ;;  %v15350_v56 = vpop.eup %12497 }
0x14bd   : > { %v15353_v33 = vpop.eup %12499 }
0x14be   : > { %v15355_v25 = vpop.eup %12501 }
0x14bf   : > { %11727 = vmatpush3.bf16.msra.mxu1 %v5505_v61  ;;  %v15359_v35 = vpop.eup %12503  ;;  %v17942_v61 = vld [vmem:[#allocation38_spill] sm:$0xff] }
0x14c6   : > { %5508 = vrot.lane.b32.xlu1 %v17929_v20, %s12724_s29  ;;  %v17943_v20 = vld [vmem:[#allocation77_spill] sm:$0xff] }
0x14cf   : > { %5506 = vrot.lane.b32.xlu0 %v17930_v21, %s12724_s29  ;;  %s12725_s29 = smov 8   ;;  %v17944_v21 = vld [vmem:[#allocation79_spill] sm:$0xff] }
0x14e0   : > { %v5373_v50 = vpop.xlane.xlu1 %5372 }
0x14e1   : > { %v5389_v48 = vsub.f32 %v15306_v2, %v5373_v50 }
0x14e3   : > { %v5420_v52 = vmul.f32 1.442695, %v5389_v48 }
0x14e4   : > { %v5369_v37 = vpop.xlane.xlu1 %5368 }
0x14e5   : > { %v5387_v11 = vsub.f32 %v15310_v55, %v5369_v37  ;;  %v17952_v37 = vld [vmem:[#allocation27_spill] sm:$0xff] }
0x14e7   : > { %v5416_v54 = vmul.f32 1.442695, %v5387_v11 }
0x14e9   : > { %12505 = vpow2.f32 %v5416_v54 }
0x14ea   : > { %5438 = vadd.xlane.f32.xlu1 %v15350_v56  ;;  %12507 = vpow2.f32 %v5414_v63  ;;  %v17956_v63 = vld [vmem:[#allocation51_spill] sm:$0xff] }
0x14eb   : > { %12509 = vpow2.f32 %v5420_v52 }
0x14ec   : > { %12511 = vpow2.f32 %v5418_v22  ;;  %v17957_v22 = vld [vmem:[#allocation48_spill] sm:$0xff] }
0x14ee   : > { %5440 = vadd.xlane.f32.xlu0 %v15355_v25  ;;  %5444 = vadd.xlane.f32.xlu1 %v15353_v33 }
0x14f2   : > { %5442 = vadd.xlane.f32.xlu0 %v15359_v35 }
0x14f3   : > { %v15362_v2 = vpop.eup %12505 }
0x14f4   : > { %5448 = vadd.xlane.f32.xlu1 %v15362_v2  ;;  %v15365_v55 = vpop.eup %12507 }
0x14f5   : > { %v15368_v16 = vpop.eup %12509 }
0x14f6   : > { %5446 = vadd.xlane.f32.xlu0 %v15365_v55  ;;  %v15371_v8 = vpop.eup %12511 }
0x14f8   : > { %5452 = vadd.xlane.f32.xlu1 %v15368_v16 }
0x14fa   : > { %5450 = vadd.xlane.f32.xlu0 %v15371_v8 }
0x1509   : > { %2447 = vrot.lane.b32.xlu1 %v17931_v3, %s12725_s29 }
0x150d   : > { %2449 = vrot.lane.b32.xlu1 %v17932_v23, %s12725_s29  ;;  %v17958_v23 = vld [vmem:[#allocation50_spill] sm:$0xff] }
0x1510   : > { %2445 = vrot.lane.b32.xlu0 %v17933_v27, %s12725_s29 }
0x1511   : > { %2451 = vrot.lane.b32.xlu1 %v17934_v15, %s12725_s29 }
0x1514   : > { %2976 = vrot.lane.b32.xlu0 %v17935_v0, %s12726_s24 }
0x1515   : > { %2978 = vrot.lane.b32.xlu1 %v17936_v13, %s12726_s24 }
0x1518   : > { %2980 = vrot.lane.b32.xlu0 %v17937_v10, %s12726_s24 }
0x1519   : > { %2982 = vrot.lane.b32.xlu1 %v17938_v28, %s12726_s24 }
0x151c   : > { %3507 = vrot.lane.b32.xlu0 %v17939_v57, %s12727_s30  ;;  %v17959_v57 = vld [vmem:[#allocation41_spill] sm:$0xff] }
0x151d   : > { %3509 = vrot.lane.b32.xlu1 %v17940_v36, %s12727_s30 }
0x1520   : > { %3511 = vrot.lane.b32.xlu0 %v17941_v41, %s12727_s30 }
0x1521   : > { %3513 = vrot.lane.b32.xlu1 %v17942_v61, %s12727_s30  ;;  %v17960_v61 = vld [vmem:[#allocation43_spill] sm:$0xff] }
0x1524   : > { %4038 = vrot.lane.b32.xlu0 %v17943_v20, %s12728_s25 }
0x1525   : > { %4040 = vrot.lane.b32.xlu1 %v17944_v21, %s12728_s25 }
0x1528   : > { %4042 = vrot.lane.b32.xlu0 %v17945_v47, %s12728_s25  ;;  %v17962_v47 = vld [vmem:[#allocation42_spill] sm:$0xff] }
0x1529   : > { %4044 = vrot.lane.b32.xlu1 %v17946_v62, %s12728_s25 }
0x152c   : > { %4569 = vrot.lane.b32.xlu0 %v17947_v18, %s12729_s15 }
0x152d   : > { %4571 = vrot.lane.b32.xlu1 %v17948_v39, %s12729_s15 }
0x1530   : > { %4573 = vrot.lane.b32.xlu0 %v17949_v7, %s12729_s15 }
0x1531   : > { %4575 = vrot.lane.b32.xlu1 %v17950_v6, %s12729_s15  ;;  %v17963_v6 = vld [vmem:[#allocation81_spill] sm:$0xff] }
0x1532   : > { %v5427_v31 = vpop.xlane.xlu1 %5426 }
0x1534   : > { %5100 = vrot.lane.b32.xlu0 %v15236_v45, %s12730_s23 }
0x1535   : > { %5102 = vrot.lane.b32.xlu1 %v15240_v14, %s12730_s23  ;;  %v17953_v14 = vld [vmem:[#allocation23_spill] sm:$0xff] }
0x1536   : > { %v5423_v50 = vpop.xlane.xlu1 %5422 }
0x1537   : > { %12513 = vrcp.f32 %v5423_v50 }
0x1538   : > { %5104 = vrot.lane.b32.xlu0 %v15234_v53, %s12730_s23  ;;  %v17954_v53 = vld [vmem:[#allocation26_spill] sm:$0xff] }
0x1539   : > { %5106 = vrot.lane.b32.xlu1 %v15238_v12, %s12730_s23 }
0x153a   : > { %v5429_v58 = vpop.xlane.xlu1 %5428 }
0x153c   : > { %2453 = vrot.lane.b32.xlu0 %v17951_v17, %s12725_s29  ;;  %v17965_v17 = vld [vmem:[#allocation80_spill] sm:$0xff] }
0x153d   : > { %2455 = vrot.lane.b32.xlu1 %v17952_v37, %s12725_s29  ;;  %v17967_v37 = vld [vmem:[#allocation73_spill] sm:$0xff] }
0x153e   : > { %v5425_v48 = vpop.xlane.xlu1 %5424  ;;  %v5435_v45 = vpop.xlane.xlu0 %5434 }
0x153f   : > { %12515 = vrcp.f32 %v5425_v48  ;;  %v17968_v48 = vld [vmem:[#allocation12_spill] sm:$0xff] }
0x1540   : > { %12517 = vrcp.f32 %v5429_v58  ;;  %2457 = vrot.lane.b32.xlu0 %v17953_v14, %s12725_s29  ;;  %v17972_v14 = vld [vmem:[#allocation31_spill] sm:$0xff] }
0x1541   : > { %2459 = vrot.lane.b32.xlu1 %v17954_v53, %s12725_s29  ;;  %12519 = vrcp.f32 %v5427_v31  ;;  %v12514_v52 = vpop.eup %12513  ;;  %v17964_v31 = vld [vmem:[#allocation83_spill] sm:$0xff]  ;;  %v17973_v53 = vld [vmem:[#allocation28_spill] sm:$0xff] }
0x1542   : > { %v5431_v12 = vpop.xlane.xlu1 %5430  ;;  %v5437_v11 = vpop.xlane.xlu0 %5436  ;;  %v5470_v0 = vmul.f32 %v12514_v52, %v15317_v24  ;;  %v17980_v52 = vld [vmem:[#allocation63_spill] sm:$0xff] }
0x1543   : > { %12521 = vrcp.f32 %v5431_v12 }
0x1544   : > { %2984 = vrot.lane.b32.xlu0 %v17955_v19, %s12726_s24 }
0x1545   : > { %2986 = vrot.lane.b32.xlu1 %v17956_v63, %s12726_s24 }
0x1546   : > { %v5433_v54 = vpop.xlane.xlu0 %5432  ;;  %v5509_v28 = vpop.permute.xlu1 %5508 }
0x1547   : > { %12523 = vrcp.f32 %v5433_v54  ;;  %v17979_v54 = vld [vmem:[#allocation61_spill] sm:$0xff] }
0x1548   : > { %12525 = vrcp.f32 %v5437_v11  ;;  %2988 = vrot.lane.b32.xlu0 %v17957_v22, %s12726_s24  ;;  %v17978_v11 = vld [vmem:[#allocation54_spill] sm:$0xff] }
0x1549   : > { %v12516_v3 = vpop.eup %12515  ;;  %2990 = vrot.lane.b32.xlu1 %v17958_v23, %s12726_s24  ;;  %12527 = vrcp.f32 %v5435_v45  ;;  %v17969_v45 = vld [vmem:[#allocation72_spill] sm:$0xff]  ;;  %v17982_v23 = vld [vmem:[#allocation62_spill] sm:$0xff] }
0x154a   : > { %v12518_v27 = vpop.eup %12517  ;;  %v5507_v15 = vpop.permute.xlu0 %5506  ;;  %v5471_v13 = vmul.f32 %v12516_v3, %v15323_v44  ;;  %v17961_v44 = vld [vmem:[#allocation40_spill] sm:$0xff] }
0x154b   : > { %11728 = vmatprep.subr.bf16.mxu1 %v5507_v15  ;;  %v12520_v10 = vpop.eup %12519  ;;  %v5473_v41 = vmul.f32 %v12518_v27, %v15320_v46  ;;  %v17981_v3 = vld [vmem:[#allocation60_spill] sm:$0xff] }
0x154c   : > { %3515 = vrot.lane.b32.xlu0 %v17959_v57, %s12727_s30  ;;  %11729 = vmatpush3.bf16.msra.mxu1 %v5507_v15  ;;  %v5486_v36 = vpack.c.bf16 %v5471_v13, %v5470_v0  ;;  %v5472_v24 = vmul.f32 %v12520_v10, %v15313_v29  ;;  %v17983_v0 = vld [vmem:[#allocation85_spill] sm:$0xff]  ;;  %v17984_v10 = vld [vmem:[#allocation87_spill] sm:$0xff] }
0x154d   : > { %3517 = vrot.lane.b32.xlu1 %v17960_v61, %s12727_s30  ;;  %11730 = vmatprep.subr.bf16.mxu1 %v5509_v28  ;;  %v12522_v20 = vpop.eup %12521  ;;  %v17985_v61 = vld [vmem:[#allocation84_spill] sm:$0xff] }
0x154e   : > { %11732 = vmatprep.mubr.bf16.mxu1 %v5486_v36  ;;  %v5487_v62 = vpack.c.bf16 %v5473_v41, %v5472_v24  ;;  %v5474_v46 = vmul.f32 %v12522_v20, %v15331_v42  ;;  %v17966_v42 = vld [vmem:[#allocation82_spill] sm:$0xff] }
0x1550   : > { %3519 = vrot.lane.b32.xlu0 %v17961_v44, %s12727_s30  ;;  %11731 = vmatpush3.bf16.msra.mxu1 %v5509_v28  ;;  %v17986_v44 = vld [vmem:[#allocation86_spill] sm:$0xff] }
0x1551   : > { %v12524_v21 = vpop.eup %12523  ;;  %3521 = vrot.lane.b32.xlu1 %v17962_v47, %s12727_s30 }
0x1552   : > { %v12526_v18 = vpop.eup %12525  ;;  %v5475_v39 = vmul.f32 %v12524_v21, %v15335_v59 }
0x1553   : > { %11733 = vmatmul.mubr.bf16.vlgmr.msra.gmra.mrb[128].mxu1 %v5487_v62  ;;  %v12528_v7 = vpop.eup %12527  ;;  %v5477_v50 = vmul.f32 %v12526_v18, %v15329_v60  ;;  %v17970_v60 = vld [vmem:[#allocation11_spill] sm:$0xff] }
0x1554   : > { %4046 = vrot.lane.b32.xlu0 %v17963_v6, %s12728_s25  ;;  %v5488_v29 = vpack.c.bf16 %v5475_v39, %v5474_v46  ;;  %v5476_v58 = vmul.f32 %v12528_v7, %v15325_v38  ;;  %v17971_v38 = vld [vmem:[#allocation29_spill] sm:$0xff] }
0x1555   : > { %4048 = vrot.lane.b32.xlu1 %v17964_v31, %s12728_s25 }
0x1556   : > { %11736 = vmatprep.mubr.bf16.mxu1 %v5488_v29  ;;  %v5489_v59 = vpack.c.bf16 %v5477_v50, %v5476_v58 }
0x1558   : > { %4050 = vrot.lane.b32.xlu0 %v17965_v17, %s12728_s25  ;;  %v17989_v17 = vld [vmem:[#allocation74_spill] sm:$0xff] }
0x1559   : > { %4052 = vrot.lane.b32.xlu1 %v17966_v42, %s12728_s25  ;;  %v17990_v42 = vld [vmem:[#allocation14_spill] sm:$0xff] }
0x155b   : > { %11737 = vmatmul.mubr.bf16.gmra.mrb[132].mxu1 %v5489_v59 }
0x155c   : > { %4577 = vrot.lane.b32.xlu0 %v17967_v37, %s12729_s15 }
0x155d   : > { %4579 = vrot.lane.b32.xlu1 %v17968_v48, %s12729_s15 }
0x1560   : > { %4581 = vrot.lane.b32.xlu0 %v17969_v45, %s12729_s15 }
0x1561   : > { %4583 = vrot.lane.b32.xlu1 %v17970_v60, %s12729_s15 }
0x1564   : > { %5108 = vrot.lane.b32.xlu0 %v15244_v26, %s12730_s23  ;;  %v17974_v26 = vld [vmem:[#allocation30_spill] sm:$0xff] }
0x1565   : > { %5110 = vrot.lane.b32.xlu1 %v15248_v40, %s12730_s23  ;;  %v17975_v40 = vld [vmem:[#allocation53_spill] sm:$0xff] }
0x1568   : > { %5112 = vrot.lane.b32.xlu0 %v15242_v49, %s12730_s23  ;;  %v17976_v49 = vld [vmem:[#allocation55_spill] sm:$0xff] }
0x1569   : > { %5114 = vrot.lane.b32.xlu1 %v15246_v1, %s12730_s23  ;;  %v17977_v1 = vld [vmem:[#allocation52_spill] sm:$0xff] }
0x156c   : > { %2461 = vrot.lane.b32.xlu0 %v17971_v38, %s12725_s29 }
0x156d   : > { %2463 = vrot.lane.b32.xlu1 %v17972_v14, %s12725_s29 }
0x1570   : > { %2465 = vrot.lane.b32.xlu0 %v17973_v53, %s12725_s29 }
0x1571   : > { %2467 = vrot.lane.b32.xlu1 %v17974_v26, %s12725_s29  ;;  %v17994_v26 = vld [vmem:[#allocation34_spill] sm:$0xff] }
0x1574   : > { %2992 = vrot.lane.b32.xlu0 %v17975_v40, %s12726_s24 }
0x1575   : > { %2994 = vrot.lane.b32.xlu1 %v17976_v49, %s12726_s24 }
0x1577   : > { %v5439_v12 = vpop.xlane.xlu1 %5438 }
0x1578   : > { %2996 = vrot.lane.b32.xlu0 %v17977_v1, %s12726_s24  ;;  %12529 = vrcp.f32 %v5439_v12  ;;  %v17995_v12 = vld [vmem:[#allocation57_spill] sm:$0xff]  ;;  %v17996_v1 = vld [vmem:[#allocation59_spill] sm:$0xff] }
0x1579   : > { %2998 = vrot.lane.b32.xlu1 %v17978_v11, %s12726_s24 }
0x157b   : > { %v5445_v19 = vpop.xlane.xlu1 %5444  ;;  %v5441_v63 = vpop.xlane.xlu0 %5440 }
0x157c   : > { %3523 = vrot.lane.b32.xlu0 %v17979_v54, %s12727_s30  ;;  %12531 = vrcp.f32 %v5441_v63  ;;  %v17997_v63 = vld [vmem:[#allocation56_spill] sm:$0xff]  ;;  %v17998_v54 = vld [vmem:[#allocation58_spill] sm:$0xff] }
0x157d   : > { %3525 = vrot.lane.b32.xlu1 %v17980_v52, %s12727_s30  ;;  %12533 = vrcp.f32 %v5445_v19 }
0x157f   : > { %v5443_v22 = vpop.xlane.xlu0 %5442 }
0x1580   : > { %12535 = vrcp.f32 %v5443_v22  ;;  %3527 = vrot.lane.b32.xlu0 %v17981_v3, %s12727_s30  ;;  %v17999_v3 = vld [vmem:[#allocation65_spill] sm:$0xff] }
0x1581   : > { %3529 = vrot.lane.b32.xlu1 %v17982_v23, %s12727_s30  ;;  %v5449_v27 = vpop.xlane.xlu1 %5448  ;;  %v18000_v23 = vld [vmem:[#allocation67_spill] sm:$0xff] }
0x1582   : > { %12537 = vrcp.f32 %v5449_v27  ;;  %v12530_v13 = vpop.eup %12529 }
0x1583   : > { %v5447_v15 = vpop.xlane.xlu0 %5446  ;;  %v5478_v20 = vmul.f32 %v12530_v13, %v15350_v56  ;;  %v17987_v56 = vld [vmem:[#allocation75_spill] sm:$0xff] }
0x1584   : > { %12539 = vrcp.f32 %v5447_v15  ;;  %4054 = vrot.lane.b32.xlu0 %v17983_v0, %s12728_s25 }
0x1585   : > { %4056 = vrot.lane.b32.xlu1 %v17984_v10, %s12728_s25  ;;  %v5453_v28 = vpop.xlane.xlu1 %5452 }
0x1586   : > { %12541 = vrcp.f32 %v5453_v28  ;;  %v12532_v57 = vpop.eup %12531 }
0x1587   : > { %v5451_v36 = vpop.xlane.xlu0 %5450  ;;  %v12534_v41 = vpop.eup %12533  ;;  %v5479_v24 = vmul.f32 %v12532_v57, %v15355_v25  ;;  %v17988_v25 = vld [vmem:[#allocation13_spill] sm:$0xff] }
0x1588   : > { %12543 = vrcp.f32 %v5451_v36  ;;  %4058 = vrot.lane.b32.xlu0 %v17985_v61, %s12728_s25  ;;  %v5481_v39 = vmul.f32 %v12534_v41, %v15353_v33 }
0x1589   : > { %4060 = vrot.lane.b32.xlu1 %v17986_v44, %s12728_s25  ;;  %v2448_v21 = vpop.permute.xlu1 %2447  ;;  %v5490_v62 = vpack.c.bf16 %v5479_v24, %v5478_v20 }
0x158a   : > { %v12536_v47 = vpop.eup %12535  ;;  %2495 = vst.msk [vmem:[#allocation3 + $0x8] sm:$0xff] %vm2493_vm4, %v2448_v21 }
0x158b   : > { %v2446_v18 = vpop.permute.xlu0 %2445  ;;  %v5480_v46 = vmul.f32 %v12536_v47, %v15359_v35  ;;  %11740 = vmatprep.mubr.bf16.mxu1 %v5490_v62 }
0x158c   : > { %v12538_v7 = vpop.eup %12537  ;;  %2494 = vst.msk [vmem:[#allocation3] sm:$0xff] %vm2493_vm4, %v2446_v18  ;;  %4585 = vrot.lane.b32.xlu0 %v17987_v56, %s12729_s15 }
0x158d   : > { %4587 = vrot.lane.b32.xlu1 %v17988_v25, %s12729_s15  ;;  %v2450_v6 = vpop.permute.xlu1 %2449  ;;  %v5491_v29 = vpack.c.bf16 %v5481_v39, %v5480_v46  ;;  %v5483_v50 = vmul.f32 %v12538_v7, %v15362_v2 }
0x158e   : > { %v12540_v31 = vpop.eup %12539  ;;  %2496 = vst.msk [vmem:[#allocation3 + $0x10] sm:$0xff] %vm2493_vm4, %v2450_v6 }
0x158f   : > { %11741 = vmatmul.mubr.bf16.gmra.mrb[136].mxu1 %v5491_v29  ;;  %v2977_v35 = vpop.permute.xlu0 %2976  ;;  %v5482_v33 = vmul.f32 %v12540_v31, %v15365_v55 }
0x1590   : > { %v12542_v58 = vpop.eup %12541  ;;  %3025 = vst.msk [vmem:[#allocation3] sm:$0xff] %vm3024_vm5, %v2977_v35  ;;  %4589 = vrot.lane.b32.xlu0 %v17989_v17, %s12729_s15 }
0x1591   : > { %4591 = vrot.lane.b32.xlu1 %v17990_v42, %s12729_s15  ;;  %v2452_v59 = vpop.permute.xlu1 %2451  ;;  %v5492_v37 = vpack.c.bf16 %v5483_v50, %v5482_v33  ;;  %v5485_v2 = vmul.f32 %v12542_v58, %v15368_v16 }
0x1592   : > { %v12544_v48 = vpop.eup %12543  ;;  %2497 = vst.msk [vmem:[#allocation3 + $0x18] sm:$0xff] %vm2493_vm4, %v2452_v59 }
0x1593   : > { %11744 = vmatprep.mubr.bf16.mxu1 %v5492_v37  ;;  %v2981_v45 = vpop.permute.xlu0 %2980  ;;  %v5484_v55 = vmul.f32 %v12544_v48, %v15371_v8  ;;  %v17992_v8 = vld [vmem:[#allocation35_spill] sm:$0xff] }
0x1594   : > { %3027 = vst.msk [vmem:[#allocation3 + $0x10] sm:$0xff] %vm3024_vm5, %v2981_v45  ;;  %5116 = vrot.lane.b32.xlu0 %v15252_v5, %s12730_s23 }
0x1595   : > { %5118 = vrot.lane.b32.xlu1 %v15256_v30, %s12730_s23  ;;  %v2979_v60 = vpop.permute.xlu1 %2978  ;;  %v5493_v38 = vpack.c.bf16 %v5485_v2, %v5484_v55  ;;  %v17991_v30 = vld [vmem:[#allocation33_spill] sm:$0xff] }
0x1596   : > { %3026 = vst.msk [vmem:[#allocation3 + $0x8] sm:$0xff] %vm3024_vm5, %v2979_v60 }
0x1597   : > { %11745 = vmatmul.mubr.bf16.gmra.mrb[140].mxu1 %v5493_v38  ;;  %v3508_v14 = vpop.permute.xlu0 %3507 }
0x1598   : > { %3556 = vst.msk [vmem:[#allocation3] sm:$0xff] %vm3555_vm6, %v3508_v14  ;;  %5120 = vrot.lane.b32.xlu0 %v15250_v43, %s12730_s23 }
0x1599   : > { %5122 = vrot.lane.b32.xlu1 %v15254_v9, %s12730_s23  ;;  %v2983_v16 = vpop.permute.xlu1 %2982  ;;  %v17993_v9 = vld [vmem:[#allocation32_spill] sm:$0xff] }
0x159a   : > { %3028 = vst.msk [vmem:[#allocation3 + $0x18] sm:$0xff] %vm3024_vm5, %v2983_v16 }
0x159b   : > { %v3512_v5 = vpop.permute.xlu0 %3511 }
0x159c   : > { %3558 = vst.msk [vmem:[#allocation3 + $0x10] sm:$0xff] %vm3555_vm6, %v3512_v5  ;;  %2469 = vrot.lane.b32.xlu0 %v17991_v30, %s12725_s29 }
0x159d   : > { %2471 = vrot.lane.b32.xlu1 %v17992_v8, %s12725_s29  ;;  %v3510_v53 = vpop.permute.xlu1 %3509 }
0x159e   : > { %3557 = vst.msk [vmem:[#allocation3 + $0x8] sm:$0xff] %vm3555_vm6, %v3510_v53 }
0x159f   : > { %v4039_v43 = vpop.permute.xlu0 %4038 }
0x15a0   : > { %4087 = vst.msk [vmem:[#allocation3] sm:$0xff] %vm4086_vm7, %v4039_v43  ;;  %2473 = vrot.lane.b32.xlu0 %v17993_v9, %s12725_s29 }
0x15a1   : > { %2475 = vrot.lane.b32.xlu1 %v17994_v26, %s12725_s29  ;;  %v3514_v40 = vpop.permute.xlu1 %3513 }
0x15a2   : > { %3559 = vst.msk [vmem:[#allocation3 + $0x18] sm:$0xff] %vm3555_vm6, %v3514_v40 }
0x15a3   : > { %v4043_v49 = vpop.permute.xlu0 %4042 }
0x15a4   : > { %4089 = vst.msk [vmem:[#allocation3 + $0x10] sm:$0xff] %vm4086_vm7, %v4043_v49  ;;  %3000 = vrot.lane.b32.xlu0 %v17995_v12, %s12726_s24 }
0x15a5   : > { %3002 = vrot.lane.b32.xlu1 %v17996_v1, %s12726_s24  ;;  %v4041_v11 = vpop.permute.xlu1 %4040 }
0x15a6   : > { %4088 = vst.msk [vmem:[#allocation3 + $0x8] sm:$0xff] %vm4086_vm7, %v4041_v11 }
0x15a7   : > { %v4570_v19 = vpop.permute.xlu0 %4569 }
0x15a8   : > { %4618 = vst.msk [vmem:[#allocation3] sm:$0xff] %vm4617_vm8, %v4570_v19  ;;  %3004 = vrot.lane.b32.xlu0 %v17997_v63, %s12726_s24 }
0x15a9   : > { %3006 = vrot.lane.b32.xlu1 %v17998_v54, %s12726_s24  ;;  %v4045_v52 = vpop.permute.xlu1 %4044  ;;  %v11901_v54 = vld [vmem:[%s12816_s28 + $0x60] sm:$0xff]  }
0x15aa   : > { %4090 = vst.msk [vmem:[#allocation3 + $0x18] sm:$0xff] %vm4086_vm7, %v4045_v52  ;;  %11748 = vmatprep.subr.bf16.mxu1 %v11901_v54 }
0x15ab   : > { %v4574_v22 = vpop.permute.xlu0 %4573  ;;  %11749 = vmatpush3.bf16.msra.mxu1 %v11901_v54 }
0x15ac   : > { %4620 = vst.msk [vmem:[#allocation3 + $0x10] sm:$0xff] %vm4617_vm8, %v4574_v22  ;;  %3531 = vrot.lane.b32.xlu0 %v17999_v3, %s12727_s30  ;;  %v11902_v3 = vld [vmem:[%s12816_s28 + $0x68] sm:$0xff]  }
0x15ad   : > { %3533 = vrot.lane.b32.xlu1 %v18000_v23, %s12727_s30  ;;  %v4572_v27 = vpop.permute.xlu1 %4571  ;;  %11750 = vmatprep.subr.bf16.mxu1 %v11902_v3 }
0x15ae   : > { %4619 = vst.msk [vmem:[#allocation3 + $0x8] sm:$0xff] %vm4617_vm8, %v4572_v27 }
0x15af   : > { %v5101_v15 = vpop.permute.xlu0 %5100  ;;  %11751 = vmatpush3.bf16.msra.mxu1 %v11902_v3 }
0x15b0   : > { %5149 = vst.msk [vmem:[#allocation3] sm:$0xff] %vm5148_vm9, %v5101_v15  ;;  %v11903_v15 = vld [vmem:[%s12816_s28 + $0x70] sm:$0xff]  }
0x15b1   : > { %v4576_v0 = vpop.permute.xlu1 %4575  ;;  %11752 = vmatprep.subr.bf16.mxu1 %v11903_v15 }
0x15b2   : > { %4621 = vst.msk [vmem:[#allocation3 + $0x18] sm:$0xff] %vm4617_vm8, %v4576_v0 }
0x15b3   : > { %v5105_v13 = vpop.permute.xlu0 %5104  ;;  %11753 = vmatpush3.bf16.msra.mxu1 %v11903_v15 }
0x15b4   : > { %5151 = vst.msk [vmem:[#allocation3 + $0x10] sm:$0xff] %vm5148_vm9, %v5105_v13 }
0x15b5   : > { %v5103_v10 = vpop.permute.xlu1 %5102 }
0x15b6   : > { %5150 = vst.msk [vmem:[#allocation3 + $0x8] sm:$0xff] %vm5148_vm9, %v5103_v10 }
0x15b7   : > { %v2454_v28 = vpop.permute.xlu0 %2453 }
0x15b8   : > { %2498 = vst.msk [vmem:[#allocation3 + $0x20] sm:$0xff] %vm2493_vm4, %v2454_v28  ;;  %v11904_v28 = vld [vmem:[%s12816_s28 + $0x78] sm:$0xff]  }
0x15b9   : > { %v5107_v57 = vpop.permute.xlu1 %5106  ;;  %11754 = vmatprep.subr.bf16.mxu1 %v11904_v28 }
0x15ba   : > { %5152 = vst.msk [vmem:[#allocation3 + $0x18] sm:$0xff] %vm5148_vm9, %v5107_v57  ;;  %11755 = vmatpush3.bf16.msra.mxu1 %v11904_v28 }
0x15bb   : > { %v2458_v36 = vpop.permute.xlu0 %2457 }
0x15bc   : > { %2500 = vst.msk [vmem:[#allocation3 + $0x30] sm:$0xff] %vm2493_vm4, %v2458_v36 }
0x15bd   : > { %v2456_v41 = vpop.permute.xlu1 %2455 }
0x15be   : > { %2499 = vst.msk [vmem:[#allocation3 + $0x28] sm:$0xff] %vm2493_vm4, %v2456_v41 }
0x15bf   : > { %v2985_v61 = vpop.permute.xlu0 %2984 }
0x15c0   : > { %3029 = vst.msk [vmem:[#allocation3 + $0x20] sm:$0xff] %vm3024_vm5, %v2985_v61 }
0x15c1   : > { %v2460_v20 = vpop.permute.xlu1 %2459 }
0x15c2   : > { %2501 = vst.msk [vmem:[#allocation3 + $0x38] sm:$0xff] %vm2493_vm4, %v2460_v20 }
0x15c3   : > { %v2989_v24 = vpop.permute.xlu0 %2988 }
0x15c4   : > { %3031 = vst.msk [vmem:[#allocation3 + $0x30] sm:$0xff] %vm3024_vm5, %v2989_v24 }
0x15c5   : > { %v2987_v44 = vpop.permute.xlu1 %2986 }
0x15c6   : > { %3030 = vst.msk [vmem:[#allocation3 + $0x28] sm:$0xff] %vm3024_vm5, %v2987_v44 }
0x15c7   : > { %v3516_v21 = vpop.permute.xlu0 %3515 }
0x15c8   : > { %3560 = vst.msk [vmem:[#allocation3 + $0x20] sm:$0xff] %vm3555_vm6, %v3516_v21  ;;  %v18001_v21 = vld [vmem:[#allocation64_spill] sm:$0xff] }
0x15c9   : > { %v2991_v47 = vpop.permute.xlu1 %2990 }
0x15ca   : > { %3032 = vst.msk [vmem:[#allocation3 + $0x38] sm:$0xff] %vm3024_vm5, %v2991_v47 }
0x15cb   : > { %v3520_v62 = vpop.permute.xlu0 %3519 }
0x15cc   : > { %3562 = vst.msk [vmem:[#allocation3 + $0x30] sm:$0xff] %vm3555_vm6, %v3520_v62 }
0x15cd   : > { %v3518_v18 = vpop.permute.xlu1 %3517 }
0x15ce   : > { %3561 = vst.msk [vmem:[#allocation3 + $0x28] sm:$0xff] %vm3555_vm6, %v3518_v18  ;;  %v18002_v18 = vld [vmem:[#allocation66_spill] sm:$0xff] }
0x15cf   : > { %v4047_v46 = vpop.permute.xlu0 %4046 }
0x15d0   : > { %4091 = vst.msk [vmem:[#allocation3 + $0x20] sm:$0xff] %vm4086_vm7, %v4047_v46 }
0x15d1   : > { %v3522_v39 = vpop.permute.xlu1 %3521 }
0x15d2   : > { %3563 = vst.msk [vmem:[#allocation3 + $0x38] sm:$0xff] %vm3555_vm6, %v3522_v39  ;;  %v18003_v39 = vld [vmem:[#allocation89_spill] sm:$0xff] }
0x15d3   : > { %v4051_v7 = vpop.permute.xlu0 %4050 }
0x15d4   : > { %4093 = vst.msk [vmem:[#allocation3 + $0x30] sm:$0xff] %vm4086_vm7, %v4051_v7  ;;  %v18004_v7 = vld [vmem:[#allocation91_spill] sm:$0xff] }
0x15d5   : > { %v4049_v56 = vpop.permute.xlu1 %4048 }
0x15d6   : > { %4092 = vst.msk [vmem:[#allocation3 + $0x28] sm:$0xff] %vm4086_vm7, %v4049_v56  ;;  %v18005_v56 = vld [vmem:[#allocation88_spill] sm:$0xff] }
0x15d7   : > { %v4578_v25 = vpop.permute.xlu0 %4577 }
0x15d8   : > { %4622 = vst.msk [vmem:[#allocation3 + $0x20] sm:$0xff] %vm4617_vm8, %v4578_v25  ;;  %v18006_v25 = vld [vmem:[#allocation90_spill] sm:$0xff] }
0x15d9   : > { %v4053_v6 = vpop.permute.xlu1 %4052 }
0x15da   : > { %4094 = vst.msk [vmem:[#allocation3 + $0x38] sm:$0xff] %vm4086_vm7, %v4053_v6  ;;  %v18007_v6 = vld [vmem:[#allocation93_spill] sm:$0xff] }
0x15db   : > { %v4582_v29 = vpop.permute.xlu0 %4581 }
0x15dc   : > { %4624 = vst.msk [vmem:[#allocation3 + $0x30] sm:$0xff] %vm4617_vm8, %v4582_v29  ;;  %v18008_v29 = vld [vmem:[#allocation95_spill] sm:$0xff] }
0x15dd   : > { %v4580_v31 = vpop.permute.xlu1 %4579 }
0x15de   : > { %4623 = vst.msk [vmem:[#allocation3 + $0x28] sm:$0xff] %vm4617_vm8, %v4580_v31 }
0x15df   : > { %v5109_v35 = vpop.permute.xlu0 %5108 }
0x15e0   : > { %5153 = vst.msk [vmem:[#allocation3 + $0x20] sm:$0xff] %vm5148_vm9, %v5109_v35 }
0x15e1   : > { %v4584_v33 = vpop.permute.xlu1 %4583 }
0x15e2   : > { %4625 = vst.msk [vmem:[#allocation3 + $0x38] sm:$0xff] %vm4617_vm8, %v4584_v33 }
0x15e3   : > { %v5113_v50 = vpop.permute.xlu0 %5112 }
0x15e4   : > { %5155 = vst.msk [vmem:[#allocation3 + $0x30] sm:$0xff] %vm5148_vm9, %v5113_v50 }
0x15e5   : > { %v5111_v58 = vpop.permute.xlu1 %5110 }
0x15e6   : > { %5154 = vst.msk [vmem:[#allocation3 + $0x28] sm:$0xff] %vm5148_vm9, %v5111_v58 }
0x15e7   : > { %v2462_v17 = vpop.permute.xlu0 %2461 }
0x15e8   : > { %2502 = vst.msk [vmem:[#allocation3 + $0x40] sm:$0xff] %vm2493_vm4, %v2462_v17 }
0x15e9   : > { %v5115_v42 = vpop.permute.xlu1 %5114 }
0x15ea   : > { %5156 = vst.msk [vmem:[#allocation3 + $0x38] sm:$0xff] %vm5148_vm9, %v5115_v42  ;;  %v18009_v42 = vld [vmem:[#allocation92_spill] sm:$0xff] }
0x15eb   : > { %v2466_v59 = vpop.permute.xlu0 %2465 }
0x15ec   : > { %2504 = vst.msk [vmem:[#allocation3 + $0x50] sm:$0xff] %vm2493_vm4, %v2466_v59 }
0x15ed   : > { %v2464_v37 = vpop.permute.xlu1 %2463 }
0x15ee   : > { %2503 = vst.msk [vmem:[#allocation3 + $0x48] sm:$0xff] %vm2493_vm4, %v2464_v37  ;;  %v18010_v37 = vld [vmem:[#allocation94_spill] sm:$0xff] }
0x15ef   : > { %v2993_v48 = vpop.permute.xlu0 %2992 }
0x15f0   : > { %3033 = vst.msk [vmem:[#allocation3 + $0x40] sm:$0xff] %vm3024_vm5, %v2993_v48 }
0x15f1   : > { %v2468_v45 = vpop.permute.xlu1 %2467 }
0x15f2   : > { %2505 = vst.msk [vmem:[#allocation3 + $0x58] sm:$0xff] %vm2493_vm4, %v2468_v45 }
0x15f3   : > { %v2997_v55 = vpop.permute.xlu0 %2996 }
0x15f4   : > { %3035 = vst.msk [vmem:[#allocation3 + $0x50] sm:$0xff] %vm3024_vm5, %v2997_v55 }
0x15f5   : > { %v2995_v2 = vpop.permute.xlu1 %2994 }
0x15f6   : > { %3034 = vst.msk [vmem:[#allocation3 + $0x48] sm:$0xff] %vm3024_vm5, %v2995_v2 }
0x15f7   : > { %v3524_v60 = vpop.permute.xlu0 %3523 }
0x15f8   : > { %3564 = vst.msk [vmem:[#allocation3 + $0x40] sm:$0xff] %vm3555_vm6, %v3524_v60 }
0x15f9   : > { %v2999_v38 = vpop.permute.xlu1 %2998 }
0x15fa   : > { %3036 = vst.msk [vmem:[#allocation3 + $0x58] sm:$0xff] %vm3024_vm5, %v2999_v38 }
0x15fb   : > { %v3528_v14 = vpop.permute.xlu0 %3527 }
0x15fc   : > { %3566 = vst.msk [vmem:[#allocation3 + $0x50] sm:$0xff] %vm3555_vm6, %v3528_v14 }
0x15fd   : > { %v3526_v16 = vpop.permute.xlu1 %3525 }
0x15fe   : > { %3565 = vst.msk [vmem:[#allocation3 + $0x48] sm:$0xff] %vm3555_vm6, %v3526_v16 }
0x15ff   : > { %v4055_v5 = vpop.permute.xlu0 %4054 }
0x1600   : > { %4095 = vst.msk [vmem:[#allocation3 + $0x40] sm:$0xff] %vm4086_vm7, %v4055_v5 }
0x1601   : > { %v3530_v30 = vpop.permute.xlu1 %3529 }
0x1602   : > { %3567 = vst.msk [vmem:[#allocation3 + $0x58] sm:$0xff] %vm3555_vm6, %v3530_v30 }
0x1603   : > { %v4059_v8 = vpop.permute.xlu0 %4058 }
0x1604   : > { %4097 = vst.msk [vmem:[#allocation3 + $0x50] sm:$0xff] %vm4086_vm7, %v4059_v8 }
0x1605   : > { %v4057_v53 = vpop.permute.xlu1 %4056 }
0x1606   : > { %4096 = vst.msk [vmem:[#allocation3 + $0x48] sm:$0xff] %vm4086_vm7, %v4057_v53 }
0x1607   : > { %v4586_v43 = vpop.permute.xlu0 %4585 }
0x1608   : > { %4626 = vst.msk [vmem:[#allocation3 + $0x40] sm:$0xff] %vm4617_vm8, %v4586_v43 }
0x1609   : > { %v4061_v9 = vpop.permute.xlu1 %4060 }
0x160a   : > { %4098 = vst.msk [vmem:[#allocation3 + $0x58] sm:$0xff] %vm4086_vm7, %v4061_v9 }
0x160b   : > { %v4590_v26 = vpop.permute.xlu0 %4589 }
0x160c   : > { %4628 = vst.msk [vmem:[#allocation3 + $0x50] sm:$0xff] %vm4617_vm8, %v4590_v26 }
0x160d   : > { %v4588_v40 = vpop.permute.xlu1 %4587 }
0x160e   : > { %4627 = vst.msk [vmem:[#allocation3 + $0x48] sm:$0xff] %vm4617_vm8, %v4588_v40 }
0x160f   : > { %v5117_v49 = vpop.permute.xlu0 %5116 }
0x1610   : > { %5157 = vst.msk [vmem:[#allocation3 + $0x40] sm:$0xff] %vm5148_vm9, %v5117_v49 }
0x1611   : > { %v4592_v12 = vpop.permute.xlu1 %4591 }
0x1612   : > { %4629 = vst.msk [vmem:[#allocation3 + $0x58] sm:$0xff] %vm4617_vm8, %v4592_v12 }
0x1613   : > { %v5121_v1 = vpop.permute.xlu0 %5120 }
0x1614   : > { %5159 = vst.msk [vmem:[#allocation3 + $0x50] sm:$0xff] %vm5148_vm9, %v5121_v1 }
0x1615   : > { %v5119_v11 = vpop.permute.xlu1 %5118 }
0x1616   : > { %5158 = vst.msk [vmem:[#allocation3 + $0x48] sm:$0xff] %vm5148_vm9, %v5119_v11 }
0x1617   : > { %v2470_v19 = vpop.permute.xlu0 %2469 }
0x1618   : > { %2506 = vst.msk [vmem:[#allocation3 + $0x60] sm:$0xff] %vm2493_vm4, %v2470_v19 }
0x1619   : > { %v5123_v63 = vpop.permute.xlu1 %5122 }
0x161a   : > { %5160 = vst.msk [vmem:[#allocation3 + $0x58] sm:$0xff] %vm5148_vm9, %v5123_v63 }
0x161b   : > { %v2474_v52 = vpop.permute.xlu0 %2473 }
0x161c   : > { %2508 = vst.msk [vmem:[#allocation3 + $0x70] sm:$0xff] %vm2493_vm4, %v2474_v52 }
0x161d   : > { %v2472_v22 = vpop.permute.xlu1 %2471 }
0x161e   : > { %2507 = vst.msk [vmem:[#allocation3 + $0x68] sm:$0xff] %vm2493_vm4, %v2472_v22 }
0x161f   : > { %v3001_v23 = vpop.permute.xlu0 %3000 }
0x1620   : > { %3037 = vst.msk [vmem:[#allocation3 + $0x60] sm:$0xff] %vm3024_vm5, %v3001_v23 }
0x1621   : > { %v2476_v27 = vpop.permute.xlu1 %2475 }
0x1622   : > { %2509 = vst.msk [vmem:[#allocation3 + $0x78] sm:$0xff] %vm2493_vm4, %v2476_v27 }
0x1623   : > { %v3005_v0 = vpop.permute.xlu0 %3004 }
0x1624   : > { %3039 = vst.msk [vmem:[#allocation3 + $0x70] sm:$0xff] %vm3024_vm5, %v3005_v0 }
0x1625   : > { %v3003_v13 = vpop.permute.xlu1 %3002 }
0x1626   : > { %3038 = vst.msk [vmem:[#allocation3 + $0x68] sm:$0xff] %vm3024_vm5, %v3003_v13  ;;  %v11734_v10 = vpop.f32.mrb[128].mxu1 }
0x1627   : > { %5635 = vrot.lane.b32.xlu0 %v11734_v10, %s12731_s14  ;;  %v5552_v57 = vpop.f32.mrb[129].mxu1  ;;  %v3532_v36 = vpop.permute.xlu0 %3531 }
0x1628   : > { %3568 = vst.msk [vmem:[#allocation3 + $0x60] sm:$0xff] %vm3555_vm6, %v3532_v36  ;;  %v11735_v41 = vpop.f32.mrb[130].mxu1 }
0x1629   : > { %v3007_v61 = vpop.permute.xlu1 %3006  ;;  %5637 = vrot.lane.b32.xlu1 %v11735_v41, %s12731_s14  ;;  %v5555_v20 = vpop.f32.mrb[131].mxu1 }
0x162a   : > { %3040 = vst.msk [vmem:[#allocation3 + $0x78] sm:$0xff] %vm3024_vm5, %v3007_v61 }
0x162b   : > { %5631 = vrot.lane.b32.xlu0 %v5552_v57, %s12731_s14 }
0x162d   : > { %v3534_v24 = vpop.permute.xlu1 %3533  ;;  %5633 = vrot.lane.b32.xlu1 %v5555_v20, %s12731_s14 }
0x162e   : > { %3569 = vst.msk [vmem:[#allocation3 + $0x68] sm:$0xff] %vm3555_vm6, %v3534_v24  ;;  %v11738_v44 = vpop.f32.mrb[132].mxu1 }
0x162f   : > { %3535 = vrot.lane.b32.xlu0 %v18001_v21, %s12727_s30  ;;  %v5568_v47 = vpop.f32.mrb[133].mxu1 }
0x1630   : > { %v11739_v62 = vpop.f32.mrb[134].mxu1 }
0x1631   : > { %3537 = vrot.lane.b32.xlu1 %v18002_v18, %s12727_s30  ;;  %v5571_v46 = vpop.f32.mrb[135].mxu1 }
0x1633   : > { %4062 = vrot.lane.b32.xlu0 %v18003_v39, %s12728_s25 }
0x1635   : > { %4064 = vrot.lane.b32.xlu1 %v18004_v7, %s12728_s25 }
0x1637   : > { %5643 = vrot.lane.b32.xlu0 %v11738_v44, %s12731_s14 }
0x1639   : > { %5645 = vrot.lane.b32.xlu1 %v11739_v62, %s12731_s14 }
0x163b   : > { %5639 = vrot.lane.b32.xlu0 %v5568_v47, %s12731_s14 }
0x163d   : > { %5641 = vrot.lane.b32.xlu1 %v5571_v46, %s12731_s14 }
0x163f   : > { %4066 = vrot.lane.b32.xlu0 %v18005_v56, %s12728_s25 }
0x1641   : > { %4068 = vrot.lane.b32.xlu1 %v18006_v25, %s12728_s25 }
0x1643   : > { %4593 = vrot.lane.b32.xlu0 %v18007_v6, %s12729_s15 }
0x1645   : > { %4595 = vrot.lane.b32.xlu1 %v18008_v29, %s12729_s15 }
0x1662   : > { %v11742_v31 = vpop.f32.mrb[136].mxu1 }
0x1663   : > { %v5584_v35 = vpop.f32.mrb[137].mxu1  ;;  %5651 = vrot.lane.b32.xlu0 %v11742_v31, %s12731_s14  ;;  %v18011_v31 = vld [vmem:[#allocation8_spill] sm:$0xff] }
0x1664   : > { %v11743_v33 = vpop.f32.mrb[138].mxu1 }
0x1665   : > { %5653 = vrot.lane.b32.xlu1 %v11743_v33, %s12731_s14  ;;  %v5587_v50 = vpop.f32.mrb[139].mxu1  ;;  %v15726_v33 = vld [vmem:[%s12821_s13] sm:$0xff] }
0x1667   : > { %5647 = vrot.lane.b32.xlu0 %v5584_v35, %s12731_s14  ;;  %v15723_v35 = vsub.s32 3, %v18011_v31 }
0x1669   : > { %5649 = vrot.lane.b32.xlu1 %v5587_v50, %s12731_s14  ;;  %v15730_v50 = vrot.slane %v15726_v33, %v15723_v35 }
0x166a   : > { %v11746_v58 = vpop.f32.mrb[140].mxu1 }
0x166b   : > { %v5600_v17 = vpop.f32.mrb[141].mxu1  ;;  %4597 = vrot.lane.b32.xlu0 %v18009_v42, %s12729_s15 }
0x166c   : > { %v11747_v59 = vpop.f32.mrb[142].mxu1 }
0x166d   : > { %4599 = vrot.lane.b32.xlu1 %v18010_v37, %s12729_s15  ;;  %v5603_v48 = vpop.f32.mrb[143].mxu1 }
0x166f   : > { %5124 = vrot.lane.b32.xlu0 %v15260_v4, %s12730_s23 }
0x1671   : > { %5126 = vrot.lane.b32.xlu1 %v15264_v51, %s12730_s23 }
0x1673   : > { %5128 = vrot.lane.b32.xlu0 %v15258_v32, %s12730_s23 }
0x1675   : > { %5130 = vrot.lane.b32.xlu1 %v15262_v34, %s12730_s23 }
0x1677   : > { %5655 = vrot.lane.b32.xlu0 %v5600_v17, %s12731_s14 }
0x1679   : > { %5657 = vrot.lane.b32.xlu1 %v5603_v48, %s12731_s14 }
0x167b   : > { %5659 = vrot.lane.b32.xlu0 %v11746_v58, %s12731_s14 }
0x167d   : > { %5661 = vrot.lane.b32.xlu1 %v11747_v59, %s12731_s14 }
0x1699   : > { %v5636_v45 = vpop.permute.xlu0 %5635 }
0x169a   : > { %5682 = vst.msk [vmem:[#allocation3 + $0x10] sm:$0xff] %vm5679_vm10, %v5636_v45 }
0x169b   : > { %v5638_v4 = vpop.permute.xlu1 %5637 }
0x169c   : > { %5683 = vst.msk [vmem:[#allocation3 + $0x18] sm:$0xff] %vm5679_vm10, %v5638_v4  ;;  %v12658_v4 = vld [vmem:[#allocation2] sm:$0xff] }
0x169d   : > { %v5632_v51 = vpop.permute.xlu0 %5631 }
0x169e   : > { %5680 = vst.msk [vmem:[#allocation3] sm:$0xff] %vm5679_vm10, %v5632_v51 }
0x169f   : > { %v5634_v32 = vpop.permute.xlu1 %5633 }
0x16a0   : > { %5681 = vst.msk [vmem:[#allocation3 + $0x8] sm:$0xff] %vm5679_vm10, %v5634_v32 }
0x16a1   : > { %v3536_v34 = vpop.permute.xlu0 %3535  ;;  %v5698_v30 = vld [vmem:[#allocation3 + $0x10] sm:$0xff] }
0x16a2   : > { %3570 = vst.msk [vmem:[#allocation3 + $0x70] sm:$0xff] %vm3555_vm6, %v3536_v34 }
0x16a3   : > { %v3538_v55 = vpop.permute.xlu1 %3537  ;;  %v5699_v60 = vld [vmem:[#allocation3 + $0x18] sm:$0xff] }
0x16a4   : > { %3571 = vst.msk [vmem:[#allocation3 + $0x78] sm:$0xff] %vm3555_vm6, %v3538_v55  ;;  %v5713_v53 = vpack.c.bf16 %v5699_v60, %v5698_v30  ;;  %v12659_v55 = vld [vmem:[#allocation2 + $0x8] sm:$0xff]  ;;  %v12660_v60 = vld [vmem:[#allocation2 + $0x10] sm:$0xff] }
0x16a5   : > { %v4063_v2 = vpop.permute.xlu0 %4062  ;;  %v5696_v14 = vld [vmem:[#allocation3] sm:$0xff] }
0x16a6   : > { %4099 = vst.msk [vmem:[#allocation3 + $0x60] sm:$0xff] %vm4086_vm7, %v4063_v2 }
0x16a7   : > { %v4065_v38 = vpop.permute.xlu1 %4064  ;;  %v5697_v16 = vld [vmem:[#allocation3 + $0x8] sm:$0xff] }
0x16a8   : > { %4100 = vst.msk [vmem:[#allocation3 + $0x68] sm:$0xff] %vm4086_vm7, %v4065_v38  ;;  %v5712_v5 = vpack.c.bf16 %v5697_v16, %v5696_v14 }
0x16a9   : > { %v5644_v8 = vpop.permute.xlu0 %5643 }
0x16aa   : > { %5686 = vst.msk [vmem:[#allocation3 + $0x30] sm:$0xff] %vm5679_vm10, %v5644_v8  ;;  %11756 = vmatprep.mubr.msk.bf16.mxu1 %vm1116_vm2, %v5712_v5  ;;  %v12661_v5 = vld [vmem:[#allocation2 + $0x18] sm:$0xff] }
0x16ab   : > { %v5646_v43 = vpop.permute.xlu1 %5645  ;;  %11757 = vmatmul.mubr.msk.bf16.vlgmr.msra.gmra.mrb[144].mxu1 %vm1116_vm2, %v5713_v53 }
0x16ac   : > { %5687 = vst.msk [vmem:[#allocation3 + $0x38] sm:$0xff] %vm5679_vm10, %v5646_v43 }
0x16ad   : > { %v5640_v9 = vpop.permute.xlu0 %5639 }
0x16ae   : > { %5684 = vst.msk [vmem:[#allocation3 + $0x20] sm:$0xff] %vm5679_vm10, %v5640_v9 }
0x16af   : > { %v5642_v26 = vpop.permute.xlu1 %5641 }
0x16b0   : > { %5685 = vst.msk [vmem:[#allocation3 + $0x28] sm:$0xff] %vm5679_vm10, %v5642_v26 }
0x16b1   : > { %v4067_v40 = vpop.permute.xlu0 %4066  ;;  %v5702_v52 = vld [vmem:[#allocation3 + $0x30] sm:$0xff] }
0x16b2   : > { %4101 = vst.msk [vmem:[#allocation3 + $0x70] sm:$0xff] %vm4086_vm7, %v4067_v40 }
0x16b3   : > { %v4069_v49 = vpop.permute.xlu1 %4068  ;;  %v5703_v1 = vld [vmem:[#allocation3 + $0x38] sm:$0xff] }
0x16b4   : > { %4102 = vst.msk [vmem:[#allocation3 + $0x78] sm:$0xff] %vm4086_vm7, %v4069_v49  ;;  %v5715_v22 = vpack.c.bf16 %v5703_v1, %v5702_v52 }
0x16b5   : > { %v4594_v12 = vpop.permute.xlu0 %4593  ;;  %v5700_v19 = vld [vmem:[#allocation3 + $0x20] sm:$0xff] }
0x16b6   : > { %4630 = vst.msk [vmem:[#allocation3 + $0x60] sm:$0xff] %vm4617_vm8, %v4594_v12 }
0x16b7   : > { %v4596_v11 = vpop.permute.xlu1 %4595  ;;  %v5701_v63 = vld [vmem:[#allocation3 + $0x28] sm:$0xff] }
0x16b8   : > { %4631 = vst.msk [vmem:[#allocation3 + $0x68] sm:$0xff] %vm4617_vm8, %v4596_v11  ;;  %v5714_v54 = vpack.c.bf16 %v5701_v63, %v5700_v19  ;;  %v12662_v11 = vld [vmem:[#allocation2 + $0x20] sm:$0xff] }
0x16ba   : > { %11760 = vmatprep.mubr.msk.bf16.mxu1 %vm1116_vm2, %v5714_v54  ;;  %v12663_v54 = vld [vmem:[#allocation2 + $0x28] sm:$0xff] }
0x16bb   : > { %11761 = vmatmul.mubr.msk.bf16.gmra.mrb[148].mxu1 %vm1116_vm2, %v5715_v22  ;;  %v12664_v22 = vld [vmem:[#allocation2 + $0x30] sm:$0xff] }
0x16d5   : > { %v5652_v3 = vpop.permute.xlu0 %5651 }
0x16d6   : > { %5690 = vst.msk [vmem:[#allocation3 + $0x50] sm:$0xff] %vm5679_vm10, %v5652_v3 }
0x16d7   : > { %v5654_v23 = vpop.permute.xlu1 %5653 }
0x16d8   : > { %5691 = vst.msk [vmem:[#allocation3 + $0x58] sm:$0xff] %vm5679_vm10, %v5654_v23 }
0x16d9   : > { %v5648_v27 = vpop.permute.xlu0 %5647 }
0x16da   : > { %5688 = vst.msk [vmem:[#allocation3 + $0x40] sm:$0xff] %vm5679_vm10, %v5648_v27  ;;  %v12665_v27 = vld [vmem:[#allocation2 + $0x38] sm:$0xff] }
0x16db   : > { %v5650_v15 = vpop.permute.xlu1 %5649 }
0x16dc   : > { %5689 = vst.msk [vmem:[#allocation3 + $0x48] sm:$0xff] %vm5679_vm10, %v5650_v15 }
0x16dd   : > { %v4598_v0 = vpop.permute.xlu0 %4597  ;;  %v5706_v20 = vld [vmem:[#allocation3 + $0x50] sm:$0xff] }
0x16de   : > { %4632 = vst.msk [vmem:[#allocation3 + $0x70] sm:$0xff] %vm4617_vm8, %v4598_v0 }
0x16df   : > { %v4600_v13 = vpop.permute.xlu1 %4599  ;;  %v5707_v28 = vld [vmem:[#allocation3 + $0x58] sm:$0xff] }
0x16e0   : > { %4633 = vst.msk [vmem:[#allocation3 + $0x78] sm:$0xff] %vm4617_vm8, %v4600_v13  ;;  %v5717_v44 = vpack.c.bf16 %v5707_v28, %v5706_v20 }
0x16e1   : > { %v5125_v10 = vpop.permute.xlu0 %5124  ;;  %v5704_v36 = vld [vmem:[#allocation3 + $0x40] sm:$0xff] }
0x16e2   : > { %5161 = vst.msk [vmem:[#allocation3 + $0x60] sm:$0xff] %vm5148_vm9, %v5125_v10 }
0x16e3   : > { %v5127_v57 = vpop.permute.xlu1 %5126  ;;  %v5705_v41 = vld [vmem:[#allocation3 + $0x48] sm:$0xff] }
0x16e4   : > { %5162 = vst.msk [vmem:[#allocation3 + $0x68] sm:$0xff] %vm5148_vm9, %v5127_v57  ;;  %v5716_v61 = vpack.c.bf16 %v5705_v41, %v5704_v36 }
0x16e5   : > { %v5129_v24 = vpop.permute.xlu0 %5128 }
0x16e6   : > { %5163 = vst.msk [vmem:[#allocation3 + $0x70] sm:$0xff] %vm5148_vm9, %v5129_v24  ;;  %11764 = vmatprep.mubr.msk.bf16.mxu1 %vm1116_vm2, %v5716_v61 }
0x16e7   : > { %v5131_v21 = vpop.permute.xlu1 %5130  ;;  %11765 = vmatmul.mubr.msk.bf16.gmra.mrb[152].mxu1 %vm1116_vm2, %v5717_v44  ;;  %v12666_v44 = vld [vmem:[#allocation2 + $0x40] sm:$0xff] }
0x16e8   : > { %5164 = vst.msk [vmem:[#allocation3 + $0x78] sm:$0xff] %vm5148_vm9, %v5131_v21 }
0x16e9   : > { %v5656_v47 = vpop.permute.xlu0 %5655 }
0x16ea   : > { %5692 = vst.msk [vmem:[#allocation3 + $0x60] sm:$0xff] %vm5679_vm10, %v5656_v47 }
0x16eb   : > { %v5658_v62 = vpop.permute.xlu1 %5657 }
0x16ec   : > { %5693 = vst.msk [vmem:[#allocation3 + $0x68] sm:$0xff] %vm5679_vm10, %v5658_v62  ;;  %v12667_v62 = vld [vmem:[#allocation2 + $0x48] sm:$0xff] }
0x16ed   : > { %v5660_v18 = vpop.permute.xlu0 %5659 }
0x16ee   : > { %5694 = vst.msk [vmem:[#allocation3 + $0x70] sm:$0xff] %vm5679_vm10, %v5660_v18 }
0x16ef   : > { %v5662_v46 = vpop.permute.xlu1 %5661 }
0x16f0   : > { %5695 = vst.msk [vmem:[#allocation3 + $0x78] sm:$0xff] %vm5679_vm10, %v5662_v46  ;;  %v12668_v46 = vld [vmem:[#allocation2 + $0x50] sm:$0xff] }
0x16f1   : > { %v5708_v39 = vld [vmem:[#allocation3 + $0x60] sm:$0xff] }
0x16f3   : > { %v5709_v7 = vld [vmem:[#allocation3 + $0x68] sm:$0xff] }
0x16f4   : > { %v5718_v56 = vpack.c.bf16 %v5709_v7, %v5708_v39 }
0x16f5   : > { %v5710_v25 = vld [vmem:[#allocation3 + $0x70] sm:$0xff] }
0x16f6   : > { %11768 = vmatprep.mubr.msk.bf16.mxu1 %vm1116_vm2, %v5718_v56  ;;  %v12669_v56 = vld [vmem:[#allocation2 + $0x58] sm:$0xff] }
0x16f7   : > { %v5711_v6 = vld [vmem:[#allocation3 + $0x78] sm:$0xff] }
0x16f8   : > { %v5719_v29 = vpack.c.bf16 %v5711_v6, %v5710_v25 }
0x16fa   : > { %11769 = vmatmul.mubr.msk.bf16.gmra.mrb[156].mxu1 %vm1116_vm2, %v5719_v29 }
0x177e   : > { %v11758_v58 = vpop.f32.mrb[144].mxu1 }
0x177f   : > { %v5806_v17 = vpop.f32.mrb[145].mxu1  ;;  %v5815_v42 = vadd.f32 %v11758_v58, %v15730_v50 }
0x1780   : > { %v5807_v59 = vadd.f32 %v5806_v17, %v15730_v50  ;;  %v11759_v37 = vpop.f32.mrb[146].mxu1 }
0x1781   : > { %v5809_v48 = vpop.f32.mrb[147].mxu1  ;;  %v5818_v32 = vadd.f32 %v11759_v37, %v15730_v50  ;;  %v15742_v38 = vadd.f32 %v12660_v60, %v5815_v42  ;;  %v12671_v60 = vld [vmem:[#allocation2 + $0x68] sm:$0xff] }
0x1782   : > { %v5810_v45 = vadd.f32 %v5809_v48, %v15730_v50  ;;  %v15735_v51 = vadd.f32 %v12658_v4, %v5807_v59 }
0x1783   : > { %v5891_v16 = vsel %vm1116_vm2, %v15742_v38, 0.0  ;;  %v15748_v30 = vadd.f32 %v12661_v5, %v5818_v32  ;;  %v12670_v32 = vld [vmem:[#allocation2 + $0x60] sm:$0xff] }
0x1784   : > { %v5885_v34 = vsel %vm1116_vm2, %v15735_v51, 0.0  ;;  %v15740_v2 = vadd.f32 %v12659_v55, %v5810_v45 }
0x1785   : > { %5886 = vadd.xlane.f32.xlu0 %v5885_v34  ;;  %v5894_v8 = vsel %vm1116_vm2, %v15748_v30, 0.0 }
0x1786   : > { %v5888_v14 = vsel %vm1116_vm2, %v15740_v2, 0.0 }
0x1787   : > { %5889 = vadd.xlane.f32.xlu1 %v5888_v14 }
0x1789   : > { %5892 = vadd.xlane.f32.xlu0 %v5891_v16  ;;  %v12672_v16 = vld [vmem:[#allocation2 + $0x70] sm:$0xff] }
0x178d   : > { %5895 = vadd.xlane.f32.xlu0 %v5894_v8 }
0x178e   : > { %v11762_v53 = vpop.f32.mrb[148].mxu1 }
0x178f   : > { %v5822_v43 = vpop.f32.mrb[149].mxu1  ;;  %v5831_v9 = vadd.f32 %v11762_v53, %v15730_v50  ;;  %v12673_v53 = vld [vmem:[#allocation2 + $0x78] sm:$0xff] }
0x1790   : > { %v5823_v26 = vadd.f32 %v5822_v43, %v15730_v50  ;;  %v11763_v40 = vpop.f32.mrb[150].mxu1 }
0x1791   : > { %v5825_v49 = vpop.f32.mrb[151].mxu1  ;;  %v5834_v12 = vadd.f32 %v11763_v40, %v15730_v50  ;;  %v15762_v3 = vadd.f32 %v12664_v22, %v5831_v9 }
0x1792   : > { %v5826_v1 = vadd.f32 %v5825_v49, %v15730_v50  ;;  %v15756_v19 = vadd.f32 %v12662_v11, %v5823_v26 }
0x1793   : > { %v15766_v15 = vadd.f32 %v12665_v27, %v5834_v12  ;;  %v5903_v0 = vsel %vm1116_vm2, %v15762_v3, 0.0 }
0x1794   : > { %v5897_v63 = vsel %vm1116_vm2, %v15756_v19, 0.0  ;;  %v15760_v52 = vadd.f32 %v12663_v54, %v5826_v1 }
0x1795   : > { %5898 = vadd.xlane.f32.xlu0 %v5897_v63  ;;  %v5906_v13 = vsel %vm1116_vm2, %v15766_v15, 0.0 }
0x1796   : > { %v5900_v23 = vsel %vm1116_vm2, %v15760_v52, 0.0 }
0x1797   : > { %5901 = vadd.xlane.f32.xlu1 %v5900_v23 }
0x1799   : > { %5904 = vadd.xlane.f32.xlu0 %v5903_v0 }
0x179b   : > { %5907 = vadd.xlane.f32.xlu1 %v5906_v13 }
0x17ba   : > { %v11766_v10 = vpop.f32.mrb[152].mxu1 }
0x17bb   : > { %v5838_v28 = vpop.f32.mrb[153].mxu1  ;;  %v5847_v57 = vadd.f32 %v11766_v10, %v15730_v50 }
0x17bc   : > { %v5839_v36 = vadd.f32 %v5838_v28, %v15730_v50  ;;  %v11767_v41 = vpop.f32.mrb[154].mxu1 }
0x17bd   : > { %v5841_v61 = vpop.f32.mrb[155].mxu1  ;;  %v5850_v20 = vadd.f32 %v11767_v41, %v15730_v50  ;;  %v15782_v39 = vadd.f32 %v12668_v46, %v5847_v57 }
0x17be   : > { %v5842_v24 = vadd.f32 %v5841_v61, %v15730_v50  ;;  %v15776_v21 = vadd.f32 %v12666_v44, %v5839_v36 }
0x17bf   : > { %v15786_v25 = vadd.f32 %v12669_v56, %v5850_v20  ;;  %v5915_v6 = vsel %vm1116_vm2, %v15782_v39, 0.0 }
0x17c0   : > { %v5909_v47 = vsel %vm1116_vm2, %v15776_v21, 0.0  ;;  %v15780_v18 = vadd.f32 %v12667_v62, %v5842_v24 }
0x17c1   : > { %5910 = vadd.xlane.f32.xlu0 %v5909_v47  ;;  %v5918_v29 = vsel %vm1116_vm2, %v15786_v25, 0.0 }
0x17c2   : > { %v5912_v7 = vsel %vm1116_vm2, %v15780_v18, 0.0 }
0x17c3   : > { %5913 = vadd.xlane.f32.xlu1 %v5912_v7 }
0x17c5   : > { %5916 = vadd.xlane.f32.xlu0 %v5915_v6 }
0x17c7   : > { %5919 = vadd.xlane.f32.xlu1 %v5918_v29 }
0x17cd   : > { %v11770_v58 = vpop.f32.mrb[156].mxu1 }
0x17ce   : > { %v5854_v17 = vpop.f32.mrb[157].mxu1  ;;  %v5863_v42 = vadd.f32 %v11770_v58, %v15730_v50 }
0x17cf   : > { %v5855_v59 = vadd.f32 %v5854_v17, %v15730_v50  ;;  %v11771_v37 = vpop.f32.mrb[158].mxu1 }
0x17d0   : > { %v5857_v48 = vpop.f32.mrb[159].mxu1  ;;  %v5866_v45 = vadd.f32 %v11771_v37, %v15730_v50  ;;  %v15802_v5 = vadd.f32 %v12672_v16, %v5863_v42  ;;  %v742_v37 = vld [vmem:[%s12831_s20] sm:$0xff] }
0x17d1   : > { %v5858_v4 = vadd.f32 %v5857_v48, %v15730_v50  ;;  %v15796_v34 = vadd.f32 %v12670_v32, %v5855_v59  ;;  %v743_v48 = vld [vmem:[%s12831_s20 + $0x8] sm:$0xff]  ;;  %v758_v16 = vld [vmem:[%s12831_s20 + $0x80] sm:$0xff] }
0x17d2   : > { %v15806_v43 = vadd.f32 %v12673_v53, %v5866_v45  ;;  %v5927_v50 = vsel %vm1116_vm2, %v15802_v5, 0.0  ;;  %v759_v53 = vld [vmem:[%s12831_s20 + $0x88] sm:$0xff] }
0x17d3   : > { %v5921_v55 = vsel %vm1116_vm2, %v15796_v34, 0.0  ;;  %v15800_v14 = vadd.f32 %v12671_v60, %v5858_v4  ;;  %v751_v4 = vld [vmem:[%s12831_s20 + $0x48] sm:$0xff] }
0x17d4   : > { %5922 = vadd.xlane.f32.xlu0 %v5921_v55  ;;  %v5930_v9 = vsel %vm1116_vm2, %v15806_v43, 0.0  ;;  %v10040_v55 = vcombine.low %v743_v48, %v751_v4  ;;  %v10041_v60 = vcombine.high %v743_v48, %v751_v4  ;;  %v15902_v4 = vld [vmem:[%s12831_s20 + $0x10] sm:$0xff] }
0x17d5   : > { %v5924_v8 = vsel %vm1116_vm2, %v15800_v14, 0.0 }
0x17d6   : > { %5925 = vadd.xlane.f32.xlu1 %v5924_v8  ;;  %6681 = vmatprep.subr.bf16.mxu1 %v10041_v60  ;;  %v766_v8 = vld [vmem:[%s12831_s20 + $0xc0] sm:$0xff] }
0x17d7   : > { %6682 = vmatpush1.bf16.msra.mxu1 %v10040_v55  ;;  %v15908_v55 = vld [vmem:[%s12831_s20 + $0x18] sm:$0xff] }
0x17d8   : > { %5928 = vadd.xlane.f32.xlu0 %v5927_v50  ;;  %v10055_v50 = vcombine.high %v758_v16, %v766_v8 }
0x17da   : > { %5931 = vadd.xlane.f32.xlu1 %v5930_v9  ;;  %v767_v9 = vld [vmem:[%s12831_s20 + $0xc8] sm:$0xff] }
0x1812   : > { %v5887_v26 = vpop.xlane.xlu0 %5886 }
0x1813   : > { %v5934_v40 = vmul.f32 0.015625, %v5887_v26  ;;  %v10054_v26 = vcombine.low %v758_v16, %v766_v8  ;;  %v15915_v16 = vld [vmem:[%s12831_s20 + $0x58] sm:$0xff] }
0x1814   : > { %v5890_v49 = vpop.xlane.xlu1 %5889 }
0x1815   : > { %v15813_v12 = vsub.f32 %v15735_v51, %v5934_v40  ;;  %v5935_v1 = vmul.f32 0.015625, %v5890_v49  ;;  %v10056_v40 = vcombine.low %v759_v53, %v767_v9  ;;  %v10057_v49 = vcombine.high %v759_v53, %v767_v9 }
0x1816   : > { %v5893_v11 = vpop.xlane.xlu0 %5892  ;;  %v10044_v53 = vcombine.low %v15908_v55, %v15915_v16 }
0x1817   : > { %v15816_v63 = vsub.f32 %v15740_v2, %v5935_v1  ;;  %v5936_v54 = vmul.f32 0.015625, %v5893_v11  ;;  %v5966_v22 = vmul.f32 %v15813_v12, %v15813_v12  ;;  %6683 = vmatprep.subr.bf16.mxu1 %v10057_v49  ;;  %v774_v1 = vld [vmem:[%s12831_s20 + $0x100] sm:$0xff] }
0x1818   : > { %v782_v11 = vld [vmem:[%s12831_s20 + $0x140] sm:$0xff]  ;;  %6684 = vmatpush1.bf16.msra.mxu1 %v10056_v40 }
0x1819   : > { %v15821_v23 = vsub.f32 %v15742_v38, %v5936_v54  ;;  %v5982_v27 = vsel %vm1116_vm2, %v5966_v22, 0.0  ;;  %v5967_v0 = vmul.f32 %v15816_v63, %v15816_v63  ;;  %v775_v54 = vld [vmem:[%s12831_s20 + $0x108] sm:$0xff]  ;;  %v10071_v22 = vcombine.high %v774_v1, %v782_v11 }
0x181a   : > { %5983 = vadd.xlane.f32.xlu0 %v5982_v27  ;;  %v5896_v51 = vpop.xlane.xlu0 %5895  ;;  %v783_v27 = vld [vmem:[%s12831_s20 + $0x148] sm:$0xff] }
0x181b   : > { %v5937_v13 = vmul.f32 0.015625, %v5896_v51  ;;  %v5985_v10 = vsel %vm1116_vm2, %v5967_v0, 0.0  ;;  %v5968_v2 = vmul.f32 %v15821_v23, %v15821_v23  ;;  %v10070_v0 = vcombine.low %v774_v1, %v782_v11 }
0x181c   : > { %5986 = vadd.xlane.f32.xlu1 %v5985_v10  ;;  %v10072_v51 = vcombine.low %v775_v54, %v783_v27  ;;  %v790_v10 = vld [vmem:[%s12831_s20 + $0x180] sm:$0xff] }
0x181d   : > { %v15830_v28 = vsub.f32 %v15748_v30, %v5937_v13  ;;  %v5988_v38 = vsel %vm1116_vm2, %v5968_v2, 0.0  ;;  %v10073_v13 = vcombine.high %v775_v54, %v783_v27  ;;  %v798_v2 = vld [vmem:[%s12831_s20 + $0x1c0] sm:$0xff] }
0x181e   : > { %5989 = vadd.xlane.f32.xlu0 %v5988_v38  ;;  %v791_v38 = vld [vmem:[%s12831_s20 + $0x188] sm:$0xff] }
0x181f   : > { %v5969_v57 = vmul.f32 %v15830_v28, %v15830_v28  ;;  %6685 = vmatprep.subr.bf16.mxu1 %v10073_v13 }
0x1820   : > { %6686 = vmatpush1.bf16.msra.mxu1 %v10072_v51 }
0x1821   : > { %v5991_v36 = vsel %vm1116_vm2, %v5969_v57, 0.0  ;;  %v10087_v57 = vcombine.high %v790_v10, %v798_v2 }
0x1822   : > { %5992 = vadd.xlane.f32.xlu1 %v5991_v36  ;;  %v5899_v41 = vpop.xlane.xlu0 %5898  ;;  %v799_v36 = vld [vmem:[%s12831_s20 + $0x1c8] sm:$0xff] }
0x1823   : > { %v5938_v61 = vmul.f32 0.015625, %v5899_v41  ;;  %v10086_v41 = vcombine.low %v790_v10, %v798_v2 }
0x1824   : > { %v5902_v20 = vpop.xlane.xlu1 %5901 }
0x1825   : > { %v15837_v24 = vsub.f32 %v15756_v19, %v5938_v61  ;;  %v5939_v44 = vmul.f32 0.015625, %v5902_v20  ;;  %v10088_v61 = vcombine.low %v791_v38, %v799_v36  ;;  %v10089_v20 = vcombine.high %v791_v38, %v799_v36 }
0x1826   : > { %v5905_v47 = vpop.xlane.xlu0 %5904 }
0x1827   : > { %v15840_v30 = vsub.f32 %v15760_v52, %v5939_v44  ;;  %v5940_v62 = vmul.f32 0.015625, %v5905_v47  ;;  %v5970_v46 = vmul.f32 %v15837_v24, %v15837_v24  ;;  %6687 = vmatprep.subr.bf16.mxu1 %v10089_v20  ;;  %v17761_v44 = vmov 0   ;;  %v15955_v20 = vld [vmem:[%s12831_s20 + $0x28] sm:$0xff] }
0x1828   : > { %v5908_v7 = vpop.xlane.xlu1 %5907  ;;  %6688 = vmatpush1.bf16.msra.mxu1 %v10088_v61  ;;  %6600 = vmatprep.mubr.bf16.mxu0 %v17761_v44  ;;  %v15950_v61 = vld [vmem:[%s12831_s20 + $0x60] sm:$0xff] }
0x1829   : > { %v15845_v56 = vsub.f32 %v15762_v3, %v5940_v62  ;;  %v5941_v6 = vmul.f32 0.015625, %v5908_v7  ;;  %v5994_v19 = vsel %vm1116_vm2, %v5970_v46, 0.0  ;;  %v5971_v29 = vmul.f32 %v15840_v30, %v15840_v30  ;;  %6713 = vmatprep.mubr.bf16.mxu1 %v17761_v44 }
0x182a   : > { %5995 = vadd.xlane.f32.xlu0 %v5994_v19 }
0x182b   : > { %v15851_v52 = vsub.f32 %v15766_v15, %v5941_v6  ;;  %v5997_v58 = vsel %vm1116_vm2, %v5971_v29, 0.0  ;;  %v5972_v17 = vmul.f32 %v15845_v56, %v15845_v56  ;;  %v750_v15 = vld [vmem:[%s12831_s20 + $0x40] sm:$0xff] }
0x182c   : > { %5998 = vadd.xlane.f32.xlu1 %v5997_v58  ;;  %v10039_v45 = vcombine.high %v742_v37, %v750_v15  ;;  %v10038_v32 = vcombine.low %v742_v37, %v750_v15 }
0x182d   : > { %v6000_v3 = vsel %vm1116_vm2, %v5972_v17, 0.0  ;;  %v5973_v42 = vmul.f32 %v15851_v52, %v15851_v52 }
0x182e   : > { %6001 = vadd.xlane.f32.xlu0 %v6000_v3  ;;  %6568 = vmatprep.subr.bf16.mxu0 %v10039_v45 }
0x182f   : > { %v6003_v59 = vsel %vm1116_vm2, %v5973_v42, 0.0  ;;  %6569 = vmatpush1.bf16.msra.mxu0 %v10038_v32  ;;  %v15905_v32 = vld [vmem:[%s12831_s20 + $0x50] sm:$0xff] }
0x1830   : > { %6004 = vadd.xlane.f32.xlu1 %v6003_v59  ;;  %6570 = vmatprep.subr.bf16.mxu0 %v10055_v50  ;;  %v10043_v60 = vcombine.high %v15902_v4, %v15905_v32  ;;  %v10045_v50 = vcombine.high %v15908_v55, %v15915_v16 }
0x1832   : > { %6907 = vmatprep.subr.bf16.mxu1 %v10045_v50 }
0x1833   : > { %6571 = vmatpush1.bf16.msra.mxu0 %v10054_v26 }
0x1834   : > { %6572 = vmatprep.subr.bf16.mxu0 %v10071_v22 }
0x1837   : > { %6573 = vmatpush1.bf16.msra.mxu0 %v10070_v0 }
0x1838   : > { %6574 = vmatprep.subr.bf16.mxu0 %v10087_v57 }
0x183b   : > { %6575 = vmatpush1.bf16.msra.mxu0 %v10086_v41  ;;  %v15947_v41 = vld [vmem:[%s12831_s20 + $0x20] sm:$0xff] }
0x183c   : > { %6794 = vmatprep.subr.bf16.mxu0 %v10043_v60 }
0x184e   : > { %v5911_v47 = vpop.xlane.xlu0 %5910 }
0x184f   : > { %v5942_v62 = vmul.f32 0.015625, %v5911_v47  ;;  %v15958_v47 = vld [vmem:[%s12831_s20 + $0x68] sm:$0xff] }
0x1850   : > { %v5914_v46 = vpop.xlane.xlu1 %5913 }
0x1851   : > { %v15879_v7 = vsub.f32 %v15776_v21, %v5942_v62  ;;  %v5943_v6 = vmul.f32 0.015625, %v5914_v46  ;;  %v10048_v62 = vcombine.low %v15955_v20, %v15958_v47 }
0x1852   : > { %v5917_v19 = vpop.xlane.xlu0 %5916 }
0x1853   : > { %v15882_v29 = vsub.f32 %v15780_v18, %v5943_v6  ;;  %v5944_v58 = vmul.f32 0.015625, %v5917_v19  ;;  %v5974_v17 = vmul.f32 %v15879_v7, %v15879_v7 }
0x1854   : > { %v5920_v3 = vpop.xlane.xlu1 %5919 }
0x1855   : > { %v15887_v42 = vsub.f32 %v15782_v39, %v5944_v58  ;;  %v5945_v59 = vmul.f32 0.015625, %v5920_v3  ;;  %v6006_v21 = vsel %vm1116_vm2, %v5974_v17, 0.0  ;;  %v5975_v37 = vmul.f32 %v15882_v29, %v15882_v29 }
0x1856   : > { %6007 = vadd.xlane.f32.xlu0 %v6006_v21 }
0x1857   : > { %v15893_v18 = vsub.f32 %v15786_v25, %v5945_v59  ;;  %v6009_v15 = vsel %vm1116_vm2, %v5975_v37, 0.0  ;;  %v5976_v48 = vmul.f32 %v15887_v42, %v15887_v42  ;;  %v10042_v25 = vcombine.low %v15902_v4, %v15905_v32 }
0x1858   : > { %6010 = vadd.xlane.f32.xlu1 %v6009_v15 }
0x1859   : > { %v6012_v39 = vsel %vm1116_vm2, %v5976_v48, 0.0  ;;  %v5977_v45 = vmul.f32 %v15893_v18, %v15893_v18 }
0x185a   : > { %6013 = vadd.xlane.f32.xlu0 %v6012_v39  ;;  %v15963_v39 = vsub.s32 4, %v18011_v31 }
0x185b   : > { %v6015_v8 = vsel %vm1116_vm2, %v5977_v45, 0.0 }
0x185c   : > { %6016 = vadd.xlane.f32.xlu1 %v6015_v8  ;;  %v15967_v60 = vrot.slane %v15726_v33, %v15963_v39  ;;  %v15970_v8 = vsub.s32 5, %v18011_v31 }
0x1861   : > { %v5923_v9 = vpop.xlane.xlu0 %5922 }
0x1862   : > { %v5946_v26 = vmul.f32 0.015625, %v5923_v9 }
0x1863   : > { %v5926_v40 = vpop.xlane.xlu1 %5925 }
0x1864   : > { %v15923_v49 = vsub.f32 %v15796_v34, %v5946_v26  ;;  %v5947_v1 = vmul.f32 0.015625, %v5926_v40 }
0x1865   : > { %v5929_v11 = vpop.xlane.xlu0 %5928 }
0x1866   : > { %v15926_v54 = vsub.f32 %v15800_v14, %v5947_v1  ;;  %v5948_v22 = vmul.f32 0.015625, %v5929_v11  ;;  %v5978_v27 = vmul.f32 %v15923_v49, %v15923_v49  ;;  %v15975_v11 = vrot.slane %v15726_v33, %v15970_v8 }
0x1867   : > { %v5932_v0 = vpop.xlane.xlu1 %5931 }
0x1868   : > { %v15931_v51 = vsub.f32 %v15802_v5, %v5948_v22  ;;  %v5949_v13 = vmul.f32 0.015625, %v5932_v0  ;;  %v6018_v34 = vsel %vm1116_vm2, %v5978_v27, 0.0  ;;  %v5979_v10 = vmul.f32 %v15926_v54, %v15926_v54 }
0x1869   : > { %6019 = vadd.xlane.f32.xlu0 %v6018_v34 }
0x186a   : > { %v15937_v14 = vsub.f32 %v15806_v43, %v5949_v13  ;;  %v6021_v2 = vsel %vm1116_vm2, %v5979_v10, 0.0  ;;  %v5980_v38 = vmul.f32 %v15931_v51, %v15931_v51  ;;  %v10046_v43 = vcombine.low %v15947_v41, %v15950_v61 }
0x186b   : > { %6022 = vadd.xlane.f32.xlu1 %v6021_v2 }
0x186c   : > { %v6024_v5 = vsel %vm1116_vm2, %v5980_v38, 0.0  ;;  %v5981_v57 = vmul.f32 %v15937_v14, %v15937_v14 }
0x186d   : > { %6025 = vadd.xlane.f32.xlu0 %v6024_v5 }
0x186e   : > { %v6027_v36 = vsel %vm1116_vm2, %v5981_v57, 0.0  ;;  %v760_v57 = vld [vmem:[%s12831_s20 + $0x90] sm:$0xff] }
0x186f   : > { %6028 = vadd.xlane.f32.xlu1 %v6027_v36 }
0x18a7   : > { %v5984_v46 = vpop.xlane.xlu0 %5983 }
0x18a8   : > { %v6030_v6 = vmul.f32 0.015625, %v5984_v46 }
0x18a9   : > { %v5987_v19 = vpop.xlane.xlu1 %5986 }
0x18aa   : > { %v6046_v58 = vadd.f32 1e-05, %v6030_v6  ;;  %v6031_v17 = vmul.f32 0.015625, %v5987_v19  ;;  %v768_v6 = vld [vmem:[%s12831_s20 + $0xd0] sm:$0xff]  ;;  %v761_v19 = vld [vmem:[%s12831_s20 + $0x98] sm:$0xff] }
0x18ab   : > { %v5990_v3 = vpop.xlane.xlu0 %5989 }
0x18ac   : > { %12545 = vrsqrt.f32 %v6046_v58  ;;  %v6047_v59 = vadd.f32 1e-05, %v6031_v17  ;;  %v6032_v21 = vmul.f32 0.015625, %v5990_v3  ;;  %v769_v58 = vld [vmem:[%s12831_s20 + $0xd8] sm:$0xff] }
0x18ae   : > { %12547 = vrsqrt.f32 %v6047_v59  ;;  %v6048_v37 = vadd.f32 1e-05, %v6032_v21 }
0x18af   : > { %v5993_v15 = vpop.xlane.xlu1 %5992 }
0x18b0   : > { %12549 = vrsqrt.f32 %v6048_v37  ;;  %v6033_v48 = vmul.f32 0.015625, %v5993_v15 }
0x18b2   : > { %v6049_v45 = vadd.f32 1e-05, %v6033_v48  ;;  %v10061_v48 = vcombine.high %v761_v19, %v769_v58 }
0x18b4   : > { %12551 = vrsqrt.f32 %v6049_v45  ;;  %v776_v45 = vld [vmem:[%s12831_s20 + $0x110] sm:$0xff] }
0x18b6   : > { %v12546_v50 = vpop.eup %12545 }
0x18b7   : > { %v6078_v9 = vmul.f32 %v12546_v50, %v15813_v12  ;;  %v5996_v26 = vpop.xlane.xlu0 %5995 }
0x18b8   : > { %v12548_v40 = vpop.eup %12547  ;;  %v6034_v1 = vmul.f32 0.015625, %v5996_v26  ;;  %v784_v26 = vld [vmem:[%s12831_s20 + $0x150] sm:$0xff] }
0x18b9   : > { %v6098_v22 = vmul.f32 %v15967_v60, %v6078_v9  ;;  %v6079_v27 = vmul.f32 %v12548_v40, %v15816_v63  ;;  %v5999_v0 = vpop.xlane.xlu1 %5998  ;;  %v777_v40 = vld [vmem:[%s12831_s20 + $0x118] sm:$0xff]  ;;  %v10074_v4 = vcombine.low %v776_v45, %v784_v26 }
0x18ba   : > { %v12550_v13 = vpop.eup %12549  ;;  %v6050_v34 = vadd.f32 1e-05, %v6034_v1  ;;  %v6035_v10 = vmul.f32 0.015625, %v5999_v0  ;;  %v10075_v0 = vcombine.high %v776_v45, %v784_v26 }
0x18bb   : > { %v6099_v12 = vmul.f32 %v15967_v60, %v6079_v27  ;;  %v6002_v2 = vpop.xlane.xlu0 %6001  ;;  %v15982_v33 = vadd.f32 %v15975_v11, %v6098_v22  ;;  %v6080_v63 = vmul.f32 %v12550_v13, %v15821_v23  ;;  %v10059_v23 = vcombine.high %v760_v57, %v768_v6 }
0x18bc   : > { %12553 = vrsqrt.f32 %v6050_v34  ;;  %v6051_v38 = vadd.f32 1e-05, %v6035_v10  ;;  %v6036_v5 = vmul.f32 0.015625, %v6002_v2  ;;  %v10058_v22 = vcombine.low %v760_v57, %v768_v6  ;;  %v792_v34 = vld [vmem:[%s12831_s20 + $0x190] sm:$0xff]  ;;  %v793_v2 = vld [vmem:[%s12831_s20 + $0x198] sm:$0xff] }
0x18bd   : > { %v15985_v36 = vadd.f32 %v15975_v11, %v6099_v12  ;;  %v6005_v46 = vpop.xlane.xlu1 %6004  ;;  %v6100_v50 = vmul.f32 %v15967_v60, %v6080_v63  ;;  %v10060_v27 = vcombine.low %v761_v19, %v769_v58  ;;  %v800_v12 = vld [vmem:[%s12831_s20 + $0x1d0] sm:$0xff] }
0x18be   : > { %v12552_v17 = vpop.eup %12551  ;;  %12555 = vrsqrt.f32 %v6051_v38  ;;  %v6052_v3 = vadd.f32 1e-05, %v6036_v5  ;;  %v6037_v59 = vmul.f32 0.015625, %v6005_v46  ;;  %v801_v38 = vld [vmem:[%s12831_s20 + $0x1d8] sm:$0xff]  ;;  %v10090_v19 = vcombine.low %v792_v34, %v800_v12 }
0x18bf   : > { %v15993_v21 = vpack.c.bf16 %v15985_v36, %v15982_v33  ;;  %v6081_v37 = vmul.f32 %v12552_v17, %v15830_v28  ;;  %v785_v28 = vld [vmem:[%s12831_s20 + $0x158] sm:$0xff]  ;;  %v16019_v10 = vadd.f32 %v15975_v11, %v6100_v50  ;;  %v10093_v57 = vcombine.high %v793_v2, %v801_v38 }
0x18c0   : > { %12557 = vrsqrt.f32 %v6052_v3  ;;  %v6053_v15 = vadd.f32 1e-05, %v6037_v59  ;;  %v10077_v13 = vcombine.high %v777_v40, %v785_v28  ;;  %v10092_v58 = vcombine.low %v793_v2, %v801_v38 }
0x18c1   : > { %v6101_v9 = vmul.f32 %v15967_v60, %v6081_v37  ;;  %10102 = vmatmul.mubr.msk.bf16.vlgmr.msra.gmra.mrb[160].mxu0 %vm1116_vm2, %v15993_v21  ;;  %10110 = vmatmul.mubr.msk.bf16.vlgmr.msra.gmra.mrb[160].mxu1 %vm1116_vm2, %v15993_v21  ;;  %v10049_v3 = vcombine.high %v15955_v20, %v15958_v47 }
0x18c2   : > { %12559 = vrsqrt.f32 %v6053_v15  ;;  %6610 = vmatprep.mubr.bf16.mxu0 %v17761_v44  ;;  %6723 = vmatprep.mubr.bf16.mxu1 %v17761_v44 }
0x18c3   : > { %v16009_v1 = vadd.f32 %v15975_v11, %v6101_v9  ;;  %6795 = vmatpush1.bf16.msra.mxu0 %v10042_v25  ;;  %6908 = vmatpush1.bf16.msra.mxu1 %v10044_v53  ;;  %v10076_v25 = vcombine.low %v777_v40, %v785_v28  ;;  %v10091_v53 = vcombine.high %v792_v34, %v800_v12 }
0x18c4   : > { %6796 = vmatprep.subr.bf16.mxu0 %v10059_v23  ;;  %6909 = vmatprep.subr.bf16.mxu1 %v10061_v48 }
0x18c5   : > { %v16026_v32 = vpack.c.bf16 %v16009_v1, %v16019_v10 }
0x18c6   : > { %v12554_v5 = vpop.eup %12553 }
0x18c7   : > { %v6082_v55 = vmul.f32 %v12554_v5, %v15837_v24  ;;  %6797 = vmatpush1.bf16.msra.mxu0 %v10058_v22  ;;  %6910 = vmatpush1.bf16.msra.mxu1 %v10060_v27 }
0x18c8   : > { %v12556_v16 = vpop.eup %12555  ;;  %6798 = vmatprep.subr.bf16.mxu0 %v10075_v0  ;;  %6911 = vmatprep.subr.bf16.mxu1 %v10077_v13 }
0x18c9   : > { %v6102_v63 = vmul.f32 %v15967_v60, %v6082_v55  ;;  %v6083_v46 = vmul.f32 %v12556_v16, %v15840_v30  ;;  %10103 = vmatmul.mubr.msk.bf16.gmra.mrb[164].mxu0 %vm1116_vm2, %v16026_v32  ;;  %10111 = vmatmul.mubr.msk.bf16.gmra.mrb[164].mxu1 %vm1116_vm2, %v16026_v32  ;;  %v10047_v30 = vcombine.high %v15947_v41, %v15950_v61  ;;  %v802_v41 = vld [vmem:[%s12831_s20 + $0x1e0] sm:$0xff]  ;;  %v795_v61 = vld [vmem:[%s12831_s20 + $0x1a8] sm:$0xff] }
0x18ca   : > { %v12558_v6 = vpop.eup %12557  ;;  %6620 = vmatprep.mubr.bf16.mxu0 %v17761_v44  ;;  %6733 = vmatprep.mubr.bf16.mxu1 %v17761_v44 }
0x18cb   : > { %v6103_v24 = vmul.f32 %v15967_v60, %v6083_v46  ;;  %6799 = vmatpush1.bf16.msra.mxu0 %v10074_v4  ;;  %6912 = vmatpush1.bf16.msra.mxu1 %v10076_v25  ;;  %v16043_v59 = vadd.f32 %v15975_v11, %v6102_v63  ;;  %v6084_v15 = vmul.f32 %v12558_v6, %v15845_v56 }
0x18cc   : > { %v12560_v17 = vpop.eup %12559  ;;  %6800 = vmatprep.subr.bf16.mxu0 %v10091_v53  ;;  %6913 = vmatprep.subr.bf16.mxu1 %v10093_v57 }
0x18cd   : > { %v16046_v37 = vadd.f32 %v15975_v11, %v6103_v24  ;;  %v6085_v23 = vmul.f32 %v12560_v17, %v15851_v52  ;;  %v6104_v50 = vmul.f32 %v15967_v60, %v6084_v15 }
0x18cf   : > { %v16052_v48 = vpack.c.bf16 %v16046_v37, %v16043_v59  ;;  %v6105_v45 = vmul.f32 %v15967_v60, %v6085_v23  ;;  %6801 = vmatpush1.bf16.msra.mxu0 %v10090_v19  ;;  %6914 = vmatpush1.bf16.msra.mxu1 %v10092_v58  ;;  %v16066_v52 = vadd.f32 %v15975_v11, %v6104_v50 }
0x18d0   : > { %7020 = vmatprep.subr.bf16.mxu0 %v10047_v30  ;;  %7133 = vmatprep.subr.bf16.mxu1 %v10049_v3 }
0x18d1   : > { %10104 = vmatmul.mubr.msk.bf16.gmra.mrb[168].mxu0 %vm1116_vm2, %v16052_v48  ;;  %10112 = vmatmul.mubr.msk.bf16.gmra.mrb[168].mxu1 %vm1116_vm2, %v16052_v48  ;;  %v16063_v56 = vadd.f32 %v15975_v11, %v6105_v45 }
0x18d2   : > { %6630 = vmatprep.mubr.bf16.mxu0 %v17761_v44  ;;  %6743 = vmatprep.mubr.bf16.mxu1 %v17761_v44 }
0x18d3   : > { %v16070_v9 = vpack.c.bf16 %v16063_v56, %v16066_v52 }
0x18d9   : > { %10105 = vmatmul.mubr.msk.bf16.gmra.mrb[172].mxu0 %vm1116_vm2, %v16070_v9  ;;  %10113 = vmatmul.mubr.msk.bf16.gmra.mrb[172].mxu1 %vm1116_vm2, %v16070_v9 }
0x18da   : > { %6640 = vmatprep.mubr.bf16.mxu0 %v17761_v44  ;;  %6753 = vmatprep.mubr.bf16.mxu1 %v17761_v44 }
0x18e3   : > { %v6008_v26 = vpop.xlane.xlu0 %6007 }
0x18e4   : > { %v6038_v40 = vmul.f32 0.015625, %v6008_v26 }
0x18e5   : > { %v6011_v28 = vpop.xlane.xlu1 %6010 }
0x18e6   : > { %v6054_v22 = vadd.f32 1e-05, %v6038_v40  ;;  %v6039_v27 = vmul.f32 0.015625, %v6011_v28 }
0x18e7   : > { %v6014_v0 = vpop.xlane.xlu0 %6013 }
0x18e8   : > { %12561 = vrsqrt.f32 %v6054_v22  ;;  %v6055_v13 = vadd.f32 1e-05, %v6039_v27  ;;  %v6040_v34 = vmul.f32 0.015625, %v6014_v0 }
0x18e9   : > { %v6017_v12 = vpop.xlane.xlu1 %6016 }
0x18ea   : > { %12563 = vrsqrt.f32 %v6055_v13  ;;  %v6056_v2 = vadd.f32 1e-05, %v6040_v34  ;;  %v6041_v38 = vmul.f32 0.015625, %v6017_v12 }
0x18ec   : > { %12565 = vrsqrt.f32 %v6056_v2  ;;  %v6057_v5 = vadd.f32 1e-05, %v6041_v38 }
0x18ee   : > { %12567 = vrsqrt.f32 %v6057_v5 }
0x18f2   : > { %v12562_v4 = vpop.eup %12561 }
0x18f3   : > { %v6086_v55 = vmul.f32 %v12562_v4, %v15879_v7 }
0x18f4   : > { %v12564_v25 = vpop.eup %12563 }
0x18f5   : > { %v6106_v16 = vmul.f32 %v15967_v60, %v6086_v55  ;;  %v6087_v53 = vmul.f32 %v12564_v25, %v15882_v29 }
0x18f6   : > { %v12566_v57 = vpop.eup %12565  ;;  %v6020_v63 = vpop.xlane.xlu0 %6019 }
0x18f7   : > { %v6107_v46 = vmul.f32 %v15967_v60, %v6087_v53  ;;  %v6042_v6 = vmul.f32 0.015625, %v6020_v63  ;;  %v16083_v19 = vadd.f32 %v15975_v11, %v6106_v16  ;;  %v6088_v7 = vmul.f32 %v12566_v57, %v15887_v42 }
0x18f8   : > { %v12568_v24 = vpop.eup %12567  ;;  %v6023_v58 = vpop.xlane.xlu1 %6022 }
0x18f9   : > { %v16086_v17 = vadd.f32 %v15975_v11, %v6107_v46  ;;  %v6089_v30 = vmul.f32 %v12568_v24, %v15893_v18  ;;  %v6058_v3 = vadd.f32 1e-05, %v6042_v6  ;;  %v6043_v15 = vmul.f32 0.015625, %v6023_v58  ;;  %v762_v6 = vld [vmem:[%s12831_s20 + $0xa0] sm:$0xff]  ;;  %v763_v58 = vld [vmem:[%s12831_s20 + $0xa8] sm:$0xff] }
0x18fa   : > { %v6026_v29 = vpop.xlane.xlu0 %6025  ;;  %v6108_v28 = vmul.f32 %v15967_v60, %v6088_v7  ;;  %v770_v24 = vld [vmem:[%s12831_s20 + $0xe0] sm:$0xff]  ;;  %v771_v7 = vld [vmem:[%s12831_s20 + $0xe8] sm:$0xff] }
0x18fb   : > { %v16092_v23 = vpack.c.bf16 %v16086_v17, %v16083_v19  ;;  %v6109_v45 = vmul.f32 %v15967_v60, %v6089_v30  ;;  %12569 = vrsqrt.f32 %v6058_v3  ;;  %v6059_v50 = vadd.f32 1e-05, %v6043_v15  ;;  %v786_v15 = vld [vmem:[%s12831_s20 + $0x160] sm:$0xff] }
0x18fc   : > { %v6044_v26 = vmul.f32 0.015625, %v6026_v29  ;;  %v6029_v40 = vpop.xlane.xlu1 %6028  ;;  %v16106_v0 = vadd.f32 %v15975_v11, %v6108_v28  ;;  %v10063_v30 = vcombine.high %v762_v6, %v770_v24  ;;  %v10065_v3 = vcombine.high %v763_v58, %v771_v7  ;;  %v779_v29 = vld [vmem:[%s12831_s20 + $0x128] sm:$0xff] }
0x18fd   : > { %v6045_v22 = vmul.f32 0.015625, %v6029_v40  ;;  %10106 = vmatmul.mubr.msk.bf16.gmra.mrb[176].mxu0 %vm1116_vm2, %v16092_v23  ;;  %10114 = vmatmul.mubr.msk.bf16.gmra.mrb[176].mxu1 %vm1116_vm2, %v16092_v23  ;;  %12571 = vrsqrt.f32 %v6059_v50  ;;  %v16103_v18 = vadd.f32 %v15975_v11, %v6109_v45  ;;  %v787_v45 = vld [vmem:[%s12831_s20 + $0x168] sm:$0xff]  ;;  %v10062_v50 = vcombine.low %v762_v6, %v770_v24  ;;  %v780_v24 = vld [vmem:[%s12831_s20 + $0x130] sm:$0xff] }
0x18fe   : > { %v6060_v42 = vadd.f32 1e-05, %v6044_v26  ;;  %6650 = vmatprep.mubr.bf16.mxu0 %v17761_v44  ;;  %6763 = vmatprep.mubr.bf16.mxu1 %v17761_v44  ;;  %v10064_v26 = vcombine.low %v763_v58, %v771_v7  ;;  %v10081_v28 = vcombine.high %v779_v29, %v787_v45  ;;  %v10080_v47 = vcombine.low %v779_v29, %v787_v45 }
0x18ff   : > { %18012 = vst [vmem:[#allocation16_spill] sm:$0xff] %v16103_v18  ;;  %v6061_v27 = vadd.f32 1e-05, %v6045_v22  ;;  %v16110_v13 = vpack.c.bf16 %v16103_v18, %v16106_v0  ;;  %v794_v22 = vld [vmem:[%s12831_s20 + $0x1a0] sm:$0xff] }
0x1900   : > { %12573 = vrsqrt.f32 %v6060_v42 }
0x1901   : > { %12575 = vrsqrt.f32 %v6061_v27  ;;  %v748_v27 = vld [vmem:[%s12831_s20 + $0x30] sm:$0xff] }
0x1905   : > { %v12570_v34 = vpop.eup %12569  ;;  %10107 = vmatmul.mubr.msk.bf16.gmra.mrb[180].mxu0 %vm1116_vm2, %v16110_v13  ;;  %10115 = vmatmul.mubr.msk.bf16.gmra.mrb[180].mxu1 %vm1116_vm2, %v16110_v13 }
0x1906   : > { %v6090_v12 = vmul.f32 %v12570_v34, %v15923_v49  ;;  %6660 = vmatprep.mubr.bf16.mxu0 %v17761_v44  ;;  %6773 = vmatprep.mubr.bf16.mxu1 %v17761_v44  ;;  %v756_v34 = vld [vmem:[%s12831_s20 + $0x70] sm:$0xff] }
0x1907   : > { %v12572_v2 = vpop.eup %12571 }
0x1908   : > { %v6110_v38 = vmul.f32 %v15967_v60, %v6090_v12  ;;  %v6091_v5 = vmul.f32 %v12572_v2, %v15926_v54  ;;  %v749_v12 = vld [vmem:[%s12831_s20 + $0x38] sm:$0xff] }
0x1909   : > { %v757_v2 = vld [vmem:[%s12831_s20 + $0x78] sm:$0xff] }
0x190a   : > { %v12574_v4 = vpop.eup %12573  ;;  %v6111_v25 = vmul.f32 %v15967_v60, %v6091_v5  ;;  %v16124_v53 = vadd.f32 %v15975_v11, %v6110_v38  ;;  %v10094_v38 = vcombine.low %v794_v22, %v802_v41  ;;  %v10052_v6 = vcombine.low %v749_v12, %v757_v2 }
0x190b   : > { %v12576_v55 = vpop.eup %12575  ;;  %v6092_v57 = vmul.f32 %v12574_v4, %v15931_v51  ;;  %v10051_v4 = vcombine.high %v748_v27, %v756_v34 }
0x190c   : > { %v6093_v16 = vmul.f32 %v12576_v55, %v15937_v14  ;;  %18013 = vst [vmem:[#allocation17_spill] sm:$0xff] %v16124_v53  ;;  %v16127_v49 = vadd.f32 %v15975_v11, %v6111_v25  ;;  %v10053_v55 = vcombine.high %v749_v12, %v757_v2  ;;  %v764_v25 = vld [vmem:[%s12831_s20 + $0xb0] sm:$0xff]  ;;  %v18017_v12 = vld [vmem:[#allocation10_spill] sm:$0xff] }
0x190d   : > { %v6112_v14 = vmul.f32 %v15967_v60, %v6092_v57  ;;  %v765_v57 = vld [vmem:[%s12831_s20 + $0xb8] sm:$0xff] }
0x190e   : > { %18014 = vst [vmem:[#allocation96_spill] sm:$0xff] %v16127_v49  ;;  %v16132_v63 = vpack.c.bf16 %v16127_v49, %v16124_v53  ;;  %v6113_v54 = vmul.f32 %v15967_v60, %v6093_v16  ;;  %v772_v16 = vld [vmem:[%s12831_s20 + $0xf0] sm:$0xff]  ;;  %v11927_v49 = vld [vmem:[%s12836_s27 + $0xe8] sm:$0xff]  }
0x190f   : > { %v16146_v46 = vadd.f32 %v15975_v11, %v6112_v14  ;;  %v10050_v14 = vcombine.low %v748_v27, %v756_v34  ;;  %v10067_v58 = vcombine.high %v764_v25, %v772_v16  ;;  %v11907_v27 = vld [vmem:[%s12836_s27 + $0xc0] sm:$0xff]  }
0x1910   : > { %10108 = vmatmul.mubr.msk.bf16.gmra.mrb[184].mxu0 %vm1116_vm2, %v16132_v63  ;;  %10116 = vmatmul.mubr.msk.bf16.gmra.mrb[184].mxu1 %vm1116_vm2, %v16132_v63  ;;  %v16143_v51 = vadd.f32 %v15975_v11, %v6113_v54  ;;  %v778_v11 = vld [vmem:[%s12831_s20 + $0x120] sm:$0xff]  ;;  %v773_v54 = vld [vmem:[%s12831_s20 + $0xf8] sm:$0xff] }
0x1911   : > { %6670 = vmatprep.mubr.bf16.mxu0 %v17761_v44  ;;  %6783 = vmatprep.mubr.bf16.mxu1 %v17761_v44  ;;  %18016 = vst [vmem:[#allocation18_spill] sm:$0xff] %v16146_v46  ;;  %v10079_v40 = vcombine.high %v778_v11, %v786_v15  ;;  %v10078_v20 = vcombine.low %v778_v11, %v786_v15  ;;  %v788_v11 = vld [vmem:[%s12831_s20 + $0x170] sm:$0xff]  ;;  %v16279_v34 = vld [vmem:[%s12826_s17] sm:$0xff] }
0x1912   : > { %18015 = vst [vmem:[#allocation97_spill] sm:$0xff] %v16143_v51  ;;  %v16150_v60 = vpack.c.bf16 %v16143_v51, %v16146_v46  ;;  %v10069_v7 = vcombine.high %v765_v57, %v773_v54  ;;  %v10066_v15 = vcombine.low %v764_v25, %v772_v16  ;;  %v10068_v29 = vcombine.low %v765_v57, %v773_v54 }
0x1913   : > { %v10083_v45 = vcombine.high %v780_v24, %v788_v11  ;;  %v16287_v2 = vrot.slane %v16279_v34, %v18017_v12  ;;  %v16299_v25 = vrot.slane %v16279_v34, %v15723_v35 }
0x1918   : > { %10109 = vmatmul.mubr.msk.bf16.gmra.mrb[188].mxu0 %vm1116_vm2, %v16150_v60  ;;  %10117 = vmatmul.mubr.msk.bf16.gmra.mrb[188].mxu1 %vm1116_vm2, %v16150_v60 }
0x1919   : > { %6826 = vmatprep.mubr.bf16.mxu0 %v17761_v44  ;;  %6939 = vmatprep.mubr.bf16.mxu1 %v17761_v44 }
0x1920   : > { %10118 = vmatmul.mubr.msk.bf16.vlgmr.msra.gmra.mrb[192].mxu0 %vm1116_vm2, %v15993_v21  ;;  %10126 = vmatmul.mubr.msk.bf16.vlgmr.msra.gmra.mrb[192].mxu1 %vm1116_vm2, %v15993_v21 }
0x1921   : > { %7021 = vmatpush1.bf16.msra.mxu0 %v10046_v43  ;;  %7134 = vmatpush1.bf16.msra.mxu1 %v10048_v62  ;;  %v803_v43 = vld [vmem:[%s12831_s20 + $0x1e8] sm:$0xff]  ;;  %v10095_v62 = vcombine.high %v794_v22, %v802_v41  ;;  %v805_v22 = vld [vmem:[%s12831_s20 + $0x1f8] sm:$0xff]  ;;  %v10082_v41 = vcombine.low %v780_v24, %v788_v11 }
0x1922   : > { %6836 = vmatprep.mubr.bf16.mxu0 %v17761_v44  ;;  %6949 = vmatprep.mubr.bf16.mxu1 %v17761_v44  ;;  %v10097_v42 = vcombine.high %v795_v61, %v803_v43  ;;  %v10096_v5 = vcombine.low %v795_v61, %v803_v43 }
0x1923   : > { %7022 = vmatprep.subr.bf16.mxu0 %v10063_v30  ;;  %7135 = vmatprep.subr.bf16.mxu1 %v10065_v3  ;;  %v781_v30 = vld [vmem:[%s12831_s20 + $0x138] sm:$0xff] }
0x1924   : > { %v789_v3 = vld [vmem:[%s12831_s20 + $0x178] sm:$0xff] }
0x1925   : > { %7023 = vmatpush1.bf16.msra.mxu0 %v10062_v50  ;;  %7136 = vmatpush1.bf16.msra.mxu1 %v10064_v26  ;;  %v10085_v50 = vcombine.high %v781_v30, %v789_v3  ;;  %v796_v26 = vld [vmem:[%s12831_s20 + $0x1b0] sm:$0xff]  ;;  %v10084_v61 = vcombine.low %v781_v30, %v789_v3 }
0x1926   : > { %7024 = vmatprep.subr.bf16.mxu0 %v10079_v40  ;;  %7137 = vmatprep.subr.bf16.mxu1 %v10081_v28  ;;  %v804_v40 = vld [vmem:[%s12831_s20 + $0x1f0] sm:$0xff]  ;;  %v797_v28 = vld [vmem:[%s12831_s20 + $0x1b8] sm:$0xff] }
0x1927   : > { %v10099_v43 = vcombine.high %v796_v26, %v804_v40 }
0x1928   : > { %10119 = vmatmul.mubr.msk.bf16.gmra.mrb[196].mxu0 %vm1116_vm2, %v16026_v32  ;;  %10127 = vmatmul.mubr.msk.bf16.gmra.mrb[196].mxu1 %vm1116_vm2, %v16026_v32 }
0x1929   : > { %6846 = vmatprep.mubr.bf16.mxu0 %v17761_v44  ;;  %6959 = vmatprep.mubr.bf16.mxu1 %v17761_v44 }
0x192a   : > { %7025 = vmatpush1.bf16.msra.mxu0 %v10078_v20  ;;  %7138 = vmatpush1.bf16.msra.mxu1 %v10080_v47  ;;  %v10101_v20 = vcombine.high %v797_v28, %v805_v22  ;;  %v10098_v47 = vcombine.low %v796_v26, %v804_v40 }
0x192b   : > { %7026 = vmatprep.subr.bf16.mxu0 %v10095_v62  ;;  %7139 = vmatprep.subr.bf16.mxu1 %v10097_v42  ;;  %v10100_v62 = vcombine.low %v797_v28, %v805_v22  ;;  %v11905_v42 = vld [vmem:[%s12836_s27 + $0x40] sm:$0xff]  }
0x192e   : > { %7027 = vmatpush1.bf16.msra.mxu0 %v10094_v38  ;;  %7140 = vmatpush1.bf16.msra.mxu1 %v10096_v5  ;;  %v18018_v38 = vld [vmem:[#allocation15_spill] sm:$0xff] }
0x192f   : > { %7246 = vmatprep.subr.bf16.mxu0 %v10051_v4  ;;  %7359 = vmatprep.subr.bf16.mxu1 %v10053_v55  ;;  %v16291_v5 = vrot.slane %v16279_v34, %v18018_v38  ;;  %v18019_v4 = vld [vmem:[#allocation9_spill] sm:$0xff] }
0x1930   : > { %10120 = vmatmul.mubr.msk.bf16.gmra.mrb[200].mxu0 %vm1116_vm2, %v16052_v48  ;;  %10128 = vmatmul.mubr.msk.bf16.gmra.mrb[200].mxu1 %vm1116_vm2, %v16052_v48  ;;  %v16295_v55 = vrot.slane %v16279_v34, %v18019_v4 }
0x1931   : > { %6856 = vmatprep.mubr.bf16.mxu0 %v17761_v44  ;;  %6969 = vmatprep.mubr.bf16.mxu1 %v17761_v44 }
0x1938   : > { %10121 = vmatmul.mubr.msk.bf16.gmra.mrb[204].mxu0 %vm1116_vm2, %v16070_v9  ;;  %10129 = vmatmul.mubr.msk.bf16.gmra.mrb[204].mxu1 %vm1116_vm2, %v16070_v9 }
0x1939   : > { %6866 = vmatprep.mubr.bf16.mxu0 %v17761_v44  ;;  %6979 = vmatprep.mubr.bf16.mxu1 %v17761_v44 }
0x1940   : > { %10122 = vmatmul.mubr.msk.bf16.gmra.mrb[208].mxu0 %vm1116_vm2, %v16092_v23  ;;  %10130 = vmatmul.mubr.msk.bf16.gmra.mrb[208].mxu1 %vm1116_vm2, %v16092_v23 }
0x1941   : > { %6876 = vmatprep.mubr.bf16.mxu0 %v17761_v44  ;;  %6989 = vmatprep.mubr.bf16.mxu1 %v17761_v44 }
0x1948   : > { %10123 = vmatmul.mubr.msk.bf16.gmra.mrb[212].mxu0 %vm1116_vm2, %v16110_v13  ;;  %10131 = vmatmul.mubr.msk.bf16.gmra.mrb[212].mxu1 %vm1116_vm2, %v16110_v13 }
0x1949   : > { %6886 = vmatprep.mubr.bf16.mxu0 %v17761_v44  ;;  %6999 = vmatprep.mubr.bf16.mxu1 %v17761_v44 }
0x1950   : > { %10124 = vmatmul.mubr.msk.bf16.gmra.mrb[216].mxu0 %vm1116_vm2, %v16132_v63  ;;  %10132 = vmatmul.mubr.msk.bf16.gmra.mrb[216].mxu1 %vm1116_vm2, %v16132_v63 }
0x1951   : > { %6896 = vmatprep.mubr.bf16.mxu0 %v17761_v44  ;;  %7009 = vmatprep.mubr.bf16.mxu1 %v17761_v44 }
0x1958   : > { %10125 = vmatmul.mubr.msk.bf16.gmra.mrb[220].mxu0 %vm1116_vm2, %v16150_v60  ;;  %10133 = vmatmul.mubr.msk.bf16.gmra.mrb[220].mxu1 %vm1116_vm2, %v16150_v60 }
0x1959   : > { %7052 = vmatprep.mubr.bf16.mxu0 %v17761_v44  ;;  %7165 = vmatprep.mubr.bf16.mxu1 %v17761_v44 }
0x1960   : > { %10134 = vmatmul.mubr.msk.bf16.vlgmr.msra.gmra.mrb[224].mxu0 %vm1116_vm2, %v15993_v21  ;;  %10142 = vmatmul.mubr.msk.bf16.vlgmr.msra.gmra.mrb[224].mxu1 %vm1116_vm2, %v15993_v21 }
0x1961   : > { %7247 = vmatpush1.bf16.msra.mxu0 %v10050_v14  ;;  %7360 = vmatpush1.bf16.msra.mxu1 %v10052_v6 }
0x1962   : > { %7062 = vmatprep.mubr.bf16.mxu0 %v17761_v44  ;;  %7175 = vmatprep.mubr.bf16.mxu1 %v17761_v44 }
0x1963   : > { %7248 = vmatprep.subr.bf16.mxu0 %v10067_v58  ;;  %7361 = vmatprep.subr.bf16.mxu1 %v10069_v7 }
0x1965   : > { %7249 = vmatpush1.bf16.msra.mxu0 %v10066_v15  ;;  %7362 = vmatpush1.bf16.msra.mxu1 %v10068_v29 }
0x1966   : > { %7250 = vmatprep.subr.bf16.mxu0 %v10083_v45  ;;  %7363 = vmatprep.subr.bf16.mxu1 %v10085_v50 }
0x1968   : > { %10135 = vmatmul.mubr.msk.bf16.gmra.mrb[228].mxu0 %vm1116_vm2, %v16026_v32  ;;  %10143 = vmatmul.mubr.msk.bf16.gmra.mrb[228].mxu1 %vm1116_vm2, %v16026_v32 }
0x1969   : > { %7072 = vmatprep.mubr.bf16.mxu0 %v17761_v44  ;;  %7185 = vmatprep.mubr.bf16.mxu1 %v17761_v44 }
0x196a   : > { %7251 = vmatpush1.bf16.msra.mxu0 %v10082_v41  ;;  %7364 = vmatpush1.bf16.msra.mxu1 %v10084_v61 }
0x196b   : > { %7252 = vmatprep.subr.bf16.mxu0 %v10099_v43  ;;  %7365 = vmatprep.subr.bf16.mxu1 %v10101_v20 }
0x196e   : > { %7253 = vmatpush1.bf16.msra.mxu0 %v10098_v47  ;;  %7366 = vmatpush1.bf16.msra.mxu1 %v10100_v62 }
0x196f   : > { %10625 = vmatprep.subr.bf16.mxu0 %v11905_v42  ;;  %10689 = vmatprep.subr.bf16.mxu1 %v11907_v27 }
0x1970   : > { %10136 = vmatmul.mubr.msk.bf16.gmra.mrb[232].mxu0 %vm1116_vm2, %v16052_v48  ;;  %10144 = vmatmul.mubr.msk.bf16.gmra.mrb[232].mxu1 %vm1116_vm2, %v16052_v48 }
0x1971   : > { %7082 = vmatprep.mubr.bf16.mxu0 %v17761_v44  ;;  %7195 = vmatprep.mubr.bf16.mxu1 %v17761_v44 }
0x1978   : > { %10137 = vmatmul.mubr.msk.bf16.gmra.mrb[236].mxu0 %vm1116_vm2, %v16070_v9  ;;  %10145 = vmatmul.mubr.msk.bf16.gmra.mrb[236].mxu1 %vm1116_vm2, %v16070_v9 }
0x1979   : > { %7092 = vmatprep.mubr.bf16.mxu0 %v17761_v44  ;;  %7205 = vmatprep.mubr.bf16.mxu1 %v17761_v44 }
0x1980   : > { %10138 = vmatmul.mubr.msk.bf16.gmra.mrb[240].mxu0 %vm1116_vm2, %v16092_v23  ;;  %10146 = vmatmul.mubr.msk.bf16.gmra.mrb[240].mxu1 %vm1116_vm2, %v16092_v23 }
0x1981   : > { %7102 = vmatprep.mubr.bf16.mxu0 %v17761_v44  ;;  %7215 = vmatprep.mubr.bf16.mxu1 %v17761_v44 }
0x1988   : > { %10139 = vmatmul.mubr.msk.bf16.gmra.mrb[244].mxu0 %vm1116_vm2, %v16110_v13  ;;  %10147 = vmatmul.mubr.msk.bf16.gmra.mrb[244].mxu1 %vm1116_vm2, %v16110_v13 }
0x1989   : > { %7112 = vmatprep.mubr.bf16.mxu0 %v17761_v44  ;;  %7225 = vmatprep.mubr.bf16.mxu1 %v17761_v44 }
0x1990   : > { %10140 = vmatmul.mubr.msk.bf16.gmra.mrb[248].mxu0 %vm1116_vm2, %v16132_v63  ;;  %10148 = vmatmul.mubr.msk.bf16.gmra.mrb[248].mxu1 %vm1116_vm2, %v16132_v63 }
0x1991   : > { %7122 = vmatprep.mubr.bf16.mxu0 %v17761_v44  ;;  %7235 = vmatprep.mubr.bf16.mxu1 %v17761_v44 }
0x1994   : > { %v6602_v16 = vpop.f32.mrb[160].mxu0  ;;  %v6715_v57 = vpop.f32.mrb[160].mxu1 }
0x1995   : > { %v6603_v54 = vadd.f32 %v6602_v16, %v16287_v2  ;;  %v6716_v14 = vadd.f32 %v6715_v57, %v16291_v5  ;;  %v6604_v6 = vpop.f32.mrb[161].mxu0  ;;  %v6717_v24 = vpop.f32.mrb[161].mxu1 }
0x1996   : > { %v6605_v58 = vadd.f32 %v6604_v6, %v16295_v55  ;;  %v6718_v7 = vadd.f32 %v6717_v24, %v16299_v25  ;;  %v6606_v11 = vpop.f32.mrb[162].mxu0  ;;  %v6719_v30 = vpop.f32.mrb[162].mxu1 }
0x1997   : > { %v6607_v3 = vadd.f32 %v6606_v11, %v16287_v2  ;;  %v6720_v15 = vadd.f32 %v6719_v30, %v16291_v5  ;;  %v6608_v29 = vpop.f32.mrb[163].mxu0  ;;  %v6721_v45 = vpop.f32.mrb[163].mxu1  ;;  %v7472_v40 = vmax.f32 %v6603_v54, 0.0  ;;  %v7474_v28 = vmax.f32 %v6716_v14, 0.0 }
0x1998   : > { %v6609_v50 = vadd.f32 %v6608_v29, %v16295_v55  ;;  %v6722_v26 = vadd.f32 %v6721_v45, %v16299_v25  ;;  %10141 = vmatmul.mubr.msk.bf16.gmra.mrb[252].mxu0 %vm1116_vm2, %v16150_v60  ;;  %10149 = vmatmul.mubr.msk.bf16.gmra.mrb[252].mxu1 %vm1116_vm2, %v16150_v60  ;;  %v7473_v61 = vmax.f32 %v6605_v58, 0.0  ;;  %v7475_v43 = vmax.f32 %v6718_v7, 0.0  ;;  %v11908_v29 = vld [vmem:[%s12836_s27 + $0x80] sm:$0xff]  }
0x1999   : > { %v7488_v22 = vmax.f32 %v6607_v3, 0.0  ;;  %v7490_v41 = vmax.f32 %v6720_v15, 0.0  ;;  %7278 = vmatprep.mubr.bf16.mxu0 %v17761_v44  ;;  %7391 = vmatprep.mubr.bf16.mxu1 %v17761_v44  ;;  %v11906_v15 = vld [vmem:[%s12836_s27] sm:$0xff]  }
0x199a   : > { %v7489_v20 = vmax.f32 %v6609_v50, 0.0  ;;  %v7491_v47 = vmax.f32 %v6722_v26, 0.0 }
0x199b   : > { %v16317_v62 = vpack.c.bf16 %v7488_v22, %v7472_v40  ;;  %v16319_v42 = vpack.c.bf16 %v7490_v41, %v7474_v28  ;;  %v11909_v41 = vld [vmem:[%s12836_s27 + $0x48] sm:$0xff]  }
0x199c   : > { %v16321_v27 = vpack.c.bf16 %v7489_v20, %v7473_v61  ;;  %v16323_v16 = vpack.c.bf16 %v7491_v47, %v7475_v43  ;;  %v6612_v57 = vpop.f32.mrb[164].mxu0  ;;  %v6725_v54 = vpop.f32.mrb[164].mxu1  ;;  %v11911_v61 = vld [vmem:[%s12836_s27 + $0xc8] sm:$0xff]  }
0x199d   : > { %v6613_v14 = vadd.f32 %v6612_v57, %v16287_v2  ;;  %v6726_v6 = vadd.f32 %v6725_v54, %v16291_v5  ;;  %v6614_v24 = vpop.f32.mrb[165].mxu0  ;;  %v6727_v58 = vpop.f32.mrb[165].mxu1 }
0x199e   : > { %v6615_v7 = vadd.f32 %v6614_v24, %v16295_v55  ;;  %v6728_v11 = vadd.f32 %v6727_v58, %v16299_v25  ;;  %v6616_v30 = vpop.f32.mrb[166].mxu0  ;;  %v6729_v3 = vpop.f32.mrb[166].mxu1 }
0x199f   : > { %v6617_v45 = vadd.f32 %v6616_v30, %v16287_v2  ;;  %v6730_v50 = vadd.f32 %v6729_v3, %v16291_v5  ;;  %v6618_v26 = vpop.f32.mrb[167].mxu0  ;;  %v6731_v40 = vpop.f32.mrb[167].mxu1  ;;  %v7504_v43 = vmax.f32 %v6613_v14, 0.0  ;;  %v7506_v20 = vmax.f32 %v6726_v6, 0.0  ;;  %v11910_v3 = vld [vmem:[%s12836_s27 + $0x8] sm:$0xff]  }
0x19a0   : > { %v6619_v28 = vadd.f32 %v6618_v26, %v16295_v55  ;;  %v6732_v22 = vadd.f32 %v6731_v40, %v16299_v25  ;;  %10150 = vmatmul.mubr.msk.bf16.vlgmr.msra.gmra.mrb[0].mxu0 %vm1116_vm2, %v15993_v21  ;;  %10158 = vmatmul.mubr.msk.bf16.vlgmr.msra.gmra.mrb[0].mxu1 %vm1116_vm2, %v15993_v21  ;;  %v7505_v54 = vmax.f32 %v6615_v7, 0.0  ;;  %v7507_v24 = vmax.f32 %v6728_v11, 0.0  ;;  %v11912_v26 = vld [vmem:[%s12836_s27 + $0x88] sm:$0xff]  }
0x19a1   : > { %v7520_v47 = vmax.f32 %v6617_v45, 0.0  ;;  %v7522_v57 = vmax.f32 %v6730_v50, 0.0  ;;  %10626 = vmatpush3.bf16.msra.mxu0 %v11906_v15  ;;  %10690 = vmatpush3.bf16.msra.mxu1 %v11908_v29  ;;  %v11913_v45 = vld [vmem:[%s12836_s27 + $0x50] sm:$0xff]  }
0x19a2   : > { %v7521_v58 = vmax.f32 %v6619_v28, 0.0  ;;  %v7523_v30 = vmax.f32 %v6732_v22, 0.0  ;;  %7288 = vmatprep.mubr.bf16.mxu0 %v17761_v44  ;;  %7401 = vmatprep.mubr.bf16.mxu1 %v17761_v44  ;;  %v11915_v50 = vld [vmem:[%s12836_s27 + $0xd0] sm:$0xff]  }
0x19a3   : > { %v16343_v14 = vpack.c.bf16 %v7520_v47, %v7504_v43  ;;  %v16345_v6 = vpack.c.bf16 %v7522_v57, %v7506_v20  ;;  %10627 = vmatprep.subr.bf16.mxu0 %v11909_v41  ;;  %10691 = vmatprep.subr.bf16.mxu1 %v11911_v61 }
0x19a4   : > { %v16351_v40 = vpack.c.bf16 %v7521_v58, %v7505_v54  ;;  %v16353_v21 = vpack.c.bf16 %v7523_v30, %v7507_v24  ;;  %v6622_v7 = vpop.f32.mrb[168].mxu0  ;;  %v6735_v11 = vpop.f32.mrb[168].mxu1  ;;  %v11914_v58 = vld [vmem:[%s12836_s27 + $0x10] sm:$0xff]  }
0x19a5   : > { %v6623_v15 = vadd.f32 %v6622_v7, %v16287_v2  ;;  %v6736_v29 = vadd.f32 %v6735_v11, %v16291_v5  ;;  %v6624_v28 = vpop.f32.mrb[169].mxu0  ;;  %v6737_v22 = vpop.f32.mrb[169].mxu1  ;;  %10628 = vmatpush3.bf16.msra.mxu0 %v11910_v3  ;;  %10692 = vmatpush3.bf16.msra.mxu1 %v11912_v26  ;;  %v11916_v30 = vld [vmem:[%s12836_s27 + $0x90] sm:$0xff]  }
0x19a6   : > { %v6625_v43 = vadd.f32 %v6624_v28, %v16295_v55  ;;  %v6738_v20 = vadd.f32 %v6737_v22, %v16299_v25  ;;  %v6626_v47 = vpop.f32.mrb[170].mxu0  ;;  %v6739_v57 = vpop.f32.mrb[170].mxu1  ;;  %10629 = vmatprep.subr.bf16.mxu0 %v11913_v45  ;;  %10693 = vmatprep.subr.bf16.mxu1 %v11915_v50  ;;  %v11917_v28 = vld [vmem:[%s12836_s27 + $0x58] sm:$0xff]  }
0x19a7   : > { %v6627_v41 = vadd.f32 %v6626_v47, %v16287_v2  ;;  %v6740_v61 = vadd.f32 %v6739_v57, %v16291_v5  ;;  %v6628_v54 = vpop.f32.mrb[171].mxu0  ;;  %v6741_v24 = vpop.f32.mrb[171].mxu1  ;;  %v11919_v22 = vld [vmem:[%s12836_s27 + $0xd8] sm:$0xff]   ;;  %v7536_v44 = vmax.f32 %v6623_v15, 0.0  ;;  %v7538_v3 = vmax.f32 %v6736_v29, 0.0 }
0x19a8   : > { %v6629_v7 = vadd.f32 %v6628_v54, %v16295_v55  ;;  %v6742_v11 = vadd.f32 %v6741_v24, %v16299_v25  ;;  %10151 = vmatmul.mubr.msk.bf16.gmra.mrb[4].mxu0 %vm1116_vm2, %v16026_v32  ;;  %10159 = vmatmul.mubr.msk.bf16.gmra.mrb[4].mxu1 %vm1116_vm2, %v16026_v32  ;;  %v7537_v45 = vmax.f32 %v6625_v43, 0.0  ;;  %v7539_v50 = vmax.f32 %v6738_v20, 0.0 }
0x19a9   : > { %v7552_v26 = vmax.f32 %v6627_v41, 0.0  ;;  %v7554_v47 = vmax.f32 %v6740_v61, 0.0  ;;  %v18020_v24 = vmov 0   ;;  %10630 = vmatpush3.bf16.msra.mxu0 %v11914_v58  ;;  %10694 = vmatpush3.bf16.msra.mxu1 %v11916_v30  ;;  %v11918_v41 = vld [vmem:[%s12836_s27 + $0x18] sm:$0xff]  }
0x19aa   : > { %v7553_v57 = vmax.f32 %v6629_v7, 0.0  ;;  %v7555_v54 = vmax.f32 %v6742_v11, 0.0  ;;  %7298 = vmatprep.mubr.bf16.mxu0 %v18020_v24  ;;  %7411 = vmatprep.mubr.bf16.mxu1 %v18020_v24  ;;  %v11920_v61 = vld [vmem:[%s12836_s27 + $0x98] sm:$0xff]   ;;  %v11921_v7 = vld [vmem:[%s12836_s27 + $0x60] sm:$0xff]  }
0x19ab   : > { %v16373_v15 = vpack.c.bf16 %v7552_v26, %v7536_v44  ;;  %v16375_v29 = vpack.c.bf16 %v7554_v47, %v7538_v3  ;;  %10631 = vmatprep.subr.bf16.mxu0 %v11917_v28  ;;  %10695 = vmatprep.subr.bf16.mxu1 %v11919_v22  ;;  %v11923_v11 = vld [vmem:[%s12836_s27 + $0xe0] sm:$0xff]  }
0x19ac   : > { %v16379_v51 = vpack.c.bf16 %v7553_v57, %v7537_v45  ;;  %v16381_v32 = vpack.c.bf16 %v7555_v54, %v7539_v50  ;;  %v6632_v43 = vpop.f32.mrb[172].mxu0  ;;  %v6745_v20 = vpop.f32.mrb[172].mxu1 }
0x19ad   : > { %v6633_v44 = vadd.f32 %v6632_v43, %v16287_v2  ;;  %v6746_v3 = vadd.f32 %v6745_v20, %v16291_v5  ;;  %v6634_v58 = vpop.f32.mrb[173].mxu0  ;;  %v6747_v30 = vpop.f32.mrb[173].mxu1  ;;  %10632 = vmatpush3.bf16.msra.mxu0 %v11918_v41  ;;  %10696 = vmatpush3.bf16.msra.mxu1 %v11920_v61  ;;  %v11922_v43 = vld [vmem:[%s12836_s27 + $0x20] sm:$0xff]  }
0x19ae   : > { %v6635_v26 = vadd.f32 %v6634_v58, %v16295_v55  ;;  %v6748_v47 = vadd.f32 %v6747_v30, %v16299_v25  ;;  %v6636_v45 = vpop.f32.mrb[174].mxu0  ;;  %v6749_v50 = vpop.f32.mrb[174].mxu1  ;;  %v11924_v20 = vld [vmem:[%s12836_s27 + $0xa0] sm:$0xff]   ;;  %10633 = vmatprep.subr.bf16.mxu0 %v11921_v7  ;;  %10697 = vmatprep.subr.bf16.mxu1 %v11923_v11  ;;  %v11925_v30 = vld [vmem:[%s12836_s27 + $0x68] sm:$0xff]  }
0x19af   : > { %v6637_v28 = vadd.f32 %v6636_v45, %v16287_v2  ;;  %v6750_v22 = vadd.f32 %v6749_v50, %v16291_v5  ;;  %v6638_v57 = vpop.f32.mrb[175].mxu0  ;;  %v6751_v54 = vpop.f32.mrb[175].mxu1  ;;  %v7568_v53 = vmax.f32 %v6633_v44, 0.0  ;;  %v7570_v18 = vmax.f32 %v6746_v3, 0.0 }
0x19b0   : > { %v6639_v46 = vadd.f32 %v6638_v57, %v16295_v55  ;;  %v6752_v58 = vadd.f32 %v6751_v54, %v16299_v25  ;;  %10152 = vmatmul.mubr.msk.bf16.gmra.mrb[8].mxu0 %vm1116_vm2, %v16052_v48  ;;  %10160 = vmatmul.mubr.msk.bf16.gmra.mrb[8].mxu1 %vm1116_vm2, %v16052_v48  ;;  %v7569_v41 = vmax.f32 %v6635_v26, 0.0  ;;  %v7571_v61 = vmax.f32 %v6748_v47, 0.0  ;;  %v11926_v48 = vld [vmem:[%s12836_s27 + $0x28] sm:$0xff]   ;;  %v11933_v57 = vld [vmem:[%s12836_s27 + $0x78] sm:$0xff]  }
0x19b1   : > { %v7584_v45 = vmax.f32 %v6637_v28, 0.0  ;;  %v7586_v50 = vmax.f32 %v6750_v22, 0.0  ;;  %7308 = vmatprep.mubr.bf16.mxu0 %v18020_v24  ;;  %7421 = vmatprep.mubr.bf16.mxu1 %v18020_v24  ;;  %v11928_v26 = vld [vmem:[%s12836_s27 + $0xa8] sm:$0xff]   ;;  %v11929_v28 = vld [vmem:[%s12836_s27 + $0x70] sm:$0xff]   ;;  %v11935_v54 = vld [vmem:[%s12836_s27 + $0xf8] sm:$0xff]  }
0x19b2   : > { %v7585_v7 = vmax.f32 %v6639_v46, 0.0  ;;  %v7587_v11 = vmax.f32 %v6752_v58, 0.0  ;;  %10634 = vmatpush3.bf16.msra.mxu0 %v11922_v43  ;;  %10698 = vmatpush3.bf16.msra.mxu1 %v11924_v20  ;;  %v11931_v22 = vld [vmem:[%s12836_s27 + $0xf0] sm:$0xff]   ;;  %v11936_v43 = vld [vmem:[%s12836_s27 + $0xb8] sm:$0xff]   ;;  %v11937_v20 = vld [vmem:[%s12836_s27 + $0x140] sm:$0xff]  }
0x19b3   : > { %v16403_v44 = vpack.c.bf16 %v7584_v45, %v7568_v53  ;;  %v16405_v3 = vpack.c.bf16 %v7586_v50, %v7570_v18  ;;  %10635 = vmatprep.subr.bf16.mxu0 %v11925_v30  ;;  %10699 = vmatprep.subr.bf16.mxu1 %v11927_v49  ;;  %v11930_v18 = vld [vmem:[%s12836_s27 + $0x30] sm:$0xff]   ;;  %v11934_v49 = vld [vmem:[%s12836_s27 + $0x38] sm:$0xff]   ;;  %v11939_v58 = vld [vmem:[%s12836_s27 + $0x1c0] sm:$0xff]  }
0x19b4   : > { %v16409_v47 = vpack.c.bf16 %v7585_v7, %v7569_v41  ;;  %v16411_v46 = vpack.c.bf16 %v7587_v11, %v7571_v61  ;;  %v11932_v53 = vld [vmem:[%s12836_s27 + $0xb0] sm:$0xff]  }
0x19b6   : > { %10636 = vmatpush3.bf16.msra.mxu0 %v11926_v48  ;;  %10700 = vmatpush3.bf16.msra.mxu1 %v11928_v26 }
0x19b7   : > { %10637 = vmatprep.subr.bf16.mxu0 %v11929_v28  ;;  %10701 = vmatprep.subr.bf16.mxu1 %v11931_v22 }
0x19b8   : > { %10153 = vmatmul.mubr.msk.bf16.gmra.mrb[12].mxu0 %vm1116_vm2, %v16070_v9  ;;  %10161 = vmatmul.mubr.msk.bf16.gmra.mrb[12].mxu1 %vm1116_vm2, %v16070_v9 }
0x19b9   : > { %7318 = vmatprep.mubr.bf16.mxu0 %v18020_v24  ;;  %7431 = vmatprep.mubr.bf16.mxu1 %v18020_v24 }
0x19ba   : > { %10638 = vmatpush3.bf16.msra.mxu0 %v11930_v18  ;;  %10702 = vmatpush3.bf16.msra.mxu1 %v11932_v53 }
0x19bb   : > { %10639 = vmatprep.subr.bf16.mxu0 %v11933_v57  ;;  %10703 = vmatprep.subr.bf16.mxu1 %v11935_v54 }
0x19be   : > { %10640 = vmatpush3.bf16.msra.mxu0 %v11934_v49  ;;  %10704 = vmatpush3.bf16.msra.mxu1 %v11936_v43 }
0x19bf   : > { %10753 = vmatprep.subr.bf16.mxu0 %v11937_v20  ;;  %10817 = vmatprep.subr.bf16.mxu1 %v11939_v58 }
0x19c0   : > { %10154 = vmatmul.mubr.msk.bf16.gmra.mrb[16].mxu0 %vm1116_vm2, %v16092_v23  ;;  %10162 = vmatmul.mubr.msk.bf16.gmra.mrb[16].mxu1 %vm1116_vm2, %v16092_v23 }
0x19c1   : > { %7328 = vmatprep.mubr.bf16.mxu0 %v18020_v24  ;;  %7441 = vmatprep.mubr.bf16.mxu1 %v18020_v24 }
0x19c8   : > { %10155 = vmatmul.mubr.msk.bf16.gmra.mrb[20].mxu0 %vm1116_vm2, %v16110_v13  ;;  %10163 = vmatmul.mubr.msk.bf16.gmra.mrb[20].mxu1 %vm1116_vm2, %v16110_v13 }
0x19c9   : > { %7338 = vmatprep.mubr.bf16.mxu0 %v18020_v24  ;;  %7451 = vmatprep.mubr.bf16.mxu1 %v18020_v24 }
0x19d0   : > { %v6642_v9 = vpop.f32.mrb[176].mxu0  ;;  %v6755_v30 = vpop.f32.mrb[176].mxu1  ;;  %10156 = vmatmul.mubr.msk.bf16.gmra.mrb[24].mxu0 %vm1116_vm2, %v16132_v63  ;;  %10164 = vmatmul.mubr.msk.bf16.gmra.mrb[24].mxu1 %vm1116_vm2, %v16132_v63 }
0x19d1   : > { %v6643_v45 = vadd.f32 %v6642_v9, %v16287_v2  ;;  %v6756_v23 = vadd.f32 %v6755_v30, %v16291_v5  ;;  %v6644_v50 = vpop.f32.mrb[177].mxu0  ;;  %v6757_v41 = vpop.f32.mrb[177].mxu1  ;;  %7348 = vmatprep.mubr.bf16.mxu0 %v18020_v24  ;;  %7461 = vmatprep.mubr.bf16.mxu1 %v18020_v24 }
0x19d2   : > { %v6645_v13 = vadd.f32 %v6644_v50, %v16295_v55  ;;  %v6758_v61 = vadd.f32 %v6757_v41, %v16299_v25  ;;  %v6646_v7 = vpop.f32.mrb[178].mxu0  ;;  %v6759_v11 = vpop.f32.mrb[178].mxu1 }
0x19d3   : > { %v6647_v48 = vadd.f32 %v6646_v7, %v16287_v2  ;;  %v6760_v26 = vadd.f32 %v6759_v11, %v16291_v5  ;;  %v6648_v28 = vpop.f32.mrb[179].mxu0  ;;  %v6761_v22 = vpop.f32.mrb[179].mxu1  ;;  %v7600_v53 = vmax.f32 %v6643_v45, 0.0  ;;  %v7602_v57 = vmax.f32 %v6756_v23, 0.0 }
0x19d4   : > { %v6649_v63 = vadd.f32 %v6648_v28, %v16295_v55  ;;  %v6762_v18 = vadd.f32 %v6761_v22, %v16299_v25  ;;  %v7601_v43 = vmax.f32 %v6645_v13, 0.0  ;;  %v7603_v20 = vmax.f32 %v6758_v61, 0.0 }
0x19d5   : > { %v7616_v54 = vmax.f32 %v6647_v48, 0.0  ;;  %v7618_v49 = vmax.f32 %v6760_v26, 0.0 }
0x19d6   : > { %v7617_v58 = vmax.f32 %v6649_v63, 0.0  ;;  %v7619_v9 = vmax.f32 %v6762_v18, 0.0 }
0x19d7   : > { %v16455_v30 = vpack.c.bf16 %v7616_v54, %v7600_v53  ;;  %v16457_v24 = vpack.c.bf16 %v7618_v49, %v7602_v57 }
0x19d8   : > { %v16459_v50 = vpack.c.bf16 %v7617_v58, %v7601_v43  ;;  %v16461_v41 = vpack.c.bf16 %v7619_v9, %v7603_v20  ;;  %v6652_v7 = vpop.f32.mrb[180].mxu0  ;;  %v6765_v11 = vpop.f32.mrb[180].mxu1  ;;  %10157 = vmatmul.mubr.msk.bf16.gmra.mrb[28].mxu0 %vm1116_vm2, %v16150_v60  ;;  %10165 = vmatmul.mubr.msk.bf16.gmra.mrb[28].mxu1 %vm1116_vm2, %v16150_v60 }
0x19d9   : > { %v6653_v28 = vadd.f32 %v6652_v7, %v16287_v2  ;;  %v6766_v45 = vadd.f32 %v6765_v11, %v16291_v5  ;;  %v6654_v23 = vpop.f32.mrb[181].mxu0  ;;  %v6767_v13 = vpop.f32.mrb[181].mxu1  ;;  %8660 = vmatprep.mubr.bf16.mxu0 %v16321_v27  ;;  %8757 = vmatprep.mubr.bf16.mxu1 %v16323_v16  ;;  %v11938_v11 = vld [vmem:[%s12836_s27 + $0x100] sm:$0xff]  }
0x19da   : > { %v6655_v61 = vadd.f32 %v6654_v23, %v16295_v55  ;;  %v6768_v48 = vadd.f32 %v6767_v13, %v16299_v25  ;;  %v6656_v26 = vpop.f32.mrb[182].mxu0  ;;  %v6769_v22 = vpop.f32.mrb[182].mxu1 }
0x19db   : > { %v6657_v63 = vadd.f32 %v6656_v26, %v16287_v2  ;;  %v6770_v18 = vadd.f32 %v6769_v22, %v16291_v5  ;;  %v6658_v53 = vpop.f32.mrb[183].mxu0  ;;  %v6771_v60 = vpop.f32.mrb[183].mxu1  ;;  %v7632_v49 = vmax.f32 %v6653_v28, 0.0  ;;  %v7634_v27 = vmax.f32 %v6766_v45, 0.0  ;;  %v11940_v26 = vld [vmem:[%s12836_s27 + $0x180] sm:$0xff]   ;;  %v11941_v28 = vld [vmem:[%s12836_s27 + $0x148] sm:$0xff]  }
0x19dc   : > { %v6659_v57 = vadd.f32 %v6658_v53, %v16295_v55  ;;  %v6772_v54 = vadd.f32 %v6771_v60, %v16299_v25  ;;  %v7633_v20 = vmax.f32 %v6655_v61, 0.0  ;;  %v7635_v58 = vmax.f32 %v6768_v48, 0.0  ;;  %v11943_v45 = vld [vmem:[%s12836_s27 + $0x1c8] sm:$0xff]  }
0x19dd   : > { %v7648_v43 = vmax.f32 %v6657_v63, 0.0  ;;  %v7650_v16 = vmax.f32 %v6770_v18, 0.0  ;;  %v11942_v61 = vld [vmem:[%s12836_s27 + $0x108] sm:$0xff]   ;;  %v11945_v63 = vld [vmem:[%s12836_s27 + $0x150] sm:$0xff]  }
0x19de   : > { %v7649_v9 = vmax.f32 %v6659_v57, 0.0  ;;  %v7651_v7 = vmax.f32 %v6772_v54, 0.0  ;;  %v11944_v48 = vld [vmem:[%s12836_s27 + $0x188] sm:$0xff]   ;;  %v11947_v57 = vld [vmem:[%s12836_s27 + $0x1d0] sm:$0xff]  }
0x19df   : > { %v16478_v23 = vpack.c.bf16 %v7648_v43, %v7632_v49  ;;  %v16480_v13 = vpack.c.bf16 %v7650_v16, %v7634_v27 }
0x19e0   : > { %v16483_v22 = vpack.c.bf16 %v7649_v9, %v7633_v20  ;;  %v16485_v53 = vpack.c.bf16 %v7651_v7, %v7635_v58  ;;  %8661 = vmatmul.mubr.bf16.vlgmr.msra.gmra.mrb[32].mxu0 %v16317_v62  ;;  %8758 = vmatmul.mubr.bf16.vlgmr.msra.gmra.mrb[32].mxu1 %v16319_v42  ;;  %v11946_v7 = vld [vmem:[%s12836_s27 + $0x110] sm:$0xff]  }
0x19e1   : > { %10754 = vmatpush3.bf16.msra.mxu0 %v11938_v11  ;;  %8668 = vmatprep.mubr.bf16.mxu0 %v16351_v40  ;;  %v11948_v11 = vld [vmem:[%s12836_s27 + $0x190] sm:$0xff]  }
0x19e2   : > { %8765 = vmatprep.mubr.bf16.mxu1 %v16353_v21  ;;  %10818 = vmatpush3.bf16.msra.mxu1 %v11940_v26 }
0x19e3   : > { %v6662_v18 = vpop.f32.mrb[184].mxu0  ;;  %v6775_v60 = vpop.f32.mrb[184].mxu1  ;;  %10755 = vmatprep.subr.bf16.mxu0 %v11941_v28  ;;  %10819 = vmatprep.subr.bf16.mxu1 %v11943_v45  ;;  %v16508_v45 = vsub.s32 6, %v18011_v31 }
0x19e4   : > { %v6663_v54 = vadd.f32 %v6662_v18, %v16287_v2  ;;  %v6776_v62 = vadd.f32 %v6775_v60, %v16291_v5  ;;  %v6664_v42 = vpop.f32.mrb[185].mxu0  ;;  %v6777_v49 = vpop.f32.mrb[185].mxu1  ;;  %v11949_v18 = vld [vmem:[%s12836_s27 + $0x158] sm:$0xff]  }
0x19e5   : > { %v6665_v40 = vadd.f32 %v6664_v42, %v16295_v55  ;;  %v6778_v21 = vadd.f32 %v6777_v49, %v16299_v25  ;;  %v6666_v27 = vpop.f32.mrb[186].mxu0  ;;  %v6779_v43 = vpop.f32.mrb[186].mxu1  ;;  %10756 = vmatpush3.bf16.msra.mxu0 %v11942_v61  ;;  %v11951_v61 = vld [vmem:[%s12836_s27 + $0x1d8] sm:$0xff]  }
0x19e6   : > { %v6667_v16 = vadd.f32 %v6666_v27, %v16287_v2  ;;  %v6780_v20 = vadd.f32 %v6779_v43, %v16291_v5  ;;  %v6668_v58 = vpop.f32.mrb[187].mxu0  ;;  %v6781_v9 = vpop.f32.mrb[187].mxu1  ;;  %10820 = vmatpush3.bf16.msra.mxu1 %v11944_v48  ;;  %10757 = vmatprep.subr.bf16.mxu0 %v11945_v63  ;;  %v7664_v60 = vmax.f32 %v6663_v54, 0.0  ;;  %v7666_v42 = vmax.f32 %v6776_v62, 0.0  ;;  %v11950_v62 = vld [vmem:[%s12836_s27 + $0x118] sm:$0xff]  }
0x19e7   : > { %v6669_v26 = vadd.f32 %v6668_v58, %v16295_v55  ;;  %v6782_v28 = vadd.f32 %v6781_v9, %v16299_v25  ;;  %10821 = vmatprep.subr.bf16.mxu1 %v11947_v57  ;;  %v7665_v48 = vmax.f32 %v6665_v40, 0.0  ;;  %v7667_v63 = vmax.f32 %v6778_v21, 0.0 }
0x19e8   : > { %v7680_v49 = vmax.f32 %v6667_v16, 0.0  ;;  %v7682_v27 = vmax.f32 %v6780_v20, 0.0  ;;  %8669 = vmatmul.mubr.bf16.gmra.mrb[36].mxu0 %v16343_v14  ;;  %8766 = vmatmul.mubr.bf16.gmra.mrb[36].mxu1 %v16345_v6  ;;  %v11952_v14 = vld [vmem:[%s12836_s27 + $0x198] sm:$0xff]   ;;  %v16527_v20 = vsub.s32 7, %v18011_v31  ;;  %v16537_v31 = vrot.slane %v16279_v34, %v15963_v39 }
0x19e9   : > { %v7681_v43 = vmax.f32 %v6669_v26, 0.0  ;;  %v7683_v58 = vmax.f32 %v6782_v28, 0.0  ;;  %8676 = vmatprep.mubr.bf16.mxu0 %v16379_v51  ;;  %8773 = vmatprep.mubr.bf16.mxu1 %v16381_v32  ;;  %v11953_v51 = vld [vmem:[%s12836_s27 + $0x160] sm:$0xff]  }
0x19ea   : > { %v16516_v57 = vpack.c.bf16 %v7680_v49, %v7664_v60  ;;  %v16518_v54 = vpack.c.bf16 %v7682_v27, %v7666_v42  ;;  %10758 = vmatpush3.bf16.msra.mxu0 %v11946_v7  ;;  %10822 = vmatpush3.bf16.msra.mxu1 %v11948_v11  ;;  %v11955_v32 = vld [vmem:[%s12836_s27 + $0x1e0] sm:$0xff]  }
0x19eb   : > { %v16522_v16 = vpack.c.bf16 %v7681_v43, %v7665_v48  ;;  %v16524_v6 = vpack.c.bf16 %v7683_v58, %v7667_v63  ;;  %v6672_v40 = vpop.f32.mrb[188].mxu0  ;;  %v6785_v21 = vpop.f32.mrb[188].mxu1  ;;  %10759 = vmatprep.subr.bf16.mxu0 %v11949_v18  ;;  %10823 = vmatprep.subr.bf16.mxu1 %v11951_v61  ;;  %v16541_v18 = vrot.slane %v16279_v34, %v16508_v45  ;;  %v11954_v58 = vld [vmem:[%s12836_s27 + $0x120] sm:$0xff]  }
0x19ec   : > { %v6673_v9 = vadd.f32 %v6672_v40, %v16287_v2  ;;  %v6786_v7 = vadd.f32 %v6785_v21, %v16291_v5  ;;  %v6674_v11 = vpop.f32.mrb[189].mxu0  ;;  %v6787_v26 = vpop.f32.mrb[189].mxu1  ;;  %v16547_v43 = vrot.slane %v16279_v34, %v15970_v8  ;;  %v11956_v40 = vld [vmem:[%s12836_s27 + $0x1a0] sm:$0xff]  }
0x19ed   : > { %v6675_v28 = vadd.f32 %v6674_v11, %v16295_v55  ;;  %v6788_v60 = vadd.f32 %v6787_v26, %v16299_v25  ;;  %v6676_v42 = vpop.f32.mrb[190].mxu0  ;;  %v6789_v49 = vpop.f32.mrb[190].mxu1  ;;  %v16555_v26 = vrot.slane %v16279_v34, %v16527_v20 }
0x19ee   : > { %v6677_v61 = vadd.f32 %v6676_v42, %v16287_v2  ;;  %v6790_v27 = vadd.f32 %v6789_v49, %v16291_v5  ;;  %v6678_v48 = vpop.f32.mrb[191].mxu0  ;;  %v6791_v63 = vpop.f32.mrb[191].mxu1  ;;  %10760 = vmatpush3.bf16.msra.mxu0 %v11950_v62  ;;  %10824 = vmatpush3.bf16.msra.mxu1 %v11952_v14  ;;  %v11957_v2 = vld [vmem:[%s12836_s27 + $0x168] sm:$0xff]   ;;  %v7696_v42 = vmax.f32 %v6673_v9, 0.0  ;;  %v7698_v49 = vmax.f32 %v6786_v7, 0.0 }
0x19ef   : > { %v6679_v21 = vadd.f32 %v6678_v48, %v16295_v55  ;;  %v6792_v11 = vadd.f32 %v6791_v63, %v16299_v25  ;;  %10761 = vmatprep.subr.bf16.mxu0 %v11953_v51  ;;  %10825 = vmatprep.subr.bf16.mxu1 %v11955_v32  ;;  %v11959_v5 = vld [vmem:[%s12836_s27 + $0x1e8] sm:$0xff]   ;;  %v7697_v55 = vmax.f32 %v6675_v28, 0.0  ;;  %v7699_v25 = vmax.f32 %v6788_v60, 0.0 }
0x19f0   : > { %v7712_v62 = vmax.f32 %v6677_v61, 0.0  ;;  %v7714_v14 = vmax.f32 %v6790_v27, 0.0  ;;  %8677 = vmatmul.mubr.bf16.gmra.mrb[40].mxu0 %v16373_v15  ;;  %8774 = vmatmul.mubr.bf16.gmra.mrb[40].mxu1 %v16375_v29  ;;  %v11958_v9 = vld [vmem:[%s12836_s27 + $0x128] sm:$0xff]   ;;  %v11961_v61 = vld [vmem:[%s12836_s27 + $0x170] sm:$0xff]  }
0x19f1   : > { %v7713_v48 = vmax.f32 %v6679_v21, 0.0  ;;  %v7715_v34 = vmax.f32 %v6792_v11, 0.0  ;;  %8684 = vmatprep.mubr.bf16.mxu0 %v16409_v47  ;;  %8781 = vmatprep.mubr.bf16.mxu1 %v16411_v46  ;;  %v11960_v15 = vld [vmem:[%s12836_s27 + $0x1a8] sm:$0xff]   ;;  %v11963_v47 = vld [vmem:[%s12836_s27 + $0x1f0] sm:$0xff]  }
0x19f2   : > { %v16563_v51 = vpack.c.bf16 %v7712_v62, %v7696_v42  ;;  %v16565_v32 = vpack.c.bf16 %v7714_v14, %v7698_v49  ;;  %10762 = vmatpush3.bf16.msra.mxu0 %v11954_v58  ;;  %10826 = vmatpush3.bf16.msra.mxu1 %v11956_v40  ;;  %v11962_v14 = vld [vmem:[%s12836_s27 + $0x130] sm:$0xff]  }
0x19f3   : > { %v16569_v7 = vpack.c.bf16 %v7713_v48, %v7697_v55  ;;  %v16571_v29 = vpack.c.bf16 %v7715_v34, %v7699_v25  ;;  %v6828_v28 = vpop.f32.mrb[192].mxu0  ;;  %v6941_v60 = vpop.f32.mrb[192].mxu1  ;;  %10763 = vmatprep.subr.bf16.mxu0 %v11957_v2  ;;  %10827 = vmatprep.subr.bf16.mxu1 %v11959_v5  ;;  %v11964_v55 = vld [vmem:[%s12836_s27 + $0x1b0] sm:$0xff]   ;;  %v11965_v34 = vld [vmem:[%s12836_s27 + $0x178] sm:$0xff]  }
0x19f4   : > { %v6829_v46 = vadd.f32 %v6828_v28, %v16537_v31  ;;  %v6942_v27 = vadd.f32 %v6941_v60, %v16541_v18  ;;  %v6830_v63 = vpop.f32.mrb[193].mxu0  ;;  %v6943_v58 = vpop.f32.mrb[193].mxu1  ;;  %v11967_v28 = vld [vmem:[%s12836_s27 + $0x1f8] sm:$0xff]  }
0x19f5   : > { %v6831_v40 = vadd.f32 %v6830_v63, %v16547_v43  ;;  %v6944_v21 = vadd.f32 %v6943_v58, %v16555_v26  ;;  %v6832_v11 = vpop.f32.mrb[194].mxu0  ;;  %v6945_v42 = vpop.f32.mrb[194].mxu1 }
0x19f6   : > { %v6833_v2 = vadd.f32 %v6832_v11, %v16537_v31  ;;  %v6946_v5 = vadd.f32 %v6945_v42, %v16541_v18  ;;  %v6834_v49 = vpop.f32.mrb[195].mxu0  ;;  %v6947_v62 = vpop.f32.mrb[195].mxu1  ;;  %10764 = vmatpush3.bf16.msra.mxu0 %v11958_v9  ;;  %10828 = vmatpush3.bf16.msra.mxu1 %v11960_v15  ;;  %v7476_v60 = vmax.f32 %v6829_v46, 0.0  ;;  %v7478_v63 = vmax.f32 %v6942_v27, 0.0  ;;  %v11966_v46 = vld [vmem:[%s12836_s27 + $0x138] sm:$0xff]  }
0x19f7   : > { %v6835_v25 = vadd.f32 %v6834_v49, %v16547_v43  ;;  %v6948_v48 = vadd.f32 %v6947_v62, %v16555_v26  ;;  %10765 = vmatprep.subr.bf16.mxu0 %v11961_v61  ;;  %10829 = vmatprep.subr.bf16.mxu1 %v11963_v47  ;;  %v7477_v9 = vmax.f32 %v6831_v40, 0.0  ;;  %v7479_v15 = vmax.f32 %v6944_v21, 0.0 }
0x19f8   : > { %v7492_v58 = vmax.f32 %v6833_v2, 0.0  ;;  %v7494_v11 = vmax.f32 %v6946_v5, 0.0  ;;  %8685 = vmatmul.mubr.bf16.gmra.mrb[44].mxu0 %v16403_v44  ;;  %8782 = vmatmul.mubr.bf16.gmra.mrb[44].mxu1 %v16405_v3  ;;  %v11968_v44 = vld [vmem:[%s12836_s27 + $0x1b8] sm:$0xff]   ;;  %v11969_v2 = vld [vmem:[%s12836_s27 + $0x240] sm:$0xff]  }
0x19f9   : > { %v7493_v42 = vmax.f32 %v6835_v25, 0.0  ;;  %v7495_v49 = vmax.f32 %v6948_v48, 0.0  ;;  %8692 = vmatprep.mubr.bf16.mxu0 %v16459_v50  ;;  %8789 = vmatprep.mubr.bf16.mxu1 %v16461_v41  ;;  %v11971_v50 = vld [vmem:[%s12836_s27 + $0x2c0] sm:$0xff]  }
0x19fa   : > { %v16591_v61 = vpack.c.bf16 %v7492_v58, %v7476_v60  ;;  %v16593_v47 = vpack.c.bf16 %v7494_v11, %v7478_v63  ;;  %10766 = vmatpush3.bf16.msra.mxu0 %v11962_v14  ;;  %10830 = vmatpush3.bf16.msra.mxu1 %v11964_v55 }
0x19fb   : > { %v16597_v27 = vpack.c.bf16 %v7493_v42, %v7477_v9  ;;  %v16599_v3 = vpack.c.bf16 %v7495_v49, %v7479_v15  ;;  %v6838_v40 = vpop.f32.mrb[196].mxu0  ;;  %v6951_v21 = vpop.f32.mrb[196].mxu1  ;;  %10767 = vmatprep.subr.bf16.mxu0 %v11965_v34  ;;  %10831 = vmatprep.subr.bf16.mxu1 %v11967_v28 }
0x19fc   : > { %v6839_v41 = vadd.f32 %v6838_v40, %v16537_v31  ;;  %v6952_v5 = vadd.f32 %v6951_v21, %v16541_v18  ;;  %v6840_v62 = vpop.f32.mrb[197].mxu0  ;;  %v6953_v25 = vpop.f32.mrb[197].mxu1 }
0x19fd   : > { %v6841_v14 = vadd.f32 %v6840_v62, %v16547_v43  ;;  %v6954_v55 = vadd.f32 %v6953_v25, %v16555_v26  ;;  %v6842_v48 = vpop.f32.mrb[198].mxu0  ;;  %v6955_v60 = vpop.f32.mrb[198].mxu1 }
0x19fe   : > { %v6843_v63 = vadd.f32 %v6842_v48, %v16537_v31  ;;  %v6956_v58 = vadd.f32 %v6955_v60, %v16541_v18  ;;  %v6844_v34 = vpop.f32.mrb[199].mxu0  ;;  %v6957_v28 = vpop.f32.mrb[199].mxu1  ;;  %10768 = vmatpush3.bf16.msra.mxu0 %v11966_v46  ;;  %10832 = vmatpush3.bf16.msra.mxu1 %v11968_v44  ;;  %v7508_v15 = vmax.f32 %v6839_v41, 0.0  ;;  %v7510_v42 = vmax.f32 %v6952_v5, 0.0 }
0x19ff   : > { %v6845_v11 = vadd.f32 %v6844_v34, %v16547_v43  ;;  %v6958_v9 = vadd.f32 %v6957_v28, %v16555_v26  ;;  %10881 = vmatprep.subr.bf16.mxu0 %v11969_v2  ;;  %10945 = vmatprep.subr.bf16.mxu1 %v11971_v50  ;;  %v7509_v21 = vmax.f32 %v6841_v14, 0.0  ;;  %v7511_v62 = vmax.f32 %v6954_v55, 0.0 }
0x1a00   : > { %v7524_v49 = vmax.f32 %v6843_v63, 0.0  ;;  %v7526_v40 = vmax.f32 %v6956_v58, 0.0  ;;  %8693 = vmatmul.mubr.bf16.gmra.mrb[48].mxu0 %v16455_v30  ;;  %8790 = vmatmul.mubr.bf16.gmra.mrb[48].mxu1 %v16457_v24 }
0x1a01   : > { %v7525_v25 = vmax.f32 %v6845_v11, 0.0  ;;  %v7527_v48 = vmax.f32 %v6958_v9, 0.0  ;;  %8700 = vmatprep.mubr.bf16.mxu0 %v16483_v22  ;;  %8797 = vmatprep.mubr.bf16.mxu1 %v16485_v53 }
0x1a02   : > { %v16615_v46 = vpack.c.bf16 %v7524_v49, %v7508_v15  ;;  %v16617_v44 = vpack.c.bf16 %v7526_v40, %v7510_v42 }
0x1a03   : > { %v16619_v2 = vpack.c.bf16 %v7525_v25, %v7509_v21  ;;  %v16621_v50 = vpack.c.bf16 %v7527_v48, %v7511_v62  ;;  %v6848_v41 = vpop.f32.mrb[200].mxu0  ;;  %v6961_v30 = vpop.f32.mrb[200].mxu1 }
0x1a04   : > { %v6849_v24 = vadd.f32 %v6848_v41, %v16537_v31  ;;  %v6962_v5 = vadd.f32 %v6961_v30, %v16541_v18  ;;  %v6850_v14 = vpop.f32.mrb[201].mxu0  ;;  %v6963_v55 = vpop.f32.mrb[201].mxu1 }
0x1a05   : > { %v6851_v22 = vadd.f32 %v6850_v14, %v16547_v43  ;;  %v6964_v53 = vadd.f32 %v6963_v55, %v16555_v26  ;;  %v6852_v60 = vpop.f32.mrb[202].mxu0  ;;  %v6965_v63 = vpop.f32.mrb[202].mxu1 }
0x1a06   : > { %v6853_v58 = vadd.f32 %v6852_v60, %v16537_v31  ;;  %v6966_v34 = vadd.f32 %v6965_v63, %v16541_v18  ;;  %v6854_v28 = vpop.f32.mrb[203].mxu0  ;;  %v6967_v11 = vpop.f32.mrb[203].mxu1  ;;  %v7540_v42 = vmax.f32 %v6849_v24, 0.0  ;;  %v7542_v49 = vmax.f32 %v6962_v5, 0.0 }
0x1a07   : > { %v6855_v9 = vadd.f32 %v6854_v28, %v16547_v43  ;;  %v6968_v15 = vadd.f32 %v6967_v11, %v16555_v26  ;;  %v7541_v62 = vmax.f32 %v6851_v22, 0.0  ;;  %v7543_v25 = vmax.f32 %v6964_v53, 0.0 }
0x1a08   : > { %v7556_v40 = vmax.f32 %v6853_v58, 0.0  ;;  %v7558_v21 = vmax.f32 %v6966_v34, 0.0  ;;  %8701 = vmatmul.mubr.bf16.gmra.mrb[52].mxu0 %v16478_v23  ;;  %8798 = vmatmul.mubr.bf16.gmra.mrb[52].mxu1 %v16480_v13 }
0x1a09   : > { %v7557_v48 = vmax.f32 %v6855_v9, 0.0  ;;  %v7559_v41 = vmax.f32 %v6968_v15, 0.0  ;;  %8708 = vmatprep.mubr.bf16.mxu0 %v16522_v16  ;;  %8805 = vmatprep.mubr.bf16.mxu1 %v16524_v6 }
0x1a0a   : > { %v16635_v30 = vpack.c.bf16 %v7556_v40, %v7540_v42  ;;  %v16637_v14 = vpack.c.bf16 %v7558_v21, %v7542_v49 }
0x1a0b   : > { %v16639_v24 = vpack.c.bf16 %v7557_v48, %v7541_v62  ;;  %v16641_v5 = vpack.c.bf16 %v7559_v41, %v7543_v25  ;;  %v6858_v55 = vpop.f32.mrb[204].mxu0  ;;  %v6971_v23 = vpop.f32.mrb[204].mxu1 }
0x1a0c   : > { %v6859_v13 = vadd.f32 %v6858_v55, %v16537_v31  ;;  %v6972_v22 = vadd.f32 %v6971_v23, %v16541_v18  ;;  %v6860_v53 = vpop.f32.mrb[205].mxu0  ;;  %v6973_v60 = vpop.f32.mrb[205].mxu1 }
0x1a0d   : > { %v6861_v16 = vadd.f32 %v6860_v53, %v16547_v43  ;;  %v6974_v6 = vadd.f32 %v6973_v60, %v16555_v26  ;;  %v6862_v63 = vpop.f32.mrb[206].mxu0  ;;  %v6975_v58 = vpop.f32.mrb[206].mxu1 }
0x1a0e   : > { %v6863_v34 = vadd.f32 %v6862_v63, %v16537_v31  ;;  %v6976_v28 = vadd.f32 %v6975_v58, %v16541_v18  ;;  %v6864_v11 = vpop.f32.mrb[207].mxu0  ;;  %v6977_v9 = vpop.f32.mrb[207].mxu1  ;;  %v7572_v49 = vmax.f32 %v6859_v13, 0.0  ;;  %v7574_v40 = vmax.f32 %v6972_v22, 0.0 }
0x1a0f   : > { %v6865_v15 = vadd.f32 %v6864_v11, %v16547_v43  ;;  %v6978_v42 = vadd.f32 %v6977_v9, %v16555_v26  ;;  %v7573_v25 = vmax.f32 %v6861_v16, 0.0  ;;  %v7575_v48 = vmax.f32 %v6974_v6, 0.0 }
0x1a10   : > { %v7588_v21 = vmax.f32 %v6863_v34, 0.0  ;;  %v7590_v62 = vmax.f32 %v6976_v28, 0.0  ;;  %8709 = vmatmul.mubr.bf16.gmra.mrb[56].mxu0 %v16516_v57  ;;  %8806 = vmatmul.mubr.bf16.gmra.mrb[56].mxu1 %v16518_v54 }
0x1a11   : > { %v7589_v41 = vmax.f32 %v6865_v15, 0.0  ;;  %v7591_v55 = vmax.f32 %v6978_v42, 0.0  ;;  %8716 = vmatprep.mubr.bf16.mxu0 %v16569_v7  ;;  %8813 = vmatprep.mubr.bf16.mxu1 %v16571_v29 }
0x1a12   : > { %v16655_v23 = vpack.c.bf16 %v7588_v21, %v7572_v49  ;;  %v16657_v53 = vpack.c.bf16 %v7590_v62, %v7574_v40 }
0x1a13   : > { %v16659_v13 = vpack.c.bf16 %v7589_v41, %v7573_v25  ;;  %v16661_v22 = vpack.c.bf16 %v7591_v55, %v7575_v48  ;;  %v6868_v60 = vpop.f32.mrb[208].mxu0  ;;  %v6981_v57 = vpop.f32.mrb[208].mxu1 }
0x1a14   : > { %v6869_v54 = vadd.f32 %v6868_v60, %v16537_v31  ;;  %v6982_v16 = vadd.f32 %v6981_v57, %v16541_v18  ;;  %v6870_v6 = vpop.f32.mrb[209].mxu0  ;;  %v6983_v63 = vpop.f32.mrb[209].mxu1 }
0x1a15   : > { %v6871_v7 = vadd.f32 %v6870_v6, %v16547_v43  ;;  %v6984_v29 = vadd.f32 %v6983_v63, %v16555_v26  ;;  %v6872_v58 = vpop.f32.mrb[210].mxu0  ;;  %v6985_v34 = vpop.f32.mrb[210].mxu1 }
0x1a16   : > { %v6873_v28 = vadd.f32 %v6872_v58, %v16537_v31  ;;  %v6986_v11 = vadd.f32 %v6985_v34, %v16541_v18  ;;  %v6874_v9 = vpop.f32.mrb[211].mxu0  ;;  %v6987_v15 = vpop.f32.mrb[211].mxu1  ;;  %v7604_v40 = vmax.f32 %v6869_v54, 0.0  ;;  %v7606_v21 = vmax.f32 %v6982_v16, 0.0 }
0x1a17   : > { %v6875_v42 = vadd.f32 %v6874_v9, %v16547_v43  ;;  %v6988_v49 = vadd.f32 %v6987_v15, %v16555_v26  ;;  %v7605_v48 = vmax.f32 %v6871_v7, 0.0  ;;  %v7607_v41 = vmax.f32 %v6984_v29, 0.0 }
0x1a18   : > { %v7620_v62 = vmax.f32 %v6873_v28, 0.0  ;;  %v7622_v25 = vmax.f32 %v6986_v11, 0.0  ;;  %8717 = vmatmul.mubr.bf16.gmra.mrb[60].mxu0 %v16563_v51  ;;  %8814 = vmatmul.mubr.bf16.gmra.mrb[60].mxu1 %v16565_v32  ;;  %v11970_v11 = vld [vmem:[%s12836_s27 + $0x200] sm:$0xff]  }
0x1a19   : > { %v7621_v55 = vmax.f32 %v6875_v42, 0.0  ;;  %v7623_v60 = vmax.f32 %v6988_v49, 0.0  ;;  %8854 = vmatprep.mubr.bf16.mxu0 %v16597_v27  ;;  %8951 = vmatprep.mubr.bf16.mxu1 %v16599_v3 }
0x1a1a   : > { %v16675_v57 = vpack.c.bf16 %v7620_v62, %v7604_v40  ;;  %v16677_v6 = vpack.c.bf16 %v7622_v25, %v7606_v21  ;;  %v11972_v40 = vld [vmem:[%s12836_s27 + $0x280] sm:$0xff]   ;;  %v11973_v25 = vld [vmem:[%s12836_s27 + $0x248] sm:$0xff]  }
0x1a1b   : > { %v16679_v54 = vpack.c.bf16 %v7621_v55, %v7605_v48  ;;  %v16681_v16 = vpack.c.bf16 %v7623_v60, %v7607_v41  ;;  %v6878_v51 = vpop.f32.mrb[212].mxu0  ;;  %v6991_v32 = vpop.f32.mrb[212].mxu1  ;;  %v11975_v48 = vld [vmem:[%s12836_s27 + $0x2c8] sm:$0xff]  }
0x1a1c   : > { %v6879_v63 = vadd.f32 %v6878_v51, %v16537_v31  ;;  %v6992_v7 = vadd.f32 %v6991_v32, %v16541_v18  ;;  %v6880_v27 = vpop.f32.mrb[213].mxu0  ;;  %v6993_v29 = vpop.f32.mrb[213].mxu1 }
0x1a1d   : > { %v6881_v3 = vadd.f32 %v6880_v27, %v16547_v43  ;;  %v6994_v58 = vadd.f32 %v6993_v29, %v16555_v26  ;;  %v6882_v34 = vpop.f32.mrb[214].mxu0  ;;  %v6995_v28 = vpop.f32.mrb[214].mxu1 }
0x1a1e   : > { %v6883_v9 = vadd.f32 %v6882_v34, %v16537_v31  ;;  %v6996_v15 = vadd.f32 %v6995_v28, %v16541_v18  ;;  %v6884_v42 = vpop.f32.mrb[215].mxu0  ;;  %v6997_v49 = vpop.f32.mrb[215].mxu1  ;;  %v7636_v41 = vmax.f32 %v6879_v63, 0.0  ;;  %v7638_v55 = vmax.f32 %v6992_v7, 0.0  ;;  %v11974_v28 = vld [vmem:[%s12836_s27 + $0x208] sm:$0xff]  }
0x1a1f   : > { %v6885_v21 = vadd.f32 %v6884_v42, %v16547_v43  ;;  %v6998_v62 = vadd.f32 %v6997_v49, %v16555_v26  ;;  %v7637_v32 = vmax.f32 %v6881_v3, 0.0  ;;  %v7639_v27 = vmax.f32 %v6994_v58, 0.0  ;;  %v11976_v7 = vld [vmem:[%s12836_s27 + $0x288] sm:$0xff]  }
0x1a20   : > { %v7652_v60 = vmax.f32 %v6883_v9, 0.0  ;;  %v7654_v51 = vmax.f32 %v6996_v15, 0.0  ;;  %8855 = vmatmul.mubr.bf16.vlgmr.msra.gmra.mrb[64].mxu0 %v16591_v61  ;;  %8952 = vmatmul.mubr.bf16.vlgmr.msra.gmra.mrb[64].mxu1 %v16593_v47  ;;  %v11977_v61 = vld [vmem:[%s12836_s27 + $0x250] sm:$0xff]  }
0x1a21   : > { %v7653_v29 = vmax.f32 %v6885_v21, 0.0  ;;  %v7655_v34 = vmax.f32 %v6998_v62, 0.0  ;;  %10882 = vmatpush3.bf16.msra.mxu0 %v11970_v11  ;;  %8862 = vmatprep.mubr.bf16.mxu0 %v16619_v2  ;;  %v11979_v11 = vld [vmem:[%s12836_s27 + $0x2d0] sm:$0xff]  }
0x1a22   : > { %v16699_v42 = vpack.c.bf16 %v7652_v60, %v7636_v41  ;;  %v16701_v63 = vpack.c.bf16 %v7654_v51, %v7638_v55  ;;  %8959 = vmatprep.mubr.bf16.mxu1 %v16621_v50  ;;  %10946 = vmatpush3.bf16.msra.mxu1 %v11972_v40  ;;  %v11978_v51 = vld [vmem:[%s12836_s27 + $0x210] sm:$0xff]  }
0x1a23   : > { %v16706_v9 = vpack.c.bf16 %v7653_v29, %v7637_v32  ;;  %v16708_v47 = vpack.c.bf16 %v7655_v34, %v7639_v27  ;;  %v6888_v3 = vpop.f32.mrb[216].mxu0  ;;  %v7001_v58 = vpop.f32.mrb[216].mxu1  ;;  %10883 = vmatprep.subr.bf16.mxu0 %v11973_v25  ;;  %10947 = vmatprep.subr.bf16.mxu1 %v11975_v48  ;;  %v11980_v32 = vld [vmem:[%s12836_s27 + $0x290] sm:$0xff]   ;;  %v11981_v34 = vld [vmem:[%s12836_s27 + $0x258] sm:$0xff]  }
0x1a24   : > { %v6889_v2 = vadd.f32 %v6888_v3, %v16537_v31  ;;  %v7002_v15 = vadd.f32 %v7001_v58, %v16541_v18  ;;  %v6890_v49 = vpop.f32.mrb[217].mxu0  ;;  %v7003_v50 = vpop.f32.mrb[217].mxu1  ;;  %v11983_v3 = vld [vmem:[%s12836_s27 + $0x2d8] sm:$0xff]  }
0x1a25   : > { %v6891_v40 = vadd.f32 %v6890_v49, %v16547_v43  ;;  %v7004_v21 = vadd.f32 %v7003_v50, %v16555_v26  ;;  %v6892_v62 = vpop.f32.mrb[218].mxu0  ;;  %v7005_v41 = vpop.f32.mrb[218].mxu1  ;;  %10884 = vmatpush3.bf16.msra.mxu0 %v11974_v28 }
0x1a26   : > { %v6893_v25 = vadd.f32 %v6892_v62, %v16537_v31  ;;  %v7006_v48 = vadd.f32 %v7005_v41, %v16541_v18  ;;  %v6894_v55 = vpop.f32.mrb[219].mxu0  ;;  %v7007_v60 = vpop.f32.mrb[219].mxu1  ;;  %10948 = vmatpush3.bf16.msra.mxu1 %v11976_v7  ;;  %10885 = vmatprep.subr.bf16.mxu0 %v11977_v61  ;;  %v7668_v58 = vmax.f32 %v6889_v2, 0.0  ;;  %v7670_v28 = vmax.f32 %v7002_v15, 0.0  ;;  %v16732_v15 = vld [vmem:[%s12826_s17 + $0x8] sm:$0xff] }
0x1a27   : > { %v6895_v27 = vadd.f32 %v6894_v55, %v16547_v43  ;;  %v7008_v29 = vadd.f32 %v7007_v60, %v16555_v26  ;;  %10949 = vmatprep.subr.bf16.mxu1 %v11979_v11  ;;  %v7669_v7 = vmax.f32 %v6891_v40, 0.0  ;;  %v7671_v61 = vmax.f32 %v7004_v21, 0.0 }
0x1a28   : > { %v7684_v49 = vmax.f32 %v6893_v25, 0.0  ;;  %v7686_v50 = vmax.f32 %v7006_v48, 0.0  ;;  %8863 = vmatmul.mubr.bf16.gmra.mrb[68].mxu0 %v16615_v46  ;;  %8960 = vmatmul.mubr.bf16.gmra.mrb[68].mxu1 %v16617_v44  ;;  %v11982_v46 = vld [vmem:[%s12836_s27 + $0x218] sm:$0xff]  }
0x1a29   : > { %v7685_v62 = vmax.f32 %v6895_v27, 0.0  ;;  %v7687_v41 = vmax.f32 %v7008_v29, 0.0  ;;  %8870 = vmatprep.mubr.bf16.mxu0 %v16639_v24  ;;  %8967 = vmatprep.mubr.bf16.mxu1 %v16641_v5  ;;  %v11984_v44 = vld [vmem:[%s12836_s27 + $0x298] sm:$0xff]   ;;  %v11985_v24 = vld [vmem:[%s12836_s27 + $0x260] sm:$0xff]  }
0x1a2a   : > { %v16727_v11 = vpack.c.bf16 %v7684_v49, %v7668_v58  ;;  %v16729_v2 = vpack.c.bf16 %v7686_v50, %v7670_v28  ;;  %10886 = vmatpush3.bf16.msra.mxu0 %v11978_v51  ;;  %10950 = vmatpush3.bf16.msra.mxu1 %v11980_v32  ;;  %v11987_v5 = vld [vmem:[%s12836_s27 + $0x2e0] sm:$0xff]  }
0x1a2b   : > { %v16736_v40 = vpack.c.bf16 %v7685_v62, %v7669_v7  ;;  %v16738_v21 = vpack.c.bf16 %v7687_v41, %v7671_v61  ;;  %v6898_v25 = vpop.f32.mrb[220].mxu0  ;;  %v7011_v48 = vpop.f32.mrb[220].mxu1  ;;  %10887 = vmatprep.subr.bf16.mxu0 %v11981_v34  ;;  %10951 = vmatprep.subr.bf16.mxu1 %v11983_v3  ;;  %v16748_v34 = vrot.slane %v16732_v15, %v18017_v12  ;;  %v11986_v12 = vld [vmem:[%s12836_s27 + $0x220] sm:$0xff]  }
0x1a2c   : > { %v6899_v55 = vadd.f32 %v6898_v25, %v16537_v31  ;;  %v7012_v60 = vadd.f32 %v7011_v48, %v16541_v18  ;;  %v6900_v51 = vpop.f32.mrb[221].mxu0  ;;  %v7013_v32 = vpop.f32.mrb[221].mxu1  ;;  %v16752_v3 = vrot.slane %v16732_v15, %v18018_v38  ;;  %v16758_v62 = vrot.slane %v16732_v15, %v18019_v4  ;;  %v11988_v41 = vld [vmem:[%s12836_s27 + $0x2a0] sm:$0xff]  }
0x1a2d   : > { %v6901_v27 = vadd.f32 %v6900_v51, %v16547_v43  ;;  %v7014_v29 = vadd.f32 %v7013_v32, %v16555_v26  ;;  %v6902_v58 = vpop.f32.mrb[222].mxu0  ;;  %v7015_v28 = vpop.f32.mrb[222].mxu1  ;;  %v16766_v48 = vrot.slane %v16732_v15, %v15723_v35 }
0x1a2e   : > { %v6903_v49 = vadd.f32 %v6902_v58, %v16537_v31  ;;  %v7016_v50 = vadd.f32 %v7015_v28, %v16541_v18  ;;  %v6904_v7 = vpop.f32.mrb[223].mxu0  ;;  %v7017_v61 = vpop.f32.mrb[223].mxu1  ;;  %10888 = vmatpush3.bf16.msra.mxu0 %v11982_v46  ;;  %10952 = vmatpush3.bf16.msra.mxu1 %v11984_v44  ;;  %v11989_v31 = vld [vmem:[%s12836_s27 + $0x268] sm:$0xff]   ;;  %v7700_v51 = vmax.f32 %v6899_v55, 0.0  ;;  %v7702_v4 = vmax.f32 %v7012_v60, 0.0  ;;  %v11993_v58 = vld [vmem:[%s12836_s27 + $0x270] sm:$0xff]  }
0x1a2f   : > { %v6905_v25 = vadd.f32 %v6904_v7, %v16547_v43  ;;  %v7018_v38 = vadd.f32 %v7017_v61, %v16555_v26  ;;  %10889 = vmatprep.subr.bf16.mxu0 %v11985_v24  ;;  %10953 = vmatprep.subr.bf16.mxu1 %v11987_v5  ;;  %v11991_v18 = vld [vmem:[%s12836_s27 + $0x2e8] sm:$0xff]   ;;  %v7701_v43 = vmax.f32 %v6901_v27, 0.0  ;;  %v7703_v26 = vmax.f32 %v7014_v29, 0.0 }
0x1a30   : > { %v7716_v46 = vmax.f32 %v6903_v49, 0.0  ;;  %v7718_v44 = vmax.f32 %v7016_v50, 0.0  ;;  %8871 = vmatmul.mubr.bf16.gmra.mrb[72].mxu0 %v16635_v30  ;;  %8968 = vmatmul.mubr.bf16.gmra.mrb[72].mxu1 %v16637_v14  ;;  %v11990_v55 = vld [vmem:[%s12836_s27 + $0x228] sm:$0xff]  }
0x1a31   : > { %v7717_v32 = vmax.f32 %v6905_v25, 0.0  ;;  %v7719_v35 = vmax.f32 %v7018_v38, 0.0  ;;  %8878 = vmatprep.mubr.bf16.mxu0 %v16659_v13  ;;  %8975 = vmatprep.mubr.bf16.mxu1 %v16661_v22  ;;  %v11992_v30 = vld [vmem:[%s12836_s27 + $0x2a8] sm:$0xff]   ;;  %v11995_v13 = vld [vmem:[%s12836_s27 + $0x2f0] sm:$0xff]  }
0x1a32   : > { %v16774_v24 = vpack.c.bf16 %v7716_v46, %v7700_v51  ;;  %v16776_v5 = vpack.c.bf16 %v7718_v44, %v7702_v4  ;;  %10890 = vmatpush3.bf16.msra.mxu0 %v11986_v12  ;;  %10954 = vmatpush3.bf16.msra.mxu1 %v11988_v41  ;;  %v11994_v51 = vld [vmem:[%s12836_s27 + $0x230] sm:$0xff]  }
0x1a33   : > { %v16780_v60 = vpack.c.bf16 %v7717_v32, %v7701_v43  ;;  %v16782_v14 = vpack.c.bf16 %v7719_v35, %v7703_v26  ;;  %v7054_v27 = vpop.f32.mrb[224].mxu0  ;;  %v7167_v29 = vpop.f32.mrb[224].mxu1  ;;  %10891 = vmatprep.subr.bf16.mxu0 %v11989_v31  ;;  %10955 = vmatprep.subr.bf16.mxu1 %v11991_v18  ;;  %v11996_v4 = vld [vmem:[%s12836_s27 + $0x2b0] sm:$0xff]   ;;  %v11997_v43 = vld [vmem:[%s12836_s27 + $0x278] sm:$0xff]  }
0x1a34   : > { %v7055_v22 = vadd.f32 %v7054_v27, %v16748_v34  ;;  %v7168_v28 = vadd.f32 %v7167_v29, %v16752_v3  ;;  %v7056_v49 = vpop.f32.mrb[225].mxu0  ;;  %v7169_v50 = vpop.f32.mrb[225].mxu1  ;;  %v11999_v26 = vld [vmem:[%s12836_s27 + $0x2f8] sm:$0xff]  }
0x1a35   : > { %v7057_v7 = vadd.f32 %v7056_v49, %v16758_v62  ;;  %v7170_v61 = vadd.f32 %v7169_v50, %v16766_v48  ;;  %v7058_v12 = vpop.f32.mrb[226].mxu0  ;;  %v7171_v41 = vpop.f32.mrb[226].mxu1 }
0x1a36   : > { %v7059_v25 = vadd.f32 %v7058_v12, %v16748_v34  ;;  %v7172_v38 = vadd.f32 %v7171_v41, %v16752_v3  ;;  %v7060_v31 = vpop.f32.mrb[227].mxu0  ;;  %v7173_v18 = vpop.f32.mrb[227].mxu1  ;;  %10892 = vmatpush3.bf16.msra.mxu0 %v11990_v55  ;;  %10956 = vmatpush3.bf16.msra.mxu1 %v11992_v30  ;;  %v7480_v32 = vmax.f32 %v7055_v22, 0.0  ;;  %v7482_v35 = vmax.f32 %v7168_v28, 0.0  ;;  %v11998_v22 = vld [vmem:[%s12836_s27 + $0x238] sm:$0xff]   ;;  %v12001_v12 = vld [vmem:[%s12836_s27 + $0x340] sm:$0xff]  }
0x1a37   : > { %v7061_v46 = vadd.f32 %v7060_v31, %v16758_v62  ;;  %v7174_v44 = vadd.f32 %v7173_v18, %v16766_v48  ;;  %10893 = vmatprep.subr.bf16.mxu0 %v11993_v58  ;;  %10957 = vmatprep.subr.bf16.mxu1 %v11995_v13  ;;  %v7481_v55 = vmax.f32 %v7057_v7, 0.0  ;;  %v7483_v30 = vmax.f32 %v7170_v61, 0.0 }
0x1a38   : > { %v7496_v27 = vmax.f32 %v7059_v25, 0.0  ;;  %v7498_v29 = vmax.f32 %v7172_v38, 0.0  ;;  %8879 = vmatmul.mubr.bf16.gmra.mrb[76].mxu0 %v16655_v23  ;;  %8976 = vmatmul.mubr.bf16.gmra.mrb[76].mxu1 %v16657_v53  ;;  %v12000_v23 = vld [vmem:[%s12836_s27 + $0x2b8] sm:$0xff]  }
0x1a39   : > { %v7497_v49 = vmax.f32 %v7061_v46, 0.0  ;;  %v7499_v50 = vmax.f32 %v7174_v44, 0.0  ;;  %8886 = vmatprep.mubr.bf16.mxu0 %v16679_v54  ;;  %8983 = vmatprep.mubr.bf16.mxu1 %v16681_v16  ;;  %v12003_v54 = vld [vmem:[%s12836_s27 + $0x3c0] sm:$0xff]  }
0x1a3a   : > { %v16802_v58 = vpack.c.bf16 %v7496_v27, %v7480_v32  ;;  %v16804_v13 = vpack.c.bf16 %v7498_v29, %v7482_v35  ;;  %10894 = vmatpush3.bf16.msra.mxu0 %v11994_v51  ;;  %10958 = vmatpush3.bf16.msra.mxu1 %v11996_v4 }
0x1a3b   : > { %v16808_v28 = vpack.c.bf16 %v7497_v49, %v7481_v55  ;;  %v16810_v53 = vpack.c.bf16 %v7499_v50, %v7483_v30  ;;  %v7064_v7 = vpop.f32.mrb[228].mxu0  ;;  %v7177_v61 = vpop.f32.mrb[228].mxu1  ;;  %10895 = vmatprep.subr.bf16.mxu0 %v11997_v43  ;;  %10959 = vmatprep.subr.bf16.mxu1 %v11999_v26 }
0x1a3c   : > { %v7065_v16 = vadd.f32 %v7064_v7, %v16748_v34  ;;  %v7178_v41 = vadd.f32 %v7177_v61, %v16752_v3  ;;  %v7066_v25 = vpop.f32.mrb[229].mxu0  ;;  %v7179_v38 = vpop.f32.mrb[229].mxu1 }
0x1a3d   : > { %v7067_v31 = vadd.f32 %v7066_v25, %v16758_v62  ;;  %v7180_v18 = vadd.f32 %v7179_v38, %v16766_v48  ;;  %v7068_v51 = vpop.f32.mrb[230].mxu0  ;;  %v7181_v4 = vpop.f32.mrb[230].mxu1 }
0x1a3e   : > { %v7069_v46 = vadd.f32 %v7068_v51, %v16748_v34  ;;  %v7182_v44 = vadd.f32 %v7181_v4, %v16752_v3  ;;  %v7070_v43 = vpop.f32.mrb[231].mxu0  ;;  %v7183_v26 = vpop.f32.mrb[231].mxu1  ;;  %10896 = vmatpush3.bf16.msra.mxu0 %v11998_v22  ;;  %10960 = vmatpush3.bf16.msra.mxu1 %v12000_v23  ;;  %v7512_v27 = vmax.f32 %v7065_v16, 0.0  ;;  %v7514_v29 = vmax.f32 %v7178_v41, 0.0 }
0x1a3f   : > { %v7071_v32 = vadd.f32 %v7070_v43, %v16758_v62  ;;  %v7184_v35 = vadd.f32 %v7183_v26, %v16766_v48  ;;  %11009 = vmatprep.subr.bf16.mxu0 %v12001_v12  ;;  %11073 = vmatprep.subr.bf16.mxu1 %v12003_v54  ;;  %v7513_v49 = vmax.f32 %v7067_v31, 0.0  ;;  %v7515_v50 = vmax.f32 %v7180_v18, 0.0 }
0x1a40   : > { %v7528_v55 = vmax.f32 %v7069_v46, 0.0  ;;  %v7530_v30 = vmax.f32 %v7182_v44, 0.0  ;;  %8887 = vmatmul.mubr.bf16.gmra.mrb[80].mxu0 %v16675_v57  ;;  %8984 = vmatmul.mubr.bf16.gmra.mrb[80].mxu1 %v16677_v6 }
0x1a41   : > { %v7529_v7 = vmax.f32 %v7071_v32, 0.0  ;;  %v7531_v61 = vmax.f32 %v7184_v35, 0.0  ;;  %8894 = vmatprep.mubr.bf16.mxu0 %v16706_v9  ;;  %8991 = vmatprep.mubr.bf16.mxu1 %v16708_v47 }
0x1a42   : > { %v16826_v22 = vpack.c.bf16 %v7528_v55, %v7512_v27  ;;  %v16828_v23 = vpack.c.bf16 %v7530_v30, %v7514_v29 }
0x1a43   : > { %v16830_v12 = vpack.c.bf16 %v7529_v7, %v7513_v49  ;;  %v16832_v54 = vpack.c.bf16 %v7531_v61, %v7515_v50  ;;  %v7074_v16 = vpop.f32.mrb[232].mxu0  ;;  %v7187_v57 = vpop.f32.mrb[232].mxu1 }
0x1a44   : > { %v7075_v6 = vadd.f32 %v7074_v16, %v16748_v34  ;;  %v7188_v41 = vadd.f32 %v7187_v57, %v16752_v3  ;;  %v7076_v25 = vpop.f32.mrb[233].mxu0  ;;  %v7189_v38 = vpop.f32.mrb[233].mxu1 }
0x1a45   : > { %v7077_v9 = vadd.f32 %v7076_v25, %v16758_v62  ;;  %v7190_v47 = vadd.f32 %v7189_v38, %v16766_v48  ;;  %v7078_v31 = vpop.f32.mrb[234].mxu0  ;;  %v7191_v18 = vpop.f32.mrb[234].mxu1 }
0x1a46   : > { %v7079_v51 = vadd.f32 %v7078_v31, %v16748_v34  ;;  %v7192_v4 = vadd.f32 %v7191_v18, %v16752_v3  ;;  %v7080_v46 = vpop.f32.mrb[235].mxu0  ;;  %v7193_v44 = vpop.f32.mrb[235].mxu1  ;;  %v7544_v32 = vmax.f32 %v7075_v6, 0.0  ;;  %v7546_v35 = vmax.f32 %v7188_v41, 0.0 }
0x1a47   : > { %v7081_v43 = vadd.f32 %v7080_v46, %v16758_v62  ;;  %v7194_v26 = vadd.f32 %v7193_v44, %v16766_v48  ;;  %v7545_v55 = vmax.f32 %v7077_v9, 0.0  ;;  %v7547_v30 = vmax.f32 %v7190_v47, 0.0 }
0x1a48   : > { %v7560_v27 = vmax.f32 %v7079_v51, 0.0  ;;  %v7562_v29 = vmax.f32 %v7192_v4, 0.0  ;;  %8895 = vmatmul.mubr.bf16.gmra.mrb[84].mxu0 %v16699_v42  ;;  %8992 = vmatmul.mubr.bf16.gmra.mrb[84].mxu1 %v16701_v63 }
0x1a49   : > { %v7561_v49 = vmax.f32 %v7081_v43, 0.0  ;;  %v7563_v50 = vmax.f32 %v7194_v26, 0.0  ;;  %8902 = vmatprep.mubr.bf16.mxu0 %v16736_v40  ;;  %8999 = vmatprep.mubr.bf16.mxu1 %v16738_v21 }
0x1a4a   : > { %v16846_v7 = vpack.c.bf16 %v7560_v27, %v7544_v32  ;;  %v16848_v61 = vpack.c.bf16 %v7562_v29, %v7546_v35 }
0x1a4b   : > { %v16850_v16 = vpack.c.bf16 %v7561_v49, %v7545_v55  ;;  %v16852_v57 = vpack.c.bf16 %v7563_v50, %v7547_v30  ;;  %v7084_v6 = vpop.f32.mrb[236].mxu0  ;;  %v7197_v42 = vpop.f32.mrb[236].mxu1 }
0x1a4c   : > { %v7085_v63 = vadd.f32 %v7084_v6, %v16748_v34  ;;  %v7198_v41 = vadd.f32 %v7197_v42, %v16752_v3  ;;  %v7086_v25 = vpop.f32.mrb[237].mxu0  ;;  %v7199_v38 = vpop.f32.mrb[237].mxu1 }
0x1a4d   : > { %v7087_v40 = vadd.f32 %v7086_v25, %v16758_v62  ;;  %v7200_v21 = vadd.f32 %v7199_v38, %v16766_v48  ;;  %v7088_v9 = vpop.f32.mrb[238].mxu0  ;;  %v7201_v47 = vpop.f32.mrb[238].mxu1 }
0x1a4e   : > { %v7089_v31 = vadd.f32 %v7088_v9, %v16748_v34  ;;  %v7202_v18 = vadd.f32 %v7201_v47, %v16752_v3  ;;  %v7090_v51 = vpop.f32.mrb[239].mxu0  ;;  %v7203_v4 = vpop.f32.mrb[239].mxu1  ;;  %v7576_v43 = vmax.f32 %v7085_v63, 0.0  ;;  %v7578_v26 = vmax.f32 %v7198_v41, 0.0 }
0x1a4f   : > { %v7091_v46 = vadd.f32 %v7090_v51, %v16758_v62  ;;  %v7204_v44 = vadd.f32 %v7203_v4, %v16766_v48  ;;  %v7577_v27 = vmax.f32 %v7087_v40, 0.0  ;;  %v7579_v29 = vmax.f32 %v7200_v21, 0.0 }
0x1a50   : > { %v7592_v32 = vmax.f32 %v7089_v31, 0.0  ;;  %v7594_v35 = vmax.f32 %v7202_v18, 0.0  ;;  %8903 = vmatmul.mubr.bf16.gmra.mrb[88].mxu0 %v16727_v11  ;;  %9000 = vmatmul.mubr.bf16.gmra.mrb[88].mxu1 %v16729_v2 }
0x1a51   : > { %v7593_v55 = vmax.f32 %v7091_v46, 0.0  ;;  %v7595_v30 = vmax.f32 %v7204_v44, 0.0  ;;  %8910 = vmatprep.mubr.bf16.mxu0 %v16780_v60  ;;  %9007 = vmatprep.mubr.bf16.mxu1 %v16782_v14 }
0x1a52   : > { %v16866_v49 = vpack.c.bf16 %v7592_v32, %v7576_v43  ;;  %v16868_v50 = vpack.c.bf16 %v7594_v35, %v7578_v26 }
0x1a53   : > { %v16870_v6 = vpack.c.bf16 %v7593_v55, %v7577_v27  ;;  %v16872_v42 = vpack.c.bf16 %v7595_v30, %v7579_v29  ;;  %v7094_v63 = vpop.f32.mrb[240].mxu0  ;;  %v7207_v11 = vpop.f32.mrb[240].mxu1 }
0x1a54   : > { %v7095_v2 = vadd.f32 %v7094_v63, %v16748_v34  ;;  %v7208_v41 = vadd.f32 %v7207_v11, %v16752_v3  ;;  %v7096_v25 = vpop.f32.mrb[241].mxu0  ;;  %v7209_v38 = vpop.f32.mrb[241].mxu1 }
0x1a55   : > { %v7097_v60 = vadd.f32 %v7096_v25, %v16758_v62  ;;  %v7210_v14 = vadd.f32 %v7209_v38, %v16766_v48  ;;  %v7098_v40 = vpop.f32.mrb[242].mxu0  ;;  %v7211_v21 = vpop.f32.mrb[242].mxu1 }
0x1a56   : > { %v7099_v9 = vadd.f32 %v7098_v40, %v16748_v34  ;;  %v7212_v47 = vadd.f32 %v7211_v21, %v16752_v3  ;;  %v7100_v31 = vpop.f32.mrb[243].mxu0  ;;  %v7213_v18 = vpop.f32.mrb[243].mxu1  ;;  %v7608_v46 = vmax.f32 %v7095_v2, 0.0  ;;  %v7610_v44 = vmax.f32 %v7208_v41, 0.0  ;;  %v12002_v40 = vld [vmem:[%s12836_s27 + $0x300] sm:$0xff]  }
0x1a57   : > { %v7101_v51 = vadd.f32 %v7100_v31, %v16758_v62  ;;  %v7214_v4 = vadd.f32 %v7213_v18, %v16766_v48  ;;  %v7609_v32 = vmax.f32 %v7097_v60, 0.0  ;;  %v7611_v35 = vmax.f32 %v7210_v14, 0.0  ;;  %v12004_v18 = vld [vmem:[%s12836_s27 + $0x380] sm:$0xff]  }
0x1a58   : > { %v7624_v43 = vmax.f32 %v7099_v9, 0.0  ;;  %v7626_v26 = vmax.f32 %v7212_v47, 0.0  ;;  %8911 = vmatmul.mubr.bf16.gmra.mrb[92].mxu0 %v16774_v24  ;;  %9008 = vmatmul.mubr.bf16.gmra.mrb[92].mxu1 %v16776_v5 }
0x1a59   : > { %v7625_v27 = vmax.f32 %v7101_v51, 0.0  ;;  %v7627_v29 = vmax.f32 %v7214_v4, 0.0  ;;  %9048 = vmatprep.mubr.bf16.mxu0 %v16808_v28  ;;  %9145 = vmatprep.mubr.bf16.mxu1 %v16810_v53 }
0x1a5a   : > { %v16886_v55 = vpack.c.bf16 %v7624_v43, %v7608_v46  ;;  %v16888_v30 = vpack.c.bf16 %v7626_v26, %v7610_v44  ;;  %v12005_v46 = vld [vmem:[%s12836_s27 + $0x348] sm:$0xff]  }
0x1a5b   : > { %v16890_v63 = vpack.c.bf16 %v7625_v27, %v7609_v32  ;;  %v16892_v11 = vpack.c.bf16 %v7627_v29, %v7611_v35  ;;  %v7104_v24 = vpop.f32.mrb[244].mxu0  ;;  %v7217_v5 = vpop.f32.mrb[244].mxu1  ;;  %v12007_v44 = vld [vmem:[%s12836_s27 + $0x3c8] sm:$0xff]  }
0x1a5c   : > { %v7105_v2 = vadd.f32 %v7104_v24, %v16748_v34  ;;  %v7218_v41 = vadd.f32 %v7217_v5, %v16752_v3  ;;  %v7106_v28 = vpop.f32.mrb[245].mxu0  ;;  %v7219_v25 = vpop.f32.mrb[245].mxu1 }
0x1a5d   : > { %v7107_v53 = vadd.f32 %v7106_v28, %v16758_v62  ;;  %v7220_v38 = vadd.f32 %v7219_v25, %v16766_v48  ;;  %v7108_v60 = vpop.f32.mrb[246].mxu0  ;;  %v7221_v14 = vpop.f32.mrb[246].mxu1  ;;  %v12006_v28 = vld [vmem:[%s12836_s27 + $0x308] sm:$0xff]  }
0x1a5e   : > { %v7109_v21 = vadd.f32 %v7108_v60, %v16748_v34  ;;  %v7222_v9 = vadd.f32 %v7221_v14, %v16752_v3  ;;  %v7110_v47 = vpop.f32.mrb[247].mxu0  ;;  %v7223_v31 = vpop.f32.mrb[247].mxu1  ;;  %v7640_v43 = vmax.f32 %v7105_v2, 0.0  ;;  %v7642_v26 = vmax.f32 %v7218_v41, 0.0  ;;  %v12008_v41 = vld [vmem:[%s12836_s27 + $0x388] sm:$0xff]   ;;  %v12011_v14 = vld [vmem:[%s12836_s27 + $0x3d0] sm:$0xff]  }
0x1a5f   : > { %v7111_v51 = vadd.f32 %v7110_v47, %v16758_v62  ;;  %v7224_v4 = vadd.f32 %v7223_v31, %v16766_v48  ;;  %v7641_v27 = vmax.f32 %v7107_v53, 0.0  ;;  %v7643_v29 = vmax.f32 %v7220_v38, 0.0 }
0x1a60   : > { %v7656_v32 = vmax.f32 %v7109_v21, 0.0  ;;  %v7658_v35 = vmax.f32 %v7222_v9, 0.0  ;;  %9049 = vmatmul.mubr.bf16.vlgmr.msra.gmra.mrb[96].mxu0 %v16802_v58  ;;  %9146 = vmatmul.mubr.bf16.vlgmr.msra.gmra.mrb[96].mxu1 %v16804_v13  ;;  %v12009_v58 = vld [vmem:[%s12836_s27 + $0x350] sm:$0xff]  }
0x1a61   : > { %v7657_v24 = vmax.f32 %v7111_v51, 0.0  ;;  %v7659_v5 = vmax.f32 %v7224_v4, 0.0  ;;  %11010 = vmatpush3.bf16.msra.mxu0 %v12002_v40  ;;  %9056 = vmatprep.mubr.bf16.mxu0 %v16830_v12 }
0x1a62   : > { %v16910_v25 = vpack.c.bf16 %v7656_v32, %v7640_v43  ;;  %v16912_v2 = vpack.c.bf16 %v7658_v35, %v7642_v26  ;;  %9153 = vmatprep.mubr.bf16.mxu1 %v16832_v54  ;;  %11074 = vmatpush3.bf16.msra.mxu1 %v12004_v18  ;;  %v12010_v43 = vld [vmem:[%s12836_s27 + $0x310] sm:$0xff]  }
0x1a63   : > { %v16917_v60 = vpack.c.bf16 %v7657_v24, %v7641_v27  ;;  %v16919_v13 = vpack.c.bf16 %v7659_v5, %v7643_v29  ;;  %v7114_v53 = vpop.f32.mrb[248].mxu0  ;;  %v7227_v38 = vpop.f32.mrb[248].mxu1  ;;  %11011 = vmatprep.subr.bf16.mxu0 %v12005_v46  ;;  %11075 = vmatprep.subr.bf16.mxu1 %v12007_v44  ;;  %v12012_v26 = vld [vmem:[%s12836_s27 + $0x390] sm:$0xff]   ;;  %v12013_v27 = vld [vmem:[%s12836_s27 + $0x358] sm:$0xff]  }
0x1a64   : > { %v7115_v12 = vadd.f32 %v7114_v53, %v16748_v34  ;;  %v7228_v40 = vadd.f32 %v7227_v38, %v16752_v3  ;;  %v7116_v21 = vpop.f32.mrb[249].mxu0  ;;  %v7229_v54 = vpop.f32.mrb[249].mxu1  ;;  %v12015_v29 = vld [vmem:[%s12836_s27 + $0x3d8] sm:$0xff]  }
0x1a65   : > { %v7117_v9 = vadd.f32 %v7116_v21, %v16758_v62  ;;  %v7230_v47 = vadd.f32 %v7229_v54, %v16766_v48  ;;  %v7118_v31 = vpop.f32.mrb[250].mxu0  ;;  %v7231_v18 = vpop.f32.mrb[250].mxu1  ;;  %11012 = vmatpush3.bf16.msra.mxu0 %v12006_v28 }
0x1a66   : > { %v7119_v51 = vadd.f32 %v7118_v31, %v16748_v34  ;;  %v7232_v4 = vadd.f32 %v7231_v18, %v16752_v3  ;;  %v7120_v46 = vpop.f32.mrb[251].mxu0  ;;  %v7233_v44 = vpop.f32.mrb[251].mxu1  ;;  %11076 = vmatpush3.bf16.msra.mxu1 %v12008_v41  ;;  %11013 = vmatprep.subr.bf16.mxu0 %v12009_v58  ;;  %v7672_v24 = vmax.f32 %v7115_v12, 0.0  ;;  %v7674_v5 = vmax.f32 %v7228_v40, 0.0  ;;  %v12014_v40 = vld [vmem:[%s12836_s27 + $0x318] sm:$0xff]   ;;  %v12017_v31 = vld [vmem:[%s12836_s27 + $0x360] sm:$0xff]  }
0x1a67   : > { %v7121_v32 = vadd.f32 %v7120_v46, %v16758_v62  ;;  %v7234_v35 = vadd.f32 %v7233_v44, %v16766_v48  ;;  %11077 = vmatprep.subr.bf16.mxu1 %v12011_v14  ;;  %v7673_v41 = vmax.f32 %v7117_v9, 0.0  ;;  %v7675_v58 = vmax.f32 %v7230_v47, 0.0 }
0x1a68   : > { %v7688_v28 = vmax.f32 %v7119_v51, 0.0  ;;  %v7690_v53 = vmax.f32 %v7232_v4, 0.0  ;;  %9057 = vmatmul.mubr.bf16.gmra.mrb[100].mxu0 %v16826_v22  ;;  %9154 = vmatmul.mubr.bf16.gmra.mrb[100].mxu1 %v16828_v23  ;;  %v12016_v22 = vld [vmem:[%s12836_s27 + $0x398] sm:$0xff]  }
0x1a69   : > { %v7689_v38 = vmax.f32 %v7121_v32, 0.0  ;;  %v7691_v21 = vmax.f32 %v7234_v35, 0.0  ;;  %9064 = vmatprep.mubr.bf16.mxu0 %v16850_v16  ;;  %9161 = vmatprep.mubr.bf16.mxu1 %v16852_v57  ;;  %v12019_v16 = vld [vmem:[%s12836_s27 + $0x3e0] sm:$0xff]   ;;  %v16956_v32 = vrot.slane %v16732_v15, %v15963_v39  ;;  %v16960_v35 = vrot.slane %v16732_v15, %v16508_v45 }
0x1a6a   : > { %v16938_v14 = vpack.c.bf16 %v7688_v28, %v7672_v24  ;;  %v16940_v12 = vpack.c.bf16 %v7690_v53, %v7674_v5  ;;  %11014 = vmatpush3.bf16.msra.mxu0 %v12010_v43  ;;  %11078 = vmatpush3.bf16.msra.mxu1 %v12012_v26  ;;  %v16966_v28 = vrot.slane %v16732_v15, %v15970_v8  ;;  %v12018_v39 = vld [vmem:[%s12836_s27 + $0x320] sm:$0xff]  }
0x1a6b   : > { %v16944_v54 = vpack.c.bf16 %v7689_v38, %v7673_v41  ;;  %v16946_v23 = vpack.c.bf16 %v7691_v21, %v7675_v58  ;;  %v7124_v9 = vpop.f32.mrb[252].mxu0  ;;  %v7237_v47 = vpop.f32.mrb[252].mxu1  ;;  %11015 = vmatprep.subr.bf16.mxu0 %v12013_v27  ;;  %11079 = vmatprep.subr.bf16.mxu1 %v12015_v29  ;;  %v12020_v53 = vld [vmem:[%s12836_s27 + $0x3a0] sm:$0xff]   ;;  %v16974_v38 = vrot.slane %v16732_v15, %v16527_v20 }
0x1a6c   : > { %v7125_v57 = vadd.f32 %v7124_v9, %v16748_v34  ;;  %v7238_v18 = vadd.f32 %v7237_v47, %v16752_v3  ;;  %v7126_v51 = vpop.f32.mrb[253].mxu0  ;;  %v7239_v4 = vpop.f32.mrb[253].mxu1 }
0x1a6d   : > { %v7127_v46 = vadd.f32 %v7126_v51, %v16758_v62  ;;  %v7240_v44 = vadd.f32 %v7239_v4, %v16766_v48  ;;  %v7128_v43 = vpop.f32.mrb[254].mxu0  ;;  %v7241_v26 = vpop.f32.mrb[254].mxu1  ;;  %v12025_v4 = vld [vmem:[%s12836_s27 + $0x370] sm:$0xff]  }
0x1a6e   : > { %v7129_v27 = vadd.f32 %v7128_v43, %v16748_v34  ;;  %v7242_v29 = vadd.f32 %v7241_v26, %v16752_v3  ;;  %v7130_v24 = vpop.f32.mrb[255].mxu0  ;;  %v7243_v5 = vpop.f32.mrb[255].mxu1  ;;  %11016 = vmatpush3.bf16.msra.mxu0 %v12014_v40  ;;  %11080 = vmatpush3.bf16.msra.mxu1 %v12016_v22  ;;  %v12021_v34 = vld [vmem:[%s12836_s27 + $0x368] sm:$0xff]   ;;  %v7704_v21 = vmax.f32 %v7125_v57, 0.0  ;;  %v7706_v8 = vmax.f32 %v7238_v18, 0.0 }
0x1a6f   : > { %v7131_v41 = vadd.f32 %v7130_v24, %v16758_v62  ;;  %v7244_v58 = vadd.f32 %v7243_v5, %v16766_v48  ;;  %11017 = vmatprep.subr.bf16.mxu0 %v12017_v31  ;;  %11081 = vmatprep.subr.bf16.mxu1 %v12019_v16  ;;  %v12023_v3 = vld [vmem:[%s12836_s27 + $0x3e8] sm:$0xff]   ;;  %v7705_v62 = vmax.f32 %v7127_v46, 0.0  ;;  %v7707_v48 = vmax.f32 %v7240_v44, 0.0 }
0x1a70   : > { %v7720_v40 = vmax.f32 %v7129_v27, 0.0  ;;  %v7722_v22 = vmax.f32 %v7242_v29, 0.0  ;;  %9065 = vmatmul.mubr.bf16.gmra.mrb[104].mxu0 %v16846_v7  ;;  %9162 = vmatmul.mubr.bf16.gmra.mrb[104].mxu1 %v16848_v61  ;;  %v12022_v16 = vld [vmem:[%s12836_s27 + $0x328] sm:$0xff]  }
0x1a71   : > { %v7721_v9 = vmax.f32 %v7131_v41, 0.0  ;;  %v7723_v15 = vmax.f32 %v7244_v58, 0.0  ;;  %9072 = vmatprep.mubr.bf16.mxu0 %v16870_v6  ;;  %9169 = vmatprep.mubr.bf16.mxu1 %v16872_v42  ;;  %v12024_v7 = vld [vmem:[%s12836_s27 + $0x3a8] sm:$0xff]   ;;  %v12027_v6 = vld [vmem:[%s12836_s27 + $0x3f0] sm:$0xff]  }
0x1a72   : > { %v16982_v47 = vpack.c.bf16 %v7720_v40, %v7704_v21  ;;  %v16984_v31 = vpack.c.bf16 %v7722_v22, %v7706_v8  ;;  %11018 = vmatpush3.bf16.msra.mxu0 %v12018_v39  ;;  %11082 = vmatpush3.bf16.msra.mxu1 %v12020_v53  ;;  %v12026_v58 = vld [vmem:[%s12836_s27 + $0x330] sm:$0xff]   ;;  %v12029_v8 = vld [vmem:[%s12836_s27 + $0x378] sm:$0xff]  }
0x1a73   : > { %v16988_v57 = vpack.c.bf16 %v7721_v9, %v7705_v62  ;;  %v16990_v61 = vpack.c.bf16 %v7723_v15, %v7707_v48  ;;  %v7280_v18 = vpop.f32.mrb[0].mxu0  ;;  %v7393_v51 = vpop.f32.mrb[0].mxu1  ;;  %11019 = vmatprep.subr.bf16.mxu0 %v12021_v34  ;;  %11083 = vmatprep.subr.bf16.mxu1 %v12023_v3  ;;  %v12028_v34 = vld [vmem:[%s12836_s27 + $0x3b0] sm:$0xff]   ;;  %v12031_v40 = vld [vmem:[%s12836_s27 + $0x3f8] sm:$0xff]  }
0x1a74   : > { %v7281_v42 = vadd.f32 %v7280_v18, %v16956_v32  ;;  %v7394_v46 = vadd.f32 %v7393_v51, %v16960_v35  ;;  %v7282_v44 = vpop.f32.mrb[1].mxu0  ;;  %v7395_v43 = vpop.f32.mrb[1].mxu1 }
0x1a75   : > { %v7283_v26 = vadd.f32 %v7282_v44, %v16966_v28  ;;  %v7396_v27 = vadd.f32 %v7395_v43, %v16974_v38  ;;  %v7284_v29 = vpop.f32.mrb[2].mxu0  ;;  %v7397_v24 = vpop.f32.mrb[2].mxu1 }
0x1a76   : > { %v7285_v5 = vadd.f32 %v7284_v29, %v16956_v32  ;;  %v7398_v39 = vadd.f32 %v7397_v24, %v16960_v35  ;;  %v7286_v53 = vpop.f32.mrb[3].mxu0  ;;  %v7399_v41 = vpop.f32.mrb[3].mxu1  ;;  %11020 = vmatpush3.bf16.msra.mxu0 %v12022_v16  ;;  %11084 = vmatpush3.bf16.msra.mxu1 %v12024_v7  ;;  %v7484_v22 = vmax.f32 %v7281_v42, 0.0  ;;  %v7486_v62 = vmax.f32 %v7394_v46, 0.0  ;;  %v12032_v42 = vld [vmem:[%s12836_s27 + $0x3b8] sm:$0xff]  }
0x1a77   : > { %v7287_v3 = vadd.f32 %v7286_v53, %v16966_v28  ;;  %v7400_v21 = vadd.f32 %v7399_v41, %v16974_v38  ;;  %11021 = vmatprep.subr.bf16.mxu0 %v12025_v4  ;;  %11085 = vmatprep.subr.bf16.mxu1 %v12027_v6  ;;  %v7485_v15 = vmax.f32 %v7283_v26, 0.0  ;;  %v7487_v16 = vmax.f32 %v7396_v27, 0.0  ;;  %v12030_v6 = vld [vmem:[%s12836_s27 + $0x338] sm:$0xff]  }
0x1a78   : > { %v7500_v48 = vmax.f32 %v7285_v5, 0.0  ;;  %v7502_v9 = vmax.f32 %v7398_v39, 0.0  ;;  %9073 = vmatmul.mubr.bf16.gmra.mrb[108].mxu0 %v16866_v49  ;;  %9170 = vmatmul.mubr.bf16.gmra.mrb[108].mxu1 %v16868_v50 }
0x1a79   : > { %v7501_v7 = vmax.f32 %v7287_v3, 0.0  ;;  %v7503_v18 = vmax.f32 %v7400_v21, 0.0  ;;  %9080 = vmatprep.mubr.bf16.mxu0 %v16890_v63  ;;  %9177 = vmatprep.mubr.bf16.mxu1 %v16892_v11 }
0x1a7a   : > { %v17010_v51 = vpack.c.bf16 %v7500_v48, %v7484_v22  ;;  %v17012_v4 = vpack.c.bf16 %v7502_v9, %v7486_v62  ;;  %11022 = vmatpush3.bf16.msra.mxu0 %v12026_v58  ;;  %11086 = vmatpush3.bf16.msra.mxu1 %v12028_v34 }
0x1a7b   : > { %v17016_v46 = vpack.c.bf16 %v7501_v7, %v7485_v15  ;;  %v17018_v49 = vpack.c.bf16 %v7503_v18, %v7487_v16  ;;  %v7290_v50 = vpop.f32.mrb[4].mxu0  ;;  %v7403_v44 = vpop.f32.mrb[4].mxu1  ;;  %11023 = vmatprep.subr.bf16.mxu0 %v12029_v8  ;;  %11087 = vmatprep.subr.bf16.mxu1 %v12031_v40 }
0x1a7c   : > { %v7291_v63 = vadd.f32 %v7290_v50, %v16956_v32  ;;  %v7404_v11 = vadd.f32 %v7403_v44, %v16960_v35  ;;  %v7292_v43 = vpop.f32.mrb[5].mxu0  ;;  %v7405_v26 = vpop.f32.mrb[5].mxu1 }
0x1a7d   : > { %v7293_v27 = vadd.f32 %v7292_v43, %v16966_v28  ;;  %v7406_v29 = vadd.f32 %v7405_v26, %v16974_v38  ;;  %v7294_v24 = vpop.f32.mrb[6].mxu0  ;;  %v7407_v5 = vpop.f32.mrb[6].mxu1 }
0x1a7e   : > { %v7295_v39 = vadd.f32 %v7294_v24, %v16956_v32  ;;  %v7408_v53 = vadd.f32 %v7407_v5, %v16960_v35  ;;  %v7296_v41 = vpop.f32.mrb[7].mxu0  ;;  %v7409_v58 = vpop.f32.mrb[7].mxu1  ;;  %11024 = vmatpush3.bf16.msra.mxu0 %v12030_v6  ;;  %11088 = vmatpush3.bf16.msra.mxu1 %v12032_v42  ;;  %v7516_v21 = vmax.f32 %v7291_v63, 0.0  ;;  %v7518_v8 = vmax.f32 %v7404_v11, 0.0 }
0x1a7f   : > { %v7297_v34 = vadd.f32 %v7296_v41, %v16966_v28  ;;  %v7410_v3 = vadd.f32 %v7409_v58, %v16974_v38  ;;  %v7517_v62 = vmax.f32 %v7293_v27, 0.0  ;;  %v7519_v48 = vmax.f32 %v7406_v29, 0.0 }
0x1a80   : > { %v7532_v40 = vmax.f32 %v7295_v39, 0.0  ;;  %v7534_v22 = vmax.f32 %v7408_v53, 0.0  ;;  %9081 = vmatmul.mubr.bf16.gmra.mrb[112].mxu0 %v16886_v55  ;;  %9178 = vmatmul.mubr.bf16.gmra.mrb[112].mxu1 %v16888_v30 }
0x1a81   : > { %v7533_v9 = vmax.f32 %v7297_v34, 0.0  ;;  %v7535_v15 = vmax.f32 %v7410_v3, 0.0  ;;  %9088 = vmatprep.mubr.bf16.mxu0 %v16917_v60  ;;  %9185 = vmatprep.mubr.bf16.mxu1 %v16919_v13 }
0x1a82   : > { %v17032_v16 = vpack.c.bf16 %v7532_v40, %v7516_v21  ;;  %v17034_v7 = vpack.c.bf16 %v7534_v22, %v7518_v8 }
0x1a83   : > { %v17036_v18 = vpack.c.bf16 %v7533_v9, %v7517_v62  ;;  %v17038_v6 = vpack.c.bf16 %v7535_v15, %v7519_v48  ;;  %v7300_v42 = vpop.f32.mrb[8].mxu0  ;;  %v7413_v55 = vpop.f32.mrb[8].mxu1 }
0x1a84   : > { %v7301_v30 = vadd.f32 %v7300_v42, %v16956_v32  ;;  %v7414_v50 = vadd.f32 %v7413_v55, %v16960_v35  ;;  %v7302_v44 = vpop.f32.mrb[9].mxu0  ;;  %v7415_v63 = vpop.f32.mrb[9].mxu1 }
0x1a85   : > { %v7303_v60 = vadd.f32 %v7302_v44, %v16966_v28  ;;  %v7416_v13 = vadd.f32 %v7415_v63, %v16974_v38  ;;  %v7304_v11 = vpop.f32.mrb[10].mxu0  ;;  %v7417_v43 = vpop.f32.mrb[10].mxu1 }
0x1a86   : > { %v7305_v26 = vadd.f32 %v7304_v11, %v16956_v32  ;;  %v7418_v27 = vadd.f32 %v7417_v43, %v16960_v35  ;;  %v7306_v29 = vpop.f32.mrb[11].mxu0  ;;  %v7419_v24 = vpop.f32.mrb[11].mxu1  ;;  %v7548_v53 = vmax.f32 %v7301_v30, 0.0  ;;  %v7550_v41 = vmax.f32 %v7414_v50, 0.0 }
0x1a87   : > { %v7307_v5 = vadd.f32 %v7306_v29, %v16966_v28  ;;  %v7420_v39 = vadd.f32 %v7419_v24, %v16974_v38  ;;  %v7549_v3 = vmax.f32 %v7303_v60, 0.0  ;;  %v7551_v21 = vmax.f32 %v7416_v13, 0.0 }
0x1a88   : > { %v7564_v58 = vmax.f32 %v7305_v26, 0.0  ;;  %v7566_v34 = vmax.f32 %v7418_v27, 0.0  ;;  %9089 = vmatmul.mubr.bf16.gmra.mrb[116].mxu0 %v16910_v25  ;;  %9186 = vmatmul.mubr.bf16.gmra.mrb[116].mxu1 %v16912_v2 }
0x1a89   : > { %v7565_v8 = vmax.f32 %v7307_v5, 0.0  ;;  %v7567_v40 = vmax.f32 %v7420_v39, 0.0  ;;  %9096 = vmatprep.mubr.bf16.mxu0 %v16944_v54  ;;  %9193 = vmatprep.mubr.bf16.mxu1 %v16946_v23 }
0x1a8a   : > { %v17052_v22 = vpack.c.bf16 %v7564_v58, %v7548_v53  ;;  %v17054_v62 = vpack.c.bf16 %v7566_v34, %v7550_v41 }
0x1a8b   : > { %v17056_v48 = vpack.c.bf16 %v7565_v8, %v7549_v3  ;;  %v17058_v9 = vpack.c.bf16 %v7567_v40, %v7551_v21  ;;  %v7310_v15 = vpop.f32.mrb[12].mxu0  ;;  %v7423_v25 = vpop.f32.mrb[12].mxu1 }
0x1a8c   : > { %v7311_v2 = vadd.f32 %v7310_v15, %v16956_v32  ;;  %v7424_v42 = vadd.f32 %v7423_v25, %v16960_v35  ;;  %v7312_v55 = vpop.f32.mrb[13].mxu0  ;;  %v7425_v30 = vpop.f32.mrb[13].mxu1 }
0x1a8d   : > { %v7313_v54 = vadd.f32 %v7312_v55, %v16966_v28  ;;  %v7426_v23 = vadd.f32 %v7425_v30, %v16974_v38  ;;  %v7314_v50 = vpop.f32.mrb[14].mxu0  ;;  %v7427_v44 = vpop.f32.mrb[14].mxu1 }
0x1a8e   : > { %v7315_v63 = vadd.f32 %v7314_v50, %v16956_v32  ;;  %v7428_v60 = vadd.f32 %v7427_v44, %v16960_v35  ;;  %v7316_v13 = vpop.f32.mrb[15].mxu0  ;;  %v7429_v11 = vpop.f32.mrb[15].mxu1  ;;  %v7580_v27 = vmax.f32 %v7311_v2, 0.0  ;;  %v7582_v29 = vmax.f32 %v7424_v42, 0.0 }
0x1a8f   : > { %v7317_v43 = vadd.f32 %v7316_v13, %v16966_v28  ;;  %v7430_v26 = vadd.f32 %v7429_v11, %v16974_v38  ;;  %v7581_v39 = vmax.f32 %v7313_v54, 0.0  ;;  %v7583_v53 = vmax.f32 %v7426_v23, 0.0 }
0x1a90   : > { %v7596_v24 = vmax.f32 %v7315_v63, 0.0  ;;  %v7598_v5 = vmax.f32 %v7428_v60, 0.0  ;;  %9097 = vmatmul.mubr.bf16.gmra.mrb[120].mxu0 %v16938_v14  ;;  %9194 = vmatmul.mubr.bf16.gmra.mrb[120].mxu1 %v16940_v12 }
0x1a91   : > { %v7597_v41 = vmax.f32 %v7317_v43, 0.0  ;;  %v7599_v58 = vmax.f32 %v7430_v26, 0.0  ;;  %9104 = vmatprep.mubr.bf16.mxu0 %v16988_v57  ;;  %9201 = vmatprep.mubr.bf16.mxu1 %v16990_v61 }
0x1a92   : > { %v17072_v34 = vpack.c.bf16 %v7596_v24, %v7580_v27  ;;  %v17074_v3 = vpack.c.bf16 %v7598_v5, %v7582_v29 }
0x1a93   : > { %v17076_v21 = vpack.c.bf16 %v7597_v41, %v7581_v39  ;;  %v17078_v8 = vpack.c.bf16 %v7599_v58, %v7583_v53  ;;  %v7320_v40 = vpop.f32.mrb[16].mxu0  ;;  %v7433_v14 = vpop.f32.mrb[16].mxu1 }
0x1a94   : > { %v7321_v12 = vadd.f32 %v7320_v40, %v16956_v32  ;;  %v7434_v15 = vadd.f32 %v7433_v14, %v16960_v35  ;;  %v7322_v25 = vpop.f32.mrb[17].mxu0  ;;  %v7435_v2 = vpop.f32.mrb[17].mxu1 }
0x1a95   : > { %v7323_v57 = vadd.f32 %v7322_v25, %v16966_v28  ;;  %v7436_v61 = vadd.f32 %v7435_v2, %v16974_v38  ;;  %v7324_v42 = vpop.f32.mrb[18].mxu0  ;;  %v7437_v55 = vpop.f32.mrb[18].mxu1 }
0x1a96   : > { %v7325_v30 = vadd.f32 %v7324_v42, %v16956_v32  ;;  %v7438_v54 = vadd.f32 %v7437_v55, %v16960_v35  ;;  %v7326_v23 = vpop.f32.mrb[19].mxu0  ;;  %v7439_v50 = vpop.f32.mrb[19].mxu1  ;;  %v7612_v60 = vmax.f32 %v7321_v12, 0.0  ;;  %v7614_v13 = vmax.f32 %v7434_v15, 0.0 }
0x1a97   : > { %v7327_v44 = vadd.f32 %v7326_v23, %v16966_v28  ;;  %v7440_v63 = vadd.f32 %v7439_v50, %v16974_v38  ;;  %v7613_v26 = vmax.f32 %v7323_v57, 0.0  ;;  %v7615_v27 = vmax.f32 %v7436_v61, 0.0 }
0x1a98   : > { %v7628_v11 = vmax.f32 %v7325_v30, 0.0  ;;  %v7630_v43 = vmax.f32 %v7438_v54, 0.0  ;;  %9105 = vmatmul.mubr.bf16.gmra.mrb[124].mxu0 %v16982_v47  ;;  %9202 = vmatmul.mubr.bf16.gmra.mrb[124].mxu1 %v16984_v31 }
0x1a99   : > { %v7629_v29 = vmax.f32 %v7327_v44, 0.0  ;;  %v7631_v24 = vmax.f32 %v7440_v63, 0.0  ;;  %9242 = vmatprep.mubr.bf16.mxu0 %v17016_v46  ;;  %9339 = vmatprep.mubr.bf16.mxu1 %v17018_v49 }
0x1a9a   : > { %v17092_v5 = vpack.c.bf16 %v7628_v11, %v7612_v60  ;;  %v17094_v39 = vpack.c.bf16 %v7630_v43, %v7614_v13 }
0x1a9b   : > { %v17096_v53 = vpack.c.bf16 %v7629_v29, %v7613_v26  ;;  %v17098_v41 = vpack.c.bf16 %v7631_v24, %v7615_v27  ;;  %v7330_v58 = vpop.f32.mrb[20].mxu0  ;;  %v7443_v47 = vpop.f32.mrb[20].mxu1 }
0x1a9c   : > { %v7331_v31 = vadd.f32 %v7330_v58, %v16956_v32  ;;  %v7444_v40 = vadd.f32 %v7443_v47, %v16960_v35  ;;  %v7332_v14 = vpop.f32.mrb[21].mxu0  ;;  %v7445_v12 = vpop.f32.mrb[21].mxu1 }
0x1a9d   : > { %v7333_v46 = vadd.f32 %v7332_v14, %v16966_v28  ;;  %v7446_v49 = vadd.f32 %v7445_v12, %v16974_v38  ;;  %v7334_v15 = vpop.f32.mrb[22].mxu0  ;;  %v7447_v25 = vpop.f32.mrb[22].mxu1 }
0x1a9e   : > { %v7335_v2 = vadd.f32 %v7334_v15, %v16956_v32  ;;  %v7448_v57 = vadd.f32 %v7447_v25, %v16960_v35  ;;  %v7336_v61 = vpop.f32.mrb[23].mxu0  ;;  %v7449_v42 = vpop.f32.mrb[23].mxu1  ;;  %v7644_v54 = vmax.f32 %v7331_v31, 0.0  ;;  %v7646_v23 = vmax.f32 %v7444_v40, 0.0 }
0x1a9f   : > { %v7337_v55 = vadd.f32 %v7336_v61, %v16966_v28  ;;  %v7450_v30 = vadd.f32 %v7449_v42, %v16974_v38  ;;  %v7645_v63 = vmax.f32 %v7333_v46, 0.0  ;;  %v7647_v60 = vmax.f32 %v7446_v49, 0.0 }
0x1aa0   : > { %v7660_v50 = vmax.f32 %v7335_v2, 0.0  ;;  %v7662_v44 = vmax.f32 %v7448_v57, 0.0  ;;  %9243 = vmatmul.mubr.bf16.vlgmr.msra.gmra.mrb[128].mxu0 %v17010_v51  ;;  %9340 = vmatmul.mubr.bf16.vlgmr.msra.gmra.mrb[128].mxu1 %v17012_v4 }
0x1aa1   : > { %v7661_v13 = vmax.f32 %v7337_v55, 0.0  ;;  %v7663_v11 = vmax.f32 %v7450_v30, 0.0  ;;  %9250 = vmatprep.mubr.bf16.mxu0 %v17036_v18  ;;  %9347 = vmatprep.mubr.bf16.mxu1 %v17038_v6 }
0x1aa2   : > { %v17112_v43 = vpack.c.bf16 %v7660_v50, %v7644_v54  ;;  %v17114_v26 = vpack.c.bf16 %v7662_v44, %v7646_v23 }
0x1aa3   : > { %v17116_v27 = vpack.c.bf16 %v7661_v13, %v7645_v63  ;;  %v17118_v29 = vpack.c.bf16 %v7663_v11, %v7647_v60  ;;  %v7340_v24 = vpop.f32.mrb[24].mxu0  ;;  %v7453_v51 = vpop.f32.mrb[24].mxu1 }
0x1aa4   : > { %v7341_v4 = vadd.f32 %v7340_v24, %v16956_v32  ;;  %v7454_v58 = vadd.f32 %v7453_v51, %v16960_v35  ;;  %v7342_v47 = vpop.f32.mrb[25].mxu0  ;;  %v7455_v31 = vpop.f32.mrb[25].mxu1 }
0x1aa5   : > { %v7343_v18 = vadd.f32 %v7342_v47, %v16966_v28  ;;  %v7456_v6 = vadd.f32 %v7455_v31, %v16974_v38  ;;  %v7344_v40 = vpop.f32.mrb[26].mxu0  ;;  %v7457_v14 = vpop.f32.mrb[26].mxu1 }
0x1aa6   : > { %v7345_v12 = vadd.f32 %v7344_v40, %v16956_v32  ;;  %v7458_v46 = vadd.f32 %v7457_v14, %v16960_v35  ;;  %v7346_v49 = vpop.f32.mrb[27].mxu0  ;;  %v7459_v15 = vpop.f32.mrb[27].mxu1  ;;  %v7676_v57 = vmax.f32 %v7341_v4, 0.0  ;;  %v7678_v61 = vmax.f32 %v7454_v58, 0.0 }
0x1aa7   : > { %v7347_v25 = vadd.f32 %v7346_v49, %v16966_v28  ;;  %v7460_v2 = vadd.f32 %v7459_v15, %v16974_v38  ;;  %v7677_v30 = vmax.f32 %v7343_v18, 0.0  ;;  %v7679_v54 = vmax.f32 %v7456_v6, 0.0 }
0x1aa8   : > { %v7692_v42 = vmax.f32 %v7345_v12, 0.0  ;;  %v7694_v55 = vmax.f32 %v7458_v46, 0.0  ;;  %9251 = vmatmul.mubr.bf16.gmra.mrb[132].mxu0 %v17032_v16  ;;  %9348 = vmatmul.mubr.bf16.gmra.mrb[132].mxu1 %v17034_v7 }
0x1aa9   : > { %v7693_v23 = vmax.f32 %v7347_v25, 0.0  ;;  %v7695_v50 = vmax.f32 %v7460_v2, 0.0  ;;  %9258 = vmatprep.mubr.bf16.mxu0 %v17056_v48  ;;  %9355 = vmatprep.mubr.bf16.mxu1 %v17058_v9 }
0x1aaa   : > { %v17132_v44 = vpack.c.bf16 %v7692_v42, %v7676_v57  ;;  %v17134_v63 = vpack.c.bf16 %v7694_v55, %v7678_v61 }
0x1aab   : > { %v17136_v60 = vpack.c.bf16 %v7693_v23, %v7677_v30  ;;  %v17138_v13 = vpack.c.bf16 %v7695_v50, %v7679_v54  ;;  %v7350_v11 = vpop.f32.mrb[28].mxu0  ;;  %v7463_v16 = vpop.f32.mrb[28].mxu1  ;;  %v12674_v30 = vld [vmem:[%s12821_s13] sm:$0xff] }
0x1aac   : > { %v7351_v7 = vadd.f32 %v7350_v11, %v16956_v32  ;;  %v7464_v24 = vadd.f32 %v7463_v16, %v16960_v35  ;;  %v7352_v51 = vpop.f32.mrb[29].mxu0  ;;  %v7465_v4 = vpop.f32.mrb[29].mxu1 }
0x1aad   : > { %v7353_v48 = vadd.f32 %v7352_v51, %v16966_v28  ;;  %v7466_v9 = vadd.f32 %v7465_v4, %v16974_v38  ;;  %v7354_v58 = vpop.f32.mrb[30].mxu0  ;;  %v7467_v47 = vpop.f32.mrb[30].mxu1 }
0x1aae   : > { %v7355_v31 = vadd.f32 %v7354_v58, %v16956_v32  ;;  %v7468_v18 = vadd.f32 %v7467_v47, %v16960_v35  ;;  %v7356_v6 = vpop.f32.mrb[31].mxu0  ;;  %v7469_v40 = vpop.f32.mrb[31].mxu1  ;;  %v7708_v46 = vmax.f32 %v7351_v7, 0.0  ;;  %v7710_v49 = vmax.f32 %v7464_v24, 0.0 }
0x1aaf   : > { %v7357_v14 = vadd.f32 %v7356_v6, %v16966_v28  ;;  %v7470_v12 = vadd.f32 %v7469_v40, %v16974_v38  ;;  %v7709_v2 = vmax.f32 %v7353_v48, 0.0  ;;  %v7711_v57 = vmax.f32 %v7466_v9, 0.0 }
0x1ab0   : > { %v7724_v15 = vmax.f32 %v7355_v31, 0.0  ;;  %v7726_v25 = vmax.f32 %v7468_v18, 0.0  ;;  %9259 = vmatmul.mubr.bf16.gmra.mrb[136].mxu0 %v17052_v22  ;;  %9356 = vmatmul.mubr.bf16.gmra.mrb[136].mxu1 %v17054_v62  ;;  %v17162_v62 = vrot.slane %v12674_v30, %v16508_v45 }
0x1ab1   : > { %v7725_v32 = vmax.f32 %v7357_v14, 0.0  ;;  %v7727_v61 = vmax.f32 %v7470_v12, 0.0  ;;  %9266 = vmatprep.mubr.bf16.mxu0 %v17076_v21  ;;  %9363 = vmatprep.mubr.bf16.mxu1 %v17078_v8 }
0x1ab2   : > { %v17152_v35 = vpack.c.bf16 %v7724_v15, %v7708_v46  ;;  %v17154_v28 = vpack.c.bf16 %v7726_v25, %v7710_v49 }
0x1ab3   : > { %v17156_v38 = vpack.c.bf16 %v7725_v32, %v7709_v2  ;;  %v17158_v42 = vpack.c.bf16 %v7727_v61, %v7711_v57  ;;  %v10641_v55 = vpop.f32.mrb[32].mxu0  ;;  %v10705_v22 = vpop.f32.mrb[32].mxu1 }
0x1ab4   : > { %v10642_v54 = vpop.f32.mrb[33].mxu0  ;;  %v10706_v23 = vpop.f32.mrb[33].mxu1 }
0x1ab5   : > { %v10643_v50 = vadd.f32 %v10642_v54, %v10641_v55  ;;  %v10707_v21 = vadd.f32 %v10706_v23, %v10705_v22  ;;  %v10644_v11 = vpop.f32.mrb[34].mxu0  ;;  %v10708_v8 = vpop.f32.mrb[34].mxu1 }
0x1ab6   : > { %v10645_v16 = vpop.f32.mrb[35].mxu0  ;;  %v10709_v7 = vpop.f32.mrb[35].mxu1 }
0x1ab7   : > { %v8663_v24 = vadd.f32 %v10643_v50, %v17162_v62  ;;  %v10646_v51 = vadd.f32 %v10645_v16, %v10644_v11  ;;  %v10710_v4 = vadd.f32 %v10709_v7, %v10708_v8 }
0x1ab8   : > { %9267 = vmatmul.mubr.bf16.gmra.mrb[140].mxu0 %v17072_v34  ;;  %9364 = vmatmul.mubr.bf16.gmra.mrb[140].mxu1 %v17074_v3 }
0x1ab9   : > { %v17167_v48 = vadd.f32 %v10707_v21, %v8663_v24  ;;  %v8666_v45 = vadd.f32 %v10646_v51, %v17162_v62  ;;  %9274 = vmatprep.mubr.bf16.mxu0 %v17096_v53  ;;  %9371 = vmatprep.mubr.bf16.mxu1 %v17098_v41 }
0x1abb   : > { %v17172_v9 = vadd.f32 %v10710_v4, %v8666_v45  ;;  %v10647_v58 = vpop.f32.mrb[36].mxu0  ;;  %v10711_v47 = vpop.f32.mrb[36].mxu1 }
0x1abc   : > { %v10648_v31 = vpop.f32.mrb[37].mxu0  ;;  %v10712_v18 = vpop.f32.mrb[37].mxu1 }
0x1abd   : > { %v10649_v6 = vadd.f32 %v10648_v31, %v10647_v58  ;;  %v10713_v40 = vadd.f32 %v10712_v18, %v10711_v47  ;;  %v10650_v14 = vpop.f32.mrb[38].mxu0  ;;  %v10714_v34 = vpop.f32.mrb[38].mxu1 }
0x1abe   : > { %v10651_v12 = vpop.f32.mrb[39].mxu0  ;;  %v10715_v3 = vpop.f32.mrb[39].mxu1 }
0x1abf   : > { %v8671_v46 = vadd.f32 %v10649_v6, %v17162_v62  ;;  %v10652_v49 = vadd.f32 %v10651_v12, %v10650_v14  ;;  %v10716_v15 = vadd.f32 %v10715_v3, %v10714_v34 }
0x1ac0   : > { %9275 = vmatmul.mubr.bf16.gmra.mrb[144].mxu0 %v17092_v5  ;;  %9372 = vmatmul.mubr.bf16.gmra.mrb[144].mxu1 %v17094_v39 }
0x1ac1   : > { %v17177_v53 = vadd.f32 %v10713_v40, %v8671_v46  ;;  %v8674_v41 = vadd.f32 %v10652_v49, %v17162_v62  ;;  %9282 = vmatprep.mubr.bf16.mxu0 %v17116_v27  ;;  %9379 = vmatprep.mubr.bf16.mxu1 %v17118_v29 }
0x1ac3   : > { %v17182_v25 = vadd.f32 %v10716_v15, %v8674_v41  ;;  %v10653_v2 = vpop.f32.mrb[40].mxu0  ;;  %v10717_v57 = vpop.f32.mrb[40].mxu1 }
0x1ac4   : > { %v10654_v32 = vpop.f32.mrb[41].mxu0  ;;  %v10718_v61 = vpop.f32.mrb[41].mxu1 }
0x1ac5   : > { %v10655_v55 = vadd.f32 %v10654_v32, %v10653_v2  ;;  %v10719_v22 = vadd.f32 %v10718_v61, %v10717_v57  ;;  %v10656_v30 = vpop.f32.mrb[42].mxu0  ;;  %v10720_v5 = vpop.f32.mrb[42].mxu1 }
0x1ac6   : > { %v10657_v54 = vpop.f32.mrb[43].mxu0  ;;  %v10721_v39 = vpop.f32.mrb[43].mxu1 }
0x1ac7   : > { %v8679_v23 = vadd.f32 %v10655_v55, %v17162_v62  ;;  %v10658_v50 = vadd.f32 %v10657_v54, %v10656_v30  ;;  %v10722_v21 = vadd.f32 %v10721_v39, %v10720_v5 }
0x1ac8   : > { %9283 = vmatmul.mubr.bf16.gmra.mrb[148].mxu0 %v17112_v43  ;;  %9380 = vmatmul.mubr.bf16.gmra.mrb[148].mxu1 %v17114_v26 }
0x1ac9   : > { %v17187_v27 = vadd.f32 %v10719_v22, %v8679_v23  ;;  %v8682_v29 = vadd.f32 %v10658_v50, %v17162_v62  ;;  %9290 = vmatprep.mubr.bf16.mxu0 %v17136_v60  ;;  %9387 = vmatprep.mubr.bf16.mxu1 %v17138_v13 }
0x1acb   : > { %v17192_v11 = vadd.f32 %v10722_v21, %v8682_v29  ;;  %v10659_v8 = vpop.f32.mrb[44].mxu0  ;;  %v10723_v16 = vpop.f32.mrb[44].mxu1 }
0x1acc   : > { %v10660_v7 = vpop.f32.mrb[45].mxu0  ;;  %v10724_v24 = vpop.f32.mrb[45].mxu1 }
0x1acd   : > { %v10661_v51 = vadd.f32 %v10660_v7, %v10659_v8  ;;  %v10725_v4 = vadd.f32 %v10724_v24, %v10723_v16  ;;  %v10662_v45 = vpop.f32.mrb[46].mxu0  ;;  %v10726_v43 = vpop.f32.mrb[46].mxu1 }
0x1ace   : > { %v10663_v58 = vpop.f32.mrb[47].mxu0  ;;  %v10727_v26 = vpop.f32.mrb[47].mxu1 }
0x1acf   : > { %v8687_v47 = vadd.f32 %v10661_v51, %v17162_v62  ;;  %v10664_v31 = vadd.f32 %v10663_v58, %v10662_v45  ;;  %v10728_v18 = vadd.f32 %v10727_v26, %v10726_v43 }
0x1ad0   : > { %9291 = vmatmul.mubr.bf16.gmra.mrb[152].mxu0 %v17132_v44  ;;  %9388 = vmatmul.mubr.bf16.gmra.mrb[152].mxu1 %v17134_v63 }
0x1ad1   : > { %v17197_v60 = vadd.f32 %v10725_v4, %v8687_v47  ;;  %v8690_v13 = vadd.f32 %v10664_v31, %v17162_v62  ;;  %9298 = vmatprep.mubr.bf16.mxu0 %v17156_v38  ;;  %9395 = vmatprep.mubr.bf16.mxu1 %v17158_v42 }
0x1ad3   : > { %v17202_v6 = vadd.f32 %v10728_v18, %v8690_v13  ;;  %v10665_v40 = vpop.f32.mrb[48].mxu0  ;;  %v10729_v14 = vpop.f32.mrb[48].mxu1 }
0x1ad4   : > { %v10666_v34 = vpop.f32.mrb[49].mxu0  ;;  %v10730_v12 = vpop.f32.mrb[49].mxu1 }
0x1ad5   : > { %v10667_v3 = vadd.f32 %v10666_v34, %v10665_v40  ;;  %v10731_v46 = vadd.f32 %v10730_v12, %v10729_v14  ;;  %v10668_v49 = vpop.f32.mrb[50].mxu0  ;;  %v10732_v44 = vpop.f32.mrb[50].mxu1 }
0x1ad6   : > { %v10669_v15 = vpop.f32.mrb[51].mxu0  ;;  %v10733_v63 = vpop.f32.mrb[51].mxu1 }
0x1ad7   : > { %v8695_v41 = vadd.f32 %v10667_v3, %v17162_v62  ;;  %v10670_v2 = vadd.f32 %v10669_v15, %v10668_v49  ;;  %v10734_v57 = vadd.f32 %v10733_v63, %v10732_v44 }
0x1ad8   : > { %9299 = vmatmul.mubr.bf16.gmra.mrb[156].mxu0 %v17152_v35  ;;  %9396 = vmatmul.mubr.bf16.gmra.mrb[156].mxu1 %v17154_v28 }
0x1ad9   : > { %v17207_v38 = vadd.f32 %v10731_v46, %v8695_v41  ;;  %v8698_v42 = vadd.f32 %v10670_v2, %v17162_v62 }
0x1adb   : > { %v17210_v32 = vadd.f32 %v10734_v57, %v8698_v42  ;;  %v10671_v61 = vpop.f32.mrb[52].mxu0  ;;  %v10735_v55 = vpop.f32.mrb[52].mxu1 }
0x1adc   : > { %v10672_v22 = vpop.f32.mrb[53].mxu0  ;;  %v10736_v30 = vpop.f32.mrb[53].mxu1 }
0x1add   : > { %v10673_v5 = vadd.f32 %v10672_v22, %v10671_v61  ;;  %v10737_v54 = vadd.f32 %v10736_v30, %v10735_v55  ;;  %v10674_v39 = vpop.f32.mrb[54].mxu0  ;;  %v10738_v23 = vpop.f32.mrb[54].mxu1 }
0x1ade   : > { %v10675_v50 = vpop.f32.mrb[55].mxu0  ;;  %v10739_v21 = vpop.f32.mrb[55].mxu1 }
0x1adf   : > { %v8703_v35 = vadd.f32 %v10673_v5, %v17162_v62  ;;  %v10676_v29 = vadd.f32 %v10675_v50, %v10674_v39  ;;  %v10740_v28 = vadd.f32 %v10739_v21, %v10738_v23 }
0x1ae1   : > { %v17213_v8 = vadd.f32 %v10737_v54, %v8703_v35  ;;  %v8706_v16 = vadd.f32 %v10676_v29, %v17162_v62 }
0x1ae3   : > { %v17216_v7 = vadd.f32 %v10740_v28, %v8706_v16  ;;  %v10677_v24 = vpop.f32.mrb[56].mxu0  ;;  %v10741_v51 = vpop.f32.mrb[56].mxu1 }
0x1ae4   : > { %v10678_v4 = vpop.f32.mrb[57].mxu0  ;;  %v10742_v45 = vpop.f32.mrb[57].mxu1 }
0x1ae5   : > { %v10679_v43 = vadd.f32 %v10678_v4, %v10677_v24  ;;  %v10743_v58 = vadd.f32 %v10742_v45, %v10741_v51  ;;  %v10680_v26 = vpop.f32.mrb[58].mxu0  ;;  %v10744_v47 = vpop.f32.mrb[58].mxu1 }
0x1ae6   : > { %v10681_v31 = vpop.f32.mrb[59].mxu0  ;;  %v10745_v18 = vpop.f32.mrb[59].mxu1 }
0x1ae7   : > { %v8711_v13 = vadd.f32 %v10679_v43, %v17162_v62  ;;  %v10682_v40 = vadd.f32 %v10681_v31, %v10680_v26  ;;  %v10746_v14 = vadd.f32 %v10745_v18, %v10744_v47 }
0x1ae9   : > { %v17219_v34 = vadd.f32 %v10743_v58, %v8711_v13  ;;  %v8714_v12 = vadd.f32 %v10682_v40, %v17162_v62 }
0x1aeb   : > { %v17222_v3 = vadd.f32 %v10746_v14, %v8714_v12  ;;  %v10683_v46 = vpop.f32.mrb[60].mxu0  ;;  %v10747_v49 = vpop.f32.mrb[60].mxu1 }
0x1aec   : > { %v10684_v44 = vpop.f32.mrb[61].mxu0  ;;  %v10748_v15 = vpop.f32.mrb[61].mxu1 }
0x1aed   : > { %v10685_v63 = vadd.f32 %v10684_v44, %v10683_v46  ;;  %v10749_v41 = vadd.f32 %v10748_v15, %v10747_v49  ;;  %v10686_v2 = vpop.f32.mrb[62].mxu0  ;;  %v10750_v57 = vpop.f32.mrb[62].mxu1 }
0x1aee   : > { %v10687_v42 = vpop.f32.mrb[63].mxu0  ;;  %v10751_v61 = vpop.f32.mrb[63].mxu1 }
0x1aef   : > { %v8719_v55 = vadd.f32 %v10685_v63, %v17162_v62  ;;  %v10688_v22 = vadd.f32 %v10687_v42, %v10686_v2  ;;  %v10752_v30 = vadd.f32 %v10751_v61, %v10750_v57 }
0x1af1   : > { %v17225_v5 = vadd.f32 %v10749_v41, %v8719_v55  ;;  %v8722_v54 = vadd.f32 %v10688_v22, %v17162_v62 }
0x1af3   : > { %v17228_v39 = vadd.f32 %v10752_v30, %v8722_v54  ;;  %v10769_v23 = vpop.f32.mrb[64].mxu0  ;;  %v10833_v50 = vpop.f32.mrb[64].mxu1 }
0x1af4   : > { %v10770_v21 = vpop.f32.mrb[65].mxu0  ;;  %v10834_v35 = vpop.f32.mrb[65].mxu1 }
0x1af5   : > { %v10771_v29 = vadd.f32 %v10770_v21, %v10769_v23  ;;  %v10835_v28 = vadd.f32 %v10834_v35, %v10833_v50  ;;  %v10772_v16 = vpop.f32.mrb[66].mxu0  ;;  %v10836_v24 = vpop.f32.mrb[66].mxu1 }
0x1af6   : > { %v10773_v51 = vpop.f32.mrb[67].mxu0  ;;  %v10837_v4 = vpop.f32.mrb[67].mxu1 }
0x1af7   : > { %v8857_v45 = vadd.f32 %v10771_v29, %v17167_v48  ;;  %v10774_v43 = vadd.f32 %v10773_v51, %v10772_v16  ;;  %v10838_v58 = vadd.f32 %v10837_v4, %v10836_v24 }
0x1af9   : > { %v17231_v26 = vadd.f32 %v10835_v28, %v8857_v45  ;;  %v8860_v62 = vadd.f32 %v10774_v43, %v17172_v9 }
0x1afb   : > { %v17234_v47 = vadd.f32 %v10838_v58, %v8860_v62  ;;  %v10775_v31 = vpop.f32.mrb[68].mxu0  ;;  %v10839_v18 = vpop.f32.mrb[68].mxu1 }
0x1afc   : > { %v10776_v13 = vpop.f32.mrb[69].mxu0  ;;  %v10840_v40 = vpop.f32.mrb[69].mxu1 }
0x1afd   : > { %v10777_v14 = vadd.f32 %v10776_v13, %v10775_v31  ;;  %v10841_v12 = vadd.f32 %v10840_v40, %v10839_v18  ;;  %v10778_v46 = vpop.f32.mrb[70].mxu0  ;;  %v10842_v49 = vpop.f32.mrb[70].mxu1 }
0x1afe   : > { %v10779_v44 = vpop.f32.mrb[71].mxu0  ;;  %v10843_v15 = vpop.f32.mrb[71].mxu1 }
0x1aff   : > { %v8865_v48 = vadd.f32 %v10777_v14, %v17177_v53  ;;  %v10780_v63 = vadd.f32 %v10779_v44, %v10778_v46  ;;  %v10844_v41 = vadd.f32 %v10843_v15, %v10842_v49 }
0x1b01   : > { %v17237_v2 = vadd.f32 %v10841_v12, %v8865_v48  ;;  %v8868_v9 = vadd.f32 %v10780_v63, %v17182_v25 }
0x1b03   : > { %v17240_v57 = vadd.f32 %v10844_v41, %v8868_v9  ;;  %v10781_v42 = vpop.f32.mrb[72].mxu0  ;;  %v10845_v61 = vpop.f32.mrb[72].mxu1 }
0x1b04   : > { %v10782_v55 = vpop.f32.mrb[73].mxu0  ;;  %v10846_v22 = vpop.f32.mrb[73].mxu1 }
0x1b05   : > { %v10783_v30 = vadd.f32 %v10782_v55, %v10781_v42  ;;  %v10847_v54 = vadd.f32 %v10846_v22, %v10845_v61  ;;  %v10784_v23 = vpop.f32.mrb[74].mxu0  ;;  %v10848_v50 = vpop.f32.mrb[74].mxu1 }
0x1b06   : > { %v10785_v21 = vpop.f32.mrb[75].mxu0  ;;  %v10849_v35 = vpop.f32.mrb[75].mxu1 }
0x1b07   : > { %v8873_v53 = vadd.f32 %v10783_v30, %v17187_v27  ;;  %v10786_v29 = vadd.f32 %v10785_v21, %v10784_v23  ;;  %v10850_v28 = vadd.f32 %v10849_v35, %v10848_v50 }
0x1b09   : > { %v17243_v16 = vadd.f32 %v10847_v54, %v8873_v53  ;;  %v8876_v25 = vadd.f32 %v10786_v29, %v17192_v11 }
0x1b0b   : > { %v17246_v24 = vadd.f32 %v10850_v28, %v8876_v25  ;;  %v10787_v51 = vpop.f32.mrb[76].mxu0  ;;  %v10851_v4 = vpop.f32.mrb[76].mxu1 }
0x1b0c   : > { %v10788_v45 = vpop.f32.mrb[77].mxu0  ;;  %v10852_v43 = vpop.f32.mrb[77].mxu1 }
0x1b0d   : > { %v10789_v58 = vadd.f32 %v10788_v45, %v10787_v51  ;;  %v10853_v62 = vadd.f32 %v10852_v43, %v10851_v4  ;;  %v10790_v31 = vpop.f32.mrb[78].mxu0  ;;  %v10854_v18 = vpop.f32.mrb[78].mxu1 }
0x1b0e   : > { %v10791_v13 = vpop.f32.mrb[79].mxu0  ;;  %v10855_v40 = vpop.f32.mrb[79].mxu1 }
0x1b0f   : > { %v8881_v27 = vadd.f32 %v10789_v58, %v17197_v60  ;;  %v10792_v14 = vadd.f32 %v10791_v13, %v10790_v31  ;;  %v10856_v12 = vadd.f32 %v10855_v40, %v10854_v18 }
0x1b11   : > { %v17249_v46 = vadd.f32 %v10853_v62, %v8881_v27  ;;  %v8884_v11 = vadd.f32 %v10792_v14, %v17202_v6 }
0x1b13   : > { %v17252_v49 = vadd.f32 %v10856_v12, %v8884_v11  ;;  %v10793_v44 = vpop.f32.mrb[80].mxu0  ;;  %v10857_v15 = vpop.f32.mrb[80].mxu1 }
0x1b14   : > { %v10794_v48 = vpop.f32.mrb[81].mxu0  ;;  %v10858_v63 = vpop.f32.mrb[81].mxu1 }
0x1b15   : > { %v10795_v41 = vadd.f32 %v10794_v48, %v10793_v44  ;;  %v10859_v9 = vadd.f32 %v10858_v63, %v10857_v15  ;;  %v10796_v42 = vpop.f32.mrb[82].mxu0  ;;  %v10860_v61 = vpop.f32.mrb[82].mxu1 }
0x1b16   : > { %v10797_v55 = vpop.f32.mrb[83].mxu0  ;;  %v10861_v22 = vpop.f32.mrb[83].mxu1 }
0x1b17   : > { %v8889_v60 = vadd.f32 %v10795_v41, %v17207_v38  ;;  %v10798_v30 = vadd.f32 %v10797_v55, %v10796_v42  ;;  %v10862_v54 = vadd.f32 %v10861_v22, %v10860_v61 }
0x1b19   : > { %v17255_v23 = vadd.f32 %v10859_v9, %v8889_v60  ;;  %v8892_v6 = vadd.f32 %v10798_v30, %v17210_v32 }
0x1b1b   : > { %v17258_v50 = vadd.f32 %v10862_v54, %v8892_v6  ;;  %v10799_v21 = vpop.f32.mrb[84].mxu0  ;;  %v10863_v35 = vpop.f32.mrb[84].mxu1 }
0x1b1c   : > { %v10800_v53 = vpop.f32.mrb[85].mxu0  ;;  %v10864_v29 = vpop.f32.mrb[85].mxu1 }
0x1b1d   : > { %v10801_v28 = vadd.f32 %v10800_v53, %v10799_v21  ;;  %v10865_v25 = vadd.f32 %v10864_v29, %v10863_v35  ;;  %v10802_v51 = vpop.f32.mrb[86].mxu0  ;;  %v10866_v4 = vpop.f32.mrb[86].mxu1 }
0x1b1e   : > { %v10803_v45 = vpop.f32.mrb[87].mxu0  ;;  %v10867_v43 = vpop.f32.mrb[87].mxu1 }
0x1b1f   : > { %v8897_v38 = vadd.f32 %v10801_v28, %v17213_v8  ;;  %v10804_v58 = vadd.f32 %v10803_v45, %v10802_v51  ;;  %v10868_v62 = vadd.f32 %v10867_v43, %v10866_v4 }
0x1b21   : > { %v17261_v31 = vadd.f32 %v10865_v25, %v8897_v38  ;;  %v8900_v32 = vadd.f32 %v10804_v58, %v17216_v7 }
0x1b23   : > { %v17264_v18 = vadd.f32 %v10868_v62, %v8900_v32  ;;  %v10805_v13 = vpop.f32.mrb[88].mxu0  ;;  %v10869_v40 = vpop.f32.mrb[88].mxu1 }
0x1b24   : > { %v10806_v27 = vpop.f32.mrb[89].mxu0  ;;  %v10870_v14 = vpop.f32.mrb[89].mxu1 }
0x1b25   : > { %v10807_v12 = vadd.f32 %v10806_v27, %v10805_v13  ;;  %v10871_v11 = vadd.f32 %v10870_v14, %v10869_v40  ;;  %v10808_v44 = vpop.f32.mrb[90].mxu0  ;;  %v10872_v15 = vpop.f32.mrb[90].mxu1 }
0x1b26   : > { %v10809_v48 = vpop.f32.mrb[91].mxu0  ;;  %v10873_v63 = vpop.f32.mrb[91].mxu1 }
0x1b27   : > { %v8905_v8 = vadd.f32 %v10807_v12, %v17219_v34  ;;  %v10810_v41 = vadd.f32 %v10809_v48, %v10808_v44  ;;  %v10874_v9 = vadd.f32 %v10873_v63, %v10872_v15 }
0x1b29   : > { %v17267_v42 = vadd.f32 %v10871_v11, %v8905_v8  ;;  %v8908_v7 = vadd.f32 %v10810_v41, %v17222_v3 }
0x1b2b   : > { %v17270_v61 = vadd.f32 %v10874_v9, %v8908_v7  ;;  %v10811_v55 = vpop.f32.mrb[92].mxu0  ;;  %v10875_v22 = vpop.f32.mrb[92].mxu1 }
0x1b2c   : > { %v10812_v60 = vpop.f32.mrb[93].mxu0  ;;  %v10876_v30 = vpop.f32.mrb[93].mxu1 }
0x1b2d   : > { %v10813_v54 = vadd.f32 %v10812_v60, %v10811_v55  ;;  %v10877_v6 = vadd.f32 %v10876_v30, %v10875_v22  ;;  %v10814_v21 = vpop.f32.mrb[94].mxu0  ;;  %v10878_v35 = vpop.f32.mrb[94].mxu1 }
0x1b2e   : > { %v10815_v53 = vpop.f32.mrb[95].mxu0  ;;  %v10879_v29 = vpop.f32.mrb[95].mxu1 }
0x1b2f   : > { %v8913_v34 = vadd.f32 %v10813_v54, %v17225_v5  ;;  %v10816_v28 = vadd.f32 %v10815_v53, %v10814_v21  ;;  %v10880_v25 = vadd.f32 %v10879_v29, %v10878_v35 }
0x1b31   : > { %v17273_v51 = vadd.f32 %v10877_v6, %v8913_v34  ;;  %v8916_v3 = vadd.f32 %v10816_v28, %v17228_v39 }
0x1b33   : > { %v17276_v4 = vadd.f32 %v10880_v25, %v8916_v3  ;;  %v10897_v45 = vpop.f32.mrb[96].mxu0  ;;  %v10961_v43 = vpop.f32.mrb[96].mxu1 }
0x1b34   : > { %v10898_v38 = vpop.f32.mrb[97].mxu0  ;;  %v10962_v58 = vpop.f32.mrb[97].mxu1 }
0x1b35   : > { %v10899_v62 = vadd.f32 %v10898_v38, %v10897_v45  ;;  %v10963_v32 = vadd.f32 %v10962_v58, %v10961_v43  ;;  %v10900_v13 = vpop.f32.mrb[98].mxu0  ;;  %v10964_v40 = vpop.f32.mrb[98].mxu1 }
0x1b36   : > { %v10901_v27 = vpop.f32.mrb[99].mxu0  ;;  %v10965_v14 = vpop.f32.mrb[99].mxu1 }
0x1b37   : > { %v9051_v5 = vadd.f32 %v10899_v62, %v17231_v26  ;;  %v10902_v12 = vadd.f32 %v10901_v27, %v10900_v13  ;;  %v10966_v11 = vadd.f32 %v10965_v14, %v10964_v40 }
0x1b39   : > { %v17279_v44 = vadd.f32 %v10963_v32, %v9051_v5  ;;  %v9054_v39 = vadd.f32 %v10902_v12, %v17234_v47 }
0x1b3b   : > { %v17282_v15 = vadd.f32 %v10966_v11, %v9054_v39  ;;  %v10903_v48 = vpop.f32.mrb[100].mxu0  ;;  %v10967_v63 = vpop.f32.mrb[100].mxu1 }
0x1b3c   : > { %v10904_v8 = vpop.f32.mrb[101].mxu0  ;;  %v10968_v41 = vpop.f32.mrb[101].mxu1 }
0x1b3d   : > { %v10905_v9 = vadd.f32 %v10904_v8, %v10903_v48  ;;  %v10969_v7 = vadd.f32 %v10968_v41, %v10967_v63  ;;  %v10906_v55 = vpop.f32.mrb[102].mxu0  ;;  %v10970_v22 = vpop.f32.mrb[102].mxu1 }
0x1b3e   : > { %v10907_v60 = vpop.f32.mrb[103].mxu0  ;;  %v10971_v30 = vpop.f32.mrb[103].mxu1 }
0x1b3f   : > { %v9059_v26 = vadd.f32 %v10905_v9, %v17237_v2  ;;  %v10908_v54 = vadd.f32 %v10907_v60, %v10906_v55  ;;  %v10972_v6 = vadd.f32 %v10971_v30, %v10970_v22 }
0x1b41   : > { %v17285_v21 = vadd.f32 %v10969_v7, %v9059_v26  ;;  %v9062_v47 = vadd.f32 %v10908_v54, %v17240_v57 }
0x1b43   : > { %v17288_v35 = vadd.f32 %v10972_v6, %v9062_v47  ;;  %v10909_v53 = vpop.f32.mrb[104].mxu0  ;;  %v10973_v29 = vpop.f32.mrb[104].mxu1 }
0x1b44   : > { %v10910_v34 = vpop.f32.mrb[105].mxu0  ;;  %v10974_v28 = vpop.f32.mrb[105].mxu1 }
0x1b45   : > { %v10911_v25 = vadd.f32 %v10910_v34, %v10909_v53  ;;  %v10975_v3 = vadd.f32 %v10974_v28, %v10973_v29  ;;  %v10912_v45 = vpop.f32.mrb[106].mxu0  ;;  %v10976_v43 = vpop.f32.mrb[106].mxu1 }
0x1b46   : > { %v10913_v38 = vpop.f32.mrb[107].mxu0  ;;  %v10977_v58 = vpop.f32.mrb[107].mxu1 }
0x1b47   : > { %v9067_v2 = vadd.f32 %v10911_v25, %v17243_v16  ;;  %v10914_v62 = vadd.f32 %v10913_v38, %v10912_v45  ;;  %v10978_v32 = vadd.f32 %v10977_v58, %v10976_v43 }
0x1b49   : > { %v17291_v13 = vadd.f32 %v10975_v3, %v9067_v2  ;;  %v9070_v57 = vadd.f32 %v10914_v62, %v17246_v24 }
0x1b4b   : > { %v17294_v40 = vadd.f32 %v10978_v32, %v9070_v57  ;;  %v10915_v27 = vpop.f32.mrb[108].mxu0  ;;  %v10979_v14 = vpop.f32.mrb[108].mxu1 }
0x1b4c   : > { %v10916_v5 = vpop.f32.mrb[109].mxu0  ;;  %v10980_v12 = vpop.f32.mrb[109].mxu1 }
0x1b4d   : > { %v10917_v11 = vadd.f32 %v10916_v5, %v10915_v27  ;;  %v10981_v39 = vadd.f32 %v10980_v12, %v10979_v14  ;;  %v10918_v48 = vpop.f32.mrb[110].mxu0  ;;  %v10982_v63 = vpop.f32.mrb[110].mxu1 }
0x1b4e   : > { %v10919_v8 = vpop.f32.mrb[111].mxu0  ;;  %v10983_v41 = vpop.f32.mrb[111].mxu1 }
0x1b4f   : > { %v9075_v16 = vadd.f32 %v10917_v11, %v17249_v46  ;;  %v10920_v9 = vadd.f32 %v10919_v8, %v10918_v48  ;;  %v10984_v7 = vadd.f32 %v10983_v41, %v10982_v63 }
0x1b51   : > { %v17297_v55 = vadd.f32 %v10981_v39, %v9075_v16  ;;  %v9078_v24 = vadd.f32 %v10920_v9, %v17252_v49 }
0x1b53   : > { %v17300_v22 = vadd.f32 %v10984_v7, %v9078_v24  ;;  %v10921_v60 = vpop.f32.mrb[112].mxu0  ;;  %v10985_v30 = vpop.f32.mrb[112].mxu1 }
0x1b54   : > { %v10922_v26 = vpop.f32.mrb[113].mxu0  ;;  %v10986_v54 = vpop.f32.mrb[113].mxu1 }
0x1b55   : > { %v10923_v6 = vadd.f32 %v10922_v26, %v10921_v60  ;;  %v10987_v47 = vadd.f32 %v10986_v54, %v10985_v30  ;;  %v10924_v53 = vpop.f32.mrb[114].mxu0  ;;  %v10988_v29 = vpop.f32.mrb[114].mxu1 }
0x1b56   : > { %v10925_v34 = vpop.f32.mrb[115].mxu0  ;;  %v10989_v28 = vpop.f32.mrb[115].mxu1 }
0x1b57   : > { %v9083_v46 = vadd.f32 %v10923_v6, %v17255_v23  ;;  %v10926_v25 = vadd.f32 %v10925_v34, %v10924_v53  ;;  %v10990_v3 = vadd.f32 %v10989_v28, %v10988_v29 }
0x1b59   : > { %v17303_v45 = vadd.f32 %v10987_v47, %v9083_v46  ;;  %v9086_v49 = vadd.f32 %v10926_v25, %v17258_v50 }
0x1b5b   : > { %v17306_v43 = vadd.f32 %v10990_v3, %v9086_v49  ;;  %v10927_v38 = vpop.f32.mrb[116].mxu0  ;;  %v10991_v58 = vpop.f32.mrb[116].mxu1 }
0x1b5c   : > { %v10928_v2 = vpop.f32.mrb[117].mxu0  ;;  %v10992_v62 = vpop.f32.mrb[117].mxu1 }
0x1b5d   : > { %v10929_v32 = vadd.f32 %v10928_v2, %v10927_v38  ;;  %v10993_v57 = vadd.f32 %v10992_v62, %v10991_v58  ;;  %v10930_v27 = vpop.f32.mrb[118].mxu0  ;;  %v10994_v14 = vpop.f32.mrb[118].mxu1 }
0x1b5e   : > { %v10931_v5 = vpop.f32.mrb[119].mxu0  ;;  %v10995_v12 = vpop.f32.mrb[119].mxu1 }
0x1b5f   : > { %v9091_v23 = vadd.f32 %v10929_v32, %v17261_v31  ;;  %v10932_v11 = vadd.f32 %v10931_v5, %v10930_v27  ;;  %v10996_v39 = vadd.f32 %v10995_v12, %v10994_v14 }
0x1b61   : > { %v17309_v48 = vadd.f32 %v10993_v57, %v9091_v23  ;;  %v9094_v50 = vadd.f32 %v10932_v11, %v17264_v18 }
0x1b63   : > { %v17312_v63 = vadd.f32 %v10996_v39, %v9094_v50  ;;  %v10933_v8 = vpop.f32.mrb[120].mxu0  ;;  %v10997_v41 = vpop.f32.mrb[120].mxu1 }
0x1b64   : > { %v10934_v16 = vpop.f32.mrb[121].mxu0  ;;  %v10998_v9 = vpop.f32.mrb[121].mxu1 }
0x1b65   : > { %v10935_v7 = vadd.f32 %v10934_v16, %v10933_v8  ;;  %v10999_v24 = vadd.f32 %v10998_v9, %v10997_v41  ;;  %v10936_v60 = vpop.f32.mrb[122].mxu0  ;;  %v11000_v30 = vpop.f32.mrb[122].mxu1 }
0x1b66   : > { %v10937_v26 = vpop.f32.mrb[123].mxu0  ;;  %v11001_v54 = vpop.f32.mrb[123].mxu1 }
0x1b67   : > { %v9099_v31 = vadd.f32 %v10935_v7, %v17267_v42  ;;  %v10938_v6 = vadd.f32 %v10937_v26, %v10936_v60  ;;  %v11002_v47 = vadd.f32 %v11001_v54, %v11000_v30 }
0x1b69   : > { %v17315_v53 = vadd.f32 %v10999_v24, %v9099_v31  ;;  %v9102_v18 = vadd.f32 %v10938_v6, %v17270_v61 }
0x1b6b   : > { %v17318_v29 = vadd.f32 %v11002_v47, %v9102_v18  ;;  %v10939_v34 = vpop.f32.mrb[124].mxu0  ;;  %v11003_v28 = vpop.f32.mrb[124].mxu1 }
0x1b6c   : > { %v10940_v46 = vpop.f32.mrb[125].mxu0  ;;  %v11004_v25 = vpop.f32.mrb[125].mxu1 }
0x1b6d   : > { %v10941_v3 = vadd.f32 %v10940_v46, %v10939_v34  ;;  %v11005_v49 = vadd.f32 %v11004_v25, %v11003_v28  ;;  %v10942_v38 = vpop.f32.mrb[126].mxu0  ;;  %v11006_v58 = vpop.f32.mrb[126].mxu1 }
0x1b6e   : > { %v10943_v2 = vpop.f32.mrb[127].mxu0  ;;  %v11007_v62 = vpop.f32.mrb[127].mxu1 }
0x1b6f   : > { %v9107_v42 = vadd.f32 %v10941_v3, %v17273_v51  ;;  %v10944_v32 = vadd.f32 %v10943_v2, %v10942_v38  ;;  %v11008_v57 = vadd.f32 %v11007_v62, %v11006_v58 }
0x1b71   : > { %v17321_v27 = vadd.f32 %v11005_v49, %v9107_v42  ;;  %v9110_v61 = vadd.f32 %v10944_v32, %v17276_v4 }
0x1b73   : > { %v17324_v14 = vadd.f32 %v11008_v57, %v9110_v61  ;;  %v11025_v5 = vpop.f32.mrb[128].mxu0  ;;  %v11089_v12 = vpop.f32.mrb[128].mxu1 }
0x1b74   : > { %v11026_v23 = vpop.f32.mrb[129].mxu0  ;;  %v11090_v11 = vpop.f32.mrb[129].mxu1 }
0x1b75   : > { %v11027_v39 = vadd.f32 %v11026_v23, %v11025_v5  ;;  %v11091_v50 = vadd.f32 %v11090_v11, %v11089_v12  ;;  %v11028_v8 = vpop.f32.mrb[130].mxu0  ;;  %v11092_v41 = vpop.f32.mrb[130].mxu1 }
0x1b76   : > { %v11029_v16 = vpop.f32.mrb[131].mxu0  ;;  %v11093_v9 = vpop.f32.mrb[131].mxu1 }
0x1b77   : > { %v9245_v51 = vadd.f32 %v11027_v39, %v17279_v44  ;;  %v11030_v7 = vadd.f32 %v11029_v16, %v11028_v8  ;;  %v11094_v24 = vadd.f32 %v11093_v9, %v11092_v41 }
0x1b79   : > { %v9342_v60 = vadd.f32 %v11091_v50, %v9245_v51  ;;  %v9248_v30 = vadd.f32 %v11030_v7, %v17282_v15 }
0x1b7b   : > { %v9345_v4 = vadd.f32 %v11094_v24, %v9248_v30  ;;  %v11031_v26 = vpop.f32.mrb[132].mxu0  ;;  %v11095_v54 = vpop.f32.mrb[132].mxu1  ;;  %v17329_v31 = vadd.f32 %v9342_v60, %v15982_v33 }
0x1b7c   : > { %v11032_v6 = vpop.f32.mrb[133].mxu0  ;;  %v11096_v47 = vpop.f32.mrb[133].mxu1 }
0x1b7d   : > { %v11033_v18 = vadd.f32 %v11032_v6, %v11031_v26  ;;  %v11097_v34 = vadd.f32 %v11096_v47, %v11095_v54  ;;  %v11034_v28 = vpop.f32.mrb[134].mxu0  ;;  %v11098_v46 = vpop.f32.mrb[134].mxu1  ;;  %v9420_v44 = vsel %vm1116_vm2, %v17329_v31, 0.0  ;;  %v17334_v25 = vadd.f32 %v9345_v4, %v15985_v36 }
0x1b7e   : > { %v11035_v3 = vpop.f32.mrb[135].mxu0  ;;  %v11099_v15 = vpop.f32.mrb[135].mxu1  ;;  %9421 = vadd.xlane.f32.xlu0 %v9420_v44 }
0x1b7f   : > { %v9253_v49 = vadd.f32 %v11033_v18, %v17285_v21  ;;  %v11036_v38 = vadd.f32 %v11035_v3, %v11034_v28  ;;  %v11100_v33 = vadd.f32 %v11099_v15, %v11098_v46  ;;  %v9423_v58 = vsel %vm1116_vm2, %v17334_v25, 0.0 }
0x1b80   : > { %9424 = vadd.xlane.f32.xlu1 %v9423_v58 }
0x1b81   : > { %v9350_v2 = vadd.f32 %v11097_v34, %v9253_v49  ;;  %v9256_v62 = vadd.f32 %v11036_v38, %v17288_v35 }
0x1b83   : > { %v9353_v42 = vadd.f32 %v11100_v33, %v9256_v62  ;;  %v11037_v32 = vpop.f32.mrb[136].mxu0  ;;  %v11101_v57 = vpop.f32.mrb[136].mxu1  ;;  %v17341_v36 = vadd.f32 %v9350_v2, %v16019_v10 }
0x1b84   : > { %v11038_v61 = vpop.f32.mrb[137].mxu0  ;;  %v11102_v5 = vpop.f32.mrb[137].mxu1 }
0x1b85   : > { %v11039_v12 = vadd.f32 %v11038_v61, %v11037_v32  ;;  %v11103_v23 = vadd.f32 %v11102_v5, %v11101_v57  ;;  %v11040_v21 = vpop.f32.mrb[138].mxu0  ;;  %v11104_v11 = vpop.f32.mrb[138].mxu1  ;;  %v9426_v39 = vsel %vm1116_vm2, %v17341_v36, 0.0  ;;  %v17346_v50 = vadd.f32 %v9353_v42, %v16009_v1 }
0x1b86   : > { %v11041_v8 = vpop.f32.mrb[139].mxu0  ;;  %v11105_v35 = vpop.f32.mrb[139].mxu1  ;;  %9427 = vadd.xlane.f32.xlu0 %v9426_v39 }
0x1b87   : > { %v9261_v41 = vadd.f32 %v11039_v12, %v17291_v13  ;;  %v11042_v16 = vadd.f32 %v11041_v8, %v11040_v21  ;;  %v11106_v10 = vadd.f32 %v11105_v35, %v11104_v11  ;;  %v9429_v9 = vsel %vm1116_vm2, %v17346_v50, 0.0 }
0x1b88   : > { %9430 = vadd.xlane.f32.xlu1 %v9429_v9 }
0x1b89   : > { %v9358_v51 = vadd.f32 %v11103_v23, %v9261_v41  ;;  %v9264_v7 = vadd.f32 %v11042_v16, %v17294_v40 }
0x1b8b   : > { %v9361_v24 = vadd.f32 %v11106_v10, %v9264_v7  ;;  %v11043_v60 = vpop.f32.mrb[140].mxu0  ;;  %v11107_v30 = vpop.f32.mrb[140].mxu1  ;;  %v17353_v1 = vadd.f32 %v9358_v51, %v16043_v59 }
0x1b8c   : > { %v11044_v4 = vpop.f32.mrb[141].mxu0  ;;  %v11108_v26 = vpop.f32.mrb[141].mxu1 }
0x1b8d   : > { %v11045_v54 = vadd.f32 %v11044_v4, %v11043_v60  ;;  %v11109_v6 = vadd.f32 %v11108_v26, %v11107_v30  ;;  %v11046_v13 = vpop.f32.mrb[142].mxu0  ;;  %v11110_v47 = vpop.f32.mrb[142].mxu1  ;;  %v9432_v18 = vsel %vm1116_vm2, %v17353_v1, 0.0  ;;  %v17358_v34 = vadd.f32 %v9361_v24, %v16046_v37 }
0x1b8e   : > { %v11047_v28 = vpop.f32.mrb[143].mxu0  ;;  %v11111_v40 = vpop.f32.mrb[143].mxu1  ;;  %9433 = vadd.xlane.f32.xlu0 %v9432_v18 }
0x1b8f   : > { %v9269_v46 = vadd.f32 %v11045_v54, %v17297_v55  ;;  %v11048_v44 = vadd.f32 %v11047_v28, %v11046_v13  ;;  %v11112_v59 = vadd.f32 %v11111_v40, %v11110_v47  ;;  %v9435_v3 = vsel %vm1116_vm2, %v17358_v34, 0.0 }
0x1b90   : > { %9436 = vadd.xlane.f32.xlu1 %v9435_v3 }
0x1b91   : > { %v9366_v15 = vadd.f32 %v11109_v6, %v9269_v46  ;;  %v9272_v49 = vadd.f32 %v11048_v44, %v17300_v22 }
0x1b93   : > { %v9369_v38 = vadd.f32 %v11112_v59, %v9272_v49  ;;  %v11049_v33 = vpop.f32.mrb[144].mxu0  ;;  %v11113_v58 = vpop.f32.mrb[144].mxu1  ;;  %v17365_v37 = vadd.f32 %v9366_v15, %v16066_v52 }
0x1b94   : > { %v11050_v2 = vpop.f32.mrb[145].mxu0  ;;  %v11114_v62 = vpop.f32.mrb[145].mxu1 }
0x1b95   : > { %v11051_v42 = vadd.f32 %v11050_v2, %v11049_v33  ;;  %v11115_v32 = vadd.f32 %v11114_v62, %v11113_v58  ;;  %v11052_v55 = vpop.f32.mrb[146].mxu0  ;;  %v11116_v57 = vpop.f32.mrb[146].mxu1  ;;  %v9438_v61 = vsel %vm1116_vm2, %v17365_v37, 0.0  ;;  %v17370_v5 = vadd.f32 %v9369_v38, %v16063_v56  ;;  %v18021_v38 = vld [vmem:[#allocation16_spill] sm:$0xff] }
0x1b96   : > { %v11053_v12 = vpop.f32.mrb[147].mxu0  ;;  %v11117_v22 = vpop.f32.mrb[147].mxu1  ;;  %9439 = vadd.xlane.f32.xlu0 %v9438_v61 }
0x1b97   : > { %v9277_v23 = vadd.f32 %v11051_v42, %v17303_v45  ;;  %v11054_v21 = vadd.f32 %v11053_v12, %v11052_v55  ;;  %v11118_v52 = vadd.f32 %v11117_v22, %v11116_v57  ;;  %v9441_v11 = vsel %vm1116_vm2, %v17370_v5, 0.0  ;;  %v18022_v22 = vld [vmem:[#allocation17_spill] sm:$0xff] }
0x1b98   : > { %9442 = vadd.xlane.f32.xlu1 %v9441_v11 }
0x1b99   : > { %v9374_v39 = vadd.f32 %v11115_v32, %v9277_v23  ;;  %v9280_v8 = vadd.f32 %v11054_v21, %v17306_v43 }
0x1b9b   : > { %v9377_v35 = vadd.f32 %v11118_v52, %v9280_v8  ;;  %v11055_v41 = vpop.f32.mrb[148].mxu0  ;;  %v11119_v16 = vpop.f32.mrb[148].mxu1  ;;  %v17377_v56 = vadd.f32 %v9374_v39, %v16083_v19 }
0x1b9c   : > { %v11056_v10 = vpop.f32.mrb[149].mxu0  ;;  %v11120_v9 = vpop.f32.mrb[149].mxu1 }
0x1b9d   : > { %v11057_v51 = vadd.f32 %v11056_v10, %v11055_v41  ;;  %v11121_v7 = vadd.f32 %v11120_v9, %v11119_v16  ;;  %v11058_v45 = vpop.f32.mrb[150].mxu0  ;;  %v11122_v24 = vpop.f32.mrb[150].mxu1  ;;  %v9444_v60 = vsel %vm1116_vm2, %v17377_v56, 0.0  ;;  %v17382_v30 = vadd.f32 %v9377_v35, %v16086_v17  ;;  %v18023_v41 = vld [vmem:[#allocation96_spill] sm:$0xff] }
0x1b9e   : > { %v11059_v4 = vpop.f32.mrb[151].mxu0  ;;  %v11123_v43 = vpop.f32.mrb[151].mxu1  ;;  %9445 = vadd.xlane.f32.xlu0 %v9444_v60 }
0x1b9f   : > { %v9285_v26 = vadd.f32 %v11057_v51, %v17309_v48  ;;  %v11060_v54 = vadd.f32 %v11059_v4, %v11058_v45  ;;  %v11124_v19 = vadd.f32 %v11123_v43, %v11122_v24  ;;  %v9447_v6 = vsel %vm1116_vm2, %v17382_v30, 0.0  ;;  %v18024_v43 = vld [vmem:[#allocation18_spill] sm:$0xff] }
0x1ba0   : > { %9448 = vadd.xlane.f32.xlu1 %v9447_v6 }
0x1ba1   : > { %v9382_v13 = vadd.f32 %v11121_v7, %v9285_v26  ;;  %v9288_v47 = vadd.f32 %v11060_v54, %v17312_v63 }
0x1ba3   : > { %v9385_v18 = vadd.f32 %v11124_v19, %v9288_v47  ;;  %v11061_v28 = vpop.f32.mrb[152].mxu0  ;;  %v11125_v40 = vpop.f32.mrb[152].mxu1  ;;  %v17389_v17 = vadd.f32 %v9382_v13, %v16106_v0  ;;  %v18025_v19 = vld [vmem:[#allocation97_spill] sm:$0xff] }
0x1ba4   : > { %v11062_v46 = vpop.f32.mrb[153].mxu0  ;;  %v11126_v44 = vpop.f32.mrb[153].mxu1 }
0x1ba5   : > { %v11063_v59 = vadd.f32 %v11062_v46, %v11061_v28  ;;  %v11127_v3 = vadd.f32 %v11126_v44, %v11125_v40  ;;  %v11064_v48 = vpop.f32.mrb[154].mxu0  ;;  %v11128_v15 = vpop.f32.mrb[154].mxu1  ;;  %v9450_v49 = vsel %vm1116_vm2, %v17389_v17, 0.0  ;;  %v17394_v33 = vadd.f32 %v9385_v18, %v18021_v38 }
0x1ba6   : > { %v11065_v58 = vpop.f32.mrb[155].mxu0  ;;  %v11129_v63 = vpop.f32.mrb[155].mxu1  ;;  %9451 = vadd.xlane.f32.xlu0 %v9450_v49 }
0x1ba7   : > { %v9293_v2 = vadd.f32 %v11063_v59, %v17315_v53  ;;  %v11066_v62 = vadd.f32 %v11065_v58, %v11064_v48  ;;  %v11130_v0 = vadd.f32 %v11129_v63, %v11128_v15  ;;  %v9453_v42 = vsel %vm1116_vm2, %v17394_v33, 0.0 }
0x1ba8   : > { %9454 = vadd.xlane.f32.xlu1 %v9453_v42 }
0x1ba9   : > { %v9390_v32 = vadd.f32 %v11127_v3, %v9293_v2  ;;  %v9296_v55 = vadd.f32 %v11066_v62, %v17318_v29 }
0x1bab   : > { %v9393_v57 = vadd.f32 %v11130_v0, %v9296_v55  ;;  %v11067_v61 = vpop.f32.mrb[156].mxu0  ;;  %v11131_v12 = vpop.f32.mrb[156].mxu1  ;;  %v17401_v23 = vadd.f32 %v9390_v32, %v18022_v22 }
0x1bac   : > { %v11068_v21 = vpop.f32.mrb[157].mxu0  ;;  %v11132_v52 = vpop.f32.mrb[157].mxu1 }
0x1bad   : > { %v11069_v11 = vadd.f32 %v11068_v21, %v11067_v61  ;;  %v11133_v39 = vadd.f32 %v11132_v52, %v11131_v12  ;;  %v11070_v53 = vpop.f32.mrb[158].mxu0  ;;  %v11134_v8 = vpop.f32.mrb[158].mxu1  ;;  %v9456_v35 = vsel %vm1116_vm2, %v17401_v23, 0.0  ;;  %v17406_v16 = vadd.f32 %v9393_v57, %v18023_v41 }
0x1bae   : > { %v11071_v10 = vpop.f32.mrb[159].mxu0  ;;  %v11135_v29 = vpop.f32.mrb[159].mxu1  ;;  %9457 = vadd.xlane.f32.xlu0 %v9456_v35 }
0x1baf   : > { %v9301_v9 = vadd.f32 %v11069_v11, %v17321_v27  ;;  %v11072_v51 = vadd.f32 %v11071_v10, %v11070_v53  ;;  %v11136_v7 = vadd.f32 %v11135_v29, %v11134_v8  ;;  %v9459_v45 = vsel %vm1116_vm2, %v17406_v16, 0.0 }
0x1bb0   : > { %9460 = vadd.xlane.f32.xlu1 %v9459_v45 }
0x1bb1   : > { %v9398_v24 = vadd.f32 %v11133_v39, %v9301_v9  ;;  %v9304_v60 = vadd.f32 %v11072_v51, %v17324_v14 }
0x1bb3   : > { %v9401_v4 = vadd.f32 %v11136_v7, %v9304_v60  ;;  %v17413_v26 = vadd.f32 %v9398_v24, %v18024_v43 }
0x1bb5   : > { %v9462_v54 = vsel %vm1116_vm2, %v17413_v26, 0.0  ;;  %v17418_v6 = vadd.f32 %v9401_v4, %v18025_v19 }
0x1bb6   : > { %9463 = vadd.xlane.f32.xlu0 %v9462_v54 }
0x1bb7   : > { %v9465_v27 = vsel %vm1116_vm2, %v17418_v6, 0.0 }
0x1bb8   : > { %9466 = vadd.xlane.f32.xlu1 %v9465_v27 }
0x1c0b   : > { %v9422_v13 = vpop.xlane.xlu0 %9421 }
0x1c0c   : > { %v9468_v47 = vmul.f32 0.015625, %v9422_v13 }
0x1c0d   : > { %v9425_v18 = vpop.xlane.xlu1 %9424 }
0x1c0e   : > { %v17423_v14 = vsub.f32 %v17329_v31, %v9468_v47  ;;  %v9469_v28 = vmul.f32 0.015625, %v9425_v18 }
0x1c10   : > { %v17426_v40 = vsub.f32 %v17334_v25, %v9469_v28  ;;  %v9500_v46 = vmul.f32 %v17423_v14, %v17423_v14 }
0x1c12   : > { %v9516_v44 = vsel %vm1116_vm2, %v9500_v46, 0.0  ;;  %v9501_v59 = vmul.f32 %v17426_v40, %v17426_v40 }
0x1c13   : > { %v9428_v3 = vpop.xlane.xlu0 %9427  ;;  %9517 = vadd.xlane.f32.xlu0 %v9516_v44 }
0x1c14   : > { %v9470_v48 = vmul.f32 0.015625, %v9428_v3  ;;  %v9519_v15 = vsel %vm1116_vm2, %v9501_v59, 0.0 }
0x1c15   : > { %v9431_v49 = vpop.xlane.xlu1 %9430  ;;  %9520 = vadd.xlane.f32.xlu1 %v9519_v15 }
0x1c16   : > { %v17435_v31 = vsub.f32 %v17341_v36, %v9470_v48  ;;  %v9471_v25 = vmul.f32 0.015625, %v9431_v49 }
0x1c18   : > { %v17438_v38 = vsub.f32 %v17346_v50, %v9471_v25  ;;  %v9502_v58 = vmul.f32 %v17435_v31, %v17435_v31 }
0x1c1a   : > { %v9522_v63 = vsel %vm1116_vm2, %v9502_v58, 0.0  ;;  %v9503_v2 = vmul.f32 %v17438_v38, %v17438_v38 }
0x1c1b   : > { %v9434_v62 = vpop.xlane.xlu0 %9433  ;;  %9523 = vadd.xlane.f32.xlu0 %v9522_v63 }
0x1c1c   : > { %v9472_v0 = vmul.f32 0.015625, %v9434_v62  ;;  %v9525_v42 = vsel %vm1116_vm2, %v9503_v2, 0.0 }
0x1c1d   : > { %v9437_v32 = vpop.xlane.xlu1 %9436  ;;  %9526 = vadd.xlane.f32.xlu1 %v9525_v42 }
0x1c1e   : > { %v17447_v36 = vsub.f32 %v17353_v1, %v9472_v0  ;;  %v9473_v50 = vmul.f32 0.015625, %v9437_v32 }
0x1c20   : > { %v17450_v55 = vsub.f32 %v17358_v34, %v9473_v50  ;;  %v9504_v57 = vmul.f32 %v17447_v36, %v17447_v36 }
0x1c22   : > { %v9528_v61 = vsel %vm1116_vm2, %v9504_v57, 0.0  ;;  %v9505_v12 = vmul.f32 %v17450_v55, %v17450_v55 }
0x1c23   : > { %v9440_v22 = vpop.xlane.xlu0 %9439  ;;  %9529 = vadd.xlane.f32.xlu0 %v9528_v61 }
0x1c24   : > { %v9474_v21 = vmul.f32 0.015625, %v9440_v22  ;;  %v9531_v52 = vsel %vm1116_vm2, %v9505_v12, 0.0 }
0x1c25   : > { %v9443_v11 = vpop.xlane.xlu1 %9442  ;;  %9532 = vadd.xlane.f32.xlu1 %v9531_v52 }
0x1c26   : > { %v17459_v1 = vsub.f32 %v17365_v37, %v9474_v21  ;;  %v9475_v34 = vmul.f32 0.015625, %v9443_v11 }
0x1c28   : > { %v17462_v39 = vsub.f32 %v17370_v5, %v9475_v34  ;;  %v9506_v53 = vmul.f32 %v17459_v1, %v17459_v1 }
0x1c2a   : > { %v9534_v8 = vsel %vm1116_vm2, %v9506_v53, 0.0  ;;  %v9507_v35 = vmul.f32 %v17462_v39, %v17462_v39 }
0x1c2b   : > { %v9446_v41 = vpop.xlane.xlu0 %9445  ;;  %9535 = vadd.xlane.f32.xlu0 %v9534_v8  ;;  %v12675_v8 = vld [vmem:[%s12821_s13] sm:$0xff] }
0x1c2c   : > { %v9476_v10 = vmul.f32 0.015625, %v9446_v41  ;;  %v9537_v29 = vsel %vm1116_vm2, %v9507_v35, 0.0  ;;  %v17520_v35 = vrot.slane %v12675_v8, %v16527_v20 }
0x1c2d   : > { %v9449_v9 = vpop.xlane.xlu1 %9448  ;;  %9538 = vadd.xlane.f32.xlu1 %v9537_v29 }
0x1c2e   : > { %v17471_v37 = vsub.f32 %v17377_v56, %v9476_v10  ;;  %v9477_v5 = vmul.f32 0.015625, %v9449_v9 }
0x1c30   : > { %v17474_v51 = vsub.f32 %v17382_v30, %v9477_v5  ;;  %v9508_v7 = vmul.f32 %v17471_v37, %v17471_v37  ;;  %v17524_v5 = vld [vmem:[%s12821_s13 + $0x8] ss:$0 sm:$0xff] }
0x1c32   : > { %v9540_v45 = vsel %vm1116_vm2, %v9508_v7, 0.0  ;;  %v9509_v24 = vmul.f32 %v17474_v51, %v17474_v51 }
0x1c33   : > { %v9452_v60 = vpop.xlane.xlu0 %9451  ;;  %9541 = vadd.xlane.f32.xlu0 %v9540_v45 }
0x1c34   : > { %v9478_v4 = vmul.f32 0.015625, %v9452_v60  ;;  %v9543_v43 = vsel %vm1116_vm2, %v9509_v24, 0.0 }
0x1c35   : > { %v9455_v54 = vpop.xlane.xlu1 %9454  ;;  %9544 = vadd.xlane.f32.xlu1 %v9543_v43 }
0x1c36   : > { %v17483_v56 = vsub.f32 %v17389_v17, %v9478_v4  ;;  %v9479_v30 = vmul.f32 0.015625, %v9455_v54 }
0x1c38   : > { %v17486_v19 = vsub.f32 %v17394_v33, %v9479_v30  ;;  %v9510_v27 = vmul.f32 %v17483_v56, %v17483_v56 }
0x1c3a   : > { %v9546_v13 = vsel %vm1116_vm2, %v9510_v27, 0.0  ;;  %v9511_v47 = vmul.f32 %v17486_v19, %v17486_v19 }
0x1c3b   : > { %v9458_v18 = vpop.xlane.xlu0 %9457  ;;  %9547 = vadd.xlane.f32.xlu0 %v9546_v13 }
0x1c3c   : > { %v9480_v28 = vmul.f32 0.015625, %v9458_v18  ;;  %v9549_v46 = vsel %vm1116_vm2, %v9511_v47, 0.0 }
0x1c3d   : > { %v9461_v44 = vpop.xlane.xlu1 %9460  ;;  %9550 = vadd.xlane.f32.xlu1 %v9549_v46 }
0x1c3e   : > { %v17495_v17 = vsub.f32 %v17401_v23, %v9480_v28  ;;  %v9481_v33 = vmul.f32 0.015625, %v9461_v44 }
0x1c40   : > { %v17498_v59 = vsub.f32 %v17406_v16, %v9481_v33  ;;  %v9512_v3 = vmul.f32 %v17495_v17, %v17495_v17 }
0x1c42   : > { %v9552_v48 = vsel %vm1116_vm2, %v9512_v3, 0.0  ;;  %v9513_v15 = vmul.f32 %v17498_v59, %v17498_v59 }
0x1c43   : > { %9553 = vadd.xlane.f32.xlu0 %v9552_v48  ;;  %v9464_v49 = vpop.xlane.xlu0 %9463 }
0x1c44   : > { %v9482_v25 = vmul.f32 0.015625, %v9464_v49  ;;  %v9555_v58 = vsel %vm1116_vm2, %v9513_v15, 0.0 }
0x1c45   : > { %9556 = vadd.xlane.f32.xlu1 %v9555_v58  ;;  %v9467_v23 = vpop.xlane.xlu1 %9466 }
0x1c46   : > { %v17507_v63 = vsub.f32 %v17413_v26, %v9482_v25  ;;  %v9483_v16 = vmul.f32 0.015625, %v9467_v23 }
0x1c48   : > { %v17510_v2 = vsub.f32 %v17418_v6, %v9483_v16  ;;  %v9514_v62 = vmul.f32 %v17507_v63, %v17507_v63 }
0x1c4a   : > { %v9558_v0 = vsel %vm1116_vm2, %v9514_v62, 0.0  ;;  %v9515_v42 = vmul.f32 %v17510_v2, %v17510_v2 }
0x1c4b   : > { %9559 = vadd.xlane.f32.xlu0 %v9558_v0 }
0x1c4c   : > { %v9561_v32 = vsel %vm1116_vm2, %v9515_v42, 0.0 }
0x1c4d   : > { %9562 = vadd.xlane.f32.xlu1 %v9561_v32 }
0x1ca0   : > { %v9518_v50 = vpop.xlane.xlu0 %9517 }
0x1ca1   : > { %v9564_v26 = vmul.f32 0.015625, %v9518_v50 }
0x1ca2   : > { %v9521_v57 = vpop.xlane.xlu1 %9520 }
0x1ca3   : > { %v9580_v61 = vadd.f32 1e-05, %v9564_v26  ;;  %v9565_v12 = vmul.f32 0.015625, %v9521_v57 }
0x1ca5   : > { %12577 = vrsqrt.f32 %v9580_v61  ;;  %v9581_v6 = vadd.f32 1e-05, %v9565_v12 }
0x1ca7   : > { %12579 = vrsqrt.f32 %v9581_v6 }
0x1ca8   : > { %v9524_v22 = vpop.xlane.xlu0 %9523 }
0x1ca9   : > { %v9566_v21 = vmul.f32 0.015625, %v9524_v22 }
0x1caa   : > { %v9527_v52 = vpop.xlane.xlu1 %9526 }
0x1cab   : > { %v9582_v11 = vadd.f32 1e-05, %v9566_v21  ;;  %v9567_v34 = vmul.f32 0.015625, %v9527_v52 }
0x1cad   : > { %12581 = vrsqrt.f32 %v9582_v11  ;;  %v9583_v53 = vadd.f32 1e-05, %v9567_v34 }
0x1caf   : > { %v12578_v41 = vpop.eup %12577  ;;  %12583 = vrsqrt.f32 %v9583_v53 }
0x1cb0   : > { %v9612_v10 = vmul.f32 %v12578_v41, %v17423_v14  ;;  %v9530_v29 = vpop.xlane.xlu0 %9529 }
0x1cb1   : > { %v12580_v9 = vpop.eup %12579  ;;  %v9568_v7 = vmul.f32 0.015625, %v9530_v29 }
0x1cb2   : > { %v9632_v45 = vmul.f32 %v17520_v35, %v9612_v10  ;;  %v9613_v24 = vmul.f32 %v12580_v9, %v17426_v40  ;;  %v9533_v60 = vpop.xlane.xlu1 %9532 }
0x1cb3   : > { %v9584_v4 = vadd.f32 1e-05, %v9568_v7  ;;  %v9569_v43 = vmul.f32 0.015625, %v9533_v60 }
0x1cb4   : > { %v17529_v54 = vadd.f32 %v17524_v5, %v9632_v45  ;;  %v9633_v20 = vmul.f32 %v17520_v35, %v9613_v24 }
0x1cb5   : > { %12585 = vrsqrt.f32 %v9584_v4  ;;  %v9585_v30 = vadd.f32 1e-05, %v9569_v43 }
0x1cb6   : > { %9668 = vst.msk [vmem:[#allocation2] sm:$0xff] %vm1116_vm2, %v17529_v54  ;;  %v17535_v14 = vadd.f32 %v17524_v5, %v9633_v20 }
0x1cb7   : > { %v12582_v27 = vpop.eup %12581  ;;  %12587 = vrsqrt.f32 %v9585_v30 }
0x1cb8   : > { %9669 = vst.msk [vmem:[#allocation2 + $0x8] sm:$0xff] %vm1116_vm2, %v17535_v14  ;;  %v9614_v40 = vmul.f32 %v12582_v27, %v17435_v31  ;;  %v9536_v13 = vpop.xlane.xlu0 %9535 }
0x1cb9   : > { %v12584_v47 = vpop.eup %12583  ;;  %v9570_v18 = vmul.f32 0.015625, %v9536_v13 }
0x1cba   : > { %v9634_v28 = vmul.f32 %v17520_v35, %v9614_v40  ;;  %v9615_v46 = vmul.f32 %v12584_v47, %v17438_v38  ;;  %v9539_v44 = vpop.xlane.xlu1 %9538 }
0x1cbb   : > { %v9586_v33 = vadd.f32 1e-05, %v9570_v18  ;;  %v9571_v3 = vmul.f32 0.015625, %v9539_v44 }
0x1cbc   : > { %v17543_v48 = vadd.f32 %v17524_v5, %v9634_v28  ;;  %v9635_v15 = vmul.f32 %v17520_v35, %v9615_v46 }
0x1cbd   : > { %12589 = vrsqrt.f32 %v9586_v33  ;;  %v9587_v49 = vadd.f32 1e-05, %v9571_v3 }
0x1cbe   : > { %9670 = vst.msk [vmem:[#allocation2 + $0x10] sm:$0xff] %vm1116_vm2, %v17543_v48  ;;  %v17549_v31 = vadd.f32 %v17524_v5, %v9635_v15 }
0x1cbf   : > { %v12586_v25 = vpop.eup %12585  ;;  %12591 = vrsqrt.f32 %v9587_v49 }
0x1cc0   : > { %9671 = vst.msk [vmem:[#allocation2 + $0x18] sm:$0xff] %vm1116_vm2, %v17549_v31  ;;  %v9616_v38 = vmul.f32 %v12586_v25, %v17447_v36  ;;  %v9542_v58 = vpop.xlane.xlu0 %9541 }
0x1cc1   : > { %v12588_v23 = vpop.eup %12587  ;;  %v9572_v16 = vmul.f32 0.015625, %v9542_v58 }
0x1cc2   : > { %v9636_v62 = vmul.f32 %v17520_v35, %v9616_v38  ;;  %v9617_v0 = vmul.f32 %v12588_v23, %v17450_v55  ;;  %v9545_v42 = vpop.xlane.xlu1 %9544 }
0x1cc3   : > { %v9588_v32 = vadd.f32 1e-05, %v9572_v16  ;;  %v9573_v50 = vmul.f32 0.015625, %v9545_v42 }
0x1cc4   : > { %v17557_v26 = vadd.f32 %v17524_v5, %v9636_v62  ;;  %v9637_v57 = vmul.f32 %v17520_v35, %v9617_v0 }
0x1cc5   : > { %12593 = vrsqrt.f32 %v9588_v32  ;;  %v9589_v61 = vadd.f32 1e-05, %v9573_v50 }
0x1cc6   : > { %9672 = vst.msk [vmem:[#allocation2 + $0x20] sm:$0xff] %vm1116_vm2, %v17557_v26  ;;  %v17563_v36 = vadd.f32 %v17524_v5, %v9637_v57 }
0x1cc7   : > { %v12590_v12 = vpop.eup %12589  ;;  %12595 = vrsqrt.f32 %v9589_v61 }
0x1cc8   : > { %9673 = vst.msk [vmem:[#allocation2 + $0x28] sm:$0xff] %vm1116_vm2, %v17563_v36  ;;  %v9618_v55 = vmul.f32 %v12590_v12, %v17459_v1  ;;  %v9548_v6 = vpop.xlane.xlu0 %9547 }
0x1cc9   : > { %v12592_v22 = vpop.eup %12591  ;;  %v9574_v21 = vmul.f32 0.015625, %v9548_v6 }
0x1cca   : > { %v9638_v52 = vmul.f32 %v17520_v35, %v9618_v55  ;;  %v9619_v11 = vmul.f32 %v12592_v22, %v17462_v39  ;;  %v9551_v34 = vpop.xlane.xlu1 %9550 }
0x1ccb   : > { %v9590_v53 = vadd.f32 1e-05, %v9574_v21  ;;  %v9575_v8 = vmul.f32 0.015625, %v9551_v34  ;;  %v12733_v21 = vmov (!%p10295_p5), 0.0   ;;  %v9693_v34 = vsel (!%p10295_p5), %vm1116_vm2, %v17549_v31, 0.0 }
0x1ccc   : > { %v17571_v41 = vadd.f32 %v17524_v5, %v9638_v52  ;;  %v9639_v10 = vmul.f32 %v17520_v35, %v9619_v11  ;;  %11772 = vmatprep.subr.bf16.mxu0 (!%p10295_p5), %v12733_v21  ;;  %11780 = vmatprep.mubr.msk.bf16.mxu0 (!%p10295_p5), %vm12734_vm11, %v12733_v21  ;;  %v9691_v11 = vsel (!%p10295_p5), %vm1116_vm2, %v17543_v48, 0.0  ;;  %v12679_v48 = vld [vmem:[%s17702_s10 + $0x18] sm:$0xff] (!%p10295_p5)  }
0x1ccd   : > { %12597 = vrsqrt.f32 %v9590_v53  ;;  %v9591_v29 = vadd.f32 1e-05, %v9575_v8  ;;  %v12678_v53 = vld [vmem:[%s17702_s10 + $0x10] sm:$0xff] (!%p10295_p5)  }
0x1cce   : > { %9674 = vst.msk [vmem:[#allocation2 + $0x30] sm:$0xff] %vm1116_vm2, %v17571_v41  ;;  %v17577_v1 = vadd.f32 %v17524_v5, %v9639_v10 }
0x1ccf   : > { %v12594_v9 = vpop.eup %12593  ;;  %12599 = vrsqrt.f32 %v9591_v29  ;;  %v9699_v29 = vsel (!%p10295_p5), %vm1116_vm2, %v17571_v41, 0.0 }
0x1cd0   : > { %9675 = vst.msk [vmem:[#allocation2 + $0x38] sm:$0xff] %vm1116_vm2, %v17577_v1  ;;  %v9620_v39 = vmul.f32 %v12594_v9, %v17471_v37  ;;  %v9554_v7 = vpop.xlane.xlu0 %9553 }
0x1cd1   : > { %v12596_v45 = vpop.eup %12595  ;;  %v9576_v24 = vmul.f32 0.015625, %v9554_v7 }
0x1cd2   : > { %v9640_v60 = vmul.f32 %v17520_v35, %v9620_v39  ;;  %v9621_v4 = vmul.f32 %v12596_v45, %v17474_v51  ;;  %v9557_v43 = vpop.xlane.xlu1 %9556  ;;  %v9701_v39 = vsel (!%p10295_p5), %vm1116_vm2, %v17577_v1, 0.0 }
0x1cd3   : > { %v9592_v20 = vadd.f32 1e-05, %v9576_v24  ;;  %v9577_v30 = vmul.f32 0.015625, %v9557_v43 }
0x1cd4   : > { %v17585_v27 = vadd.f32 %v17524_v5, %v9640_v60  ;;  %v9641_v40 = vmul.f32 %v17520_v35, %v9621_v4 }
0x1cd5   : > { %12601 = vrsqrt.f32 %v9592_v20  ;;  %v9593_v13 = vadd.f32 1e-05, %v9577_v30 }
0x1cd6   : > { %9676 = vst.msk [vmem:[#allocation2 + $0x40] sm:$0xff] %vm1116_vm2, %v17585_v27  ;;  %v17591_v37 = vadd.f32 %v17524_v5, %v9641_v40  ;;  %v9703_v7 = vsel (!%p10295_p5), %vm1116_vm2, %v17585_v27, 0.0 }
0x1cd7   : > { %v12598_v47 = vpop.eup %12597  ;;  %12603 = vrsqrt.f32 %v9593_v13 }
0x1cd8   : > { %9677 = vst.msk [vmem:[#allocation2 + $0x48] sm:$0xff] %vm1116_vm2, %v17591_v37  ;;  %v9622_v51 = vmul.f32 %v12598_v47, %v17483_v56  ;;  %v9560_v18 = vpop.xlane.xlu0 %9559  ;;  %v9705_v45 = vsel (!%p10295_p5), %vm1116_vm2, %v17591_v37, 0.0 }
0x1cd9   : > { %v12600_v28 = vpop.eup %12599  ;;  %v9578_v46 = vmul.f32 0.015625, %v9560_v18 }
0x1cda   : > { %v9642_v44 = vmul.f32 %v17520_v35, %v9622_v51  ;;  %v9623_v33 = vmul.f32 %v12600_v28, %v17486_v19  ;;  %v9563_v3 = vpop.xlane.xlu1 %9562 }
0x1cdb   : > { %v9594_v15 = vadd.f32 1e-05, %v9578_v46  ;;  %v9579_v49 = vmul.f32 0.015625, %v9563_v3  ;;  %v10296_v46 = vld [vmem:[%s17703_s11] ss:$0 sm:$0xff] (!%p10295_p5) }
0x1cdc   : > { %v17599_v25 = vadd.f32 %v17524_v5, %v9642_v44  ;;  %v9643_v38 = vmul.f32 %v17520_v35, %v9623_v33 }
0x1cdd   : > { %12605 = vrsqrt.f32 %v9594_v15  ;;  %v9595_v58 = vadd.f32 1e-05, %v9579_v49 }
0x1cde   : > { %9678 = vst.msk [vmem:[#allocation2 + $0x50] sm:$0xff] %vm1116_vm2, %v17599_v25  ;;  %v9663_v56 = vadd.f32 %v17524_v5, %v9643_v38  ;;  %v9707_v60 = vsel (!%p10295_p5), %vm1116_vm2, %v17599_v25, 0.0 }
0x1cdf   : > { %v12602_v23 = vpop.eup %12601  ;;  %12607 = vrsqrt.f32 %v9595_v58 }
0x1ce0   : > { %9679 = vst.msk [vmem:[#allocation2 + $0x58] sm:$0xff] %vm1116_vm2, %v9663_v56  ;;  %v9624_v19 = vmul.f32 %v12602_v23, %v17495_v17  ;;  %v9709_v41 = vsel (!%p10295_p5), %vm1116_vm2, %v9663_v56, 0.0 }
0x1ce1   : > { %v12604_v16 = vpop.eup %12603 }
0x1ce2   : > { %v9644_v62 = vmul.f32 %v17520_v35, %v9624_v19  ;;  %v9625_v0 = vmul.f32 %v12604_v16, %v17498_v59 }
0x1ce4   : > { %v9664_v42 = vadd.f32 %v17524_v5, %v9644_v62  ;;  %v9645_v32 = vmul.f32 %v17520_v35, %v9625_v0 }
0x1ce6   : > { %9680 = vst.msk [vmem:[#allocation2 + $0x60] sm:$0xff] %vm1116_vm2, %v9664_v42  ;;  %v9665_v50 = vadd.f32 %v17524_v5, %v9645_v32  ;;  %v9711_v20 = vsel (!%p10295_p5), %vm1116_vm2, %v9664_v42, 0.0 }
0x1ce7   : > { %v12606_v57 = vpop.eup %12605 }
0x1ce8   : > { %9681 = vst.msk [vmem:[#allocation2 + $0x68] sm:$0xff] %vm1116_vm2, %v9665_v50  ;;  %v9626_v61 = vmul.f32 %v12606_v57, %v17507_v63  ;;  %v12676_v63 = vld [vmem:[%s17702_s10] sm:$0xff] (!%p10295_p5)   ;;  %v9713_v30 = vsel (!%p10295_p5), %vm1116_vm2, %v9665_v50, 0.0 }
0x1ce9   : > { %v12608_v12 = vpop.eup %12607  ;;  %11773 = vmatpush3.bf16.msra.mxu0 (!%p10295_p5), %v12676_v63 }
0x1cea   : > { %v9646_v17 = vmul.f32 %v17520_v35, %v9626_v61  ;;  %v9627_v55 = vmul.f32 %v12608_v12, %v17510_v2  ;;  %9687 = sbr.rel (%p10295_p5) target bundleno = 7656 (0x1de8), region = 76  ;;  %v12677_v2 = vld [vmem:[%s17702_s10 + $0x8] sm:$0xff] (!%p10295_p5)   ;;  %11774 = vmatprep.subr.bf16.mxu0 (!%p10295_p5), %v12733_v21 }
0x1cec   : > { %v9666_v59 = vadd.f32 %v17524_v5, %v9646_v17  ;;  %v9647_v6 = vmul.f32 %v17520_v35, %v9627_v55  ;;  %v9688_v35 = vsel (!%p10295_p5), %vm1116_vm2, %v17529_v54, 0.0  ;;  %v9695_v54 = vsel (!%p10295_p5), %vm1116_vm2, %v17557_v26, 0.0 }
0x1ced   : > { %11775 = vmatpush3.bf16.msra.mxu0 (!%p10295_p5), %v12677_v2 }
0x1cee   : > { %9682 = vst.msk [vmem:[#allocation2 + $0x70] sm:$0xff] %vm1116_vm2, %v9666_v59  ;;  %v9667_v22 = vadd.f32 %v17524_v5, %v9647_v6  ;;  %v9689_v5 = vsel (!%p10295_p5), %vm1116_vm2, %v17535_v14, 0.0  ;;  %11776 = vmatprep.subr.bf16.mxu0 (!%p10295_p5), %v12733_v21  ;;  %v9697_v14 = vsel (!%p10295_p5), %vm1116_vm2, %v17563_v36, 0.0  ;;  %v9715_v27 = vsel (!%p10295_p5), %vm1116_vm2, %v9666_v59, 0.0 }
0x1cef   : > { %v9690_v52 = vadd.f32 (!%p10295_p5), %v9689_v5, %v9688_v35 }
0x1cf0   : > { %9683 = vst.msk [vmem:[#allocation2 + $0x78] sm:$0xff] %vm1116_vm2, %v9667_v22  ;;  %v9717_v47 = vsel (!%p10295_p5), %vm1116_vm2, %v9667_v22, 0.0 }
0x1cf1   : > { %v9692_v8 = vadd.f32 %v9691_v11, %v9690_v52  ;;  %11777 = vmatpush3.bf16.msra.mxu0 %v12678_v53 }
0x1cf2   : > { %11778 = vmatprep.subr.bf16.mxu0 %v12733_v21 }
0x1cf3   : > { %v9694_v10 = vadd.f32 %v9693_v34, %v9692_v8 }
0x1cf5   : > { %v9696_v31 = vadd.f32 %v9695_v54, %v9694_v10  ;;  %11779 = vmatpush3.bf16.msra.mxu0 %v12679_v48 }
0x1cf7   : > { %v9698_v9 = vadd.f32 %v9697_v14, %v9696_v31 }
0x1cf9   : > { %v9700_v26 = vadd.f32 %v9699_v29, %v9698_v9 }
0x1cfb   : > { %v9702_v36 = vadd.f32 %v9701_v39, %v9700_v26 }
0x1cfd   : > { %v9704_v24 = vadd.f32 %v9703_v7, %v9702_v36 }
0x1cff   : > { %v9706_v4 = vadd.f32 %v9705_v45, %v9704_v24 }
0x1d01   : > { %v9708_v43 = vadd.f32 %v9707_v60, %v9706_v4 }
0x1d03   : > { %v9710_v1 = vadd.f32 %v9709_v41, %v9708_v43 }
0x1d05   : > { %v9712_v40 = vadd.f32 %v9711_v20, %v9710_v1 }
0x1d07   : > { %v9714_v13 = vadd.f32 %v9713_v30, %v9712_v40 }
0x1d09   : > { %v9716_v37 = vadd.f32 %v9715_v27, %v9714_v13 }
0x1d0b   : > { %v9718_v51 = vadd.f32 %v9717_v47, %v9716_v37 }
0x1d0d   : > { %v9720_v18 = vmul.f32 0.0625, %v9718_v51 }
0x1d0f   : > { %v9721_v28 = vpack.c.bf16 %v9720_v18, %v9720_v18 }
0x1d11   : > { %11781 = vmatmul.mubr.msk.bf16.vlgmr.msra.gmra.mrb[0].mxu0 %vm1116_vm2, %v9721_v28 }
0x1de4   : > { %v9798_v44 = vpop.f32.mrb[0].mxu0 }
0x1de5   : > { %v9799_v33 = vadd.f32 %v10296_v46, %v9798_v44  ;;  %v11782_v3 = vpop.f32.mrb[1].mxu0 }
0x1de6   : > { %v9801_v15 = vpop.f32.mrb[2].mxu0 }
0x1de7   : > { %9805 = vst.msk [vmem:[#allocation4] sm:$0xff] %vm9804_vm12, %v9799_v33  ;;  %v11783_v49 = vpop.f32.mrb[3].mxu0 }
0x1de8 PF: > { %p11858_p6 = scmp.eq.s32.totalorder %s12807_s22, 1  ;;  %s12735_s29 = smov [#allocation4]  }
0x1de9   : > { %s9813_s24 = sshll.u32 %s12735_s29, 4  ;;  %s9814_s24 = int_to_ptr.vmem [resolvable:$true] %s9813_s24 }
0x1dea   : > { %s12680_s30 = scalar_lea.vmem %s9814_s24, 128  ;;  %p12687_p10 = scmp.lt.s32.totalorder %s9814_s24, %s9814_s24 }
0x1deb   : > { %p12681_p7 = scmp.ne.s32.totalorder %s9814_s24, %s12680_s30  ;;  %p12688_p11 = scmp.lt.s32.totalorder %s12680_s30, %s12680_s30 }
0x1ded   : > { %p12682_p8 = pnand %p12681_p7, %p11858_p6  ;;  %p12689_p12 = por %p12688_p11, %p12687_p10 }
0x1def   : > { %p12683_p9 = pneg %p12682_p8 }
0x1df1   : > { %p12690_p13 = pnand %p12689_p12, %p12683_p9 }
0x1df3   : > { %12693 = shalt.err (!%p12690_p13)
}
0x1df4   : > { %s12694_s23 = scalar_lea.hbm %s17704_s12, 128 }
0x1df5   : > { %p12695_p0 = scmp.ne.s32.totalorder %s17704_s12, %s12694_s23  ;;  %p12700_p3 = scmp.lt.u32.totalorder %s12694_s23, %s17704_s12 }
0x1df7   : > { %p12696_p1 = pnand %p12695_p0, %p11858_p6 }
0x1df9   : > { %p12697_p2 = pneg %p12696_p1 }
0x1dfb   : > { %p12702_p4 = pnand %p12700_p3, %p12697_p2 }
0x1dfd   : > { %12705 = shalt.err (!%p12702_p4)
}
0x1dfe   : > { %11855 = dma.vmem_to_hbm [thread:$0]  (%p11858_p6), %s9814_s24, 128, %s17704_s12, [#allocation5]  }
0x1dff   : > { %12711 = dma.done.wait (%p11858_p6), [#allocation5], 128  }
0x1e00   : > { %12713 = vsyncadd (%p11858_p6), [#allocation5], 4294967168 }
0x1e01 PF: > { %s18026_s21 = sld [smem:[#allocation7_spill]] }
0x1e07   : > { %s23_s21 = sadd.s32 1, %s18026_s21  }
0x1e08   : > { %p20_p5 = scmp.ge.s32.totalorder %s23_s21, 4  }
0x1e0a   :  { %22 = sbr.rel (!%p20_p5) target bundleno = 1 (0x1), region = 115 }
0x1e11   :  { %9826 = vsyncpa [#allocation5], 1 }
0x1e12   :  { %9828 = vsyncpa [#allocation5 + $0x1], 1 }

</bundles_post_ra>
